<compile_context>
chip_gen: v5e
topology: v5e:2x2
jax: 0.10.0
libtpu: 0.0.40
codegen_flags: <defaults>
</compile_context>

<pallas_src>
import jax
import jax.numpy as jnp
from jax import lax
from jax.experimental import pallas as pl
from jax.experimental.pallas import tpu as pltpu


def _round_up(x, m):
    return (x + m - 1) // m * m


def rnn_encoder_kernel(
    emb_ref,       # [T, Bp, Ep]   bf16 embedded (dropout = identity) input
    lens_ref,      # [Bp, 1]       int32 sequence lengths (0 for padded rows)
    wih_f_ref,     # [Ep, 4*Hp]    bf16 forward  W_ih^T (gate-padded, E-padded)
    wih_b_ref,     # [Ep, 4*Hp]    bf16 backward W_ih^T
    bih_f_ref,     # [1, 4*Hp]     f32  forward  (b_ih + b_hh)
    bih_b_ref,     # [1, 4*Hp]     f32  backward (b_ih + b_hh)
    whh_f_ref,     # [Hp, 4*Hp]    bf16 forward  W_hh^T
    whh_b_ref,     # [Hp, 4*Hp]    bf16 backward W_hh^T
    woutf_ref,     # [Hp, Hp]      bf16 output_bridge W^T, forward half
    woutb_ref,     # [Hp, Hp]      bf16 output_bridge W^T, backward half
    bout_ref,      # [1, Hp]       f32
    whbf_ref,      # [Hp, Hp]      bf16 hidden_bridges[0] W^T, forward half
    whbb_ref,      # [Hp, Hp]      bf16 hidden_bridges[0] W^T, backward half
    bhb_ref,       # [1, Hp]       f32
    wcbf_ref,      # [Hp, Hp]      bf16 hidden_bridges[1] W^T, forward half
    wcbb_ref,      # [Hp, Hp]      bf16 hidden_bridges[1] W^T, backward half
    bcb_ref,       # [1, Hp]       f32
    out_ref,       # [T, Bp, Hp]   f32 bridged outputs (holds fwd h during loop)
    h_out_ref,     # [Bp, Hp]      f32 bridged h_n
    c_out_ref,     # [Bp, Hp]      f32 bridged c_n
    gx_f_scr,      # [T, Bp, 4*Hp] bf16 scratch: precomputed forward input gates
    gx_b_scr,      # [T, Bp, 4*Hp] bf16 scratch: precomputed backward input gates
    bwd_scr,       # [T, Bp, Hp]   bf16 scratch: backward-direction hidden per t
):
    T, Bp, Ep = emb_ref.shape
    Hp = whh_f_ref.shape[0]

    # Time-chunk size for the time-parallel phases (projection & bridge).
    TC = T if T <= 16 else 16
    n_full = T // TC
    rem = T - n_full * TC

    # ---- phase 1: input projection, chunked over T, no big gx temporary ----
    def proj_chunk(t0, tc):
        emb2 = emb_ref[pl.ds(t0, tc)].reshape(tc * Bp, Ep)
        gf = (jnp.dot(emb2, wih_f_ref[...], preferred_element_type=jnp.float32)
              + bih_f_ref[...])
        gb = (jnp.dot(emb2, wih_b_ref[...], preferred_element_type=jnp.float32)
              + bih_b_ref[...])
        gx_f_scr[pl.ds(t0, tc)] = gf.reshape(tc, Bp, 4 * Hp).astype(gx_f_scr.dtype)
        gx_b_scr[pl.ds(t0, tc)] = gb.reshape(tc, Bp, 4 * Hp).astype(gx_b_scr.dtype)

    def proj_body(ci, carry):
        proj_chunk(pl.multiple_of(ci * TC, TC), TC)
        return carry

    if n_full > 0:
        lax.fori_loop(0, n_full, proj_body, 0, unroll=False)
    if rem > 0:
        proj_chunk(n_full * TC, rem)

    lens = lens_ref[...]                       # [Bp, 1] int32
    zeros = jnp.zeros((Bp, Hp), jnp.float32)

    def gate_math(gx_t, h, c, whh_ref):
        # PyTorch LSTM gate order: i, f, g, o — each block lane-aligned (Hp % 128 == 0).
        gates = gx_t.astype(jnp.float32) + jnp.dot(
            h.astype(jnp.bfloat16), whh_ref[...],
            preferred_element_type=jnp.float32)
        i_g = jax.nn.sigmoid(gates[:, 0 * Hp:1 * Hp])
        f_g = jax.nn.sigmoid(gates[:, 1 * Hp:2 * Hp])
        g_g = jnp.tanh(gates[:, 2 * Hp:3 * Hp])
        o_g = jax.nn.sigmoid(gates[:, 3 * Hp:4 * Hp])
        c_new = f_g * c + i_g * g_g
        h_new = o_g * jnp.tanh(c_new)
        return h_new, c_new

    # ---- phase 2: fused fwd/bwd recurrence (packed-sequence semantics) -----
    def body(t, carry):
        h_f, c_f, h_b, c_b = carry

        # forward step at time t
        m_f = t < lens                          # [Bp, 1] bool
        hn_f, cn_f = gate_math(gx_f_scr[t], h_f, c_f, whh_f_ref)
        out_ref[t] = jnp.where(m_f, hn_f, zeros)
        h_f = jnp.where(m_f, hn_f, h_f)
        c_f = jnp.where(m_f, cn_f, c_f)

        # backward step at time T-1-t (independent chain -> overlaps with fwd;
        # keep the two h@Whh matmuls issued back-to-back, esp. for v5e's MRF)
        tb = T - 1 - t
        m_b = tb < lens
        hn_b, cn_b = gate_math(gx_b_scr[tb], h_b, c_b, whh_b_ref)
        bwd_scr[tb] = jnp.where(m_b, hn_b, zeros).astype(bwd_scr.dtype)
        h_b = jnp.where(m_b, hn_b, h_b)
        c_b = jnp.where(m_b, cn_b, c_b)

        return (h_f, c_f, h_b, c_b)

    unroll = True if T <= 16 else 4
    h_f, c_f, h_b, c_b = lax.fori_loop(
        0, T, body, (zeros, zeros, zeros, zeros), unroll=unroll)

    # ---- phase 3: output bridge, chunked over T, split fwd/bwd weights -----
    def bridge_chunk(t0, tc):
        fwd_c = out_ref[pl.ds(t0, tc)].reshape(tc * Bp, Hp).astype(jnp.bfloat16)
        bwd_c = bwd_scr[pl.ds(t0, tc)].reshape(tc * Bp, Hp)
        br = (jnp.dot(fwd_c, woutf_ref[...], preferred_element_type=jnp.float32)
              + jnp.dot(bwd_c, woutb_ref[...], preferred_element_type=jnp.float32)
              + bout_ref[...])
        out_ref[pl.ds(t0, tc)] = br.reshape(tc, Bp, Hp)

    def bridge_body(ci, carry):
        bridge_chunk(pl.multiple_of(ci * TC, TC), TC)
        return carry

    if n_full > 0:
        lax.fori_loop(0, n_full, bridge_body, 0, unroll=False)
    if rem > 0:
        bridge_chunk(n_full * TC, rem)

    # ---- phase 4: hidden bridges (split weights, no concat) ----------------
    h_out_ref[...] = (
        jnp.dot(h_f.astype(jnp.bfloat16), whbf_ref[...],
                preferred_element_type=jnp.float32)
        + jnp.dot(h_b.astype(jnp.bfloat16), whbb_ref[...],
                  preferred_element_type=jnp.float32)
        + bhb_ref[...])
    c_out_ref[...] = (
        jnp.dot(c_f.astype(jnp.bfloat16), wcbf_ref[...],
                preferred_element_type=jnp.float32)
        + jnp.dot(c_b.astype(jnp.bfloat16), wcbb_ref[...],
                  preferred_element_type=jnp.float32)
        + bcb_ref[...])


def rnn_encoder_forward(src, src_len, params):
    """src: [T, B] int32 tokens, src_len: [B] int32 lengths (all >= 1)."""
    emb_table = params["embedding"]               # [V, E]
    embedded = emb_table[src]                     # [T, B, E]  (gather = glue)
    # dropout_layer: p=0.0 / eval mode -> identity
    T, B, E = embedded.shape
    H = params["whh_f"].shape[0]

    Hp = _round_up(H, 128)                        # lane-aligned hidden size
    Bp = _round_up(B, 8)                          # full-sublane batch
    Ep = _round_up(E, 128)                        # K-aligned input projection

    embedded = embedded.astype(jnp.bfloat16)
    if Bp != B or Ep != E:
        embedded = jnp.pad(embedded, ((0, 0), (0, Bp - B), (0, Ep - E)))
    src_len_p = jnp.pad(src_len, (0, Bp - B)) if Bp != B else src_len
    lens = src_len_p.astype(jnp.int32).reshape(Bp, 1)

    # --- weight re-layout: gate blocks padded to Hp, fwd/bwd halves split,
    #     everything matmul-sized cast to bf16 (biases stay f32) --------------
    def pad_gate_cols(w):                         # [..., 4H] -> [..., 4Hp]
        if Hp == H:
            return w
        blocks = [jnp.pad(w[..., g * H:(g + 1) * H],
                          [(0, 0)] * (w.ndim - 1) + [(0, Hp - H)])
                  for g in range(4)]
        return jnp.concatenate(blocks, axis=-1)

    def pad_rows_to(w, n):                        # [R, X] -> [n, X]
        return w if n == w.shape[0] else jnp.pad(w, ((0, n - w.shape[0]), (0, 0)))

    def pad_cols(w):                              # [..., H] -> [..., Hp]
        return w if Hp == H else jnp.pad(w, [(0, 0)] * (w.ndim - 1) + [(0, Hp - H)])

    bf16 = jnp.bfloat16
    wih_f = pad_rows_to(pad_gate_cols(params["wih_f"]), Ep).astype(bf16)
    wih_b = pad_rows_to(pad_gate_cols(params["wih_b"]), Ep).astype(bf16)
    bih_f = pad_gate_cols(params["b_f"])
    bih_b = pad_gate_cols(params["b_b"])
    whh_f = pad_rows_to(pad_gate_cols(params["whh_f"]), Hp).astype(bf16)
    whh_b = pad_rows_to(pad_gate_cols(params["whh_b"]), Hp).astype(bf16)

    def split_pad_bridge(w):                      # [2H, H] -> ([Hp,Hp], [Hp,Hp])
        return (pad_rows_to(pad_cols(w[:H]), Hp).astype(bf16),
                pad_rows_to(pad_cols(w[H:]), Hp).astype(bf16))

    w_out_f, w_out_b = split_pad_bridge(params["w_out"])
    w_hb_f, w_hb_b = split_pad_bridge(params["w_hb"])
    w_cb_f, w_cb_b = split_pad_bridge(params["w_cb"])
    b_out = pad_cols(params["b_out"])
    b_hb = pad_cols(params["b_hb"])
    b_cb = pad_cols(params["b_cb"])

    # --- VMEM limit with headroom, derived per generation --------------------
    try:
        vmem_cap = pltpu.get_tpu_info().vmem_capacity_bytes
    except Exception:
        vmem_cap = 128 * 1024 * 1024
    vmem_limit = int(vmem_cap * 0.8)              # leave room for compiler temporaries

    vmem = pl.BlockSpec(memory_space=pltpu.MemorySpace.VMEM)
    outputs, h_n, c_n = pl.pallas_call(
        rnn_encoder_kernel,
        out_shape=(
            jax.ShapeDtypeStruct((T, Bp, Hp), jnp.float32),
            jax.ShapeDtypeStruct((Bp, Hp), jnp.float32),
            jax.ShapeDtypeStruct((Bp, Hp), jnp.float32),
        ),
        in_specs=[vmem] * 17,
        out_specs=(vmem, vmem, vmem),
        scratch_shapes=[
            pltpu.VMEM((T, Bp, 4 * Hp), jnp.bfloat16),   # fwd input gates
            pltpu.VMEM((T, Bp, 4 * Hp), jnp.bfloat16),   # bwd input gates
            pltpu.VMEM((T, Bp, Hp), jnp.bfloat16),       # bwd hidden states
        ],
        compiler_params=pltpu.CompilerParams(vmem_limit_bytes=vmem_limit),
    )(
        embedded, lens,
        wih_f, wih_b, bih_f, bih_b, whh_f, whh_b,
        w_out_f, w_out_b, b_out,
        w_hb_f, w_hb_b, b_hb,
        w_cb_f, w_cb_b, b_cb,
    )
    return outputs[:, :B, :H], (h_n[:B, :H], c_n[:B, :H])


def init_params(key, vocab_size, emb_size, hidden_size):
    ks = jax.random.split(key, 12)
    s = 0.1
    H, E = hidden_size, emb_size

    emb = s * jax.random.normal(ks[0], (vocab_size, E), jnp.float32)
    emb = emb.at[0].set(0.0)                      # padding_idx=0 row is zero

    def lin(k, fan_in, fan_out):
        return s * jax.random.normal(k, (fan_in, fan_out), jnp.float32)

    params = {
        "embedding": emb,
        # forward direction LSTM (weights stored transposed: [in, 4H])
        "wih_f": lin(ks[1], E, 4 * H),
        "whh_f": lin(ks[2], H, 4 * H),
        "b_f": s * jax.random.normal(ks[3], (1, 4 * H), jnp.float32),
        # backward direction LSTM
        "wih_b": lin(ks[4], E, 4 * H),
        "whh_b": lin(ks[5], H, 4 * H),
        "b_b": s * jax.random.normal(ks[6], (1, 4 * H), jnp.float32),
        # output bridge Linear(2H -> H)
        "w_out": lin(ks[7], 2 * H, H),
        "b_out": s * jax.random.normal(ks[8], (1, H), jnp.float32),
        # hidden bridges for h and c
        "w_hb": lin(ks[9], 2 * H, H),
        "b_hb": jnp.zeros((1, H), jnp.float32),
        "w_cb": lin(ks[10], 2 * H, H),
        "b_cb": jnp.zeros((1, H), jnp.float32),
    }
    return params


if __name__ == "__main__":
    key = jax.random.PRNGKey(0)
    k_param, k_src = jax.random.split(key)

    VOCAB, EMB, HID = 20, 16, 32
    T, B = 8, 2

    params = init_params(k_param, VOCAB, EMB, HID)

    # src_len must be sorted descending (pack_padded_sequence convention), all >= 1
    src_len = jnp.array([8, 5], dtype=jnp.int32)
    src = jax.random.randint(k_src, (T, B), 1, VOCAB, dtype=jnp.int32)
    # zero (pad_id) out positions past each sequence's length
    pad_mask = (jnp.arange(T)[:, None] < src_len[None, :])
    src = jnp.where(pad_mask, src, 0)

    outputs, (h_n, c_n) = rnn_encoder_forward(src, src_len, params)
    jax.block_until_ready((outputs, h_n, c_n))

    assert outputs.shape == (T, B, HID)
    assert h_n.shape == (B, HID)
    assert c_n.shape == (B, HID)
    assert bool(jnp.all(jnp.isfinite(outputs)))
    print("KERNEL_OK")
</pallas_src>

<mosaic_0001>
module attributes {stable_mosaic.version = 11 : i64} {
  func.func @rnn_encoder_kernel(%arg0: memref<8x8x128xbf16, #tpu.memory_space<vmem>>, %arg1: memref<8x1xi32, #tpu.memory_space<vmem>>, %arg2: memref<128x512xbf16, #tpu.memory_space<vmem>>, %arg3: memref<128x512xbf16, #tpu.memory_space<vmem>>, %arg4: memref<1x512xf32, #tpu.memory_space<vmem>>, %arg5: memref<1x512xf32, #tpu.memory_space<vmem>>, %arg6: memref<128x512xbf16, #tpu.memory_space<vmem>>, %arg7: memref<128x512xbf16, #tpu.memory_space<vmem>>, %arg8: memref<128x128xbf16, #tpu.memory_space<vmem>>, %arg9: memref<128x128xbf16, #tpu.memory_space<vmem>>, %arg10: memref<1x128xf32, #tpu.memory_space<vmem>>, %arg11: memref<128x128xbf16, #tpu.memory_space<vmem>>, %arg12: memref<128x128xbf16, #tpu.memory_space<vmem>>, %arg13: memref<1x128xf32, #tpu.memory_space<vmem>>, %arg14: memref<128x128xbf16, #tpu.memory_space<vmem>>, %arg15: memref<128x128xbf16, #tpu.memory_space<vmem>>, %arg16: memref<1x128xf32, #tpu.memory_space<vmem>>, %arg17: memref<8x8x128xf32, #tpu.memory_space<vmem>>, %arg18: memref<8x128xf32, #tpu.memory_space<vmem>>, %arg19: memref<8x128xf32, #tpu.memory_space<vmem>>, %arg20: memref<8x8x512xbf16, #tpu.memory_space<vmem>>, %arg21: memref<8x8x512xbf16, #tpu.memory_space<vmem>>, %arg22: memref<8x8x128xbf16, #tpu.memory_space<vmem>>) attributes {dimension_semantics = [], scalar_prefetch = 0 : i64, scratch_operands = 3 : i64, tpu.core_type = #tpu.core_type<tc>} {
    %c0_i32 = arith.constant 0 : i32
    %c8_i32 = arith.constant 8 : i32
    %0 = arith.muli %c0_i32, %c8_i32 : i32
    %1 = tpu.assume_multiple %0, 8 : i32
    %2 = arith.index_cast %1 : i32 to index
    %c0 = arith.constant 0 : index
    %c0_0 = arith.constant 0 : index
    %3 = vector.load %arg0[%2, %c0, %c0_0] : memref<8x8x128xbf16, #tpu.memory_space<vmem>>, vector<8x8x128xbf16>
    %4 = vector.shape_cast %3 : vector<8x8x128xbf16> to vector<64x128xbf16>
    %c0_1 = arith.constant 0 : index
    %c0_2 = arith.constant 0 : index
    %5 = vector.load %arg2[%c0_1, %c0_2] : memref<128x512xbf16, #tpu.memory_space<vmem>>, vector<128x512xbf16>
    %cst = arith.constant dense<0.000000e+00> : vector<64x512xf32>
    %6 = tpu.matmul %4, %5, %cst {dimension_numbers = #tpu.dot_dimension_numbers<[1], [0], [0], [1], [0, 0, 1, 1], [], []>} : vector<64x128xbf16>, vector<128x512xbf16>, vector<64x512xf32> -> vector<64x512xf32>
    %c0_3 = arith.constant 0 : index
    %c0_4 = arith.constant 0 : index
    %7 = vector.load %arg4[%c0_3, %c0_4] : memref<1x512xf32, #tpu.memory_space<vmem>>, vector<1x512xf32>
    %8 = vector.broadcast %7 : vector<1x512xf32> to vector<64x512xf32>
    %9 = arith.addf %6, %8 : vector<64x512xf32>
    %c0_5 = arith.constant 0 : index
    %c0_6 = arith.constant 0 : index
    %10 = vector.load %arg3[%c0_5, %c0_6] : memref<128x512xbf16, #tpu.memory_space<vmem>>, vector<128x512xbf16>
    %cst_7 = arith.constant dense<0.000000e+00> : vector<64x512xf32>
    %11 = tpu.matmul %4, %10, %cst_7 {dimension_numbers = #tpu.dot_dimension_numbers<[1], [0], [0], [1], [0, 0, 1, 1], [], []>} : vector<64x128xbf16>, vector<128x512xbf16>, vector<64x512xf32> -> vector<64x512xf32>
    %c0_8 = arith.constant 0 : index
    %c0_9 = arith.constant 0 : index
    %12 = vector.load %arg5[%c0_8, %c0_9] : memref<1x512xf32, #tpu.memory_space<vmem>>, vector<1x512xf32>
    %13 = vector.broadcast %12 : vector<1x512xf32> to vector<64x512xf32>
    %14 = arith.addf %11, %13 : vector<64x512xf32>
    %15 = vector.shape_cast %9 : vector<64x512xf32> to vector<8x8x512xf32>
    %16 = arith.truncf %15 : vector<8x8x512xf32> to vector<8x8x512xbf16>
    %17 = arith.index_cast %1 : i32 to index
    %c0_10 = arith.constant 0 : index
    %c0_11 = arith.constant 0 : index
    %18 = vector.load %arg20[%17, %c0_10, %c0_11] : memref<8x8x512xbf16, #tpu.memory_space<vmem>>, vector<8x8x512xbf16>
    tpu.vector_store %arg20[%17, %c0_10, %c0_11], %16 {strides = array<i32>} : memref<8x8x512xbf16, #tpu.memory_space<vmem>>, vector<8x8x512xbf16>,
    %19 = vector.shape_cast %14 : vector<64x512xf32> to vector<8x8x512xf32>
    %20 = arith.truncf %19 : vector<8x8x512xf32> to vector<8x8x512xbf16>
    %21 = arith.index_cast %1 : i32 to index
    %c0_12 = arith.constant 0 : index
    %c0_13 = arith.constant 0 : index
    %22 = vector.load %arg21[%21, %c0_12, %c0_13] : memref<8x8x512xbf16, #tpu.memory_space<vmem>>, vector<8x8x512xbf16>
    tpu.vector_store %arg21[%21, %c0_12, %c0_13], %20 {strides = array<i32>} : memref<8x8x512xbf16, #tpu.memory_space<vmem>>, vector<8x8x512xbf16>,
    %c1_i32 = arith.constant 1 : i32
    %c0_14 = arith.constant 0 : index
    %c0_15 = arith.constant 0 : index
    %23 = vector.load %arg1[%c0_14, %c0_15] : memref<8x1xi32, #tpu.memory_space<vmem>>, vector<8x1xi32>
    %cst_16 = arith.constant 0.000000e+00 : f32
    %24 = vector.broadcast %cst_16 : f32 to vector<8x128xf32>
    %c0_i32_17 = arith.constant 0 : i32
    %25 = vector.broadcast %c0_i32_17 : i32 to vector<8x1xi32>
    %26 = arith.cmpi slt, %25, %23 : vector<8x1xi32>
    %27 = arith.index_cast %c0_i32_17 : i32 to index
    %c0_18 = arith.constant 0 : index
    %c0_19 = arith.constant 0 : index
    %28 = vector.load %arg20[%27, %c0_18, %c0_19] : memref<8x8x512xbf16, #tpu.memory_space<vmem>>, vector<1x8x512xbf16>
    %29 = vector.shape_cast %28 : vector<1x8x512xbf16> to vector<8x512xbf16>
    %30 = arith.extf %29 : vector<8x512xbf16> to vector<8x512xf32>
    %31 = arith.truncf %24 : vector<8x128xf32> to vector<8x128xbf16>
    %c0_20 = arith.constant 0 : index
    %c0_21 = arith.constant 0 : index
    %32 = vector.load %arg6[%c0_20, %c0_21] : memref<128x512xbf16, #tpu.memory_space<vmem>>, vector<128x512xbf16>
    %cst_22 = arith.constant dense<0.000000e+00> : vector<8x512xf32>
    %33 = tpu.matmul %31, %32, %cst_22 {dimension_numbers = #tpu.dot_dimension_numbers<[1], [0], [0], [1], [0, 0, 1, 1], [], []>} : vector<8x128xbf16>, vector<128x512xbf16>, vector<8x512xf32> -> vector<8x512xf32>
    %34 = arith.addf %30, %33 : vector<8x512xf32>
    %35 = vector.extract_strided_slice %34 {offsets = [0, 0], sizes = [8, 128], strides = [1, 1]} : vector<8x512xf32> to vector<8x128xf32>
    %36 = arith.negf %35 : vector<8x128xf32>
    %37 = math.exp %36 : vector<8x128xf32>
    %cst_23 = arith.constant 1.000000e+00 : f32
    %38 = vector.broadcast %cst_23 : f32 to vector<8x128xf32>
    %39 = arith.addf %38, %37 : vector<8x128xf32>
    %40 = arith.divf %38, %39 : vector<8x128xf32>
    %41 = vector.extract_strided_slice %34 {offsets = [0, 128], sizes = [8, 128], strides = [1, 1]} : vector<8x512xf32> to vector<8x128xf32>
    %42 = arith.negf %41 : vector<8x128xf32>
    %43 = math.exp %42 : vector<8x128xf32>
    %cst_24 = arith.constant 1.000000e+00 : f32
    %44 = vector.broadcast %cst_24 : f32 to vector<8x128xf32>
    %45 = arith.addf %44, %43 : vector<8x128xf32>
    %46 = arith.divf %44, %45 : vector<8x128xf32>
    %47 = vector.extract_strided_slice %34 {offsets = [0, 256], sizes = [8, 128], strides = [1, 1]} : vector<8x512xf32> to vector<8x128xf32>
    %48 = math.tanh %47 : vector<8x128xf32>
    %49 = vector.extract_strided_slice %34 {offsets = [0, 384], sizes = [8, 128], strides = [1, 1]} : vector<8x512xf32> to vector<8x128xf32>
    %50 = arith.negf %49 : vector<8x128xf32>
    %51 = math.exp %50 : vector<8x128xf32>
    %cst_25 = arith.constant 1.000000e+00 : f32
    %52 = vector.broadcast %cst_25 : f32 to vector<8x128xf32>
    %53 = arith.addf %52, %51 : vector<8x128xf32>
    %54 = arith.divf %52, %53 : vector<8x128xf32>
    %55 = arith.mulf %46, %24 : vector<8x128xf32>
    %56 = arith.mulf %40, %48 : vector<8x128xf32>
    %57 = arith.addf %55, %56 : vector<8x128xf32>
    %58 = math.tanh %57 : vector<8x128xf32>
    %59 = arith.mulf %54, %58 : vector<8x128xf32>
    %60 = vector.shape_cast %26 : vector<8x1xi1> to vector<8x1xi1>
    %61 = vector.broadcast %60 : vector<8x1xi1> to vector<8x128xi1>
    %62 = arith.select %61, %59, %24 : vector<8x128xi1>, vector<8x128xf32>
    %63 = arith.index_cast %c0_i32_17 : i32 to index
    %c0_26 = arith.constant 0 : index
    %c0_27 = arith.constant 0 : index
    %64 = vector.load %arg17[%63, %c0_26, %c0_27] : memref<8x8x128xf32, #tpu.memory_space<vmem>>, vector<1x8x128xf32>
    %65 = vector.shape_cast %64 : vector<1x8x128xf32> to vector<8x128xf32>
    %66 = vector.shape_cast %62 : vector<8x128xf32> to vector<1x8x128xf32>
    tpu.vector_store %arg17[%63, %c0_26, %c0_27], %66 {strides = array<i32>} : memref<8x8x128xf32, #tpu.memory_space<vmem>>, vector<1x8x128xf32>,
    %67 = vector.shape_cast %26 : vector<8x1xi1> to vector<8x1xi1>
    %68 = vector.broadcast %67 : vector<8x1xi1> to vector<8x128xi1>
    %69 = arith.select %68, %59, %24 : vector<8x128xi1>, vector<8x128xf32>
    %70 = vector.shape_cast %26 : vector<8x1xi1> to vector<8x1xi1>
    %71 = vector.broadcast %70 : vector<8x1xi1> to vector<8x128xi1>
    %72 = arith.select %71, %57, %24 : vector<8x128xi1>, vector<8x128xf32>
    %c7_i32 = arith.constant 7 : i32
    %73 = arith.subi %c7_i32, %c0_i32_17 : i32
    %74 = vector.broadcast %73 : i32 to vector<8x1xi32>
    %75 = arith.cmpi slt, %74, %23 : vector<8x1xi32>
    %76 = arith.index_cast %73 : i32 to index
    %c0_28 = arith.constant 0 : index
    %c0_29 = arith.constant 0 : index
    %77 = vector.load %arg21[%76, %c0_28, %c0_29] : memref<8x8x512xbf16, #tpu.memory_space<vmem>>, vector<1x8x512xbf16>
    %78 = vector.shape_cast %77 : vector<1x8x512xbf16> to vector<8x512xbf16>
    %79 = arith.extf %78 : vector<8x512xbf16> to vector<8x512xf32>
    %80 = arith.truncf %24 : vector<8x128xf32> to vector<8x128xbf16>
    %c0_30 = arith.constant 0 : index
    %c0_31 = arith.constant 0 : index
    %81 = vector.load %arg7[%c0_30, %c0_31] : memref<128x512xbf16, #tpu.memory_space<vmem>>, vector<128x512xbf16>
    %cst_32 = arith.constant dense<0.000000e+00> : vector<8x512xf32>
    %82 = tpu.matmul %80, %81, %cst_32 {dimension_numbers = #tpu.dot_dimension_numbers<[1], [0], [0], [1], [0, 0, 1, 1], [], []>} : vector<8x128xbf16>, vector<128x512xbf16>, vector<8x512xf32> -> vector<8x512xf32>
    %83 = arith.addf %79, %82 : vector<8x512xf32>
    %84 = vector.extract_strided_slice %83 {offsets = [0, 0], sizes = [8, 128], strides = [1, 1]} : vector<8x512xf32> to vector<8x128xf32>
    %85 = arith.negf %84 : vector<8x128xf32>
    %86 = math.exp %85 : vector<8x128xf32>
    %cst_33 = arith.constant 1.000000e+00 : f32
    %87 = vector.broadcast %cst_33 : f32 to vector<8x128xf32>
    %88 = arith.addf %87, %86 : vector<8x128xf32>
    %89 = arith.divf %87, %88 : vector<8x128xf32>
    %90 = vector.extract_strided_slice %83 {offsets = [0, 128], sizes = [8, 128], strides = [1, 1]} : vector<8x512xf32> to vector<8x128xf32>
    %91 = arith.negf %90 : vector<8x128xf32>
    %92 = math.exp %91 : vector<8x128xf32>
    %cst_34 = arith.constant 1.000000e+00 : f32
    %93 = vector.broadcast %cst_34 : f32 to vector<8x128xf32>
    %94 = arith.addf %93, %92 : vector<8x128xf32>
    %95 = arith.divf %93, %94 : vector<8x128xf32>
    %96 = vector.extract_strided_slice %83 {offsets = [0, 256], sizes = [8, 128], strides = [1, 1]} : vector<8x512xf32> to vector<8x128xf32>
    %97 = math.tanh %96 : vector<8x128xf32>
    %98 = vector.extract_strided_slice %83 {offsets = [0, 384], sizes = [8, 128], strides = [1, 1]} : vector<8x512xf32> to vector<8x128xf32>
    %99 = arith.negf %98 : vector<8x128xf32>
    %100 = math.exp %99 : vector<8x128xf32>
    %cst_35 = arith.constant 1.000000e+00 : f32
    %101 = vector.broadcast %cst_35 : f32 to vector<8x128xf32>
    %102 = arith.addf %101, %100 : vector<8x128xf32>
    %103 = arith.divf %101, %102 : vector<8x128xf32>
    %104 = arith.mulf %95, %24 : vector<8x128xf32>
    %105 = arith.mulf %89, %97 : vector<8x128xf32>
    %106 = arith.addf %104, %105 : vector<8x128xf32>
    %107 = math.tanh %106 : vector<8x128xf32>
    %108 = arith.mulf %103, %107 : vector<8x128xf32>
    %109 = vector.shape_cast %75 : vector<8x1xi1> to vector<8x1xi1>
    %110 = vector.broadcast %109 : vector<8x1xi1> to vector<8x128xi1>
    %111 = arith.select %110, %108, %24 : vector<8x128xi1>, vector<8x128xf32>
    %112 = arith.truncf %111 : vector<8x128xf32> to vector<8x128xbf16>
    %113 = arith.index_cast %73 : i32 to index
    %c0_36 = arith.constant 0 : index
    %c0_37 = arith.constant 0 : index
    %114 = vector.load %arg22[%113, %c0_36, %c0_37] : memref<8x8x128xbf16, #tpu.memory_space<vmem>>, vector<1x8x128xbf16>
    %115 = vector.shape_cast %114 : vector<1x8x128xbf16> to vector<8x128xbf16>
    %116 = vector.shape_cast %112 : vector<8x128xbf16> to vector<1x8x128xbf16>
    tpu.vector_store %arg22[%113, %c0_36, %c0_37], %116 {strides = array<i32>} : memref<8x8x128xbf16, #tpu.memory_space<vmem>>, vector<1x8x128xbf16>,
    %117 = vector.shape_cast %75 : vector<8x1xi1> to vector<8x1xi1>
    %118 = vector.broadcast %117 : vector<8x1xi1> to vector<8x128xi1>
    %119 = arith.select %118, %108, %24 : vector<8x128xi1>, vector<8x128xf32>
    %120 = vector.shape_cast %75 : vector<8x1xi1> to vector<8x1xi1>
    %121 = vector.broadcast %120 : vector<8x1xi1> to vector<8x128xi1>
    %122 = arith.select %121, %106, %24 : vector<8x128xi1>, vector<8x128xf32>
    %c1_i32_38 = arith.constant 1 : i32
    %123 = vector.broadcast %c1_i32_38 : i32 to vector<8x1xi32>
    %124 = arith.cmpi slt, %123, %23 : vector<8x1xi32>
    %125 = arith.index_cast %c1_i32_38 : i32 to index
    %c0_39 = arith.constant 0 : index
    %c0_40 = arith.constant 0 : index
    %126 = vector.load %arg20[%125, %c0_39, %c0_40] : memref<8x8x512xbf16, #tpu.memory_space<vmem>>, vector<1x8x512xbf16>
    %127 = vector.shape_cast %126 : vector<1x8x512xbf16> to vector<8x512xbf16>
    %128 = arith.extf %127 : vector<8x512xbf16> to vector<8x512xf32>
    %129 = arith.truncf %69 : vector<8x128xf32> to vector<8x128xbf16>
    %c0_41 = arith.constant 0 : index
    %c0_42 = arith.constant 0 : index
    %130 = vector.load %arg6[%c0_41, %c0_42] : memref<128x512xbf16, #tpu.memory_space<vmem>>, vector<128x512xbf16>
    %cst_43 = arith.constant dense<0.000000e+00> : vector<8x512xf32>
    %131 = tpu.matmul %129, %130, %cst_43 {dimension_numbers = #tpu.dot_dimension_numbers<[1], [0], [0], [1], [0, 0, 1, 1], [], []>} : vector<8x128xbf16>, vector<128x512xbf16>, vector<8x512xf32> -> vector<8x512xf32>
    %132 = arith.addf %128, %131 : vector<8x512xf32>
    %133 = vector.extract_strided_slice %132 {offsets = [0, 0], sizes = [8, 128], strides = [1, 1]} : vector<8x512xf32> to vector<8x128xf32>
    %134 = arith.negf %133 : vector<8x128xf32>
    %135 = math.exp %134 : vector<8x128xf32>
    %cst_44 = arith.constant 1.000000e+00 : f32
    %136 = vector.broadcast %cst_44 : f32 to vector<8x128xf32>
    %137 = arith.addf %136, %135 : vector<8x128xf32>
    %138 = arith.divf %136, %137 : vector<8x128xf32>
    %139 = vector.extract_strided_slice %132 {offsets = [0, 128], sizes = [8, 128], strides = [1, 1]} : vector<8x512xf32> to vector<8x128xf32>
    %140 = arith.negf %139 : vector<8x128xf32>
    %141 = math.exp %140 : vector<8x128xf32>
    %cst_45 = arith.constant 1.000000e+00 : f32
    %142 = vector.broadcast %cst_45 : f32 to vector<8x128xf32>
    %143 = arith.addf %142, %141 : vector<8x128xf32>
    %144 = arith.divf %142, %143 : vector<8x128xf32>
    %145 = vector.extract_strided_slice %132 {offsets = [0, 256], sizes = [8, 128], strides = [1, 1]} : vector<8x512xf32> to vector<8x128xf32>
    %146 = math.tanh %145 : vector<8x128xf32>
    %147 = vector.extract_strided_slice %132 {offsets = [0, 384], sizes = [8, 128], strides = [1, 1]} : vector<8x512xf32> to vector<8x128xf32>
    %148 = arith.negf %147 : vector<8x128xf32>
    %149 = math.exp %148 : vector<8x128xf32>
    %cst_46 = arith.constant 1.000000e+00 : f32
    %150 = vector.broadcast %cst_46 : f32 to vector<8x128xf32>
    %151 = arith.addf %150, %149 : vector<8x128xf32>
    %152 = arith.divf %150, %151 : vector<8x128xf32>
    %153 = arith.mulf %144, %72 : vector<8x128xf32>
    %154 = arith.mulf %138, %146 : vector<8x128xf32>
    %155 = arith.addf %153, %154 : vector<8x128xf32>
    %156 = math.tanh %155 : vector<8x128xf32>
    %157 = arith.mulf %152, %156 : vector<8x128xf32>
    %158 = vector.shape_cast %124 : vector<8x1xi1> to vector<8x1xi1>
    %159 = vector.broadcast %158 : vector<8x1xi1> to vector<8x128xi1>
    %160 = arith.select %159, %157, %24 : vector<8x128xi1>, vector<8x128xf32>
    %161 = arith.index_cast %c1_i32_38 : i32 to index
    %c0_47 = arith.constant 0 : index
    %c0_48 = arith.constant 0 : index
    %162 = vector.load %arg17[%161, %c0_47, %c0_48] : memref<8x8x128xf32, #tpu.memory_space<vmem>>, vector<1x8x128xf32>
    %163 = vector.shape_cast %162 : vector<1x8x128xf32> to vector<8x128xf32>
    %164 = vector.shape_cast %160 : vector<8x128xf32> to vector<1x8x128xf32>
    tpu.vector_store %arg17[%161, %c0_47, %c0_48], %164 {strides = array<i32>} : memref<8x8x128xf32, #tpu.memory_space<vmem>>, vector<1x8x128xf32>,
    %165 = vector.shape_cast %124 : vector<8x1xi1> to vector<8x1xi1>
    %166 = vector.broadcast %165 : vector<8x1xi1> to vector<8x128xi1>
    %167 = arith.select %166, %157, %69 : vector<8x128xi1>, vector<8x128xf32>
    %168 = vector.shape_cast %124 : vector<8x1xi1> to vector<8x1xi1>
    %169 = vector.broadcast %168 : vector<8x1xi1> to vector<8x128xi1>
    %170 = arith.select %169, %155, %72 : vector<8x128xi1>, vector<8x128xf32>
    %c7_i32_49 = arith.constant 7 : i32
    %171 = arith.subi %c7_i32_49, %c1_i32_38 : i32
    %172 = vector.broadcast %171 : i32 to vector<8x1xi32>
    %173 = arith.cmpi slt, %172, %23 : vector<8x1xi32>
    %174 = arith.index_cast %171 : i32 to index
    %c0_50 = arith.constant 0 : index
    %c0_51 = arith.constant 0 : index
    %175 = vector.load %arg21[%174, %c0_50, %c0_51] : memref<8x8x512xbf16, #tpu.memory_space<vmem>>, vector<1x8x512xbf16>
    %176 = vector.shape_cast %175 : vector<1x8x512xbf16> to vector<8x512xbf16>
    %177 = arith.extf %176 : vector<8x512xbf16> to vector<8x512xf32>
    %178 = arith.truncf %119 : vector<8x128xf32> to vector<8x128xbf16>
    %c0_52 = arith.constant 0 : index
    %c0_53 = arith.constant 0 : index
    %179 = vector.load %arg7[%c0_52, %c0_53] : memref<128x512xbf16, #tpu.memory_space<vmem>>, vector<128x512xbf16>
    %cst_54 = arith.constant dense<0.000000e+00> : vector<8x512xf32>
    %180 = tpu.matmul %178, %179, %cst_54 {dimension_numbers = #tpu.dot_dimension_numbers<[1], [0], [0], [1], [0, 0, 1, 1], [], []>} : vector<8x128xbf16>, vector<128x512xbf16>, vector<8x512xf32> -> vector<8x512xf32>
    %181 = arith.addf %177, %180 : vector<8x512xf32>
    %182 = vector.extract_strided_slice %181 {offsets = [0, 0], sizes = [8, 128], strides = [1, 1]} : vector<8x512xf32> to vector<8x128xf32>
    %183 = arith.negf %182 : vector<8x128xf32>
    %184 = math.exp %183 : vector<8x128xf32>
    %cst_55 = arith.constant 1.000000e+00 : f32
    %185 = vector.broadcast %cst_55 : f32 to vector<8x128xf32>
    %186 = arith.addf %185, %184 : vector<8x128xf32>
    %187 = arith.divf %185, %186 : vector<8x128xf32>
    %188 = vector.extract_strided_slice %181 {offsets = [0, 128], sizes = [8, 128], strides = [1, 1]} : vector<8x512xf32> to vector<8x128xf32>
    %189 = arith.negf %188 : vector<8x128xf32>
    %190 = math.exp %189 : vector<8x128xf32>
    %cst_56 = arith.constant 1.000000e+00 : f32
    %191 = vector.broadcast %cst_56 : f32 to vector<8x128xf32>
    %192 = arith.addf %191, %190 : vector<8x128xf32>
    %193 = arith.divf %191, %192 : vector<8x128xf32>
    %194 = vector.extract_strided_slice %181 {offsets = [0, 256], sizes = [8, 128], strides = [1, 1]} : vector<8x512xf32> to vector<8x128xf32>
    %195 = math.tanh %194 : vector<8x128xf32>
    %196 = vector.extract_strided_slice %181 {offsets = [0, 384], sizes = [8, 128], strides = [1, 1]} : vector<8x512xf32> to vector<8x128xf32>
    %197 = arith.negf %196 : vector<8x128xf32>
    %198 = math.exp %197 : vector<8x128xf32>
    %cst_57 = arith.constant 1.000000e+00 : f32
    %199 = vector.broadcast %cst_57 : f32 to vector<8x128xf32>
    %200 = arith.addf %199, %198 : vector<8x128xf32>
    %201 = arith.divf %199, %200 : vector<8x128xf32>
    %202 = arith.mulf %193, %122 : vector<8x128xf32>
    %203 = arith.mulf %187, %195 : vector<8x128xf32>
    %204 = arith.addf %202, %203 : vector<8x128xf32>
    %205 = math.tanh %204 : vector<8x128xf32>
    %206 = arith.mulf %201, %205 : vector<8x128xf32>
    %207 = vector.shape_cast %173 : vector<8x1xi1> to vector<8x1xi1>
    %208 = vector.broadcast %207 : vector<8x1xi1> to vector<8x128xi1>
    %209 = arith.select %208, %206, %24 : vector<8x128xi1>, vector<8x128xf32>
    %210 = arith.truncf %209 : vector<8x128xf32> to vector<8x128xbf16>
    %211 = arith.index_cast %171 : i32 to index
    %c0_58 = arith.constant 0 : index
    %c0_59 = arith.constant 0 : index
    %212 = vector.load %arg22[%211, %c0_58, %c0_59] : memref<8x8x128xbf16, #tpu.memory_space<vmem>>, vector<1x8x128xbf16>
    %213 = vector.shape_cast %212 : vector<1x8x128xbf16> to vector<8x128xbf16>
    %214 = vector.shape_cast %210 : vector<8x128xbf16> to vector<1x8x128xbf16>
    tpu.vector_store %arg22[%211, %c0_58, %c0_59], %214 {strides = array<i32>} : memref<8x8x128xbf16, #tpu.memory_space<vmem>>, vector<1x8x128xbf16>,
    %215 = vector.shape_cast %173 : vector<8x1xi1> to vector<8x1xi1>
    %216 = vector.broadcast %215 : vector<8x1xi1> to vector<8x128xi1>
    %217 = arith.select %216, %206, %119 : vector<8x128xi1>, vector<8x128xf32>
    %218 = vector.shape_cast %173 : vector<8x1xi1> to vector<8x1xi1>
    %219 = vector.broadcast %218 : vector<8x1xi1> to vector<8x128xi1>
    %220 = arith.select %219, %204, %122 : vector<8x128xi1>, vector<8x128xf32>
    %c2_i32 = arith.constant 2 : i32
    %221 = vector.broadcast %c2_i32 : i32 to vector<8x1xi32>
    %222 = arith.cmpi slt, %221, %23 : vector<8x1xi32>
    %223 = arith.index_cast %c2_i32 : i32 to index
    %c0_60 = arith.constant 0 : index
    %c0_61 = arith.constant 0 : index
    %224 = vector.load %arg20[%223, %c0_60, %c0_61] : memref<8x8x512xbf16, #tpu.memory_space<vmem>>, vector<1x8x512xbf16>
    %225 = vector.shape_cast %224 : vector<1x8x512xbf16> to vector<8x512xbf16>
    %226 = arith.extf %225 : vector<8x512xbf16> to vector<8x512xf32>
    %227 = arith.truncf %167 : vector<8x128xf32> to vector<8x128xbf16>
    %c0_62 = arith.constant 0 : index
    %c0_63 = arith.constant 0 : index
    %228 = vector.load %arg6[%c0_62, %c0_63] : memref<128x512xbf16, #tpu.memory_space<vmem>>, vector<128x512xbf16>
    %cst_64 = arith.constant dense<0.000000e+00> : vector<8x512xf32>
    %229 = tpu.matmul %227, %228, %cst_64 {dimension_numbers = #tpu.dot_dimension_numbers<[1], [0], [0], [1], [0, 0, 1, 1], [], []>} : vector<8x128xbf16>, vector<128x512xbf16>, vector<8x512xf32> -> vector<8x512xf32>
    %230 = arith.addf %226, %229 : vector<8x512xf32>
    %231 = vector.extract_strided_slice %230 {offsets = [0, 0], sizes = [8, 128], strides = [1, 1]} : vector<8x512xf32> to vector<8x128xf32>
    %232 = arith.negf %231 : vector<8x128xf32>
    %233 = math.exp %232 : vector<8x128xf32>
    %cst_65 = arith.constant 1.000000e+00 : f32
    %234 = vector.broadcast %cst_65 : f32 to vector<8x128xf32>
    %235 = arith.addf %234, %233 : vector<8x128xf32>
    %236 = arith.divf %234, %235 : vector<8x128xf32>
    %237 = vector.extract_strided_slice %230 {offsets = [0, 128], sizes = [8, 128], strides = [1, 1]} : vector<8x512xf32> to vector<8x128xf32>
    %238 = arith.negf %237 : vector<8x128xf32>
    %239 = math.exp %238 : vector<8x128xf32>
    %cst_66 = arith.constant 1.000000e+00 : f32
    %240 = vector.broadcast %cst_66 : f32 to vector<8x128xf32>
    %241 = arith.addf %240, %239 : vector<8x128xf32>
    %242 = arith.divf %240, %241 : vector<8x128xf32>
    %243 = vector.extract_strided_slice %230 {offsets = [0, 256], sizes = [8, 128], strides = [1, 1]} : vector<8x512xf32> to vector<8x128xf32>
    %244 = math.tanh %243 : vector<8x128xf32>
    %245 = vector.extract_strided_slice %230 {offsets = [0, 384], sizes = [8, 128], strides = [1, 1]} : vector<8x512xf32> to vector<8x128xf32>
    %246 = arith.negf %245 : vector<8x128xf32>
    %247 = math.exp %246 : vector<8x128xf32>
    %cst_67 = arith.constant 1.000000e+00 : f32
    %248 = vector.broadcast %cst_67 : f32 to vector<8x128xf32>
    %249 = arith.addf %248, %247 : vector<8x128xf32>
    %250 = arith.divf %248, %249 : vector<8x128xf32>
    %251 = arith.mulf %242, %170 : vector<8x128xf32>
    %252 = arith.mulf %236, %244 : vector<8x128xf32>
    %253 = arith.addf %251, %252 : vector<8x128xf32>
    %254 = math.tanh %253 : vector<8x128xf32>
    %255 = arith.mulf %250, %254 : vector<8x128xf32>
    %256 = vector.shape_cast %222 : vector<8x1xi1> to vector<8x1xi1>
    %257 = vector.broadcast %256 : vector<8x1xi1> to vector<8x128xi1>
    %258 = arith.select %257, %255, %24 : vector<8x128xi1>, vector<8x128xf32>
    %259 = arith.index_cast %c2_i32 : i32 to index
    %c0_68 = arith.constant 0 : index
    %c0_69 = arith.constant 0 : index
    %260 = vector.load %arg17[%259, %c0_68, %c0_69] : memref<8x8x128xf32, #tpu.memory_space<vmem>>, vector<1x8x128xf32>
    %261 = vector.shape_cast %260 : vector<1x8x128xf32> to vector<8x128xf32>
    %262 = vector.shape_cast %258 : vector<8x128xf32> to vector<1x8x128xf32>
    tpu.vector_store %arg17[%259, %c0_68, %c0_69], %262 {strides = array<i32>} : memref<8x8x128xf32, #tpu.memory_space<vmem>>, vector<1x8x128xf32>,
    %263 = vector.shape_cast %222 : vector<8x1xi1> to vector<8x1xi1>
    %264 = vector.broadcast %263 : vector<8x1xi1> to vector<8x128xi1>
    %265 = arith.select %264, %255, %167 : vector<8x128xi1>, vector<8x128xf32>
    %266 = vector.shape_cast %222 : vector<8x1xi1> to vector<8x1xi1>
    %267 = vector.broadcast %266 : vector<8x1xi1> to vector<8x128xi1>
    %268 = arith.select %267, %253, %170 : vector<8x128xi1>, vector<8x128xf32>
    %c7_i32_70 = arith.constant 7 : i32
    %269 = arith.subi %c7_i32_70, %c2_i32 : i32
    %270 = vector.broadcast %269 : i32 to vector<8x1xi32>
    %271 = arith.cmpi slt, %270, %23 : vector<8x1xi32>
    %272 = arith.index_cast %269 : i32 to index
    %c0_71 = arith.constant 0 : index
    %c0_72 = arith.constant 0 : index
    %273 = vector.load %arg21[%272, %c0_71, %c0_72] : memref<8x8x512xbf16, #tpu.memory_space<vmem>>, vector<1x8x512xbf16>
    %274 = vector.shape_cast %273 : vector<1x8x512xbf16> to vector<8x512xbf16>
    %275 = arith.extf %274 : vector<8x512xbf16> to vector<8x512xf32>
    %276 = arith.truncf %217 : vector<8x128xf32> to vector<8x128xbf16>
    %c0_73 = arith.constant 0 : index
    %c0_74 = arith.constant 0 : index
    %277 = vector.load %arg7[%c0_73, %c0_74] : memref<128x512xbf16, #tpu.memory_space<vmem>>, vector<128x512xbf16>
    %cst_75 = arith.constant dense<0.000000e+00> : vector<8x512xf32>
    %278 = tpu.matmul %276, %277, %cst_75 {dimension_numbers = #tpu.dot_dimension_numbers<[1], [0], [0], [1], [0, 0, 1, 1], [], []>} : vector<8x128xbf16>, vector<128x512xbf16>, vector<8x512xf32> -> vector<8x512xf32>
    %279 = arith.addf %275, %278 : vector<8x512xf32>
    %280 = vector.extract_strided_slice %279 {offsets = [0, 0], sizes = [8, 128], strides = [1, 1]} : vector<8x512xf32> to vector<8x128xf32>
    %281 = arith.negf %280 : vector<8x128xf32>
    %282 = math.exp %281 : vector<8x128xf32>
    %cst_76 = arith.constant 1.000000e+00 : f32
    %283 = vector.broadcast %cst_76 : f32 to vector<8x128xf32>
    %284 = arith.addf %283, %282 : vector<8x128xf32>
    %285 = arith.divf %283, %284 : vector<8x128xf32>
    %286 = vector.extract_strided_slice %279 {offsets = [0, 128], sizes = [8, 128], strides = [1, 1]} : vector<8x512xf32> to vector<8x128xf32>
    %287 = arith.negf %286 : vector<8x128xf32>
    %288 = math.exp %287 : vector<8x128xf32>
    %cst_77 = arith.constant 1.000000e+00 : f32
    %289 = vector.broadcast %cst_77 : f32 to vector<8x128xf32>
    %290 = arith.addf %289, %288 : vector<8x128xf32>
    %291 = arith.divf %289, %290 : vector<8x128xf32>
    %292 = vector.extract_strided_slice %279 {offsets = [0, 256], sizes = [8, 128], strides = [1, 1]} : vector<8x512xf32> to vector<8x128xf32>
    %293 = math.tanh %292 : vector<8x128xf32>
    %294 = vector.extract_strided_slice %279 {offsets = [0, 384], sizes = [8, 128], strides = [1, 1]} : vector<8x512xf32> to vector<8x128xf32>
    %295 = arith.negf %294 : vector<8x128xf32>
    %296 = math.exp %295 : vector<8x128xf32>
    %cst_78 = arith.constant 1.000000e+00 : f32
    %297 = vector.broadcast %cst_78 : f32 to vector<8x128xf32>
    %298 = arith.addf %297, %296 : vector<8x128xf32>
    %299 = arith.divf %297, %298 : vector<8x128xf32>
    %300 = arith.mulf %291, %220 : vector<8x128xf32>
    %301 = arith.mulf %285, %293 : vector<8x128xf32>
    %302 = arith.addf %300, %301 : vector<8x128xf32>
    %303 = math.tanh %302 : vector<8x128xf32>
    %304 = arith.mulf %299, %303 : vector<8x128xf32>
    %305 = vector.shape_cast %271 : vector<8x1xi1> to vector<8x1xi1>
    %306 = vector.broadcast %305 : vector<8x1xi1> to vector<8x128xi1>
    %307 = arith.select %306, %304, %24 : vector<8x128xi1>, vector<8x128xf32>
    %308 = arith.truncf %307 : vector<8x128xf32> to vector<8x128xbf16>
    %309 = arith.index_cast %269 : i32 to index
    %c0_79 = arith.constant 0 : index
    %c0_80 = arith.constant 0 : index
    %310 = vector.load %arg22[%309, %c0_79, %c0_80] : memref<8x8x128xbf16, #tpu.memory_space<vmem>>, vector<1x8x128xbf16>
    %311 = vector.shape_cast %310 : vector<1x8x128xbf16> to vector<8x128xbf16>
    %312 = vector.shape_cast %308 : vector<8x128xbf16> to vector<1x8x128xbf16>
    tpu.vector_store %arg22[%309, %c0_79, %c0_80], %312 {strides = array<i32>} : memref<8x8x128xbf16, #tpu.memory_space<vmem>>, vector<1x8x128xbf16>,
    %313 = vector.shape_cast %271 : vector<8x1xi1> to vector<8x1xi1>
    %314 = vector.broadcast %313 : vector<8x1xi1> to vector<8x128xi1>
    %315 = arith.select %314, %304, %217 : vector<8x128xi1>, vector<8x128xf32>
    %316 = vector.shape_cast %271 : vector<8x1xi1> to vector<8x1xi1>
    %317 = vector.broadcast %316 : vector<8x1xi1> to vector<8x128xi1>
    %318 = arith.select %317, %302, %220 : vector<8x128xi1>, vector<8x128xf32>
    %c3_i32 = arith.constant 3 : i32
    %319 = vector.broadcast %c3_i32 : i32 to vector<8x1xi32>
    %320 = arith.cmpi slt, %319, %23 : vector<8x1xi32>
    %321 = arith.index_cast %c3_i32 : i32 to index
    %c0_81 = arith.constant 0 : index
    %c0_82 = arith.constant 0 : index
    %322 = vector.load %arg20[%321, %c0_81, %c0_82] : memref<8x8x512xbf16, #tpu.memory_space<vmem>>, vector<1x8x512xbf16>
    %323 = vector.shape_cast %322 : vector<1x8x512xbf16> to vector<8x512xbf16>
    %324 = arith.extf %323 : vector<8x512xbf16> to vector<8x512xf32>
    %325 = arith.truncf %265 : vector<8x128xf32> to vector<8x128xbf16>
    %c0_83 = arith.constant 0 : index
    %c0_84 = arith.constant 0 : index
    %326 = vector.load %arg6[%c0_83, %c0_84] : memref<128x512xbf16, #tpu.memory_space<vmem>>, vector<128x512xbf16>
    %cst_85 = arith.constant dense<0.000000e+00> : vector<8x512xf32>
    %327 = tpu.matmul %325, %326, %cst_85 {dimension_numbers = #tpu.dot_dimension_numbers<[1], [0], [0], [1], [0, 0, 1, 1], [], []>} : vector<8x128xbf16>, vector<128x512xbf16>, vector<8x512xf32> -> vector<8x512xf32>
    %328 = arith.addf %324, %327 : vector<8x512xf32>
    %329 = vector.extract_strided_slice %328 {offsets = [0, 0], sizes = [8, 128], strides = [1, 1]} : vector<8x512xf32> to vector<8x128xf32>
    %330 = arith.negf %329 : vector<8x128xf32>
    %331 = math.exp %330 : vector<8x128xf32>
    %cst_86 = arith.constant 1.000000e+00 : f32
    %332 = vector.broadcast %cst_86 : f32 to vector<8x128xf32>
    %333 = arith.addf %332, %331 : vector<8x128xf32>
    %334 = arith.divf %332, %333 : vector<8x128xf32>
    %335 = vector.extract_strided_slice %328 {offsets = [0, 128], sizes = [8, 128], strides = [1, 1]} : vector<8x512xf32> to vector<8x128xf32>
    %336 = arith.negf %335 : vector<8x128xf32>
    %337 = math.exp %336 : vector<8x128xf32>
    %cst_87 = arith.constant 1.000000e+00 : f32
    %338 = vector.broadcast %cst_87 : f32 to vector<8x128xf32>
    %339 = arith.addf %338, %337 : vector<8x128xf32>
    %340 = arith.divf %338, %339 : vector<8x128xf32>
    %341 = vector.extract_strided_slice %328 {offsets = [0, 256], sizes = [8, 128], strides = [1, 1]} : vector<8x512xf32> to vector<8x128xf32>
    %342 = math.tanh %341 : vector<8x128xf32>
    %343 = vector.extract_strided_slice %328 {offsets = [0, 384], sizes = [8, 128], strides = [1, 1]} : vector<8x512xf32> to vector<8x128xf32>
    %344 = arith.negf %343 : vector<8x128xf32>
    %345 = math.exp %344 : vector<8x128xf32>
    %cst_88 = arith.constant 1.000000e+00 : f32
    %346 = vector.broadcast %cst_88 : f32 to vector<8x128xf32>
    %347 = arith.addf %346, %345 : vector<8x128xf32>
    %348 = arith.divf %346, %347 : vector<8x128xf32>
    %349 = arith.mulf %340, %268 : vector<8x128xf32>
    %350 = arith.mulf %334, %342 : vector<8x128xf32>
    %351 = arith.addf %349, %350 : vector<8x128xf32>
    %352 = math.tanh %351 : vector<8x128xf32>
    %353 = arith.mulf %348, %352 : vector<8x128xf32>
    %354 = vector.shape_cast %320 : vector<8x1xi1> to vector<8x1xi1>
    %355 = vector.broadcast %354 : vector<8x1xi1> to vector<8x128xi1>
    %356 = arith.select %355, %353, %24 : vector<8x128xi1>, vector<8x128xf32>
    %357 = arith.index_cast %c3_i32 : i32 to index
    %c0_89 = arith.constant 0 : index
    %c0_90 = arith.constant 0 : index
    %358 = vector.load %arg17[%357, %c0_89, %c0_90] : memref<8x8x128xf32, #tpu.memory_space<vmem>>, vector<1x8x128xf32>
    %359 = vector.shape_cast %358 : vector<1x8x128xf32> to vector<8x128xf32>
    %360 = vector.shape_cast %356 : vector<8x128xf32> to vector<1x8x128xf32>
    tpu.vector_store %arg17[%357, %c0_89, %c0_90], %360 {strides = array<i32>} : memref<8x8x128xf32, #tpu.memory_space<vmem>>, vector<1x8x128xf32>,
    %361 = vector.shape_cast %320 : vector<8x1xi1> to vector<8x1xi1>
    %362 = vector.broadcast %361 : vector<8x1xi1> to vector<8x128xi1>
    %363 = arith.select %362, %353, %265 : vector<8x128xi1>, vector<8x128xf32>
    %364 = vector.shape_cast %320 : vector<8x1xi1> to vector<8x1xi1>
    %365 = vector.broadcast %364 : vector<8x1xi1> to vector<8x128xi1>
    %366 = arith.select %365, %351, %268 : vector<8x128xi1>, vector<8x128xf32>
    %c7_i32_91 = arith.constant 7 : i32
    %367 = arith.subi %c7_i32_91, %c3_i32 : i32
    %368 = vector.broadcast %367 : i32 to vector<8x1xi32>
    %369 = arith.cmpi slt, %368, %23 : vector<8x1xi32>
    %370 = arith.index_cast %367 : i32 to index
    %c0_92 = arith.constant 0 : index
    %c0_93 = arith.constant 0 : index
    %371 = vector.load %arg21[%370, %c0_92, %c0_93] : memref<8x8x512xbf16, #tpu.memory_space<vmem>>, vector<1x8x512xbf16>
    %372 = vector.shape_cast %371 : vector<1x8x512xbf16> to vector<8x512xbf16>
    %373 = arith.extf %372 : vector<8x512xbf16> to vector<8x512xf32>
    %374 = arith.truncf %315 : vector<8x128xf32> to vector<8x128xbf16>
    %c0_94 = arith.constant 0 : index
    %c0_95 = arith.constant 0 : index
    %375 = vector.load %arg7[%c0_94, %c0_95] : memref<128x512xbf16, #tpu.memory_space<vmem>>, vector<128x512xbf16>
    %cst_96 = arith.constant dense<0.000000e+00> : vector<8x512xf32>
    %376 = tpu.matmul %374, %375, %cst_96 {dimension_numbers = #tpu.dot_dimension_numbers<[1], [0], [0], [1], [0, 0, 1, 1], [], []>} : vector<8x128xbf16>, vector<128x512xbf16>, vector<8x512xf32> -> vector<8x512xf32>
    %377 = arith.addf %373, %376 : vector<8x512xf32>
    %378 = vector.extract_strided_slice %377 {offsets = [0, 0], sizes = [8, 128], strides = [1, 1]} : vector<8x512xf32> to vector<8x128xf32>
    %379 = arith.negf %378 : vector<8x128xf32>
    %380 = math.exp %379 : vector<8x128xf32>
    %cst_97 = arith.constant 1.000000e+00 : f32
    %381 = vector.broadcast %cst_97 : f32 to vector<8x128xf32>
    %382 = arith.addf %381, %380 : vector<8x128xf32>
    %383 = arith.divf %381, %382 : vector<8x128xf32>
    %384 = vector.extract_strided_slice %377 {offsets = [0, 128], sizes = [8, 128], strides = [1, 1]} : vector<8x512xf32> to vector<8x128xf32>
    %385 = arith.negf %384 : vector<8x128xf32>
    %386 = math.exp %385 : vector<8x128xf32>
    %cst_98 = arith.constant 1.000000e+00 : f32
    %387 = vector.broadcast %cst_98 : f32 to vector<8x128xf32>
    %388 = arith.addf %387, %386 : vector<8x128xf32>
    %389 = arith.divf %387, %388 : vector<8x128xf32>
    %390 = vector.extract_strided_slice %377 {offsets = [0, 256], sizes = [8, 128], strides = [1, 1]} : vector<8x512xf32> to vector<8x128xf32>
    %391 = math.tanh %390 : vector<8x128xf32>
    %392 = vector.extract_strided_slice %377 {offsets = [0, 384], sizes = [8, 128], strides = [1, 1]} : vector<8x512xf32> to vector<8x128xf32>
    %393 = arith.negf %392 : vector<8x128xf32>
    %394 = math.exp %393 : vector<8x128xf32>
    %cst_99 = arith.constant 1.000000e+00 : f32
    %395 = vector.broadcast %cst_99 : f32 to vector<8x128xf32>
    %396 = arith.addf %395, %394 : vector<8x128xf32>
    %397 = arith.divf %395, %396 : vector<8x128xf32>
    %398 = arith.mulf %389, %318 : vector<8x128xf32>
    %399 = arith.mulf %383, %391 : vector<8x128xf32>
    %400 = arith.addf %398, %399 : vector<8x128xf32>
    %401 = math.tanh %400 : vector<8x128xf32>
    %402 = arith.mulf %397, %401 : vector<8x128xf32>
    %403 = vector.shape_cast %369 : vector<8x1xi1> to vector<8x1xi1>
    %404 = vector.broadcast %403 : vector<8x1xi1> to vector<8x128xi1>
    %405 = arith.select %404, %402, %24 : vector<8x128xi1>, vector<8x128xf32>
    %406 = arith.truncf %405 : vector<8x128xf32> to vector<8x128xbf16>
    %407 = arith.index_cast %367 : i32 to index
    %c0_100 = arith.constant 0 : index
    %c0_101 = arith.constant 0 : index
    %408 = vector.load %arg22[%407, %c0_100, %c0_101] : memref<8x8x128xbf16, #tpu.memory_space<vmem>>, vector<1x8x128xbf16>
    %409 = vector.shape_cast %408 : vector<1x8x128xbf16> to vector<8x128xbf16>
    %410 = vector.shape_cast %406 : vector<8x128xbf16> to vector<1x8x128xbf16>
    tpu.vector_store %arg22[%407, %c0_100, %c0_101], %410 {strides = array<i32>} : memref<8x8x128xbf16, #tpu.memory_space<vmem>>, vector<1x8x128xbf16>,
    %411 = vector.shape_cast %369 : vector<8x1xi1> to vector<8x1xi1>
    %412 = vector.broadcast %411 : vector<8x1xi1> to vector<8x128xi1>
    %413 = arith.select %412, %402, %315 : vector<8x128xi1>, vector<8x128xf32>
    %414 = vector.shape_cast %369 : vector<8x1xi1> to vector<8x1xi1>
    %415 = vector.broadcast %414 : vector<8x1xi1> to vector<8x128xi1>
    %416 = arith.select %415, %400, %318 : vector<8x128xi1>, vector<8x128xf32>
    %c4_i32 = arith.constant 4 : i32
    %417 = vector.broadcast %c4_i32 : i32 to vector<8x1xi32>
    %418 = arith.cmpi slt, %417, %23 : vector<8x1xi32>
    %419 = arith.index_cast %c4_i32 : i32 to index
    %c0_102 = arith.constant 0 : index
    %c0_103 = arith.constant 0 : index
    %420 = vector.load %arg20[%419, %c0_102, %c0_103] : memref<8x8x512xbf16, #tpu.memory_space<vmem>>, vector<1x8x512xbf16>
    %421 = vector.shape_cast %420 : vector<1x8x512xbf16> to vector<8x512xbf16>
    %422 = arith.extf %421 : vector<8x512xbf16> to vector<8x512xf32>
    %423 = arith.truncf %363 : vector<8x128xf32> to vector<8x128xbf16>
    %c0_104 = arith.constant 0 : index
    %c0_105 = arith.constant 0 : index
    %424 = vector.load %arg6[%c0_104, %c0_105] : memref<128x512xbf16, #tpu.memory_space<vmem>>, vector<128x512xbf16>
    %cst_106 = arith.constant dense<0.000000e+00> : vector<8x512xf32>
    %425 = tpu.matmul %423, %424, %cst_106 {dimension_numbers = #tpu.dot_dimension_numbers<[1], [0], [0], [1], [0, 0, 1, 1], [], []>} : vector<8x128xbf16>, vector<128x512xbf16>, vector<8x512xf32> -> vector<8x512xf32>
    %426 = arith.addf %422, %425 : vector<8x512xf32>
    %427 = vector.extract_strided_slice %426 {offsets = [0, 0], sizes = [8, 128], strides = [1, 1]} : vector<8x512xf32> to vector<8x128xf32>
    %428 = arith.negf %427 : vector<8x128xf32>
    %429 = math.exp %428 : vector<8x128xf32>
    %cst_107 = arith.constant 1.000000e+00 : f32
    %430 = vector.broadcast %cst_107 : f32 to vector<8x128xf32>
    %431 = arith.addf %430, %429 : vector<8x128xf32>
    %432 = arith.divf %430, %431 : vector<8x128xf32>
    %433 = vector.extract_strided_slice %426 {offsets = [0, 128], sizes = [8, 128], strides = [1, 1]} : vector<8x512xf32> to vector<8x128xf32>
    %434 = arith.negf %433 : vector<8x128xf32>
    %435 = math.exp %434 : vector<8x128xf32>
    %cst_108 = arith.constant 1.000000e+00 : f32
    %436 = vector.broadcast %cst_108 : f32 to vector<8x128xf32>
    %437 = arith.addf %436, %435 : vector<8x128xf32>
    %438 = arith.divf %436, %437 : vector<8x128xf32>
    %439 = vector.extract_strided_slice %426 {offsets = [0, 256], sizes = [8, 128], strides = [1, 1]} : vector<8x512xf32> to vector<8x128xf32>
    %440 = math.tanh %439 : vector<8x128xf32>
    %441 = vector.extract_strided_slice %426 {offsets = [0, 384], sizes = [8, 128], strides = [1, 1]} : vector<8x512xf32> to vector<8x128xf32>
    %442 = arith.negf %441 : vector<8x128xf32>
    %443 = math.exp %442 : vector<8x128xf32>
    %cst_109 = arith.constant 1.000000e+00 : f32
    %444 = vector.broadcast %cst_109 : f32 to vector<8x128xf32>
    %445 = arith.addf %444, %443 : vector<8x128xf32>
    %446 = arith.divf %444, %445 : vector<8x128xf32>
    %447 = arith.mulf %438, %366 : vector<8x128xf32>
    %448 = arith.mulf %432, %440 : vector<8x128xf32>
    %449 = arith.addf %447, %448 : vector<8x128xf32>
    %450 = math.tanh %449 : vector<8x128xf32>
    %451 = arith.mulf %446, %450 : vector<8x128xf32>
    %452 = vector.shape_cast %418 : vector<8x1xi1> to vector<8x1xi1>
    %453 = vector.broadcast %452 : vector<8x1xi1> to vector<8x128xi1>
    %454 = arith.select %453, %451, %24 : vector<8x128xi1>, vector<8x128xf32>
    %455 = arith.index_cast %c4_i32 : i32 to index
    %c0_110 = arith.constant 0 : index
    %c0_111 = arith.constant 0 : index
    %456 = vector.load %arg17[%455, %c0_110, %c0_111] : memref<8x8x128xf32, #tpu.memory_space<vmem>>, vector<1x8x128xf32>
    %457 = vector.shape_cast %456 : vector<1x8x128xf32> to vector<8x128xf32>
    %458 = vector.shape_cast %454 : vector<8x128xf32> to vector<1x8x128xf32>
    tpu.vector_store %arg17[%455, %c0_110, %c0_111], %458 {strides = array<i32>} : memref<8x8x128xf32, #tpu.memory_space<vmem>>, vector<1x8x128xf32>,
    %459 = vector.shape_cast %418 : vector<8x1xi1> to vector<8x1xi1>
    %460 = vector.broadcast %459 : vector<8x1xi1> to vector<8x128xi1>
    %461 = arith.select %460, %451, %363 : vector<8x128xi1>, vector<8x128xf32>
    %462 = vector.shape_cast %418 : vector<8x1xi1> to vector<8x1xi1>
    %463 = vector.broadcast %462 : vector<8x1xi1> to vector<8x128xi1>
    %464 = arith.select %463, %449, %366 : vector<8x128xi1>, vector<8x128xf32>
    %c7_i32_112 = arith.constant 7 : i32
    %465 = arith.subi %c7_i32_112, %c4_i32 : i32
    %466 = vector.broadcast %465 : i32 to vector<8x1xi32>
    %467 = arith.cmpi slt, %466, %23 : vector<8x1xi32>
    %468 = arith.index_cast %465 : i32 to index
    %c0_113 = arith.constant 0 : index
    %c0_114 = arith.constant 0 : index
    %469 = vector.load %arg21[%468, %c0_113, %c0_114] : memref<8x8x512xbf16, #tpu.memory_space<vmem>>, vector<1x8x512xbf16>
    %470 = vector.shape_cast %469 : vector<1x8x512xbf16> to vector<8x512xbf16>
    %471 = arith.extf %470 : vector<8x512xbf16> to vector<8x512xf32>
    %472 = arith.truncf %413 : vector<8x128xf32> to vector<8x128xbf16>
    %c0_115 = arith.constant 0 : index
    %c0_116 = arith.constant 0 : index
    %473 = vector.load %arg7[%c0_115, %c0_116] : memref<128x512xbf16, #tpu.memory_space<vmem>>, vector<128x512xbf16>
    %cst_117 = arith.constant dense<0.000000e+00> : vector<8x512xf32>
    %474 = tpu.matmul %472, %473, %cst_117 {dimension_numbers = #tpu.dot_dimension_numbers<[1], [0], [0], [1], [0, 0, 1, 1], [], []>} : vector<8x128xbf16>, vector<128x512xbf16>, vector<8x512xf32> -> vector<8x512xf32>
    %475 = arith.addf %471, %474 : vector<8x512xf32>
    %476 = vector.extract_strided_slice %475 {offsets = [0, 0], sizes = [8, 128], strides = [1, 1]} : vector<8x512xf32> to vector<8x128xf32>
    %477 = arith.negf %476 : vector<8x128xf32>
    %478 = math.exp %477 : vector<8x128xf32>
    %cst_118 = arith.constant 1.000000e+00 : f32
    %479 = vector.broadcast %cst_118 : f32 to vector<8x128xf32>
    %480 = arith.addf %479, %478 : vector<8x128xf32>
    %481 = arith.divf %479, %480 : vector<8x128xf32>
    %482 = vector.extract_strided_slice %475 {offsets = [0, 128], sizes = [8, 128], strides = [1, 1]} : vector<8x512xf32> to vector<8x128xf32>
    %483 = arith.negf %482 : vector<8x128xf32>
    %484 = math.exp %483 : vector<8x128xf32>
    %cst_119 = arith.constant 1.000000e+00 : f32
    %485 = vector.broadcast %cst_119 : f32 to vector<8x128xf32>
    %486 = arith.addf %485, %484 : vector<8x128xf32>
    %487 = arith.divf %485, %486 : vector<8x128xf32>
    %488 = vector.extract_strided_slice %475 {offsets = [0, 256], sizes = [8, 128], strides = [1, 1]} : vector<8x512xf32> to vector<8x128xf32>
    %489 = math.tanh %488 : vector<8x128xf32>
    %490 = vector.extract_strided_slice %475 {offsets = [0, 384], sizes = [8, 128], strides = [1, 1]} : vector<8x512xf32> to vector<8x128xf32>
    %491 = arith.negf %490 : vector<8x128xf32>
    %492 = math.exp %491 : vector<8x128xf32>
    %cst_120 = arith.constant 1.000000e+00 : f32
    %493 = vector.broadcast %cst_120 : f32 to vector<8x128xf32>
    %494 = arith.addf %493, %492 : vector<8x128xf32>
    %495 = arith.divf %493, %494 : vector<8x128xf32>
    %496 = arith.mulf %487, %416 : vector<8x128xf32>
    %497 = arith.mulf %481, %489 : vector<8x128xf32>
    %498 = arith.addf %496, %497 : vector<8x128xf32>
    %499 = math.tanh %498 : vector<8x128xf32>
    %500 = arith.mulf %495, %499 : vector<8x128xf32>
    %501 = vector.shape_cast %467 : vector<8x1xi1> to vector<8x1xi1>
    %502 = vector.broadcast %501 : vector<8x1xi1> to vector<8x128xi1>
    %503 = arith.select %502, %500, %24 : vector<8x128xi1>, vector<8x128xf32>
    %504 = arith.truncf %503 : vector<8x128xf32> to vector<8x128xbf16>
    %505 = arith.index_cast %465 : i32 to index
    %c0_121 = arith.constant 0 : index
    %c0_122 = arith.constant 0 : index
    %506 = vector.load %arg22[%505, %c0_121, %c0_122] : memref<8x8x128xbf16, #tpu.memory_space<vmem>>, vector<1x8x128xbf16>
    %507 = vector.shape_cast %506 : vector<1x8x128xbf16> to vector<8x128xbf16>
    %508 = vector.shape_cast %504 : vector<8x128xbf16> to vector<1x8x128xbf16>
    tpu.vector_store %arg22[%505, %c0_121, %c0_122], %508 {strides = array<i32>} : memref<8x8x128xbf16, #tpu.memory_space<vmem>>, vector<1x8x128xbf16>,
    %509 = vector.shape_cast %467 : vector<8x1xi1> to vector<8x1xi1>
    %510 = vector.broadcast %509 : vector<8x1xi1> to vector<8x128xi1>
    %511 = arith.select %510, %500, %413 : vector<8x128xi1>, vector<8x128xf32>
    %512 = vector.shape_cast %467 : vector<8x1xi1> to vector<8x1xi1>
    %513 = vector.broadcast %512 : vector<8x1xi1> to vector<8x128xi1>
    %514 = arith.select %513, %498, %416 : vector<8x128xi1>, vector<8x128xf32>
    %c5_i32 = arith.constant 5 : i32
    %515 = vector.broadcast %c5_i32 : i32 to vector<8x1xi32>
    %516 = arith.cmpi slt, %515, %23 : vector<8x1xi32>
    %517 = arith.index_cast %c5_i32 : i32 to index
    %c0_123 = arith.constant 0 : index
    %c0_124 = arith.constant 0 : index
    %518 = vector.load %arg20[%517, %c0_123, %c0_124] : memref<8x8x512xbf16, #tpu.memory_space<vmem>>, vector<1x8x512xbf16>
    %519 = vector.shape_cast %518 : vector<1x8x512xbf16> to vector<8x512xbf16>
    %520 = arith.extf %519 : vector<8x512xbf16> to vector<8x512xf32>
    %521 = arith.truncf %461 : vector<8x128xf32> to vector<8x128xbf16>
    %c0_125 = arith.constant 0 : index
    %c0_126 = arith.constant 0 : index
    %522 = vector.load %arg6[%c0_125, %c0_126] : memref<128x512xbf16, #tpu.memory_space<vmem>>, vector<128x512xbf16>
    %cst_127 = arith.constant dense<0.000000e+00> : vector<8x512xf32>
    %523 = tpu.matmul %521, %522, %cst_127 {dimension_numbers = #tpu.dot_dimension_numbers<[1], [0], [0], [1], [0, 0, 1, 1], [], []>} : vector<8x128xbf16>, vector<128x512xbf16>, vector<8x512xf32> -> vector<8x512xf32>
    %524 = arith.addf %520, %523 : vector<8x512xf32>
    %525 = vector.extract_strided_slice %524 {offsets = [0, 0], sizes = [8, 128], strides = [1, 1]} : vector<8x512xf32> to vector<8x128xf32>
    %526 = arith.negf %525 : vector<8x128xf32>
    %527 = math.exp %526 : vector<8x128xf32>
    %cst_128 = arith.constant 1.000000e+00 : f32
    %528 = vector.broadcast %cst_128 : f32 to vector<8x128xf32>
    %529 = arith.addf %528, %527 : vector<8x128xf32>
    %530 = arith.divf %528, %529 : vector<8x128xf32>
    %531 = vector.extract_strided_slice %524 {offsets = [0, 128], sizes = [8, 128], strides = [1, 1]} : vector<8x512xf32> to vector<8x128xf32>
    %532 = arith.negf %531 : vector<8x128xf32>
    %533 = math.exp %532 : vector<8x128xf32>
    %cst_129 = arith.constant 1.000000e+00 : f32
    %534 = vector.broadcast %cst_129 : f32 to vector<8x128xf32>
    %535 = arith.addf %534, %533 : vector<8x128xf32>
    %536 = arith.divf %534, %535 : vector<8x128xf32>
    %537 = vector.extract_strided_slice %524 {offsets = [0, 256], sizes = [8, 128], strides = [1, 1]} : vector<8x512xf32> to vector<8x128xf32>
    %538 = math.tanh %537 : vector<8x128xf32>
    %539 = vector.extract_strided_slice %524 {offsets = [0, 384], sizes = [8, 128], strides = [1, 1]} : vector<8x512xf32> to vector<8x128xf32>
    %540 = arith.negf %539 : vector<8x128xf32>
    %541 = math.exp %540 : vector<8x128xf32>
    %cst_130 = arith.constant 1.000000e+00 : f32
    %542 = vector.broadcast %cst_130 : f32 to vector<8x128xf32>
    %543 = arith.addf %542, %541 : vector<8x128xf32>
    %544 = arith.divf %542, %543 : vector<8x128xf32>
    %545 = arith.mulf %536, %464 : vector<8x128xf32>
    %546 = arith.mulf %530, %538 : vector<8x128xf32>
    %547 = arith.addf %545, %546 : vector<8x128xf32>
    %548 = math.tanh %547 : vector<8x128xf32>
    %549 = arith.mulf %544, %548 : vector<8x128xf32>
    %550 = vector.shape_cast %516 : vector<8x1xi1> to vector<8x1xi1>
    %551 = vector.broadcast %550 : vector<8x1xi1> to vector<8x128xi1>
    %552 = arith.select %551, %549, %24 : vector<8x128xi1>, vector<8x128xf32>
    %553 = arith.index_cast %c5_i32 : i32 to index
    %c0_131 = arith.constant 0 : index
    %c0_132 = arith.constant 0 : index
    %554 = vector.load %arg17[%553, %c0_131, %c0_132] : memref<8x8x128xf32, #tpu.memory_space<vmem>>, vector<1x8x128xf32>
    %555 = vector.shape_cast %554 : vector<1x8x128xf32> to vector<8x128xf32>
    %556 = vector.shape_cast %552 : vector<8x128xf32> to vector<1x8x128xf32>
    tpu.vector_store %arg17[%553, %c0_131, %c0_132], %556 {strides = array<i32>} : memref<8x8x128xf32, #tpu.memory_space<vmem>>, vector<1x8x128xf32>,
    %557 = vector.shape_cast %516 : vector<8x1xi1> to vector<8x1xi1>
    %558 = vector.broadcast %557 : vector<8x1xi1> to vector<8x128xi1>
    %559 = arith.select %558, %549, %461 : vector<8x128xi1>, vector<8x128xf32>
    %560 = vector.shape_cast %516 : vector<8x1xi1> to vector<8x1xi1>
    %561 = vector.broadcast %560 : vector<8x1xi1> to vector<8x128xi1>
    %562 = arith.select %561, %547, %464 : vector<8x128xi1>, vector<8x128xf32>
    %c7_i32_133 = arith.constant 7 : i32
    %563 = arith.subi %c7_i32_133, %c5_i32 : i32
    %564 = vector.broadcast %563 : i32 to vector<8x1xi32>
    %565 = arith.cmpi slt, %564, %23 : vector<8x1xi32>
    %566 = arith.index_cast %563 : i32 to index
    %c0_134 = arith.constant 0 : index
    %c0_135 = arith.constant 0 : index
    %567 = vector.load %arg21[%566, %c0_134, %c0_135] : memref<8x8x512xbf16, #tpu.memory_space<vmem>>, vector<1x8x512xbf16>
    %568 = vector.shape_cast %567 : vector<1x8x512xbf16> to vector<8x512xbf16>
    %569 = arith.extf %568 : vector<8x512xbf16> to vector<8x512xf32>
    %570 = arith.truncf %511 : vector<8x128xf32> to vector<8x128xbf16>
    %c0_136 = arith.constant 0 : index
    %c0_137 = arith.constant 0 : index
    %571 = vector.load %arg7[%c0_136, %c0_137] : memref<128x512xbf16, #tpu.memory_space<vmem>>, vector<128x512xbf16>
    %cst_138 = arith.constant dense<0.000000e+00> : vector<8x512xf32>
    %572 = tpu.matmul %570, %571, %cst_138 {dimension_numbers = #tpu.dot_dimension_numbers<[1], [0], [0], [1], [0, 0, 1, 1], [], []>} : vector<8x128xbf16>, vector<128x512xbf16>, vector<8x512xf32> -> vector<8x512xf32>
    %573 = arith.addf %569, %572 : vector<8x512xf32>
    %574 = vector.extract_strided_slice %573 {offsets = [0, 0], sizes = [8, 128], strides = [1, 1]} : vector<8x512xf32> to vector<8x128xf32>
    %575 = arith.negf %574 : vector<8x128xf32>
    %576 = math.exp %575 : vector<8x128xf32>
    %cst_139 = arith.constant 1.000000e+00 : f32
    %577 = vector.broadcast %cst_139 : f32 to vector<8x128xf32>
    %578 = arith.addf %577, %576 : vector<8x128xf32>
    %579 = arith.divf %577, %578 : vector<8x128xf32>
    %580 = vector.extract_strided_slice %573 {offsets = [0, 128], sizes = [8, 128], strides = [1, 1]} : vector<8x512xf32> to vector<8x128xf32>
    %581 = arith.negf %580 : vector<8x128xf32>
    %582 = math.exp %581 : vector<8x128xf32>
    %cst_140 = arith.constant 1.000000e+00 : f32
    %583 = vector.broadcast %cst_140 : f32 to vector<8x128xf32>
    %584 = arith.addf %583, %582 : vector<8x128xf32>
    %585 = arith.divf %583, %584 : vector<8x128xf32>
    %586 = vector.extract_strided_slice %573 {offsets = [0, 256], sizes = [8, 128], strides = [1, 1]} : vector<8x512xf32> to vector<8x128xf32>
    %587 = math.tanh %586 : vector<8x128xf32>
    %588 = vector.extract_strided_slice %573 {offsets = [0, 384], sizes = [8, 128], strides = [1, 1]} : vector<8x512xf32> to vector<8x128xf32>
    %589 = arith.negf %588 : vector<8x128xf32>
    %590 = math.exp %589 : vector<8x128xf32>
    %cst_141 = arith.constant 1.000000e+00 : f32
    %591 = vector.broadcast %cst_141 : f32 to vector<8x128xf32>
    %592 = arith.addf %591, %590 : vector<8x128xf32>
    %593 = arith.divf %591, %592 : vector<8x128xf32>
    %594 = arith.mulf %585, %514 : vector<8x128xf32>
    %595 = arith.mulf %579, %587 : vector<8x128xf32>
    %596 = arith.addf %594, %595 : vector<8x128xf32>
    %597 = math.tanh %596 : vector<8x128xf32>
    %598 = arith.mulf %593, %597 : vector<8x128xf32>
    %599 = vector.shape_cast %565 : vector<8x1xi1> to vector<8x1xi1>
    %600 = vector.broadcast %599 : vector<8x1xi1> to vector<8x128xi1>
    %601 = arith.select %600, %598, %24 : vector<8x128xi1>, vector<8x128xf32>
    %602 = arith.truncf %601 : vector<8x128xf32> to vector<8x128xbf16>
    %603 = arith.index_cast %563 : i32 to index
    %c0_142 = arith.constant 0 : index
    %c0_143 = arith.constant 0 : index
    %604 = vector.load %arg22[%603, %c0_142, %c0_143] : memref<8x8x128xbf16, #tpu.memory_space<vmem>>, vector<1x8x128xbf16>
    %605 = vector.shape_cast %604 : vector<1x8x128xbf16> to vector<8x128xbf16>
    %606 = vector.shape_cast %602 : vector<8x128xbf16> to vector<1x8x128xbf16>
    tpu.vector_store %arg22[%603, %c0_142, %c0_143], %606 {strides = array<i32>} : memref<8x8x128xbf16, #tpu.memory_space<vmem>>, vector<1x8x128xbf16>,
    %607 = vector.shape_cast %565 : vector<8x1xi1> to vector<8x1xi1>
    %608 = vector.broadcast %607 : vector<8x1xi1> to vector<8x128xi1>
    %609 = arith.select %608, %598, %511 : vector<8x128xi1>, vector<8x128xf32>
    %610 = vector.shape_cast %565 : vector<8x1xi1> to vector<8x1xi1>
    %611 = vector.broadcast %610 : vector<8x1xi1> to vector<8x128xi1>
    %612 = arith.select %611, %596, %514 : vector<8x128xi1>, vector<8x128xf32>
    %c6_i32 = arith.constant 6 : i32
    %613 = vector.broadcast %c6_i32 : i32 to vector<8x1xi32>
    %614 = arith.cmpi slt, %613, %23 : vector<8x1xi32>
    %615 = arith.index_cast %c6_i32 : i32 to index
    %c0_144 = arith.constant 0 : index
    %c0_145 = arith.constant 0 : index
    %616 = vector.load %arg20[%615, %c0_144, %c0_145] : memref<8x8x512xbf16, #tpu.memory_space<vmem>>, vector<1x8x512xbf16>
    %617 = vector.shape_cast %616 : vector<1x8x512xbf16> to vector<8x512xbf16>
    %618 = arith.extf %617 : vector<8x512xbf16> to vector<8x512xf32>
    %619 = arith.truncf %559 : vector<8x128xf32> to vector<8x128xbf16>
    %c0_146 = arith.constant 0 : index
    %c0_147 = arith.constant 0 : index
    %620 = vector.load %arg6[%c0_146, %c0_147] : memref<128x512xbf16, #tpu.memory_space<vmem>>, vector<128x512xbf16>
    %cst_148 = arith.constant dense<0.000000e+00> : vector<8x512xf32>
    %621 = tpu.matmul %619, %620, %cst_148 {dimension_numbers = #tpu.dot_dimension_numbers<[1], [0], [0], [1], [0, 0, 1, 1], [], []>} : vector<8x128xbf16>, vector<128x512xbf16>, vector<8x512xf32> -> vector<8x512xf32>
    %622 = arith.addf %618, %621 : vector<8x512xf32>
    %623 = vector.extract_strided_slice %622 {offsets = [0, 0], sizes = [8, 128], strides = [1, 1]} : vector<8x512xf32> to vector<8x128xf32>
    %624 = arith.negf %623 : vector<8x128xf32>
    %625 = math.exp %624 : vector<8x128xf32>
    %cst_149 = arith.constant 1.000000e+00 : f32
    %626 = vector.broadcast %cst_149 : f32 to vector<8x128xf32>
    %627 = arith.addf %626, %625 : vector<8x128xf32>
    %628 = arith.divf %626, %627 : vector<8x128xf32>
    %629 = vector.extract_strided_slice %622 {offsets = [0, 128], sizes = [8, 128], strides = [1, 1]} : vector<8x512xf32> to vector<8x128xf32>
    %630 = arith.negf %629 : vector<8x128xf32>
    %631 = math.exp %630 : vector<8x128xf32>
    %cst_150 = arith.constant 1.000000e+00 : f32
    %632 = vector.broadcast %cst_150 : f32 to vector<8x128xf32>
    %633 = arith.addf %632, %631 : vector<8x128xf32>
    %634 = arith.divf %632, %633 : vector<8x128xf32>
    %635 = vector.extract_strided_slice %622 {offsets = [0, 256], sizes = [8, 128], strides = [1, 1]} : vector<8x512xf32> to vector<8x128xf32>
    %636 = math.tanh %635 : vector<8x128xf32>
    %637 = vector.extract_strided_slice %622 {offsets = [0, 384], sizes = [8, 128], strides = [1, 1]} : vector<8x512xf32> to vector<8x128xf32>
    %638 = arith.negf %637 : vector<8x128xf32>
    %639 = math.exp %638 : vector<8x128xf32>
    %cst_151 = arith.constant 1.000000e+00 : f32
    %640 = vector.broadcast %cst_151 : f32 to vector<8x128xf32>
    %641 = arith.addf %640, %639 : vector<8x128xf32>
    %642 = arith.divf %640, %641 : vector<8x128xf32>
    %643 = arith.mulf %634, %562 : vector<8x128xf32>
    %644 = arith.mulf %628, %636 : vector<8x128xf32>
    %645 = arith.addf %643, %644 : vector<8x128xf32>
    %646 = math.tanh %645 : vector<8x128xf32>
    %647 = arith.mulf %642, %646 : vector<8x128xf32>
    %648 = vector.shape_cast %614 : vector<8x1xi1> to vector<8x1xi1>
    %649 = vector.broadcast %648 : vector<8x1xi1> to vector<8x128xi1>
    %650 = arith.select %649, %647, %24 : vector<8x128xi1>, vector<8x128xf32>
    %651 = arith.index_cast %c6_i32 : i32 to index
    %c0_152 = arith.constant 0 : index
    %c0_153 = arith.constant 0 : index
    %652 = vector.load %arg17[%651, %c0_152, %c0_153] : memref<8x8x128xf32, #tpu.memory_space<vmem>>, vector<1x8x128xf32>
    %653 = vector.shape_cast %652 : vector<1x8x128xf32> to vector<8x128xf32>
    %654 = vector.shape_cast %650 : vector<8x128xf32> to vector<1x8x128xf32>
    tpu.vector_store %arg17[%651, %c0_152, %c0_153], %654 {strides = array<i32>} : memref<8x8x128xf32, #tpu.memory_space<vmem>>, vector<1x8x128xf32>,
    %655 = vector.shape_cast %614 : vector<8x1xi1> to vector<8x1xi1>
    %656 = vector.broadcast %655 : vector<8x1xi1> to vector<8x128xi1>
    %657 = arith.select %656, %647, %559 : vector<8x128xi1>, vector<8x128xf32>
    %658 = vector.shape_cast %614 : vector<8x1xi1> to vector<8x1xi1>
    %659 = vector.broadcast %658 : vector<8x1xi1> to vector<8x128xi1>
    %660 = arith.select %659, %645, %562 : vector<8x128xi1>, vector<8x128xf32>
    %c7_i32_154 = arith.constant 7 : i32
    %661 = arith.subi %c7_i32_154, %c6_i32 : i32
    %662 = vector.broadcast %661 : i32 to vector<8x1xi32>
    %663 = arith.cmpi slt, %662, %23 : vector<8x1xi32>
    %664 = arith.index_cast %661 : i32 to index
    %c0_155 = arith.constant 0 : index
    %c0_156 = arith.constant 0 : index
    %665 = vector.load %arg21[%664, %c0_155, %c0_156] : memref<8x8x512xbf16, #tpu.memory_space<vmem>>, vector<1x8x512xbf16>
    %666 = vector.shape_cast %665 : vector<1x8x512xbf16> to vector<8x512xbf16>
    %667 = arith.extf %666 : vector<8x512xbf16> to vector<8x512xf32>
    %668 = arith.truncf %609 : vector<8x128xf32> to vector<8x128xbf16>
    %c0_157 = arith.constant 0 : index
    %c0_158 = arith.constant 0 : index
    %669 = vector.load %arg7[%c0_157, %c0_158] : memref<128x512xbf16, #tpu.memory_space<vmem>>, vector<128x512xbf16>
    %cst_159 = arith.constant dense<0.000000e+00> : vector<8x512xf32>
    %670 = tpu.matmul %668, %669, %cst_159 {dimension_numbers = #tpu.dot_dimension_numbers<[1], [0], [0], [1], [0, 0, 1, 1], [], []>} : vector<8x128xbf16>, vector<128x512xbf16>, vector<8x512xf32> -> vector<8x512xf32>
    %671 = arith.addf %667, %670 : vector<8x512xf32>
    %672 = vector.extract_strided_slice %671 {offsets = [0, 0], sizes = [8, 128], strides = [1, 1]} : vector<8x512xf32> to vector<8x128xf32>
    %673 = arith.negf %672 : vector<8x128xf32>
    %674 = math.exp %673 : vector<8x128xf32>
    %cst_160 = arith.constant 1.000000e+00 : f32
    %675 = vector.broadcast %cst_160 : f32 to vector<8x128xf32>
    %676 = arith.addf %675, %674 : vector<8x128xf32>
    %677 = arith.divf %675, %676 : vector<8x128xf32>
    %678 = vector.extract_strided_slice %671 {offsets = [0, 128], sizes = [8, 128], strides = [1, 1]} : vector<8x512xf32> to vector<8x128xf32>
    %679 = arith.negf %678 : vector<8x128xf32>
    %680 = math.exp %679 : vector<8x128xf32>
    %cst_161 = arith.constant 1.000000e+00 : f32
    %681 = vector.broadcast %cst_161 : f32 to vector<8x128xf32>
    %682 = arith.addf %681, %680 : vector<8x128xf32>
    %683 = arith.divf %681, %682 : vector<8x128xf32>
    %684 = vector.extract_strided_slice %671 {offsets = [0, 256], sizes = [8, 128], strides = [1, 1]} : vector<8x512xf32> to vector<8x128xf32>
    %685 = math.tanh %684 : vector<8x128xf32>
    %686 = vector.extract_strided_slice %671 {offsets = [0, 384], sizes = [8, 128], strides = [1, 1]} : vector<8x512xf32> to vector<8x128xf32>
    %687 = arith.negf %686 : vector<8x128xf32>
    %688 = math.exp %687 : vector<8x128xf32>
    %cst_162 = arith.constant 1.000000e+00 : f32
    %689 = vector.broadcast %cst_162 : f32 to vector<8x128xf32>
    %690 = arith.addf %689, %688 : vector<8x128xf32>
    %691 = arith.divf %689, %690 : vector<8x128xf32>
    %692 = arith.mulf %683, %612 : vector<8x128xf32>
    %693 = arith.mulf %677, %685 : vector<8x128xf32>
    %694 = arith.addf %692, %693 : vector<8x128xf32>
    %695 = math.tanh %694 : vector<8x128xf32>
    %696 = arith.mulf %691, %695 : vector<8x128xf32>
    %697 = vector.shape_cast %663 : vector<8x1xi1> to vector<8x1xi1>
    %698 = vector.broadcast %697 : vector<8x1xi1> to vector<8x128xi1>
    %699 = arith.select %698, %696, %24 : vector<8x128xi1>, vector<8x128xf32>
    %700 = arith.truncf %699 : vector<8x128xf32> to vector<8x128xbf16>
    %701 = arith.index_cast %661 : i32 to index
    %c0_163 = arith.constant 0 : index
    %c0_164 = arith.constant 0 : index
    %702 = vector.load %arg22[%701, %c0_163, %c0_164] : memref<8x8x128xbf16, #tpu.memory_space<vmem>>, vector<1x8x128xbf16>
    %703 = vector.shape_cast %702 : vector<1x8x128xbf16> to vector<8x128xbf16>
    %704 = vector.shape_cast %700 : vector<8x128xbf16> to vector<1x8x128xbf16>
    tpu.vector_store %arg22[%701, %c0_163, %c0_164], %704 {strides = array<i32>} : memref<8x8x128xbf16, #tpu.memory_space<vmem>>, vector<1x8x128xbf16>,
    %705 = vector.shape_cast %663 : vector<8x1xi1> to vector<8x1xi1>
    %706 = vector.broadcast %705 : vector<8x1xi1> to vector<8x128xi1>
    %707 = arith.select %706, %696, %609 : vector<8x128xi1>, vector<8x128xf32>
    %708 = vector.shape_cast %663 : vector<8x1xi1> to vector<8x1xi1>
    %709 = vector.broadcast %708 : vector<8x1xi1> to vector<8x128xi1>
    %710 = arith.select %709, %694, %612 : vector<8x128xi1>, vector<8x128xf32>
    %c7_i32_165 = arith.constant 7 : i32
    %711 = vector.broadcast %c7_i32_165 : i32 to vector<8x1xi32>
    %712 = arith.cmpi slt, %711, %23 : vector<8x1xi32>
    %713 = arith.index_cast %c7_i32_165 : i32 to index
    %c0_166 = arith.constant 0 : index
    %c0_167 = arith.constant 0 : index
    %714 = vector.load %arg20[%713, %c0_166, %c0_167] : memref<8x8x512xbf16, #tpu.memory_space<vmem>>, vector<1x8x512xbf16>
    %715 = vector.shape_cast %714 : vector<1x8x512xbf16> to vector<8x512xbf16>
    %716 = arith.extf %715 : vector<8x512xbf16> to vector<8x512xf32>
    %717 = arith.truncf %657 : vector<8x128xf32> to vector<8x128xbf16>
    %c0_168 = arith.constant 0 : index
    %c0_169 = arith.constant 0 : index
    %718 = vector.load %arg6[%c0_168, %c0_169] : memref<128x512xbf16, #tpu.memory_space<vmem>>, vector<128x512xbf16>
    %cst_170 = arith.constant dense<0.000000e+00> : vector<8x512xf32>
    %719 = tpu.matmul %717, %718, %cst_170 {dimension_numbers = #tpu.dot_dimension_numbers<[1], [0], [0], [1], [0, 0, 1, 1], [], []>} : vector<8x128xbf16>, vector<128x512xbf16>, vector<8x512xf32> -> vector<8x512xf32>
    %720 = arith.addf %716, %719 : vector<8x512xf32>
    %721 = vector.extract_strided_slice %720 {offsets = [0, 0], sizes = [8, 128], strides = [1, 1]} : vector<8x512xf32> to vector<8x128xf32>
    %722 = arith.negf %721 : vector<8x128xf32>
    %723 = math.exp %722 : vector<8x128xf32>
    %cst_171 = arith.constant 1.000000e+00 : f32
    %724 = vector.broadcast %cst_171 : f32 to vector<8x128xf32>
    %725 = arith.addf %724, %723 : vector<8x128xf32>
    %726 = arith.divf %724, %725 : vector<8x128xf32>
    %727 = vector.extract_strided_slice %720 {offsets = [0, 128], sizes = [8, 128], strides = [1, 1]} : vector<8x512xf32> to vector<8x128xf32>
    %728 = arith.negf %727 : vector<8x128xf32>
    %729 = math.exp %728 : vector<8x128xf32>
    %cst_172 = arith.constant 1.000000e+00 : f32
    %730 = vector.broadcast %cst_172 : f32 to vector<8x128xf32>
    %731 = arith.addf %730, %729 : vector<8x128xf32>
    %732 = arith.divf %730, %731 : vector<8x128xf32>
    %733 = vector.extract_strided_slice %720 {offsets = [0, 256], sizes = [8, 128], strides = [1, 1]} : vector<8x512xf32> to vector<8x128xf32>
    %734 = math.tanh %733 : vector<8x128xf32>
    %735 = vector.extract_strided_slice %720 {offsets = [0, 384], sizes = [8, 128], strides = [1, 1]} : vector<8x512xf32> to vector<8x128xf32>
    %736 = arith.negf %735 : vector<8x128xf32>
    %737 = math.exp %736 : vector<8x128xf32>
    %cst_173 = arith.constant 1.000000e+00 : f32
    %738 = vector.broadcast %cst_173 : f32 to vector<8x128xf32>
    %739 = arith.addf %738, %737 : vector<8x128xf32>
    %740 = arith.divf %738, %739 : vector<8x128xf32>
    %741 = arith.mulf %732, %660 : vector<8x128xf32>
    %742 = arith.mulf %726, %734 : vector<8x128xf32>
    %743 = arith.addf %741, %742 : vector<8x128xf32>
    %744 = math.tanh %743 : vector<8x128xf32>
    %745 = arith.mulf %740, %744 : vector<8x128xf32>
    %746 = vector.shape_cast %712 : vector<8x1xi1> to vector<8x1xi1>
    %747 = vector.broadcast %746 : vector<8x1xi1> to vector<8x128xi1>
    %748 = arith.select %747, %745, %24 : vector<8x128xi1>, vector<8x128xf32>
    %749 = arith.index_cast %c7_i32_165 : i32 to index
    %c0_174 = arith.constant 0 : index
    %c0_175 = arith.constant 0 : index
    %750 = vector.load %arg17[%749, %c0_174, %c0_175] : memref<8x8x128xf32, #tpu.memory_space<vmem>>, vector<1x8x128xf32>
    %751 = vector.shape_cast %750 : vector<1x8x128xf32> to vector<8x128xf32>
    %752 = vector.shape_cast %748 : vector<8x128xf32> to vector<1x8x128xf32>
    tpu.vector_store %arg17[%749, %c0_174, %c0_175], %752 {strides = array<i32>} : memref<8x8x128xf32, #tpu.memory_space<vmem>>, vector<1x8x128xf32>,
    %753 = vector.shape_cast %712 : vector<8x1xi1> to vector<8x1xi1>
    %754 = vector.broadcast %753 : vector<8x1xi1> to vector<8x128xi1>
    %755 = arith.select %754, %745, %657 : vector<8x128xi1>, vector<8x128xf32>
    %756 = vector.shape_cast %712 : vector<8x1xi1> to vector<8x1xi1>
    %757 = vector.broadcast %756 : vector<8x1xi1> to vector<8x128xi1>
    %758 = arith.select %757, %743, %660 : vector<8x128xi1>, vector<8x128xf32>
    %c7_i32_176 = arith.constant 7 : i32
    %759 = arith.subi %c7_i32_176, %c7_i32_165 : i32
    %760 = vector.broadcast %759 : i32 to vector<8x1xi32>
    %761 = arith.cmpi slt, %760, %23 : vector<8x1xi32>
    %762 = arith.index_cast %759 : i32 to index
    %c0_177 = arith.constant 0 : index
    %c0_178 = arith.constant 0 : index
    %763 = vector.load %arg21[%762, %c0_177, %c0_178] : memref<8x8x512xbf16, #tpu.memory_space<vmem>>, vector<1x8x512xbf16>
    %764 = vector.shape_cast %763 : vector<1x8x512xbf16> to vector<8x512xbf16>
    %765 = arith.extf %764 : vector<8x512xbf16> to vector<8x512xf32>
    %766 = arith.truncf %707 : vector<8x128xf32> to vector<8x128xbf16>
    %c0_179 = arith.constant 0 : index
    %c0_180 = arith.constant 0 : index
    %767 = vector.load %arg7[%c0_179, %c0_180] : memref<128x512xbf16, #tpu.memory_space<vmem>>, vector<128x512xbf16>
    %cst_181 = arith.constant dense<0.000000e+00> : vector<8x512xf32>
    %768 = tpu.matmul %766, %767, %cst_181 {dimension_numbers = #tpu.dot_dimension_numbers<[1], [0], [0], [1], [0, 0, 1, 1], [], []>} : vector<8x128xbf16>, vector<128x512xbf16>, vector<8x512xf32> -> vector<8x512xf32>
    %769 = arith.addf %765, %768 : vector<8x512xf32>
    %770 = vector.extract_strided_slice %769 {offsets = [0, 0], sizes = [8, 128], strides = [1, 1]} : vector<8x512xf32> to vector<8x128xf32>
    %771 = arith.negf %770 : vector<8x128xf32>
    %772 = math.exp %771 : vector<8x128xf32>
    %cst_182 = arith.constant 1.000000e+00 : f32
    %773 = vector.broadcast %cst_182 : f32 to vector<8x128xf32>
    %774 = arith.addf %773, %772 : vector<8x128xf32>
    %775 = arith.divf %773, %774 : vector<8x128xf32>
    %776 = vector.extract_strided_slice %769 {offsets = [0, 128], sizes = [8, 128], strides = [1, 1]} : vector<8x512xf32> to vector<8x128xf32>
    %777 = arith.negf %776 : vector<8x128xf32>
    %778 = math.exp %777 : vector<8x128xf32>
    %cst_183 = arith.constant 1.000000e+00 : f32
    %779 = vector.broadcast %cst_183 : f32 to vector<8x128xf32>
    %780 = arith.addf %779, %778 : vector<8x128xf32>
    %781 = arith.divf %779, %780 : vector<8x128xf32>
    %782 = vector.extract_strided_slice %769 {offsets = [0, 256], sizes = [8, 128], strides = [1, 1]} : vector<8x512xf32> to vector<8x128xf32>
    %783 = math.tanh %782 : vector<8x128xf32>
    %784 = vector.extract_strided_slice %769 {offsets = [0, 384], sizes = [8, 128], strides = [1, 1]} : vector<8x512xf32> to vector<8x128xf32>
    %785 = arith.negf %784 : vector<8x128xf32>
    %786 = math.exp %785 : vector<8x128xf32>
    %cst_184 = arith.constant 1.000000e+00 : f32
    %787 = vector.broadcast %cst_184 : f32 to vector<8x128xf32>
    %788 = arith.addf %787, %786 : vector<8x128xf32>
    %789 = arith.divf %787, %788 : vector<8x128xf32>
    %790 = arith.mulf %781, %710 : vector<8x128xf32>
    %791 = arith.mulf %775, %783 : vector<8x128xf32>
    %792 = arith.addf %790, %791 : vector<8x128xf32>
    %793 = math.tanh %792 : vector<8x128xf32>
    %794 = arith.mulf %789, %793 : vector<8x128xf32>
    %795 = vector.shape_cast %761 : vector<8x1xi1> to vector<8x1xi1>
    %796 = vector.broadcast %795 : vector<8x1xi1> to vector<8x128xi1>
    %797 = arith.select %796, %794, %24 : vector<8x128xi1>, vector<8x128xf32>
    %798 = arith.truncf %797 : vector<8x128xf32> to vector<8x128xbf16>
    %799 = arith.index_cast %759 : i32 to index
    %c0_185 = arith.constant 0 : index
    %c0_186 = arith.constant 0 : index
    %800 = vector.load %arg22[%799, %c0_185, %c0_186] : memref<8x8x128xbf16, #tpu.memory_space<vmem>>, vector<1x8x128xbf16>
    %801 = vector.shape_cast %800 : vector<1x8x128xbf16> to vector<8x128xbf16>
    %802 = vector.shape_cast %798 : vector<8x128xbf16> to vector<1x8x128xbf16>
    tpu.vector_store %arg22[%799, %c0_185, %c0_186], %802 {strides = array<i32>} : memref<8x8x128xbf16, #tpu.memory_space<vmem>>, vector<1x8x128xbf16>,
    %803 = vector.shape_cast %761 : vector<8x1xi1> to vector<8x1xi1>
    %804 = vector.broadcast %803 : vector<8x1xi1> to vector<8x128xi1>
    %805 = arith.select %804, %794, %707 : vector<8x128xi1>, vector<8x128xf32>
    %806 = vector.shape_cast %761 : vector<8x1xi1> to vector<8x1xi1>
    %807 = vector.broadcast %806 : vector<8x1xi1> to vector<8x128xi1>
    %808 = arith.select %807, %792, %710 : vector<8x128xi1>, vector<8x128xf32>
    %c8_i32_187 = arith.constant 8 : i32
    %c0_i32_188 = arith.constant 0 : i32
    %c8_i32_189 = arith.constant 8 : i32
    %809 = arith.muli %c0_i32_188, %c8_i32_189 : i32
    %810 = tpu.assume_multiple %809, 8 : i32
    %811 = arith.index_cast %810 : i32 to index
    %c0_190 = arith.constant 0 : index
    %c0_191 = arith.constant 0 : index
    %812 = vector.load %arg17[%811, %c0_190, %c0_191] : memref<8x8x128xf32, #tpu.memory_space<vmem>>, vector<8x8x128xf32>
    %813 = vector.shape_cast %812 : vector<8x8x128xf32> to vector<64x128xf32>
    %814 = arith.truncf %813 : vector<64x128xf32> to vector<64x128xbf16>
    %815 = arith.index_cast %810 : i32 to index
    %c0_192 = arith.constant 0 : index
    %c0_193 = arith.constant 0 : index
    %816 = vector.load %arg22[%815, %c0_192, %c0_193] : memref<8x8x128xbf16, #tpu.memory_space<vmem>>, vector<8x8x128xbf16>
    %817 = vector.shape_cast %816 : vector<8x8x128xbf16> to vector<64x128xbf16>
    %c0_194 = arith.constant 0 : index
    %c0_195 = arith.constant 0 : index
    %818 = vector.load %arg8[%c0_194, %c0_195] : memref<128x128xbf16, #tpu.memory_space<vmem>>, vector<128x128xbf16>
    %cst_196 = arith.constant dense<0.000000e+00> : vector<64x128xf32>
    %819 = tpu.matmul %814, %818, %cst_196 {dimension_numbers = #tpu.dot_dimension_numbers<[1], [0], [0], [1], [0, 0, 1, 1], [], []>} : vector<64x128xbf16>, vector<128x128xbf16>, vector<64x128xf32> -> vector<64x128xf32>
    %c0_197 = arith.constant 0 : index
    %c0_198 = arith.constant 0 : index
    %820 = vector.load %arg9[%c0_197, %c0_198] : memref<128x128xbf16, #tpu.memory_space<vmem>>, vector<128x128xbf16>
    %cst_199 = arith.constant dense<0.000000e+00> : vector<64x128xf32>
    %821 = tpu.matmul %817, %820, %cst_199 {dimension_numbers = #tpu.dot_dimension_numbers<[1], [0], [0], [1], [0, 0, 1, 1], [], []>} : vector<64x128xbf16>, vector<128x128xbf16>, vector<64x128xf32> -> vector<64x128xf32>
    %822 = arith.addf %819, %821 : vector<64x128xf32>
    %c0_200 = arith.constant 0 : index
    %c0_201 = arith.constant 0 : index
    %823 = vector.load %arg10[%c0_200, %c0_201] : memref<1x128xf32, #tpu.memory_space<vmem>>, vector<1x128xf32>
    %824 = vector.broadcast %823 : vector<1x128xf32> to vector<64x128xf32>
    %825 = arith.addf %822, %824 : vector<64x128xf32>
    %826 = vector.shape_cast %825 : vector<64x128xf32> to vector<8x8x128xf32>
    %827 = arith.index_cast %810 : i32 to index
    %c0_202 = arith.constant 0 : index
    %c0_203 = arith.constant 0 : index
    %828 = vector.load %arg17[%827, %c0_202, %c0_203] : memref<8x8x128xf32, #tpu.memory_space<vmem>>, vector<8x8x128xf32>
    tpu.vector_store %arg17[%827, %c0_202, %c0_203], %826 {strides = array<i32>} : memref<8x8x128xf32, #tpu.memory_space<vmem>>, vector<8x8x128xf32>,
    %c1_i32_204 = arith.constant 1 : i32
    %829 = arith.truncf %755 : vector<8x128xf32> to vector<8x128xbf16>
    %c0_205 = arith.constant 0 : index
    %c0_206 = arith.constant 0 : index
    %830 = vector.load %arg11[%c0_205, %c0_206] : memref<128x128xbf16, #tpu.memory_space<vmem>>, vector<128x128xbf16>
    %cst_207 = arith.constant dense<0.000000e+00> : vector<8x128xf32>
    %831 = tpu.matmul %829, %830, %cst_207 {dimension_numbers = #tpu.dot_dimension_numbers<[1], [0], [0], [1], [0, 0, 1, 1], [], []>} : vector<8x128xbf16>, vector<128x128xbf16>, vector<8x128xf32> -> vector<8x128xf32>
    %832 = arith.truncf %805 : vector<8x128xf32> to vector<8x128xbf16>
    %c0_208 = arith.constant 0 : index
    %c0_209 = arith.constant 0 : index
    %833 = vector.load %arg12[%c0_208, %c0_209] : memref<128x128xbf16, #tpu.memory_space<vmem>>, vector<128x128xbf16>
    %cst_210 = arith.constant dense<0.000000e+00> : vector<8x128xf32>
    %834 = tpu.matmul %832, %833, %cst_210 {dimension_numbers = #tpu.dot_dimension_numbers<[1], [0], [0], [1], [0, 0, 1, 1], [], []>} : vector<8x128xbf16>, vector<128x128xbf16>, vector<8x128xf32> -> vector<8x128xf32>
    %835 = arith.addf %831, %834 : vector<8x128xf32>
    %c0_211 = arith.constant 0 : index
    %c0_212 = arith.constant 0 : index
    %836 = vector.load %arg13[%c0_211, %c0_212] : memref<1x128xf32, #tpu.memory_space<vmem>>, vector<1x128xf32>
    %837 = vector.broadcast %836 : vector<1x128xf32> to vector<8x128xf32>
    %838 = arith.addf %835, %837 : vector<8x128xf32>
    %c0_213 = arith.constant 0 : index
    %c0_214 = arith.constant 0 : index
    %839 = vector.load %arg18[%c0_213, %c0_214] : memref<8x128xf32, #tpu.memory_space<vmem>>, vector<8x128xf32>
    tpu.vector_store %arg18[%c0_213, %c0_214], %838 {strides = array<i32>} : memref<8x128xf32, #tpu.memory_space<vmem>>, vector<8x128xf32>,
    %840 = arith.truncf %758 : vector<8x128xf32> to vector<8x128xbf16>
    %c0_215 = arith.constant 0 : index
    %c0_216 = arith.constant 0 : index
    %841 = vector.load %arg14[%c0_215, %c0_216] : memref<128x128xbf16, #tpu.memory_space<vmem>>, vector<128x128xbf16>
    %cst_217 = arith.constant dense<0.000000e+00> : vector<8x128xf32>
    %842 = tpu.matmul %840, %841, %cst_217 {dimension_numbers = #tpu.dot_dimension_numbers<[1], [0], [0], [1], [0, 0, 1, 1], [], []>} : vector<8x128xbf16>, vector<128x128xbf16>, vector<8x128xf32> -> vector<8x128xf32>
    %843 = arith.truncf %808 : vector<8x128xf32> to vector<8x128xbf16>
    %c0_218 = arith.constant 0 : index
    %c0_219 = arith.constant 0 : index
    %844 = vector.load %arg15[%c0_218, %c0_219] : memref<128x128xbf16, #tpu.memory_space<vmem>>, vector<128x128xbf16>
    %cst_220 = arith.constant dense<0.000000e+00> : vector<8x128xf32>
    %845 = tpu.matmul %843, %844, %cst_220 {dimension_numbers = #tpu.dot_dimension_numbers<[1], [0], [0], [1], [0, 0, 1, 1], [], []>} : vector<8x128xbf16>, vector<128x128xbf16>, vector<8x128xf32> -> vector<8x128xf32>
    %846 = arith.addf %842, %845 : vector<8x128xf32>
    %c0_221 = arith.constant 0 : index
    %c0_222 = arith.constant 0 : index
    %847 = vector.load %arg16[%c0_221, %c0_222] : memref<1x128xf32, #tpu.memory_space<vmem>>, vector<1x128xf32>
    %848 = vector.broadcast %847 : vector<1x128xf32> to vector<8x128xf32>
    %849 = arith.addf %846, %848 : vector<8x128xf32>
    %c0_223 = arith.constant 0 : index
    %c0_224 = arith.constant 0 : index
    %850 = vector.load %arg19[%c0_223, %c0_224] : memref<8x128xf32, #tpu.memory_space<vmem>>, vector<8x128xf32>
    tpu.vector_store %arg19[%c0_223, %c0_224], %849 {strides = array<i32>} : memref<8x128xf32, #tpu.memory_space<vmem>>, vector<8x128xf32>,
    return
  }
}

</mosaic_0001>

<bundles_post_ra>
// kernel: tpu_custom_call.1
= control target key start
LH: loop header
LB: loop body
LE: loop exit
PB: predicated region body
PF: predicated region fallthrough
CT: control target
= control target key end

     0   :  { %s12262_s0 = inlined_call_operand.hbm [shape: bf16[8,8,128], index: 0, kind: input, shape index: {}]   ;;  %s12263_s1 = inlined_call_operand.vmem [shape: s32[8,1], index: 1, kind: input, shape index: {}]   ;;  %s12264_s2 = inlined_call_operand.hbm [shape: bf16[128,512], index: 2, kind: input, shape index: {}]   ;;  %s12265_s3 = inlined_call_operand.hbm [shape: bf16[128,512], index: 3, kind: input, shape index: {}]   ;;  %s12266_s4 = inlined_call_operand.vmem [shape: f32[1,512], index: 4, kind: input, shape index: {}]   ;;  %s12267_s5 = inlined_call_operand.vmem [shape: f32[1,512], index: 5, kind: input, shape index: {}]   ;;  %s12268_s6 = inlined_call_operand.hbm [shape: bf16[128,512], index: 6, kind: input, shape index: {}]   ;;  %s12269_s7 = inlined_call_operand.hbm [shape: bf16[128,512], index: 7, kind: input, shape index: {}]   ;;  %s12270_s8 = inlined_call_operand.hbm [shape: bf16[128,128], index: 8, kind: input, shape index: {}]   ;;  %s12271_s9 = inlined_call_operand.hbm [shape: bf16[128,128], index: 9, kind: input, shape index: {}]   ;;  %s12272_s10 = inlined_call_operand.vmem [shape: f32[1,128], index: 10, kind: input, shape index: {}]   ;;  %s12273_s11 = inlined_call_operand.hbm [shape: bf16[128,128], index: 11, kind: input, shape index: {}]   ;;  %s12274_s12 = inlined_call_operand.hbm [shape: bf16[128,128], index: 12, kind: input, shape index: {}]   ;;  %s12275_s13 = inlined_call_operand.vmem [shape: f32[1,128], index: 13, kind: input, shape index: {}]   ;;  %s12276_s14 = inlined_call_operand.hbm [shape: bf16[128,128], index: 14, kind: input, shape index: {}]   ;;  %s12277_s15 = inlined_call_operand.hbm [shape: bf16[128,128], index: 15, kind: input, shape index: {}]   ;;  %s12278_s16 = inlined_call_operand.vmem [shape: f32[1,128], index: 16, kind: input, shape index: {}]   ;;  %s12279_s17 = inlined_call_operand.hbm [shape: f32[8,8,128], index: 17, kind: output, shape index: {0}]   ;;  %s12280_s18 = inlined_call_operand.hbm [shape: f32[8,128], index: 18, kind: output, shape index: {1}]   ;;  %s12281_s19 = inlined_call_operand.hbm [shape: f32[8,128], index: 19, kind: output, shape index: {2}]  }
   0x1   :  { %12292 = sst [smem:[#allocation41_spill]] %s12262_s0 }
   0x2   :  { %12293 = sst [smem:[#allocation42_spill]] %s12263_s1 }
   0x3   :  { %12294 = sst [smem:[#allocation43_spill]] %s12264_s2 }
   0x4   :  { %12295 = sst [smem:[#allocation44_spill]] %s12265_s3 }
   0x5   :  { %25 = vsyncpa [#allocation6], 0 }
   0x6   :  { %26 = vsyncpa [#allocation9], 0 }
   0x7   :  { %27 = vsyncpa [#allocation12], 0 }
   0x8   :  { %28 = vsyncpa [#allocation15], 0 }
   0x9   :  { %29 = vsyncpa [#allocation18], 0 }
   0xa   :  { %30 = vsyncpa [#allocation21], 0 }
   0xb   :  { %31 = vsyncpa [#allocation7], 0  ;;  %s12296_s20 = sld [smem:[#allocation43_spill]] }
  0x11   :  { %s52_s21 = sshll.u32 %s12296_s20, 4  ;;  %s53_s21 = int_to_ptr.hbm [resolvable:$true] %s52_s21 }
  0x12   :  { %32 = vsyncpa [#allocation25], 0  ;;  %s10704_s1 = smov [#allocation8]   ;;  %s82_s24 = sshll.u32 %s12268_s6, 4  ;;  %s83_s24 = int_to_ptr.hbm [resolvable:$true] %s82_s24 }
  0x13   :  { %s54_s22 = sshll.u32 %s10704_s1, 4  ;;  %s10705_s25 = smov 256   ;;  %s55_s22 = int_to_ptr.vmem [resolvable:$true] %s54_s22 }
  0x14   :  { %s10706_s3 = smov 16   ;;  %s10707_s26 = smov [#allocation11]  }
  0x15   :  { %60 = dma.hbm_to_vmem [thread:$0]  %s53_s21, 4096, %s55_s22, [#allocation9], %s10705_s25, %s10705_s25, %s10706_s3  }
  0x16   :  { %s84_s27 = sshll.u32 %s10707_s26, 4  ;;  %s108_s0 = sshll.u32 %s12270_s8, 4  ;;  %s85_s27 = int_to_ptr.vmem [resolvable:$true] %s84_s27  ;;  %s109_s0 = int_to_ptr.hbm [resolvable:$true] %s108_s0 }
  0x17   :  { %90 = dma.hbm_to_vmem [thread:$0]  %s83_s24, 4096, %s85_s27, [#allocation12], %s10705_s25, %s10705_s25, %s10706_s3  }
  0x18   :  { %s10708_s6 = smov [#allocation14]   ;;  %s136_s21 = sshll.u32 %s12273_s11, 4  ;;  %s137_s21 = int_to_ptr.hbm [resolvable:$true] %s136_s21 }
  0x19   :  { %s110_s30 = sshll.u32 %s10708_s6, 4  ;;  %s10709_s22 = smov 64   ;;  %s111_s30 = int_to_ptr.vmem [resolvable:$true] %s110_s30 }
  0x1a   :  { %s10710_s2 = smov 4   ;;  %s10711_s23 = smov [#allocation17]  }
  0x1b   :  { %116 = dma.hbm_to_vmem [thread:$0]  %s109_s0, 1024, %s111_s30, [#allocation15], %s10709_s22, %s10709_s22, %s10710_s2  }
  0x1c   :  { %s138_s24 = sshll.u32 %s10711_s23, 4  ;;  %s164_s8 = sshll.u32 %s12276_s14, 4  ;;  %s139_s24 = int_to_ptr.vmem [resolvable:$true] %s138_s24  ;;  %s165_s8 = int_to_ptr.hbm [resolvable:$true] %s164_s8 }
  0x1d   :  { %144 = dma.hbm_to_vmem [thread:$0]  %s137_s21, 1024, %s139_s24, [#allocation18], %s10709_s22, %s10709_s22, %s10710_s2  }
  0x1e   :  { %s12297_s29 = sld [smem:[#allocation41_spill]]  ;;  %s10712_s20 = smov [#allocation20]  }
  0x1f   :  { %s166_s1 = sshll.u32 %s10712_s20, 4  ;;  %s10713_s0 = smov [#allocation5]   ;;  %s167_s1 = int_to_ptr.vmem [resolvable:$true] %s166_s1 }
  0x20   :  { %172 = dma.hbm_to_vmem [thread:$0]  %s165_s8, 1024, %s167_s1, [#allocation21], %s10709_s22, %s10709_s22, %s10710_s2  }
  0x21   :  { %s39_s14 = sshll.u32 %s10713_s0, 4  ;;  %s12298_s26 = sld [smem:[#allocation44_spill]]  ;;  %s40_s14 = int_to_ptr.vmem [resolvable:$true] %s39_s14 }
  0x22   :  { %s95_s11 = sshll.u32 %s12269_s7, 4  ;;  %s10714_s28 = smov [#allocation10]   ;;  %s96_s11 = int_to_ptr.hbm [resolvable:$true] %s95_s11 }
  0x23   :  { %s10715_s8 = smov [#allocation13]   ;;  %s121_s30 = sshll.u32 %s12271_s9, 4  ;;  %s122_s30 = int_to_ptr.hbm [resolvable:$true] %s121_s30 }
  0x24   :  { %s37_s6 = sshll.u32 %s12297_s29, 4  ;;  %s67_s29 = sshll.u32 %s10714_s28, 4  ;;  %s38_s6 = int_to_ptr.hbm [resolvable:$true] %s37_s6  ;;  %s68_s29 = int_to_ptr.vmem [resolvable:$true] %s67_s29 }
  0x25   :  { %45 = dma.hbm_to_vmem [thread:$0]  %s38_s6, 512, %s40_s14, [#allocation6], %s10709_s22, %s10709_s22, %s10710_s2  }
  0x26   :  { %s97_s20 = sshll.u32 %s10715_s8, 4  ;;  %s149_s14 = sshll.u32 %s12274_s12, 4  ;;  %s98_s20 = int_to_ptr.vmem [resolvable:$true] %s97_s20  ;;  %s150_s14 = int_to_ptr.hbm [resolvable:$true] %s149_s14 }
  0x27   :  { %s65_s27 = sshll.u32 %s12298_s26, 4  ;;  %s10716_s23 = smov [#allocation16]   ;;  %s66_s27 = int_to_ptr.hbm [resolvable:$true] %s65_s27 }
  0x28   :  { %73 = dma.hbm_to_vmem [thread:$0]  %s66_s27, 4096, %s68_s29, [#allocation9], %s10705_s25, %s10705_s25, %s10706_s3  }
  0x29   :  { %103 = dma.hbm_to_vmem [thread:$0]  %s96_s11, 4096, %s98_s20, [#allocation12], %s10705_s25, %s10705_s25, %s10706_s3  }
  0x2a   :  { %s123_s26 = sshll.u32 %s10716_s23, 4  ;;  %s10717_s27 = smov [#allocation19]   ;;  %s124_s26 = int_to_ptr.vmem [resolvable:$true] %s123_s26 }
  0x2b   :  { %129 = dma.hbm_to_vmem [thread:$0]  %s122_s30, 1024, %s124_s26, [#allocation15], %s10709_s22, %s10709_s22, %s10710_s2  }
  0x2c   :  { %s151_s9 = sshll.u32 %s10717_s27, 4  ;;  %s177_s28 = sshll.u32 %s12277_s15, 4  ;;  %s152_s9 = int_to_ptr.vmem [resolvable:$true] %s151_s9  ;;  %s178_s28 = int_to_ptr.hbm [resolvable:$true] %s177_s28 }
  0x2d   :  { %157 = dma.hbm_to_vmem [thread:$0]  %s150_s14, 1024, %s152_s9, [#allocation18], %s10709_s22, %s10709_s22, %s10710_s2  }
  0x2e   :  { %s10718_s12 = smov [#allocation22]  }
  0x2f   :  { %s179_s25 = sshll.u32 %s10718_s12, 4  ;;  %s180_s25 = int_to_ptr.vmem [resolvable:$true] %s179_s25 }
  0x30   :  { %185 = dma.hbm_to_vmem [thread:$0]  %s178_s28, 1024, %s180_s25, [#allocation21], %s10709_s22, %s10709_s22, %s10710_s2  }
  0x31   :  { %10688 = dma.done.wait [#allocation6], 512  }
  0x32   :  { %10689 = vsyncadd [#allocation6], 4294966784 }
  0x33   :  { %10690 = dma.done.wait [#allocation9], 8192  }
  0x34   :  { %10691 = vsyncadd [#allocation9], 4294959104 }
  0x35   :  { %10692 = dma.done.wait [#allocation12], 8192  }
  0x36   :  { %10693 = vsyncadd [#allocation12], 4294959104 }
  0x37   :  { %10694 = dma.done.wait [#allocation15], 2048  }
  0x38   :  { %10695 = vsyncadd [#allocation15], 4294965248 }
  0x39   :  { %10696 = dma.done.wait [#allocation18], 2048  }
  0x3a   :  { %10697 = vsyncadd [#allocation18], 4294965248 }
  0x3b   :  { %10698 = dma.done.wait [#allocation21], 2048  }
  0x3c   :  { %10699 = vsyncadd [#allocation21], 4294965248  ;;  %v6963_v0 = vld [vmem:[#allocation8 + $0xe0] sm:$0xf]  ;;  %v9467_v1 = vld [vmem:[#allocation8 + $0xec] sm:$0xf0] }
  0x3d   :  { %v9465_v2 = vld [vmem:[#allocation8 + $0xe4] sm:$0xf]  ;;  %v6964_v3 = vor.u32 %v9467_v1, %v6963_v0  ;;  %v6965_v4 = vld [vmem:[#allocation8 + $0xf0] sm:$0xf0]  ;;  %v6971_v5 = vld [vmem:[#allocation8 + $0xe8] sm:$0xf] }
  0x3e   :  { %v9468_v6 = vld [vmem:[#allocation8 + $0xf4] sm:$0xf0]  ;;  %v6968_v7 = vor.u32 %v9465_v2, %v6965_v4  ;;  %v9466_v9 = vld [vmem:[#allocation8 + $0xec] sm:$0xf]  ;;  %v6973_v10 = vld [vmem:[#allocation8 + $0xf8] sm:$0xf0] }
  0x3f   :  { %v6972_v8 = vor.u32 %v9468_v6, %v6971_v5  ;;  %v6947_v11 = vld [vmem:[#allocation8 + $0xc0] sm:$0xf]  ;;  %467 = vmatpush.bf16.msra.mxu0 %v6964_v3  ;;  %v6976_v12 = vor.u32 %v9466_v9, %v6973_v10  ;;  %v9463_v13 = vld [vmem:[#allocation8 + $0xcc] sm:$0xf0]  ;;  %v9461_v14 = vld [vmem:[#allocation8 + $0xc4] sm:$0xf] }
  0x40   :  { %v6949_v15 = vld [vmem:[#allocation8 + $0xd0] sm:$0xf0]  ;;  %496 = vmatpush.bf16.msra.mxu1 %v6968_v7  ;;  %v6948_v16 = vor.u32 %v9463_v13, %v6947_v11  ;;  %v6955_v18 = vld [vmem:[#allocation8 + $0xc8] sm:$0xf]  ;;  %v9464_v19 = vld [vmem:[#allocation8 + $0xd4] sm:$0xf0] }
  0x41   :  { %525 = vmatpush.bf16.msra.mxu2 %v6972_v8  ;;  %v6952_v17 = vor.u32 %v9461_v14, %v6949_v15  ;;  %v9462_v20 = vld [vmem:[#allocation8 + $0xcc] sm:$0xf]  ;;  %554 = vmatpush.bf16.msra.mxu3 %v6976_v12  ;;  %v6956_v21 = vor.u32 %v9464_v19, %v6955_v18  ;;  %v6957_v22 = vld [vmem:[#allocation8 + $0xd8] sm:$0xf0]  ;;  %v6931_v23 = vld [vmem:[#allocation8 + $0xa0] sm:$0xf] }
  0x42   :  { %v9459_v24 = vld [vmem:[#allocation8 + $0xac] sm:$0xf0]  ;;  %v6960_v25 = vor.u32 %v9462_v20, %v6957_v22  ;;  %v9457_v26 = vld [vmem:[#allocation8 + $0xa4] sm:$0xf]  ;;  %v6933_v27 = vld [vmem:[#allocation8 + $0xb0] sm:$0xf0] }
  0x43   :  { %v6939_v28 = vld [vmem:[#allocation8 + $0xa8] sm:$0xf]  ;;  %468 = vmatpush.bf16.msra.mxu0 %v6948_v16  ;;  %v6932_v29 = vor.u32 %v9459_v24, %v6931_v23  ;;  %v9460_v30 = vld [vmem:[#allocation8 + $0xb4] sm:$0xf0]  ;;  %v9458_v31 = vld [vmem:[#allocation8 + $0xac] sm:$0xf]  ;;  %v6936_v33 = vor.u32 %v9457_v26, %v6933_v27 }
  0x44   :  { %v6941_v32 = vld [vmem:[#allocation8 + $0xb8] sm:$0xf0]  ;;  %497 = vmatpush.bf16.msra.mxu1 %v6952_v17  ;;  %v6940_v34 = vor.u32 %v9460_v30, %v6939_v28  ;;  %v6915_v35 = vld [vmem:[#allocation8 + $0x80] sm:$0xf]  ;;  %v9455_v36 = vld [vmem:[#allocation8 + $0x8c] sm:$0xf0] }
  0x45   :  { %526 = vmatpush.bf16.msra.mxu2 %v6956_v21  ;;  %v9453_v37 = vld [vmem:[#allocation8 + $0x84] sm:$0xf]  ;;  %555 = vmatpush.bf16.msra.mxu3 %v6960_v25  ;;  %v6944_v38 = vor.u32 %v9458_v31, %v6941_v32  ;;  %v6917_v39 = vld [vmem:[#allocation8 + $0x90] sm:$0xf0]  ;;  %v6923_v40 = vld [vmem:[#allocation8 + $0x88] sm:$0xf]  ;;  %v6916_v44 = vor.u32 %v9455_v36, %v6915_v35 }
  0x46   :  { %v9456_v41 = vld [vmem:[#allocation8 + $0x94] sm:$0xf0]  ;;  %v9454_v42 = vld [vmem:[#allocation8 + $0x8c] sm:$0xf]  ;;  %v6925_v43 = vld [vmem:[#allocation8 + $0x98] sm:$0xf0]  ;;  %v6920_v45 = vor.u32 %v9453_v37, %v6917_v39 }
  0x47   :  { %469 = vmatpush.bf16.msra.mxu0 %v6932_v29  ;;  %v6924_v46 = vor.u32 %v9456_v41, %v6923_v40  ;;  %v6899_v47 = vld [vmem:[#allocation8 + $0x60] sm:$0xf]  ;;  %v9451_v48 = vld [vmem:[#allocation8 + $0x6c] sm:$0xf0]  ;;  %v9449_v49 = vld [vmem:[#allocation8 + $0x64] sm:$0xf]  ;;  %v6928_v50 = vor.u32 %v9454_v42, %v6925_v43 }
  0x48   :  { %498 = vmatpush.bf16.msra.mxu1 %v6936_v33  ;;  %v6901_v51 = vld [vmem:[#allocation8 + $0x70] sm:$0xf0]  ;;  %v6907_v52 = vld [vmem:[#allocation8 + $0x68] sm:$0xf]  ;;  %v9452_v53 = vld [vmem:[#allocation8 + $0x74] sm:$0xf0]  ;;  %v6900_v56 = vor.u32 %v9451_v48, %v6899_v47 }
  0x49   :  { %527 = vmatpush.bf16.msra.mxu2 %v6940_v34  ;;  %556 = vmatpush.bf16.msra.mxu3 %v6944_v38  ;;  %v9450_v54 = vld [vmem:[#allocation8 + $0x6c] sm:$0xf]  ;;  %v6909_v55 = vld [vmem:[#allocation8 + $0x78] sm:$0xf0]  ;;  %v6904_v57 = vor.u32 %v9449_v49, %v6901_v51  ;;  %v6908_v58 = vor.u32 %v9452_v53, %v6907_v52  ;;  %v6883_v59 = vld [vmem:[#allocation8 + $0x40] sm:$0xf] }
  0x4a   :  { %v9447_v60 = vld [vmem:[#allocation8 + $0x4c] sm:$0xf0]  ;;  %v9445_v61 = vld [vmem:[#allocation8 + $0x44] sm:$0xf]  ;;  %v6912_v62 = vor.u32 %v9450_v54, %v6909_v55  ;;  %v6885_v63 = vld [vmem:[#allocation8 + $0x50] sm:$0xf0] }
  0x4b   :  { %470 = vmatpush.bf16.msra.mxu0 %v6916_v44  ;;  %v6891_v0 = vld [vmem:[#allocation8 + $0x48] sm:$0xf]  ;;  %v9448_v1 = vld [vmem:[#allocation8 + $0x54] sm:$0xf0]  ;;  %v9446_v2 = vld [vmem:[#allocation8 + $0x4c] sm:$0xf]  ;;  %v6884_v4 = vor.u32 %v9447_v60, %v6883_v59  ;;  %v6888_v5 = vor.u32 %v9445_v61, %v6885_v63 }
  0x4c   :  { %499 = vmatpush.bf16.msra.mxu1 %v6920_v45  ;;  %v6893_v3 = vld [vmem:[#allocation8 + $0x58] sm:$0xf0]  ;;  %v6892_v6 = vor.u32 %v9448_v1, %v6891_v0  ;;  %v6867_v7 = vld [vmem:[#allocation8 + $0x20] sm:$0xf]  ;;  %v9443_v8 = vld [vmem:[#allocation8 + $0x2c] sm:$0xf0] }
  0x4d   :  { %528 = vmatpush.bf16.msra.mxu2 %v6924_v46  ;;  %557 = vmatpush.bf16.msra.mxu3 %v6928_v50  ;;  %v9441_v9 = vld [vmem:[#allocation8 + $0x24] sm:$0xf]  ;;  %v6896_v10 = vor.u32 %v9446_v2, %v6893_v3  ;;  %v6869_v11 = vld [vmem:[#allocation8 + $0x30] sm:$0xf0]  ;;  %v6875_v12 = vld [vmem:[#allocation8 + $0x28] sm:$0xf]  ;;  %v6868_v16 = vor.u32 %v9443_v8, %v6867_v7 }
  0x4e   :  { %v9444_v13 = vld [vmem:[#allocation8 + $0x34] sm:$0xf0]  ;;  %v9442_v14 = vld [vmem:[#allocation8 + $0x2c] sm:$0xf]  ;;  %v6877_v15 = vld [vmem:[#allocation8 + $0x38] sm:$0xf0]  ;;  %v6872_v18 = vor.u32 %v9441_v9, %v6869_v11 }
  0x4f   :  { %471 = vmatpush.bf16.msra.mxu0 %v6900_v56  ;;  %v6851_v17 = vld [vmem:[#allocation8] sm:$0xf]  ;;  %v6876_v19 = vor.u32 %v9444_v13, %v6875_v12  ;;  %v9439_v20 = vld [vmem:[#allocation8 + $0xc] sm:$0xf0]  ;;  %v9437_v21 = vld [vmem:[#allocation8 + $0x4] sm:$0xf]  ;;  %v6880_v23 = vor.u32 %v9442_v14, %v6877_v15 }
  0x50   :  { %500 = vmatpush.bf16.msra.mxu1 %v6904_v57  ;;  %v6853_v22 = vld [vmem:[#allocation8 + $0x10] sm:$0xf0]  ;;  %v6859_v24 = vld [vmem:[#allocation8 + $0x8] sm:$0xf]  ;;  %v9440_v25 = vld [vmem:[#allocation8 + $0x14] sm:$0xf0]  ;;  %v6852_v30 = vor.u32 %v9439_v20, %v6851_v17 }
  0x51   :  { %529 = vmatpush.bf16.msra.mxu2 %v6908_v58  ;;  %558 = vmatpush.bf16.msra.mxu3 %v6912_v62  ;;  %v9438_v26 = vld [vmem:[#allocation8 + $0xc] sm:$0xf]  ;;  %v6861_v27 = vld [vmem:[#allocation8 + $0x18] sm:$0xf0]  ;;  %v7091_v28 = vld [vmem:[#allocation10 + $0xe0] sm:$0xf]  ;;  %v6856_v33 = vor.u32 %v9437_v21, %v6853_v22  ;;  %v6860_v34 = vor.u32 %v9440_v25, %v6859_v24 }
  0x52   :  { %v9499_v29 = vld [vmem:[#allocation10 + $0xec] sm:$0xf0]  ;;  %v9497_v31 = vld [vmem:[#allocation10 + $0xe4] sm:$0xf]  ;;  %v7093_v32 = vld [vmem:[#allocation10 + $0xf0] sm:$0xf0]  ;;  %v6864_v36 = vor.u32 %v9438_v26, %v6861_v27 }
  0x53   :  { %472 = vmatpush.bf16.msra.mxu0 %v6884_v4  ;;  %v10891_v35 = vld [vmem:[#allocation5] sm:$0xff]  ;;  %v7092_v37 = vor.u32 %v9499_v29, %v7091_v28  ;;  %v9498_v38 = vld [vmem:[#allocation10 + $0xec] sm:$0xf]  ;;  %v7099_v39 = vld [vmem:[#allocation10 + $0xe8] sm:$0xf]  ;;  %v7096_v41 = vor.u32 %v9497_v31, %v7093_v32  ;;  %s12299_s2 = sld [smem:[#allocation42_spill]] }
  0x54   :  { %501 = vmatpush.bf16.msra.mxu1 %v6888_v5  ;;  %v9500_v40 = vld [vmem:[#allocation10 + $0xf4] sm:$0xf0]  ;;  %v7101_v42 = vld [vmem:[#allocation10 + $0xf8] sm:$0xf0]  ;;  %v7075_v43 = vld [vmem:[#allocation10 + $0xc0] sm:$0xf] }
  0x55   :  { %530 = vmatpush.bf16.msra.mxu2 %v6892_v6  ;;  %559 = vmatpush.bf16.msra.mxu3 %v6896_v10  ;;  %v9495_v44 = vld [vmem:[#allocation10 + $0xcc] sm:$0xf0]  ;;  %v9493_v45 = vld [vmem:[#allocation10 + $0xc4] sm:$0xf]  ;;  %v7077_v46 = vld [vmem:[#allocation10 + $0xd0] sm:$0xf0]  ;;  %v7100_v48 = vor.u32 %v9500_v40, %v7099_v39  ;;  %v7104_v49 = vor.u32 %v9498_v38, %v7101_v42 }
  0x56   :  { %v9494_v47 = vld [vmem:[#allocation10 + $0xcc] sm:$0xf]  ;;  %v7076_v50 = vor.u32 %v9495_v44, %v7075_v43  ;;  %v7083_v51 = vld [vmem:[#allocation10 + $0xc8] sm:$0xf]  ;;  %v9496_v52 = vld [vmem:[#allocation10 + $0xd4] sm:$0xf0]  ;;  %v7080_v53 = vor.u32 %v9493_v45, %v7077_v46 }
  0x57   :  { %473 = vmatpush.bf16.msra.mxu0 %v6868_v16  ;;  %v7085_v54 = vld [vmem:[#allocation10 + $0xd8] sm:$0xf0]  ;;  %v7059_v55 = vld [vmem:[#allocation10 + $0xa0] sm:$0xf]  ;;  %v9491_v56 = vld [vmem:[#allocation10 + $0xac] sm:$0xf0]  ;;  %v7084_v59 = vor.u32 %v9496_v52, %v7083_v51 }
  0x58   :  { %502 = vmatpush.bf16.msra.mxu1 %v6872_v18  ;;  %v9489_v57 = vld [vmem:[#allocation10 + $0xa4] sm:$0xf]  ;;  %v7061_v58 = vld [vmem:[#allocation10 + $0xb0] sm:$0xf0]  ;;  %v7088_v60 = vor.u32 %v9494_v47, %v7085_v54  ;;  %v7060_v61 = vor.u32 %v9491_v56, %v7059_v55  ;;  %v9490_v62 = vld [vmem:[#allocation10 + $0xac] sm:$0xf] }
  0x59   :  { %531 = vmatpush.bf16.msra.mxu2 %v6876_v19  ;;  %560 = vmatpush.bf16.msra.mxu3 %v6880_v23  ;;  %v7067_v63 = vld [vmem:[#allocation10 + $0xa8] sm:$0xf]  ;;  %v9492_v0 = vld [vmem:[#allocation10 + $0xb4] sm:$0xf0]  ;;  %v7064_v1 = vor.u32 %v9489_v57, %v7061_v58  ;;  %v7069_v2 = vld [vmem:[#allocation10 + $0xb8] sm:$0xf0] }
  0x5a   :  { %v7043_v3 = vld [vmem:[#allocation10 + $0x80] sm:$0xf]  ;;  %v9487_v4 = vld [vmem:[#allocation10 + $0x8c] sm:$0xf0]  ;;  %v9485_v5 = vld [vmem:[#allocation10 + $0x84] sm:$0xf]  ;;  %v7068_v7 = vor.u32 %v9492_v0, %v7067_v63  ;;  %v7072_v8 = vor.u32 %v9490_v62, %v7069_v2 }
  0x5b   :  { %474 = vmatpush.bf16.msra.mxu0 %v6852_v30  ;;  %v7045_v6 = vld [vmem:[#allocation10 + $0x90] sm:$0xf0]  ;;  %v7044_v9 = vor.u32 %v9487_v4, %v7043_v3  ;;  %v9486_v10 = vld [vmem:[#allocation10 + $0x8c] sm:$0xf]  ;;  %v7051_v11 = vld [vmem:[#allocation10 + $0x88] sm:$0xf] }
  0x5c   :  { %503 = vmatpush.bf16.msra.mxu1 %v6856_v33  ;;  %v9488_v12 = vld [vmem:[#allocation10 + $0x94] sm:$0xf0]  ;;  %v7048_v13 = vor.u32 %v9485_v5, %v7045_v6  ;;  %v7053_v14 = vld [vmem:[#allocation10 + $0x98] sm:$0xf0]  ;;  %v7027_v15 = vld [vmem:[#allocation10 + $0x60] sm:$0xf] }
  0x5d   :  { %532 = vmatpush.bf16.msra.mxu2 %v6860_v34  ;;  %561 = vmatpush.bf16.msra.mxu3 %v6864_v36  ;;  %v9483_v16 = vld [vmem:[#allocation10 + $0x6c] sm:$0xf0]  ;;  %v9481_v17 = vld [vmem:[#allocation10 + $0x64] sm:$0xf]  ;;  %v7029_v18 = vld [vmem:[#allocation10 + $0x70] sm:$0xf0]  ;;  %v7052_v20 = vor.u32 %v9488_v12, %v7051_v11  ;;  %v7056_v21 = vor.u32 %v9486_v10, %v7053_v14 }
  0x5e   :  { %475 = vmatmul.bf16.vlgmr.msra.gmra.mxu0 %v10891_v35  ;;  %v10897_v19 = vld [vmem:[#allocation5 + $0x8] sm:$0xff]  ;;  %v7028_v22 = vor.u32 %v9483_v16, %v7027_v15  ;;  %v9484_v25 = vld [vmem:[#allocation10 + $0x74] sm:$0xf0]  ;;  %v7032_v26 = vor.u32 %v9481_v17, %v7029_v18  ;;  %v7037_v27 = vld [vmem:[#allocation10 + $0x78] sm:$0xf0]  ;;  %s10720_s0 = smov [#allocation24]  }
  0x5f   :  { %785 = vmatpush.bf16.msrb.mxu0 %v7092_v37  ;;  %504 = vmatmul.bf16.vlgmr.msra.gmra.mxu1 %v10891_v35  ;;  %v9482_v23 = vld [vmem:[#allocation10 + $0x6c] sm:$0xf]  ;;  %v7035_v24 = vld [vmem:[#allocation10 + $0x68] sm:$0xf]  ;;  %v7011_v28 = vld [vmem:[#allocation10 + $0x40] sm:$0xf] }
  0x60   :  { %814 = vmatpush.bf16.msrb.mxu1 %v7096_v41  ;;  %533 = vmatmul.bf16.vlgmr.msra.gmra.mxu2 %v10891_v35  ;;  %v9479_v29 = vld [vmem:[#allocation10 + $0x4c] sm:$0xf0]  ;;  %v9477_v30 = vld [vmem:[#allocation10 + $0x44] sm:$0xf]  ;;  %v7013_v31 = vld [vmem:[#allocation10 + $0x50] sm:$0xf0]  ;;  %v7036_v32 = vor.u32 %v9484_v25, %v7035_v24  ;;  %v7040_v33 = vor.u32 %v9482_v23, %v7037_v27 }
  0x61   :  { %562 = vmatmul.bf16.vlgmr.msra.gmra.mxu3 %v10891_v35  ;;  %843 = vmatpush.bf16.msrb.mxu2 %v7100_v48  ;;  %v7012_v34 = vor.u32 %v9479_v29, %v7011_v28  ;;  %v7016_v36 = vor.u32 %v9477_v30, %v7013_v31  ;;  %v9478_v37 = vld [vmem:[#allocation10 + $0x4c] sm:$0xf]  ;;  %v7021_v38 = vld [vmem:[#allocation10 + $0x58] sm:$0xf0]  ;;  %v6995_v39 = vld [vmem:[#allocation10 + $0x20] sm:$0xf] }
  0x62   :  { %872 = vmatpush.bf16.msrb.mxu3 %v7104_v49  ;;  %v9475_v40 = vld [vmem:[#allocation10 + $0x2c] sm:$0xf0]  ;;  %v9473_v41 = vld [vmem:[#allocation10 + $0x24] sm:$0xf]  ;;  %v7024_v42 = vor.u32 %v9478_v37, %v7021_v38  ;;  %v6997_v44 = vld [vmem:[#allocation10 + $0x30] sm:$0xf0] }
  0x63   :  { %786 = vmatpush.bf16.msrb.mxu0 %v7076_v50  ;;  %v6996_v43 = vor.u32 %v9475_v40, %v6995_v39  ;;  %v7019_v45 = vld [vmem:[#allocation10 + $0x48] sm:$0xf]  ;;  %v9480_v46 = vld [vmem:[#allocation10 + $0x54] sm:$0xf0]  ;;  %v7000_v47 = vor.u32 %v9473_v41, %v6997_v44  ;;  %v9474_v49 = vld [vmem:[#allocation10 + $0x2c] sm:$0xf] }
  0x64   :  { %815 = vmatpush.bf16.msrb.mxu1 %v7080_v53  ;;  %v7020_v48 = vor.u32 %v9480_v46, %v7019_v45  ;;  %v7005_v50 = vld [vmem:[#allocation10 + $0x38] sm:$0xf0]  ;;  %v6979_v51 = vld [vmem:[#allocation10] sm:$0xf]  ;;  %v9471_v52 = vld [vmem:[#allocation10 + $0xc] sm:$0xf0] }
  0x65   :  { %844 = vmatpush.bf16.msrb.mxu2 %v7084_v59  ;;  %v9469_v53 = vld [vmem:[#allocation10 + $0x4] sm:$0xf]  ;;  %v6981_v54 = vld [vmem:[#allocation10 + $0x10] sm:$0xf0]  ;;  %v7003_v55 = vld [vmem:[#allocation10 + $0x28] sm:$0xf]  ;;  %v7008_v57 = vor.u32 %v9474_v49, %v7005_v50  ;;  %v6980_v58 = vor.u32 %v9471_v52, %v6979_v51 }
  0x66   :  { %873 = vmatpush.bf16.msrb.mxu3 %v7088_v60  ;;  %v9476_v56 = vld [vmem:[#allocation10 + $0x34] sm:$0xf0]  ;;  %v6987_v60 = vld [vmem:[#allocation10 + $0x8] sm:$0xf]  ;;  %v6984_v62 = vor.u32 %v9469_v53, %v6981_v54  ;;  %v9470_v63 = vld [vmem:[#allocation10 + $0xc] sm:$0xf] }
  0x67   :  { %787 = vmatpush.bf16.msrb.mxu0 %v7060_v61  ;;  %v7004_v59 = vor.u32 %v9476_v56, %v7003_v55  ;;  %v9472_v61 = vld [vmem:[#allocation10 + $0x14] sm:$0xf0]  ;;  %v6989_v0 = vld [vmem:[#allocation10 + $0x18] sm:$0xf0]  ;;  %v10903_v3 = vld [vmem:[#allocation5 + $0x10] sm:$0xff]  ;;  %s6796_s30 = sshll.u32 %s10720_s0, 4  ;;  %s6797_s30 = int_to_ptr.vmem [resolvable:$true] %s6796_s30 }
  0x68   :  { %816 = vmatpush.bf16.msrb.mxu1 %v7064_v1  ;;  %v6988_v1 = vor.u32 %v9472_v61, %v6987_v60  ;;  %v6992_v2 = vor.u32 %v9470_v63, %v6989_v0  ;;  %v7219_v4 = vld [vmem:[#allocation11 + $0xe0] sm:$0xf]  ;;  %v9531_v5 = vld [vmem:[#allocation11 + $0xec] sm:$0xf0]  ;;  %v9529_v6 = vld [vmem:[#allocation11 + $0xe4] sm:$0xf] }
  0x69   :  { %845 = vmatpush.bf16.msrb.mxu2 %v7068_v7  ;;  %v7220_v7 = vor.u32 %v9531_v5, %v7219_v4  ;;  %v7229_v10 = vld [vmem:[#allocation11 + $0xf8] sm:$0xf0]  ;;  %v9527_v14 = vld [vmem:[#allocation11 + $0xcc] sm:$0xf0]  ;;  %v9525_v15 = vld [vmem:[#allocation11 + $0xc4] sm:$0xf] }
  0x6a   :  { %874 = vmatpush.bf16.msrb.mxu3 %v7072_v8  ;;  %v7221_v8 = vld [vmem:[#allocation11 + $0xf0] sm:$0xf0]  ;;  %v9526_v18 = vld [vmem:[#allocation11 + $0xcc] sm:$0xf]  ;;  %v7227_v23 = vld [vmem:[#allocation11 + $0xe8] sm:$0xf] }
  0x6b   :  { %788 = vmatpush.bf16.msrb.mxu0 %v7044_v9  ;;  %v9530_v9 = vld [vmem:[#allocation11 + $0xec] sm:$0xf]  ;;  %v7224_v11 = vor.u32 %v9529_v6, %v7221_v8  ;;  %v7205_v17 = vld [vmem:[#allocation11 + $0xd0] sm:$0xf0]  ;;  %v9532_v24 = vld [vmem:[#allocation11 + $0xf4] sm:$0xf0] }
  0x6c   :  { %817 = vmatpush.bf16.msrb.mxu1 %v7048_v13  ;;  %v7232_v12 = vor.u32 %v9530_v9, %v7229_v10  ;;  %v7203_v13 = vld [vmem:[#allocation11 + $0xc0] sm:$0xf]  ;;  %v7228_v25 = vor.u32 %v9532_v24, %v7227_v23  ;;  %v9523_v28 = vld [vmem:[#allocation11 + $0xac] sm:$0xf0]  ;;  %v9521_v29 = vld [vmem:[#allocation11 + $0xa4] sm:$0xf] }
  0x6d   :  { %846 = vmatpush.bf16.msrb.mxu2 %v7052_v20  ;;  %v7204_v16 = vor.u32 %v9527_v14, %v7203_v13  ;;  %v7213_v20 = vld [vmem:[#allocation11 + $0xd8] sm:$0xf0]  ;;  %v7187_v27 = vld [vmem:[#allocation11 + $0xa0] sm:$0xf]  ;;  %v7189_v31 = vld [vmem:[#allocation11 + $0xb0] sm:$0xf0] }
  0x6e   :  { %875 = vmatpush.bf16.msrb.mxu3 %v7056_v21  ;;  %480 = vmatmul.bf16.gmra.mxu0 %v10897_v19  ;;  %v7208_v21 = vor.u32 %v9525_v15, %v7205_v17  ;;  %v7188_v30 = vor.u32 %v9523_v28, %v7187_v27  ;;  %v7211_v37 = vld [vmem:[#allocation11 + $0xc8] sm:$0xf]  ;;  %v9528_v38 = vld [vmem:[#allocation11 + $0xd4] sm:$0xf0]  ;;  %v7171_v39 = vld [vmem:[#allocation11 + $0x80] sm:$0xf] }
  0x6f   :  { %789 = vmatpush.bf16.msrb.mxu0 %v7028_v22  ;;  %509 = vmatmul.bf16.gmra.mxu1 %v10897_v19  ;;  %v7216_v22 = vor.u32 %v9526_v18, %v7213_v20  ;;  %v7212_v40 = vor.u32 %v9528_v38, %v7211_v37  ;;  %v9519_v41 = vld [vmem:[#allocation11 + $0x8c] sm:$0xf0]  ;;  %v7195_v46 = vld [vmem:[#allocation11 + $0xa8] sm:$0xf]  ;;  %v7181_v50 = vld [vmem:[#allocation11 + $0x98] sm:$0xf0] }
  0x70   :  { %818 = vmatpush.bf16.msrb.mxu1 %v7032_v26  ;;  %538 = vmatmul.bf16.gmra.mxu2 %v10897_v19  ;;  %v10909_v26 = vld [vmem:[#allocation5 + $0x18] sm:$0xff]  ;;  %v7172_v44 = vor.u32 %v9519_v41, %v7171_v39  ;;  %v7179_v52 = vld [vmem:[#allocation11 + $0x88] sm:$0xf]  ;;  %v7155_v55 = vld [vmem:[#allocation11 + $0x60] sm:$0xf]  ;;  %s6798_s14 = sshll.u32 %s12280_s18, 4  ;;  %s6799_s14 = int_to_ptr.hbm [resolvable:$true] %s6798_s14 }
  0x71   :  { %567 = vmatmul.bf16.gmra.mxu3 %v10897_v19  ;;  %847 = vmatpush.bf16.msrb.mxu2 %v7036_v32  ;;  %v9522_v32 = vld [vmem:[#allocation11 + $0xac] sm:$0xf]  ;;  %v9520_v53 = vld [vmem:[#allocation11 + $0x94] sm:$0xf0]  ;;  %v9515_v56 = vld [vmem:[#allocation11 + $0x6c] sm:$0xf0] }
  0x72   :  { %876 = vmatpush.bf16.msrb.mxu3 %v7040_v33  ;;  %v7197_v33 = vld [vmem:[#allocation11 + $0xb8] sm:$0xf0]  ;;  %v7180_v54 = vor.u32 %v9520_v53, %v7179_v52  ;;  %v7163_v60 = vld [vmem:[#allocation11 + $0x68] sm:$0xf]  ;;  %v9516_v61 = vld [vmem:[#allocation11 + $0x74] sm:$0xf0] }
  0x73   :  { %790 = vmatpush.bf16.msrb.mxu0 %v7012_v34  ;;  %v7192_v34 = vor.u32 %v9521_v29, %v7189_v31  ;;  %v7164_v63 = vor.u32 %v9516_v61, %v7163_v60  ;;  %v9514_v0 = vld [vmem:[#allocation11 + $0x6c] sm:$0xf]  ;;  %v9511_v5 = vld [vmem:[#allocation11 + $0x4c] sm:$0xf0]  ;;  %v9509_v6 = vld [vmem:[#allocation11 + $0x44] sm:$0xf] }
  0x74   :  { %819 = vmatpush.bf16.msrb.mxu1 %v7016_v36  ;;  %v7200_v36 = vor.u32 %v9522_v32, %v7197_v33  ;;  %v7147_v9 = vld [vmem:[#allocation11 + $0x48] sm:$0xf]  ;;  %v9512_v10 = vld [vmem:[#allocation11 + $0x54] sm:$0xf0]  ;;  %v7149_v13 = vld [vmem:[#allocation11 + $0x58] sm:$0xf0] }
  0x75   :  { %848 = vmatpush.bf16.msrb.mxu2 %v7020_v48  ;;  %v9518_v48 = vld [vmem:[#allocation11 + $0x8c] sm:$0xf]  ;;  %v7123_v14 = vld [vmem:[#allocation11 + $0x20] sm:$0xf]  ;;  %v9507_v15 = vld [vmem:[#allocation11 + $0x2c] sm:$0xf0] }
  0x76   :  { %877 = vmatpush.bf16.msrb.mxu3 %v7024_v42  ;;  %v9517_v42 = vld [vmem:[#allocation11 + $0x84] sm:$0xf]  ;;  %v7184_v51 = vor.u32 %v9518_v48, %v7181_v50  ;;  %v7125_v18 = vld [vmem:[#allocation11 + $0x30] sm:$0xf0]  ;;  %v7131_v20 = vld [vmem:[#allocation11 + $0x28] sm:$0xf] }
  0x77   :  { %791 = vmatpush.bf16.msrb.mxu0 %v6996_v43  ;;  %v7173_v43 = vld [vmem:[#allocation11 + $0x90] sm:$0xf0]  ;;  %v9505_v17 = vld [vmem:[#allocation11 + $0x24] sm:$0xf]  ;;  %v9506_v23 = vld [vmem:[#allocation11 + $0x2c] sm:$0xf] }
  0x78   :  { %820 = vmatpush.bf16.msrb.mxu1 %v7000_v47  ;;  %v7176_v45 = vor.u32 %v9517_v42, %v7173_v43  ;;  %v9524_v47 = vld [vmem:[#allocation11 + $0xb4] sm:$0xf0]  ;;  %v7133_v24 = vld [vmem:[#allocation11 + $0x38] sm:$0xf0]  ;;  %v7107_v29 = vld [vmem:[#allocation11] sm:$0xf] }
  0x79   :  { %849 = vmatpush.bf16.msrb.mxu2 %v7004_v59  ;;  %v7196_v49 = vor.u32 %v9524_v47, %v7195_v46  ;;  %v7157_v59 = vld [vmem:[#allocation11 + $0x70] sm:$0xf0]  ;;  %v7136_v28 = vor.u32 %v9506_v23, %v7133_v24  ;;  %v9501_v31 = vld [vmem:[#allocation11 + $0x4] sm:$0xf]  ;;  %v9502_v39 = vld [vmem:[#allocation11 + $0xc] sm:$0xf] }
  0x7a   :  { %878 = vmatpush.bf16.msrb.mxu3 %v7008_v57  ;;  %v9513_v57 = vld [vmem:[#allocation11 + $0x64] sm:$0xf]  ;;  %v7109_v33 = vld [vmem:[#allocation11 + $0x10] sm:$0xf0]  ;;  %v7350_v41 = vld [vmem:[#allocation13 + $0xe0] sm:$0xf] }
  0x7b   :  { %792 = vmatpush.bf16.msrb.mxu0 %v6980_v58  ;;  %v7156_v58 = vor.u32 %v9515_v56, %v7155_v55  ;;  %v7112_v37 = vor.u32 %v9501_v31, %v7109_v33  ;;  %v9563_v43 = vld [vmem:[#allocation13 + $0xec] sm:$0xf0]  ;;  %v7358_v48 = vld [vmem:[#allocation13 + $0xe8] sm:$0xf]  ;;  %v9562_v50 = vld [vmem:[#allocation13 + $0xec] sm:$0xf] }
  0x7c   :  { %821 = vmatpush.bf16.msrb.mxu1 %v6984_v62  ;;  %v7160_v62 = vor.u32 %v9513_v57, %v7157_v59  ;;  %v7351_v46 = vor.u32 %v9563_v43, %v7350_v41  ;;  %v7360_v52 = vld [vmem:[#allocation13 + $0xf8] sm:$0xf0]  ;;  %v7334_v53 = vld [vmem:[#allocation13 + $0xc0] sm:$0xf]  ;;  %v9557_v56 = vld [vmem:[#allocation13 + $0xc4] sm:$0xf] }
  0x7d   :  { %850 = vmatpush.bf16.msrb.mxu2 %v6988_v1  ;;  %v7165_v1 = vld [vmem:[#allocation11 + $0x78] sm:$0xf0]  ;;  %v7336_v57 = vld [vmem:[#allocation13 + $0xd0] sm:$0xf0]  ;;  %v9560_v60 = vld [vmem:[#allocation13 + $0xd4] sm:$0xf0] }
  0x7e   :  { %879 = vmatpush.bf16.msrb.mxu3 %v6992_v2  ;;  %485 = vmatmul.bf16.gmra.mxu0 %v10903_v3  ;;  %v7139_v2 = vld [vmem:[#allocation11 + $0x40] sm:$0xf]  ;;  %v7168_v4 = vor.u32 %v9514_v0, %v7165_v1  ;;  %v7339_v59 = vor.u32 %v9557_v56, %v7336_v57  ;;  %v9558_v61 = vld [vmem:[#allocation13 + $0xcc] sm:$0xf]  ;;  %v7294_v31 = vld [vmem:[#allocation13 + $0x68] sm:$0xf] }
  0x7f   :  { %514 = vmatmul.bf16.gmra.mxu1 %v10903_v3  ;;  %1170 = vmatpush.bf16.msra.mxu0 %v7220_v7  ;;  %v7141_v7 = vld [vmem:[#allocation11 + $0x50] sm:$0xf0]  ;;  %v7318_v1 = vld [vmem:[#allocation13 + $0xa0] sm:$0xf]  ;;  %v9548_v33 = vld [vmem:[#allocation13 + $0x74] sm:$0xf0] }
  0x80   :  { %543 = vmatmul.bf16.gmra.mxu2 %v10903_v3  ;;  %1183 = vmatpush.bf16.msra.mxu1 %v7224_v11  ;;  %v7144_v8 = vor.u32 %v9509_v6, %v7141_v7  ;;  %v9510_v11 = vld [vmem:[#allocation11 + $0x4c] sm:$0xf]  ;;  %v7326_v6 = vld [vmem:[#allocation13 + $0xa8] sm:$0xf]  ;;  %v9556_v7 = vld [vmem:[#allocation13 + $0xb4] sm:$0xf0] }
  0x81   :  { %572 = vmatmul.bf16.gmra.mxu3 %v10903_v3  ;;  %1196 = vmatpush.bf16.msra.mxu2 %v7228_v25  ;;  %v7128_v25 = vor.u32 %v9505_v17, %v7125_v18  ;;  %v7310_v17 = vld [vmem:[#allocation13 + $0x88] sm:$0xf]  ;;  %v9552_v18 = vld [vmem:[#allocation13 + $0x94] sm:$0xf0]  ;;  %v9543_v41 = vld [vmem:[#allocation13 + $0x4c] sm:$0xf0] }
  0x82   :  { %1209 = vmatpush.bf16.msra.mxu3 %v7232_v12  ;;  %v7148_v12 = vor.u32 %v9512_v10, %v7147_v9  ;;  %v9554_v9 = vld [vmem:[#allocation13 + $0xac] sm:$0xf]  ;;  %v7328_v10 = vld [vmem:[#allocation13 + $0xb8] sm:$0xf0]  ;;  %v7311_v24 = vor.u32 %v9552_v18, %v7310_v17  ;;  %v12283_v43 = vmov 0   ;;  %s6809_s24 = sshll.u32 %s12281_s19, 4  ;;  %s6810_s24 = int_to_ptr.hbm [resolvable:$true] %s6809_s24 }
  0x83   :  { %1171 = vmatpush.bf16.msra.mxu0 %v7204_v16  ;;  %v7152_v16 = vor.u32 %v9510_v11, %v7149_v13  ;;  %v7327_v11 = vor.u32 %v9556_v7, %v7326_v6  ;;  %v7302_v13 = vld [vmem:[#allocation13 + $0x80] sm:$0xf]  ;;  %10086 = vset.pattern.permute.xlu0 %v12283_v43  ;;  %v9540_v56 = vld [vmem:[#allocation13 + $0x34] sm:$0xf0]  ;;  %v9534_v7 = vld [vmem:[#allocation13 + $0xc] sm:$0xf] }
  0x84   :  { %1184 = vmatpush.bf16.msra.mxu1 %v7208_v21  ;;  %v7124_v21 = vor.u32 %v9507_v15, %v7123_v14  ;;  %v9551_v14 = vld [vmem:[#allocation13 + $0x8c] sm:$0xf0]  ;;  %v9549_v15 = vld [vmem:[#allocation13 + $0x84] sm:$0xf]  ;;  %10087 = vset.pattern.permute.xlu1 %v12283_v43  ;;  %s6784_s25 = sshll.u32 %s12279_s17, 4  ;;  %s10723_s15 = smov 128   ;;  %s6785_s25 = int_to_ptr.hbm [resolvable:$true] %s6784_s25 }
  0x85   :  { %1197 = vmatpush.bf16.msra.mxu2 %v7212_v40  ;;  %v7117_v40 = vld [vmem:[#allocation11 + $0x18] sm:$0xf0]  ;;  %10088 = vset.pattern.permute.xlu2 %v12283_v43  ;;  %s10724_s3 = smov 8  }
  0x86   :  { %1210 = vmatpush.bf16.msra.mxu3 %v7216_v22  ;;  %v9508_v22 = vld [vmem:[#allocation11 + $0x34] sm:$0xf0]  ;;  %v7120_v42 = vor.u32 %v9502_v39, %v7117_v40  ;;  %v7270_v40 = vld [vmem:[#allocation13 + $0x40] sm:$0xf] }
  0x87   :  { %1172 = vmatpush.bf16.msra.mxu0 %v7188_v30  ;;  %v7132_v27 = vor.u32 %v9508_v22, %v7131_v20  ;;  %v9503_v30 = vld [vmem:[#allocation11 + $0xc] sm:$0xf0]  ;;  %v7303_v20 = vor.u32 %v9551_v14, %v7302_v13  ;;  %v7312_v22 = vld [vmem:[#allocation13 + $0x98] sm:$0xf0] }
  0x88   :  { %1185 = vmatpush.bf16.msra.mxu1 %v7192_v34  ;;  %v7108_v32 = vor.u32 %v9503_v30, %v7107_v29  ;;  %v7115_v34 = vld [vmem:[#allocation11 + $0x8] sm:$0xf]  ;;  %v9545_v29 = vld [vmem:[#allocation13 + $0x64] sm:$0xf]  ;;  %v7288_v30 = vld [vmem:[#allocation13 + $0x70] sm:$0xf0] }
  0x89   :  { %1198 = vmatpush.bf16.msra.mxu2 %v7196_v49  ;;  %v9564_v49 = vld [vmem:[#allocation13 + $0xf4] sm:$0xf0] }
  0x8a   :  { %1211 = vmatpush.bf16.msra.mxu3 %v7200_v36  ;;  %v9504_v36 = vld [vmem:[#allocation11 + $0x14] sm:$0xf0] }
  0x8b   :  { %1173 = vmatpush.bf16.msra.mxu0 %v7172_v44  ;;  %v7116_v38 = vor.u32 %v9504_v36, %v7115_v34  ;;  %v9561_v44 = vld [vmem:[#allocation13 + $0xe4] sm:$0xf]  ;;  %v9546_v34 = vld [vmem:[#allocation13 + $0x6c] sm:$0xf]  ;;  %v7296_v36 = vld [vmem:[#allocation13 + $0x78] sm:$0xf0] }
  0x8c   :  { %1186 = vmatpush.bf16.msra.mxu1 %v7176_v45  ;;  %v7352_v45 = vld [vmem:[#allocation13 + $0xf0] sm:$0xf0]  ;;  %v7299_v39 = vor.u32 %v9546_v34, %v7296_v36 }
  0x8d   :  { %1199 = vmatpush.bf16.msra.mxu2 %v7180_v54  ;;  %v7355_v47 = vor.u32 %v9561_v44, %v7352_v45  ;;  %v9559_v54 = vld [vmem:[#allocation13 + $0xcc] sm:$0xf0]  ;;  %v7272_v44 = vld [vmem:[#allocation13 + $0x50] sm:$0xf0]  ;;  %v7278_v45 = vld [vmem:[#allocation13 + $0x48] sm:$0xf] }
  0x8e   :  { %490 = vmatmul.bf16.gmra.mxu0 %v10909_v26  ;;  %1212 = vmatpush.bf16.msra.mxu3 %v7184_v51  ;;  %v7359_v51 = vor.u32 %v9564_v49, %v7358_v48  ;;  %v7335_v55 = vor.u32 %v9559_v54, %v7334_v53  ;;  %v7280_v48 = vld [vmem:[#allocation13 + $0x58] sm:$0xf0]  ;;  %v9539_v53 = vld [vmem:[#allocation13 + $0x2c] sm:$0xf0]  ;;  %v9537_v54 = vld [vmem:[#allocation13 + $0x24] sm:$0xf] }
  0x8f   :  { %519 = vmatmul.bf16.gmra.mxu1 %v10909_v26  ;;  %1174 = vmatpush.bf16.msra.mxu0 %v7156_v58  ;;  %v7342_v58 = vld [vmem:[#allocation13 + $0xc8] sm:$0xf] }
  0x90   :  { %548 = vmatmul.bf16.gmra.mxu2 %v10909_v26  ;;  %1187 = vmatpush.bf16.msra.mxu1 %v7160_v62  ;;  %v7344_v62 = vld [vmem:[#allocation13 + $0xd8] sm:$0xf0] }
  0x91   :  { %577 = vmatmul.bf16.gmra.mxu3 %v10909_v26  ;;  %1200 = vmatpush.bf16.msra.mxu2 %v7164_v63  ;;  %v7343_v63 = vor.u32 %v9560_v60, %v7342_v58  ;;  %v7347_v0 = vor.u32 %v9558_v61, %v7344_v62  ;;  %v9538_v58 = vld [vmem:[#allocation13 + $0x2c] sm:$0xf] }
  0x92   :  { %1213 = vmatpush.bf16.msra.mxu3 %v7168_v4  ;;  %v9553_v4 = vld [vmem:[#allocation13 + $0xa4] sm:$0xf] }
  0x94   :  { %1188 = vmatpush.bf16.msra.mxu1 %v7144_v8 }
  0x95   :  { %1201 = vmatpush.bf16.msra.mxu2 %v7148_v12  ;;  %v7331_v12 = vor.u32 %v9554_v9, %v7328_v10 }
  0x96   :  { %1214 = vmatpush.bf16.msra.mxu3 %v7152_v16  ;;  %v7304_v16 = vld [vmem:[#allocation13 + $0x90] sm:$0xf0] }
  0x97   :  { %v7307_v23 = vor.u32 %v9549_v15, %v7304_v16 }
  0x98   :  { %1189 = vmatpush.bf16.msra.mxu1 %v7128_v25 }
  0x99   :  { %1202 = vmatpush.bf16.msra.mxu2 %v7132_v27  ;;  %v7286_v27 = vld [vmem:[#allocation13 + $0x60] sm:$0xf] }
  0x9a   :  { %1215 = vmatpush.bf16.msra.mxu3 %v7136_v28  ;;  %v9547_v28 = vld [vmem:[#allocation13 + $0x6c] sm:$0xf0] }
  0x9c   :  { %1190 = vmatpush.bf16.msra.mxu1 %v7112_v37  ;;  %v7291_v37 = vor.u32 %v9545_v29, %v7288_v30 }
  0x9d   :  { %1203 = vmatpush.bf16.msra.mxu2 %v7116_v38  ;;  %v7295_v38 = vor.u32 %v9548_v33, %v7294_v31 }
  0x9e   :  { %793 = vmatmul.bf16.vlgmr.msrb.gmra.mxu0 %v10891_v35  ;;  %1216 = vmatpush.bf16.msra.mxu3 %v7120_v42  ;;  %v9541_v42 = vld [vmem:[#allocation13 + $0x44] sm:$0xf] }
  0x9f   :  { %822 = vmatmul.bf16.vlgmr.msrb.gmra.mxu1 %v10891_v35  ;;  %v7275_v49 = vor.u32 %v9541_v42, %v7272_v44 }
  0xa0   :  { %851 = vmatmul.bf16.vlgmr.msrb.gmra.mxu2 %v10891_v35  ;;  %1510 = vmatpush.bf16.msrb.mxu1 %v7355_v47  ;;  %v9542_v47 = vld [vmem:[#allocation13 + $0x4c] sm:$0xf] }
  0xa1   :  { %880 = vmatmul.bf16.vlgmr.msrb.gmra.mxu3 %v10891_v35  ;;  %v7140_v35 = vor.u32 %v9511_v5, %v7139_v2  ;;  %1523 = vmatpush.bf16.msrb.mxu2 %v7359_v51  ;;  %v9555_v2 = vld [vmem:[#allocation13 + $0xac] sm:$0xf0]  ;;  %v7320_v5 = vld [vmem:[#allocation13 + $0xb0] sm:$0xf0]  ;;  %v7283_v51 = vor.u32 %v9542_v47, %v7280_v48 }
  0xa2   :  { %v7323_v8 = vor.u32 %v9553_v4, %v7320_v5  ;;  %v7246_v4 = vld [vmem:[#allocation13 + $0x8] sm:$0xf]  ;;  %v9536_v5 = vld [vmem:[#allocation13 + $0x14] sm:$0xf0] }
  0xa3   :  { %1175 = vmatpush.bf16.msra.mxu0 %v7140_v35  ;;  %v7319_v35 = vor.u32 %v9555_v2, %v7318_v1  ;;  %v9533_v1 = vld [vmem:[#allocation13 + $0x4] sm:$0xf]  ;;  %v7240_v2 = vld [vmem:[#allocation13 + $0x10] sm:$0xf0]  ;;  %v7247_v9 = vor.u32 %v9536_v5, %v7246_v4 }
  0xa4   :  { %1511 = vmatpush.bf16.msrb.mxu1 %v7339_v59  ;;  %v7264_v59 = vld [vmem:[#allocation13 + $0x38] sm:$0xf0] }
  0xa5   :  { %1524 = vmatpush.bf16.msrb.mxu2 %v7343_v63  ;;  %v7267_v62 = vor.u32 %v9538_v58, %v7264_v59  ;;  %v7238_v63 = vld [vmem:[#allocation13] sm:$0xf] }
  0xa7   :  { %1176 = vmatpush.bf16.msra.mxu0 %v7124_v21  ;;  %v9550_v21 = vld [vmem:[#allocation13 + $0x8c] sm:$0xf] }
  0xa8   :  { %1512 = vmatpush.bf16.msrb.mxu1 %v7323_v8  ;;  %v7315_v25 = vor.u32 %v9550_v21, %v7312_v22  ;;  %v7243_v8 = vor.u32 %v9533_v1, %v7240_v2 }
  0xa9   :  { %1525 = vmatpush.bf16.msrb.mxu2 %v7327_v11  ;;  %v273_v11 = vld [vmem:[%s12266_s4] sm:$0xf] }
  0xaa   :  { %v10939_v13 = vperm.slane %v273_v11, 1  ;;  %v10948_v18 = vperm.slane %v273_v11, 2 }
  0xab   :  { %1177 = vmatpush.bf16.msra.mxu0 %v7108_v32  ;;  %v7287_v32 = vor.u32 %v9547_v28, %v7286_v27 }
  0xac   :  { %1513 = vmatpush.bf16.msrb.mxu1 %v7307_v23 }
  0xad   :  { %1526 = vmatpush.bf16.msrb.mxu2 %v7311_v24 }
  0xae   :  { %798 = vmatmul.bf16.gmra.mxu0 %v10897_v19 }
  0xaf   :  { %827 = vmatmul.bf16.gmra.mxu1 %v10897_v19  ;;  %1497 = vmatpush.bf16.msrb.mxu0 %v7351_v46  ;;  %v9544_v46 = vld [vmem:[#allocation13 + $0x54] sm:$0xf0] }
  0xb0   :  { %856 = vmatmul.bf16.gmra.mxu2 %v10897_v19  ;;  %1514 = vmatpush.bf16.msrb.mxu1 %v7291_v37 }
  0xb1   :  { %885 = vmatmul.bf16.gmra.mxu3 %v10897_v19  ;;  %v7363_v19 = vor.u32 %v9562_v50, %v7360_v52  ;;  %1527 = vmatpush.bf16.msrb.mxu2 %v7295_v38  ;;  %v7279_v50 = vor.u32 %v9544_v46, %v7278_v45  ;;  %v7254_v52 = vld [vmem:[#allocation13 + $0x20] sm:$0xf] }
  0xb2   :  { %v7255_v57 = vor.u32 %v9539_v53, %v7254_v52 }
  0xb3   :  { %1536 = vmatpush.bf16.msrb.mxu3 %v7363_v19  ;;  %1498 = vmatpush.bf16.msrb.mxu0 %v7335_v55  ;;  %v7256_v19 = vld [vmem:[#allocation13 + $0x30] sm:$0xf0]  ;;  %v7262_v55 = vld [vmem:[#allocation13 + $0x28] sm:$0xf] }
  0xb4   :  { %1515 = vmatpush.bf16.msrb.mxu1 %v7275_v49  ;;  %v7259_v60 = vor.u32 %v9537_v54, %v7256_v19  ;;  %v7263_v61 = vor.u32 %v9540_v56, %v7262_v55 }
  0xb5   :  { %1528 = vmatpush.bf16.msrb.mxu2 %v7279_v50 }
  0xb7   :  { %1537 = vmatpush.bf16.msrb.mxu3 %v7347_v0  ;;  %1499 = vmatpush.bf16.msrb.mxu0 %v7319_v35  ;;  %v9535_v0 = vld [vmem:[#allocation13 + $0xc] sm:$0xf0]  ;;  %v7248_v35 = vld [vmem:[#allocation13 + $0x18] sm:$0xf0] }
  0xb8   :  { %v7239_v6 = vor.u32 %v9535_v0, %v7238_v63  ;;  %1516 = vmatpush.bf16.msrb.mxu1 %v7259_v60  ;;  %v7251_v10 = vor.u32 %v9534_v7, %v7248_v35 }
  0xb9   :  { %1529 = vmatpush.bf16.msrb.mxu2 %v7263_v61 }
  0xbb   :  { %1538 = vmatpush.bf16.msrb.mxu3 %v7331_v12  ;;  %1500 = vmatpush.bf16.msrb.mxu0 %v7303_v20  ;;  %v10937_v12 = vperm.slane %v273_v11, 0  ;;  %v10951_v20 = vperm.slane %v273_v11, 3 }
  0xbc   :  { %1517 = vmatpush.bf16.msrb.mxu1 %v7243_v8 }
  0xbd   :  { %1530 = vmatpush.bf16.msrb.mxu2 %v7247_v9 }
  0xbe   :  { %803 = vmatmul.bf16.gmra.mxu0 %v10903_v3 }
  0xbf   :  { %832 = vmatmul.bf16.gmra.mxu1 %v10903_v3  ;;  %1539 = vmatpush.bf16.msrb.mxu3 %v7315_v25  ;;  %v970_v25 = vld [vmem:[%s12299_s2] sm:$0xff] }
  0xc0   :  { %861 = vmatmul.bf16.gmra.mxu2 %v10903_v3  ;;  %1501 = vmatpush.bf16.msrb.mxu0 %v7287_v32  ;;  %vm971_vm0 = vcmp.gt.s32.totalorder %v970_v25, 0  ;;  %vm1297_vm1 = vcmp.gt.s32.totalorder %v970_v25, 7  ;;  %vm2947_vm2 = vcmp.gt.s32.totalorder %v970_v25, 3 }
  0xc1   :  { %890 = vmatmul.bf16.gmra.mxu3 %v10903_v3  ;;  %v7271_v3 = vor.u32 %v9543_v41, %v7270_v40  ;;  %v1289_v31 = vsel %vm971_vm0, 1, %v12283_v43  ;;  %v1616_v44 = vsel %vm1297_vm1, 1, %v12283_v43  ;;  %v3267_v54 = vsel %vm2947_vm2, 1, %v12283_v43 }
  0xc2   :  { %1291 = vperm.xlu0 %10086, %v1289_v31  }
  0xc3   :  { %1540 = vmatpush.bf16.msrb.mxu3 %v7299_v39 }
  0xc4   :  { %1502 = vmatpush.bf16.msrb.mxu0 %v7271_v3 }
  0xc7   :  { %1541 = vmatpush.bf16.msrb.mxu3 %v7283_v51 }
  0xc8   :  { %1503 = vmatpush.bf16.msrb.mxu0 %v7255_v57 }
  0xca   :  { %1618 = vperm.xlu0 %10086, %v1616_v44  }
  0xcb   :  { %1542 = vmatpush.bf16.msrb.mxu3 %v7267_v62 }
  0xcc   :  { %1504 = vmatpush.bf16.msrb.mxu0 %v7239_v6 }
  0xce   :  { %808 = vmatmul.bf16.gmra.mxu0 %v10909_v26 }
  0xcf   :  { %837 = vmatmul.bf16.gmra.mxu1 %v10909_v26  ;;  %1543 = vmatpush.bf16.msrb.mxu3 %v7251_v10 }
  0xd0   :  { %866 = vmatmul.bf16.gmra.mxu2 %v10909_v26 }
  0xd1   :  { %895 = vmatmul.bf16.gmra.mxu3 %v10909_v26 }
  0xd2   :  { %3269 = vperm.xlu0 %10086, %v3267_v54  }
  0xdb   :  { %v476_v14 = vpop.f32.mrf.mxu0 }
  0xdc   :  { %v477_v15 = vadd.f32 %v476_v14, %v10937_v12  ;;  %v505_v16 = vpop.f32.mrf.mxu1 }
  0xdd   :  { %v506_v17 = vadd.f32 %v505_v16, %v10939_v13 }
  0xde   :  { %1178 = vmatmul.bf16.vlgmr.msra.gmra.mxu0 %v12283_v43 }
  0xdf   :  { %v10944_v26 = vpack.c.bf16 %v506_v17, %v477_v15  ;;  %1191 = vmatmul.bf16.vlgmr.msra.gmra.mxu1 %v12283_v43 }
  0xe0   :  { %1204 = vmatmul.bf16.vlgmr.msra.gmra.mxu2 %v12283_v43 }
  0xe1   :  { %1217 = vmatmul.bf16.vlgmr.msra.gmra.mxu3 %v12283_v43 }
  0xe3   :  { %v534_v21 = vpop.f32.mrf.mxu2  ;;  %v478_v24 = vpop.f32.mrf.mxu0 }
  0xe4   :  { %v535_v22 = vadd.f32 %v534_v21, %v10948_v18  ;;  %v563_v23 = vpop.f32.mrf.mxu3  ;;  %v479_v28 = vadd.f32 %v478_v24, %v10937_v12  ;;  %v507_v29 = vpop.f32.mrf.mxu1 }
  0xe5   :  { %v564_v27 = vadd.f32 %v563_v23, %v10951_v20  ;;  %v508_v30 = vadd.f32 %v507_v29, %v10939_v13 }
  0xe7   :  { %v10961_v32 = vpack.c.bf16 %v564_v27, %v535_v22  ;;  %v10963_v33 = vpack.c.bf16 %v508_v30, %v479_v28 }
  0xeb   :  { %v536_v34 = vpop.f32.mrf.mxu2  ;;  %v481_v38 = vpop.f32.mrf.mxu0 }
  0xec   :  { %v537_v36 = vadd.f32 %v536_v34, %v10948_v18  ;;  %v565_v37 = vpop.f32.mrf.mxu3  ;;  %v482_v40 = vadd.f32 %v481_v38, %v10937_v12  ;;  %v510_v41 = vpop.f32.mrf.mxu1 }
  0xed   :  { %v566_v39 = vadd.f32 %v565_v37, %v10951_v20  ;;  %v511_v42 = vadd.f32 %v510_v41, %v10939_v13 }
  0xee   :  { %1505 = vmatmul.bf16.vlgmr.msrb.gmra.mxu0 %v12283_v43 }
  0xef   :  { %v10970_v45 = vpack.c.bf16 %v566_v39, %v537_v36  ;;  %v10973_v3 = vpack.c.bf16 %v511_v42, %v482_v40  ;;  %1518 = vmatmul.bf16.vlgmr.msrb.gmra.mxu1 %v12283_v43  ;;  %v615_v39 = vld [vmem:[%s12267_s5] sm:$0xf] }
  0xf0   :  { %1531 = vmatmul.bf16.vlgmr.msrb.gmra.mxu2 %v12283_v43  ;;  %v11022_v42 = vperm.slane %v615_v39, 0  ;;  %v11024_v44 = vperm.slane %v615_v39, 1  ;;  %v11034_v54 = vperm.slane %v615_v39, 2 }
  0xf1   :  { %1544 = vmatmul.bf16.vlgmr.msrb.gmra.mxu3 %v12283_v43 }
  0xf3   :  { %v539_v46 = vpop.f32.mrf.mxu2  ;;  %v483_v49 = vpop.f32.mrf.mxu0 }
  0xf4   :  { %v540_v47 = vadd.f32 %v539_v46, %v10948_v18  ;;  %v568_v48 = vpop.f32.mrf.mxu3  ;;  %v484_v51 = vadd.f32 %v483_v49, %v10937_v12  ;;  %v512_v52 = vpop.f32.mrf.mxu1 }
  0xf5   :  { %v569_v50 = vadd.f32 %v568_v48, %v10951_v20  ;;  %v513_v53 = vadd.f32 %v512_v52, %v10939_v13 }
  0xf7   :  { %v10983_v19 = vpack.c.bf16 %v569_v50, %v540_v47  ;;  %v10985_v55 = vpack.c.bf16 %v513_v53, %v484_v51 }
  0xfb   :  { %v541_v56 = vpop.f32.mrf.mxu2  ;;  %v486_v59 = vpop.f32.mrf.mxu0 }
  0xfc   :  { %v542_v57 = vadd.f32 %v541_v56, %v10948_v18  ;;  %v570_v58 = vpop.f32.mrf.mxu3  ;;  %v487_v61 = vadd.f32 %v486_v59, %v10937_v12  ;;  %v515_v62 = vpop.f32.mrf.mxu1  ;;  %v11036_v56 = vperm.slane %v615_v39, 3 }
  0xfd   :  { %v571_v60 = vadd.f32 %v570_v58, %v10951_v20  ;;  %v516_v63 = vadd.f32 %v515_v62, %v10939_v13 }
  0xff   :  { %v10991_v0 = vpack.c.bf16 %v571_v60, %v542_v57  ;;  %v10993_v1 = vpack.c.bf16 %v516_v63, %v487_v61 }
 0x103   :  { %v544_v2 = vpop.f32.mrf.mxu2  ;;  %v488_v6 = vpop.f32.mrf.mxu0 }
 0x104   :  { %v545_v4 = vadd.f32 %v544_v2, %v10948_v18  ;;  %v573_v5 = vpop.f32.mrf.mxu3  ;;  %v489_v35 = vadd.f32 %v488_v6, %v10937_v12  ;;  %v517_v8 = vpop.f32.mrf.mxu1 }
 0x105   :  { %v574_v7 = vadd.f32 %v573_v5, %v10951_v20  ;;  %v518_v9 = vadd.f32 %v517_v8, %v10939_v13 }
 0x107   :  { %v10999_v10 = vpack.c.bf16 %v574_v7, %v545_v4  ;;  %v11001_v11 = vpack.c.bf16 %v518_v9, %v489_v35 }
 0x10b   :  { %v546_v14 = vpop.f32.mrf.mxu2  ;;  %v491_v17 = vpop.f32.mrf.mxu0 }
 0x10c   :  { %v547_v15 = vadd.f32 %v546_v14, %v10948_v18  ;;  %v575_v16 = vpop.f32.mrf.mxu3  ;;  %v492_v22 = vadd.f32 %v491_v17, %v10937_v12  ;;  %v520_v23 = vpop.f32.mrf.mxu1 }
 0x10d   :  { %v576_v21 = vadd.f32 %v575_v16, %v10951_v20  ;;  %v521_v24 = vadd.f32 %v520_v23, %v10939_v13 }
 0x10f   :  { %v11007_v25 = vpack.c.bf16 %v576_v21, %v547_v15  ;;  %v11009_v27 = vpack.c.bf16 %v521_v24, %v492_v22 }
 0x113   :  { %v549_v28 = vpop.f32.mrf.mxu2  ;;  %v493_v31 = vpop.f32.mrf.mxu0 }
 0x114   :  { %v550_v29 = vadd.f32 %v549_v28, %v10948_v18  ;;  %v578_v30 = vpop.f32.mrf.mxu3  ;;  %v494_v36 = vadd.f32 %v493_v31, %v10937_v12  ;;  %v522_v37 = vpop.f32.mrf.mxu1 }
 0x115   :  { %v579_v34 = vadd.f32 %v578_v30, %v10951_v20  ;;  %v523_v38 = vadd.f32 %v522_v37, %v10939_v13 }
 0x117   :  { %v11018_v40 = vpack.c.bf16 %v579_v34, %v550_v29  ;;  %v11020_v41 = vpack.c.bf16 %v523_v38, %v494_v36 }
 0x119   :  { %12300 = vst [vmem:[#allocation35_spill] sm:$0xff] %v11020_v41 }
 0x11b   :  { %v551_v46 = vpop.f32.mrf.mxu2  ;;  %v794_v12 = vpop.f32.mrf.mxu0 }
 0x11c   :  { %v552_v47 = vadd.f32 %v551_v46, %v10948_v18  ;;  %v580_v48 = vpop.f32.mrf.mxu3  ;;  %v795_v13 = vadd.f32 %v794_v12, %v11022_v42  ;;  %v823_v50 = vpop.f32.mrf.mxu1  ;;  %v7481_v12 = vld [vmem:[#allocation11 + $0xe0] sm:$0xf] }
 0x11d   :  { %v581_v49 = vadd.f32 %v580_v48, %v10951_v20  ;;  %v824_v51 = vadd.f32 %v823_v50, %v11024_v44 }
 0x11f   :  { %v11030_v52 = vpack.c.bf16 %v581_v49, %v552_v47  ;;  %v11032_v53 = vpack.c.bf16 %v824_v51, %v795_v13  ;;  %v9595_v49 = vld [vmem:[#allocation11 + $0xec] sm:$0xf0]  ;;  %v9593_v13 = vld [vmem:[#allocation11 + $0xe4] sm:$0xf] }
 0x120   :  { %v7482_v51 = vor.u32 %v9595_v49, %v7481_v12  ;;  %v9587_v12 = vld [vmem:[#allocation11 + $0xac] sm:$0xf0]  ;;  %v9585_v49 = vld [vmem:[#allocation11 + $0xa4] sm:$0xf] }
 0x121   :  { %12301 = vst [vmem:[#allocation36_spill] sm:$0xff] %v11030_v52 }
 0x122   :  { %12302 = vst [vmem:[#allocation37_spill] sm:$0xff] %v11032_v53  ;;  %1827 = vmatpush.bf16.msra.mxu0 %v7482_v51  ;;  %v7451_v51 = vld [vmem:[#allocation11 + $0xb0] sm:$0xf0] }
 0x123   :  { %v852_v57 = vpop.f32.mrf.mxu2  ;;  %v796_v59 = vpop.f32.mrf.mxu0 }
 0x124   :  { %v853_v18 = vadd.f32 %v852_v57, %v11034_v54  ;;  %v881_v58 = vpop.f32.mrf.mxu3  ;;  %v797_v60 = vadd.f32 %v796_v59, %v11022_v42  ;;  %v825_v61 = vpop.f32.mrf.mxu1  ;;  %v7483_v57 = vld [vmem:[#allocation11 + $0xf0] sm:$0xf0] }
 0x125   :  { %v882_v20 = vadd.f32 %v881_v58, %v11036_v56  ;;  %v826_v62 = vadd.f32 %v825_v61, %v11024_v44  ;;  %v9596_v58 = vld [vmem:[#allocation11 + $0xf4] sm:$0xf0]  ;;  %v9594_v61 = vld [vmem:[#allocation11 + $0xec] sm:$0xf] }
 0x127   :  { %v11042_v63 = vpack.c.bf16 %v882_v20, %v853_v18  ;;  %v11044_v2 = vpack.c.bf16 %v826_v62, %v797_v60  ;;  %v7489_v18 = vld [vmem:[#allocation11 + $0xe8] sm:$0xf]  ;;  %v7486_v20 = vor.u32 %v9593_v13, %v7483_v57  ;;  %v7491_v62 = vld [vmem:[#allocation11 + $0xf8] sm:$0xf0] }
 0x128   :  { %v7490_v60 = vor.u32 %v9596_v58, %v7489_v18  ;;  %v7457_v57 = vld [vmem:[#allocation11 + $0xa8] sm:$0xf]  ;;  %v9588_v18 = vld [vmem:[#allocation11 + $0xb4] sm:$0xf0] }
 0x129   :  { %12303 = vst [vmem:[#allocation38_spill] sm:$0xff] %v11042_v63  ;;  %1840 = vmatpush.bf16.msra.mxu1 %v7486_v20  ;;  %v7454_v20 = vor.u32 %v9585_v49, %v7451_v51  ;;  %v9577_v49 = vld [vmem:[#allocation11 + $0x64] sm:$0xf] }
 0x12a   :  { %1853 = vmatpush.bf16.msra.mxu2 %v7490_v60  ;;  %v7458_v60 = vor.u32 %v9588_v18, %v7457_v57  ;;  %v7419_v57 = vld [vmem:[#allocation11 + $0x70] sm:$0xf0]  ;;  %v7425_v18 = vld [vmem:[#allocation11 + $0x68] sm:$0xf]  ;;  %v9601_v63 = vld [vmem:[#allocation13 + $0x24] sm:$0xf] }
 0x12b   :  { %v854_v4 = vpop.f32.mrf.mxu2  ;;  %v799_v7 = vpop.f32.mrf.mxu0 }
 0x12c   :  { %v855_v5 = vadd.f32 %v854_v4, %v11034_v54  ;;  %v883_v6 = vpop.f32.mrf.mxu3  ;;  %v800_v8 = vadd.f32 %v799_v7, %v11022_v42  ;;  %v828_v9 = vpop.f32.mrf.mxu1  ;;  %v9591_v7 = vld [vmem:[#allocation11 + $0xcc] sm:$0xf0] }
 0x12d   :  { %v884_v35 = vadd.f32 %v883_v6, %v11036_v56  ;;  %v829_v14 = vadd.f32 %v828_v9, %v11024_v44  ;;  %v7465_v6 = vld [vmem:[#allocation11 + $0xc0] sm:$0xf] }
 0x12e   :  { %v7466_v9 = vor.u32 %v9591_v7, %v7465_v6  ;;  %v7433_v6 = vld [vmem:[#allocation11 + $0x80] sm:$0xf]  ;;  %v9583_v7 = vld [vmem:[#allocation11 + $0x8c] sm:$0xf0] }
 0x12f   :  { %v11050_v15 = vpack.c.bf16 %v884_v35, %v855_v5  ;;  %v11052_v16 = vpack.c.bf16 %v829_v14, %v800_v8  ;;  %v7494_v5 = vor.u32 %v9594_v61, %v7491_v62  ;;  %v9589_v35 = vld [vmem:[#allocation11 + $0xc4] sm:$0xf]  ;;  %v7467_v14 = vld [vmem:[#allocation11 + $0xd0] sm:$0xf0]  ;;  %v9586_v61 = vld [vmem:[#allocation11 + $0xac] sm:$0xf] }
 0x130   :  { %1828 = vmatpush.bf16.msra.mxu0 %v7466_v9  ;;  %v7459_v62 = vld [vmem:[#allocation11 + $0xb8] sm:$0xf0]  ;;  %v7434_v9 = vor.u32 %v9583_v7, %v7433_v6 }
 0x131   :  { %12304 = vst [vmem:[#allocation39_spill] sm:$0xff] %v11050_v15  ;;  %1866 = vmatpush.bf16.msra.mxu3 %v7494_v5  ;;  %v7462_v5 = vor.u32 %v9586_v61, %v7459_v62  ;;  %v7422_v61 = vor.u32 %v9577_v49, %v7419_v57  ;;  %v7427_v6 = vld [vmem:[#allocation11 + $0x78] sm:$0xf0]  ;;  %v9569_v49 = vld [vmem:[#allocation11 + $0x24] sm:$0xf] }
 0x133   :  { %v857_v17 = vpop.f32.mrf.mxu2  ;;  %v801_v23 = vpop.f32.mrf.mxu0 }
 0x134   :  { %v858_v21 = vadd.f32 %v857_v17, %v11034_v54  ;;  %v886_v22 = vpop.f32.mrf.mxu3  ;;  %v802_v28 = vadd.f32 %v801_v23, %v11022_v42  ;;  %v830_v29 = vpop.f32.mrf.mxu1  ;;  %v7473_v17 = vld [vmem:[#allocation11 + $0xc8] sm:$0xf] }
 0x135   :  { %v887_v24 = vadd.f32 %v886_v22, %v11036_v56  ;;  %v831_v30 = vadd.f32 %v830_v29, %v11024_v44 }
 0x137   :  { %v11058_v31 = vpack.c.bf16 %v887_v24, %v858_v21  ;;  %v11060_v34 = vpack.c.bf16 %v831_v30, %v802_v28  ;;  %v9592_v21 = vld [vmem:[#allocation11 + $0xd4] sm:$0xf0]  ;;  %v7470_v28 = vor.u32 %v9589_v35, %v7467_v14  ;;  %v9590_v30 = vld [vmem:[#allocation11 + $0xcc] sm:$0xf]  ;;  %v9581_v35 = vld [vmem:[#allocation11 + $0x84] sm:$0xf] }
 0x138   :  { %v7474_v29 = vor.u32 %v9592_v21, %v7473_v17  ;;  %v7435_v14 = vld [vmem:[#allocation11 + $0x90] sm:$0xf0]  ;;  %v7441_v17 = vld [vmem:[#allocation11 + $0x88] sm:$0xf]  ;;  %v9584_v21 = vld [vmem:[#allocation11 + $0x94] sm:$0xf0] }
 0x139   :  { %1841 = vmatpush.bf16.msra.mxu1 %v7470_v28  ;;  %v7438_v28 = vor.u32 %v9581_v35, %v7435_v14  ;;  %v7401_v35 = vld [vmem:[#allocation11 + $0x40] sm:$0xf] }
 0x13a   :  { %1854 = vmatpush.bf16.msra.mxu2 %v7474_v29  ;;  %v7442_v29 = vor.u32 %v9584_v21, %v7441_v17  ;;  %v7403_v21 = vld [vmem:[#allocation11 + $0x50] sm:$0xf0] }
 0x13b   :  { %v859_v36 = vpop.f32.mrf.mxu2  ;;  %v804_v39 = vpop.f32.mrf.mxu0 }
 0x13c   :  { %v860_v37 = vadd.f32 %v859_v36, %v11034_v54  ;;  %v888_v38 = vpop.f32.mrf.mxu3  ;;  %v805_v47 = vadd.f32 %v804_v39, %v11022_v42  ;;  %v833_v48 = vpop.f32.mrf.mxu1  ;;  %v7475_v36 = vld [vmem:[#allocation11 + $0xd8] sm:$0xf0] }
 0x13d   :  { %v889_v46 = vadd.f32 %v888_v38, %v11036_v56  ;;  %v834_v50 = vadd.f32 %v833_v48, %v11024_v44  ;;  %v7449_v48 = vld [vmem:[#allocation11 + $0xa0] sm:$0xf]  ;;  %1842 = vmatpush.bf16.msra.mxu1 %v7454_v20  ;;  %v9580_v20 = vld [vmem:[#allocation11 + $0x74] sm:$0xf0] }
 0x13e   :  { %1855 = vmatpush.bf16.msra.mxu2 %v7458_v60  ;;  %v7426_v62 = vor.u32 %v9580_v20, %v7425_v18  ;;  %v7387_v18 = vld [vmem:[#allocation11 + $0x30] sm:$0xf0]  ;;  %v7393_v20 = vld [vmem:[#allocation11 + $0x28] sm:$0xf] }
 0x13f   :  { %v11066_v59 = vpack.c.bf16 %v889_v46, %v860_v37  ;;  %v11068_v4 = vpack.c.bf16 %v834_v50, %v805_v47  ;;  %v7478_v46 = vor.u32 %v9590_v30, %v7475_v36  ;;  %v7450_v50 = vor.u32 %v9587_v12, %v7449_v48  ;;  %v9582_v30 = vld [vmem:[#allocation11 + $0x8c] sm:$0xf]  ;;  %v7443_v36 = vld [vmem:[#allocation11 + $0x98] sm:$0xf0]  ;;  %v7417_v48 = vld [vmem:[#allocation11 + $0x60] sm:$0xf] }
 0x140   :  { %v9579_v12 = vld [vmem:[#allocation11 + $0x6c] sm:$0xf0] }
 0x141   :  { %1867 = vmatpush.bf16.msra.mxu3 %v7478_v46  ;;  %1829 = vmatpush.bf16.msra.mxu0 %v7450_v50  ;;  %v7446_v46 = vor.u32 %v9582_v30, %v7443_v36  ;;  %v7418_v51 = vor.u32 %v9579_v12, %v7417_v48  ;;  %v7385_v48 = vld [vmem:[#allocation11 + $0x20] sm:$0xf]  ;;  %v9571_v12 = vld [vmem:[#allocation11 + $0x2c] sm:$0xf0] }
 0x142   :  { %1843 = vmatpush.bf16.msra.mxu1 %v7438_v28  ;;  %1856 = vmatpush.bf16.msra.mxu2 %v7442_v29  ;;  %v7386_v57 = vor.u32 %v9571_v12, %v7385_v48  ;;  %v7379_v48 = vld [vmem:[#allocation11 + $0x18] sm:$0xf0]  ;;  %v7624_v12 = vld [vmem:[#allocation13 + $0xe0] sm:$0xf] }
 0x143   :  { %v862_v8 = vpop.f32.mrf.mxu2  ;;  %v806_v24 = vpop.f32.mrf.mxu0 }
 0x144   :  { %v863_v22 = vadd.f32 %v862_v8, %v11034_v54  ;;  %v891_v23 = vpop.f32.mrf.mxu3  ;;  %v807_v38 = vadd.f32 %v806_v24, %v11022_v42  ;;  %v835_v39 = vpop.f32.mrf.mxu1 }
 0x145   :  { %v892_v37 = vadd.f32 %v891_v23, %v11036_v56  ;;  %v836_v47 = vadd.f32 %v835_v39, %v11024_v44  ;;  %1868 = vmatpush.bf16.msra.mxu3 %v7462_v5  ;;  %1830 = vmatpush.bf16.msra.mxu0 %v7434_v9  ;;  %v9578_v5 = vld [vmem:[#allocation11 + $0x6c] sm:$0xf]  ;;  %v9573_v9 = vld [vmem:[#allocation11 + $0x44] sm:$0xf] }
 0x146   :  { %v7430_v7 = vor.u32 %v9578_v5, %v7427_v6  ;;  %1844 = vmatpush.bf16.msra.mxu1 %v7422_v61  ;;  %1857 = vmatpush.bf16.msra.mxu2 %v7426_v62  ;;  %v7406_v30 = vor.u32 %v9573_v9, %v7403_v21  ;;  %v9572_v61 = vld [vmem:[#allocation11 + $0x34] sm:$0xf0]  ;;  %v7390_v62 = vor.u32 %v9569_v49, %v7387_v18  ;;  %v9570_v6 = vld [vmem:[#allocation11 + $0x2c] sm:$0xf]  ;;  %v9567_v9 = vld [vmem:[#allocation11 + $0xc] sm:$0xf0]  ;;  %v974_v21 = vunpack.c.l.bf16 %v10944_v26 }
 0x147   :  { %v11074_v13 = vpack.c.bf16 %v892_v37, %v863_v22  ;;  %v11076_v58 = vpack.c.bf16 %v836_v47, %v807_v38  ;;  %v7394_v5 = vor.u32 %v9572_v61, %v7393_v20  ;;  %v9627_v20 = vld [vmem:[#allocation13 + $0xec] sm:$0xf0]  ;;  %v9625_v61 = vld [vmem:[#allocation13 + $0xe4] sm:$0xf] }
 0x149   :  { %1869 = vmatpush.bf16.msra.mxu3 %v7446_v46  ;;  %1831 = vmatpush.bf16.msra.mxu0 %v7418_v51 }
 0x14a   :  { %1845 = vmatpush.bf16.msra.mxu1 %v7406_v30 }
 0x14b   :  { %v864_v8 = vpop.f32.mrf.mxu2  ;;  %v809_v24 = vpop.f32.mrf.mxu0 }
 0x14c   :  { %v865_v22 = vadd.f32 %v864_v8, %v11034_v54  ;;  %v893_v23 = vpop.f32.mrf.mxu3  ;;  %v810_v38 = vadd.f32 %v809_v24, %v11022_v42  ;;  %v838_v39 = vpop.f32.mrf.mxu1  ;;  %v9575_v8 = vld [vmem:[#allocation11 + $0x4c] sm:$0xf0] }
 0x14d   :  { %v894_v37 = vadd.f32 %v893_v23, %v11036_v56  ;;  %v839_v47 = vadd.f32 %v838_v39, %v11024_v44  ;;  %1870 = vmatpush.bf16.msra.mxu3 %v7430_v7  ;;  %v7402_v17 = vor.u32 %v9575_v8, %v7401_v35  ;;  %v9576_v23 = vld [vmem:[#allocation11 + $0x54] sm:$0xf0]  ;;  %v7395_v7 = vld [vmem:[#allocation11 + $0x38] sm:$0xf0]  ;;  %v7369_v8 = vld [vmem:[#allocation11] sm:$0xf] }
 0x14e   :  { %v7398_v35 = vor.u32 %v9570_v6, %v7395_v7  ;;  %1846 = vmatpush.bf16.msra.mxu1 %v7390_v62  ;;  %v7626_v62 = vld [vmem:[#allocation13 + $0xf0] sm:$0xf0]  ;;  %v7625_v6 = vor.u32 %v9627_v20, %v7624_v12  ;;  %v9624_v12 = vld [vmem:[#allocation13 + $0xd4] sm:$0xf0] }
 0x14f   :  { %v11082_v50 = vpack.c.bf16 %v894_v37, %v865_v22  ;;  %v11084_v60 = vpack.c.bf16 %v839_v47, %v810_v38  ;;  %v7409_v22 = vld [vmem:[#allocation11 + $0x48] sm:$0xf]  ;;  %v9574_v37 = vld [vmem:[#allocation11 + $0x4c] sm:$0xf]  ;;  %v7411_v38 = vld [vmem:[#allocation11 + $0x58] sm:$0xf0]  ;;  %1832 = vmatpush.bf16.msra.mxu0 %v7402_v17  ;;  %v7629_v7 = vor.u32 %v9625_v61, %v7626_v62 }
 0x150   :  { %v7410_v36 = vor.u32 %v9576_v23, %v7409_v22  ;;  %v7414_v47 = vor.u32 %v9574_v37, %v7411_v38  ;;  %v7370_v22 = vor.u32 %v9567_v9, %v7369_v8  ;;  %v7371_v23 = vld [vmem:[#allocation11 + $0x10] sm:$0xf0]  ;;  %v975_v37 = vunpack.c.h.bf16 %v10944_v26  ;;  %v9628_v8 = vld [vmem:[#allocation13 + $0xf4] sm:$0xf0]  ;;  %v9626_v26 = vld [vmem:[#allocation13 + $0xec] sm:$0xf] }
 0x152   :  { %1858 = vmatpush.bf16.msra.mxu2 %v7410_v36  ;;  %1871 = vmatpush.bf16.msra.mxu3 %v7414_v47  ;;  %v9566_v47 = vld [vmem:[#allocation11 + $0xc] sm:$0xf] }
 0x153   :  { %v867_v14 = vpop.f32.mrf.mxu2  ;;  %v11087_v29 = vpop.f32.mrf.mxu0  ;;  %1833 = vmatpush.bf16.msra.mxu0 %v7386_v57  ;;  %v7382_v18 = vor.u32 %v9566_v47, %v7379_v48 }
 0x154   :  { %v868_v24 = vadd.f32 %v867_v14, %v11034_v54  ;;  %v896_v28 = vpop.f32.mrf.mxu3  ;;  %v11090_v46 = vpop.f32.mrf.mxu1  ;;  %v9565_v14 = vld [vmem:[#allocation11 + $0x4] sm:$0xf] }
 0x155   :  { %v897_v39 = vadd.f32 %v896_v28, %v11036_v56  ;;  %v9568_v28 = vld [vmem:[#allocation11 + $0x14] sm:$0xf0]  ;;  %v7374_v38 = vor.u32 %v9565_v14, %v7371_v23  ;;  %v7634_v23 = vld [vmem:[#allocation13 + $0xf8] sm:$0xf0]  ;;  %v841_v20 = vadd.f32 %v11090_v46, %v11024_v44  ;;  %v9618_v44 = vld [vmem:[#allocation13 + $0xac] sm:$0xf] }
 0x156   :  { %1859 = vmatpush.bf16.msra.mxu2 %v7394_v5  ;;  %1872 = vmatpush.bf16.msra.mxu3 %v7398_v35  ;;  %v7632_v35 = vld [vmem:[#allocation13 + $0xe8] sm:$0xf]  ;;  %v7602_v46 = vld [vmem:[#allocation13 + $0xb8] sm:$0xf0] }
 0x157   :  { %v11092_v51 = vpack.c.bf16 %v897_v39, %v868_v24  ;;  %v7377_v24 = vld [vmem:[#allocation11 + $0x8] sm:$0xf]  ;;  %1834 = vmatpush.bf16.msra.mxu0 %v7370_v22  ;;  %1847 = vmatpush.bf16.msra.mxu1 %v7374_v38  ;;  %v7633_v14 = vor.u32 %v9628_v8, %v7632_v35  ;;  %v7637_v22 = vor.u32 %v9626_v26, %v7634_v23  ;;  %v9617_v35 = vld [vmem:[#allocation13 + $0xa4] sm:$0xf] }
 0x158   :  { %v7378_v39 = vor.u32 %v9568_v28, %v7377_v24  ;;  %v7608_v24 = vld [vmem:[#allocation13 + $0xc0] sm:$0xf]  ;;  %v9623_v28 = vld [vmem:[#allocation13 + $0xcc] sm:$0xf0]  ;;  %v7616_v38 = vld [vmem:[#allocation13 + $0xc8] sm:$0xf] }
 0x159   :  { %v7609_v47 = vor.u32 %v9623_v28, %v7608_v24  ;;  %v7617_v62 = vor.u32 %v9624_v12, %v7616_v38  ;;  %v7600_v23 = vld [vmem:[#allocation13 + $0xa8] sm:$0xf]  ;;  %v9620_v24 = vld [vmem:[#allocation13 + $0xb4] sm:$0xf0]  ;;  %v7605_v28 = vor.u32 %v9618_v44, %v7602_v46  ;;  %v7576_v12 = vld [vmem:[#allocation13 + $0x80] sm:$0xf] }
 0x15a   :  { %1860 = vmatpush.bf16.msra.mxu2 %v7378_v39  ;;  %1873 = vmatpush.bf16.msra.mxu3 %v7382_v18  ;;  %v977_v39 = vunpack.c.h.bf16 %v10961_v32  ;;  %v812_v18 = vadd.f32 %v11087_v29, %v11022_v42  ;;  %v7601_v29 = vor.u32 %v9620_v24, %v7600_v23  ;;  %v7560_v24 = vld [vmem:[#allocation13 + $0x60] sm:$0xf]  ;;  %v9609_v46 = vld [vmem:[#allocation13 + $0x64] sm:$0xf] }
 0x15b   :  { %v11094_v17 = vpop.f32.mrf.mxu2  ;;  %v1179_v36 = vpop.f32.mrf.mxu0  ;;  %2156 = vmatpush.bf16.msrb.mxu0 %v7625_v6  ;;  %2169 = vmatpush.bf16.msrb.mxu1 %v7629_v7  ;;  %v7592_v6 = vld [vmem:[#allocation13 + $0xa0] sm:$0xf]  ;;  %v9619_v7 = vld [vmem:[#allocation13 + $0xac] sm:$0xf0] }
 0x15c   :  { %v11097_v30 = vpop.f32.mrf.mxu3  ;;  %v1222_v49 = vadd.f32 %v1179_v36, %v974_v21  ;;  %v1192_v57 = vpop.f32.mrf.mxu1  ;;  %v9621_v36 = vld [vmem:[#allocation13 + $0xc4] sm:$0xf] }
 0x15d   :  { %v1223_v5 = vadd.f32 %v1192_v57, %v975_v37  ;;  %v7610_v37 = vld [vmem:[#allocation13 + $0xd0] sm:$0xf0]  ;;  %v7618_v57 = vld [vmem:[#allocation13 + $0xd8] sm:$0xf0] }
 0x15e   :  { %v7233_v9 = vmul.f32 -1.442695, %v1222_v49  ;;  %2182 = vmatpush.bf16.msrb.mxu2 %v7633_v14  ;;  %2195 = vmatpush.bf16.msrb.mxu3 %v7637_v22  ;;  %v7613_v48 = vor.u32 %v9621_v36, %v7610_v37  ;;  %v9622_v49 = vld [vmem:[#allocation13 + $0xcc] sm:$0xf]  ;;  %v7594_v14 = vld [vmem:[#allocation13 + $0xb0] sm:$0xf0]  ;;  %v950_v37 = vpack.c.bf16 %v841_v20, %v812_v18 }
 0x15f   :  { %v7234_v21 = vmul.f32 -1.442695, %v1223_v5  ;;  %v7621_v5 = vor.u32 %v9622_v49, %v7618_v57  ;;  %2157 = vmatpush.bf16.msrb.mxu0 %v7609_v47  ;;  %v7597_v42 = vor.u32 %v9617_v35, %v7594_v14  ;;  %v9615_v49 = vld [vmem:[#allocation13 + $0x8c] sm:$0xf0] }
 0x160   :  { %10092 = vpow2.f32 %v7233_v9  ;;  %2170 = vmatpush.bf16.msrb.mxu1 %v7613_v48  ;;  %v7593_v9 = vor.u32 %v9619_v7, %v7592_v6  ;;  %v870_v48 = vadd.f32 %v11094_v17, %v11034_v54  ;;  %v9613_v6 = vld [vmem:[#allocation13 + $0x84] sm:$0xf]  ;;  %v7578_v7 = vld [vmem:[#allocation13 + $0x90] sm:$0xf0]  ;;  %v7584_v54 = vld [vmem:[#allocation13 + $0x88] sm:$0xf]  ;;  %v1302_v23 = vunpack.c.h.bf16 %v950_v37 }
 0x161   :  { %10094 = vpow2.f32 %v7234_v21  ;;  %v7581_v20 = vor.u32 %v9613_v6, %v7578_v7  ;;  %v9616_v17 = vld [vmem:[#allocation13 + $0x94] sm:$0xf0]  ;;  %v9610_v6 = vld [vmem:[#allocation13 + $0x6c] sm:$0xf]  ;;  %v7570_v7 = vld [vmem:[#allocation13 + $0x78] sm:$0xf0] }
 0x162   :  { %2183 = vmatpush.bf16.msrb.mxu2 %v7617_v62  ;;  %2196 = vmatpush.bf16.msrb.mxu3 %v7621_v5  ;;  %v7577_v62 = vor.u32 %v9615_v49, %v7576_v12  ;;  %v899_v5 = vadd.f32 %v11097_v30, %v11036_v56  ;;  %v7585_v44 = vor.u32 %v9616_v17, %v7584_v54  ;;  %v7562_v12 = vld [vmem:[#allocation13 + $0x70] sm:$0xf0]  ;;  %v7568_v49 = vld [vmem:[#allocation13 + $0x68] sm:$0xf] }
 0x163   :  { %v1205_v61 = vpop.f32.mrf.mxu2  ;;  %v1181_v26 = vpop.f32.mrf.mxu0  ;;  %2158 = vmatpush.bf16.msrb.mxu0 %v7593_v9  ;;  %v7586_v9 = vld [vmem:[#allocation13 + $0x98] sm:$0xf0] }
 0x164   :  { %v1218_v8 = vpop.f32.mrf.mxu3  ;;  %v1194_v22 = vpop.f32.mrf.mxu1  ;;  %2171 = vmatpush.bf16.msrb.mxu1 %v7597_v42  ;;  %v9614_v26 = vld [vmem:[#allocation13 + $0x8c] sm:$0xf] }
 0x165   :  { %v1225_v21 = vadd.f32 %v1218_v8, %v977_v39  ;;  %v976_v39 = vunpack.c.l.bf16 %v10961_v32  ;;  %v1301_v8 = vunpack.c.l.bf16 %v950_v37 }
 0x166   :  { %v10093_v36 = vpop.eup %10092  ;;  %2184 = vmatpush.bf16.msrb.mxu2 %v7601_v29  ;;  %2197 = vmatpush.bf16.msrb.mxu3 %v7605_v28 }
 0x167   :  { %v7235_v38 = vmul.f32 -1.442695, %v1225_v21  ;;  %v10095_v47 = vpop.eup %10094  ;;  %v11107_v57 = vadd.f32 1.0, %v10093_v36  ;;  %v1224_v32 = vadd.f32 %v1205_v61, %v976_v39  ;;  %2159 = vmatpush.bf16.msrb.mxu0 %v7577_v62  ;;  %v11117_v21 = vpack.c.bf16 %v899_v5, %v870_v48  ;;  %v9611_v61 = vld [vmem:[#allocation13 + $0x6c] sm:$0xf0] }
 0x168   :  { %v11112_v18 = vadd.f32 1.0, %v10095_v47  ;;  %2172 = vmatpush.bf16.msrb.mxu1 %v7581_v20  ;;  %v7589_v36 = vor.u32 %v9614_v26, %v7586_v9  ;;  %v9612_v47 = vld [vmem:[#allocation13 + $0x74] sm:$0xf0]  ;;  %v7565_v62 = vor.u32 %v9609_v46, %v7562_v12 }
 0x169   :  { %10096 = vpow2.f32 %v7235_v38  ;;  %v1239_v14 = vand.u32 2147483647, %v11107_v57  ;;  %v1241_v22 = vand.u32 2147483648, %v11107_v57  ;;  %v7561_v38 = vor.u32 %v9611_v61, %v7560_v24 }
 0x16a   :  { %10098 = vrcp.f32 %v11107_v57  ;;  %2185 = vmatpush.bf16.msrb.mxu2 %v7585_v44  ;;  %v7569_v48 = vor.u32 %v9612_v47, %v7568_v49  ;;  %v1260_v20 = vand.u32 2147483648, %v11112_v18  ;;  %2198 = vmatpush.bf16.msrb.mxu3 %v7589_v36  ;;  %v1304_v9 = vunpack.c.h.bf16 %v11117_v21  ;;  %v9606_v36 = vld [vmem:[#allocation13 + $0x4c] sm:$0xf] }
 0x16b   :  { %10100 = vrcp.f32 %v11112_v18  ;;  %v1207_v35 = vpop.f32.mrf.mxu2  ;;  %v1506_v30 = vpop.f32.mrf.mxu0  ;;  %2160 = vmatpush.bf16.msrb.mxu0 %v7561_v38  ;;  %vm1235_vm3 = vweird.f32 %v11107_v57  ;;  %vm1254_vm4 = vweird.f32 %v11112_v18  ;;  %vm11136_vm5 = vcmp.eq.f32.partialorder %v1239_v14, 8.507059e+37 }
 0x16c   :  { %v1220_v56 = vpop.f32.mrf.mxu3  ;;  %v1549_v42 = vadd.f32 %v1506_v30, %v1301_v8  ;;  %v1519_v29 = vpop.f32.mrf.mxu1  ;;  %10102 = vtanh.f32 %v1224_v32  ;;  %v7573_v35 = vor.u32 %v9610_v6, %v7570_v7  ;;  %v7544_v8 = vld [vmem:[#allocation13 + $0x40] sm:$0xf]  ;;  %2173 = vmatpush.bf16.msrb.mxu1 %v7565_v62  ;;  %v9605_v30 = vld [vmem:[#allocation13 + $0x44] sm:$0xf]  ;;  %v1242_v12 = vor.u32 1.1754944e-38, %v1241_v22 }
 0x16d   :  { %v1550_v28 = vadd.f32 %v1519_v29, %v1302_v23  ;;  %v9607_v56 = vld [vmem:[#allocation13 + $0x4c] sm:$0xf0]  ;;  %v7546_v23 = vld [vmem:[#allocation13 + $0x50] sm:$0xf0]  ;;  %v7552_v29 = vld [vmem:[#allocation13 + $0x48] sm:$0xf] }
 0x16e   :  { %v7364_v37 = vmul.f32 -1.442695, %v1549_v42  ;;  %v1258_v42 = vand.u32 2147483647, %v11112_v18  ;;  %2186 = vmatpush.bf16.msrb.mxu2 %v7569_v48  ;;  %2199 = vmatpush.bf16.msrb.mxu3 %v7573_v35  ;;  %v7554_v62 = vld [vmem:[#allocation13 + $0x58] sm:$0xf0] }
 0x16f   :  { %v10097_v39 = vpop.eup %10096  ;;  %v7365_v17 = vmul.f32 -1.442695, %v1550_v28  ;;  %v9608_v28 = vld [vmem:[#allocation13 + $0x54] sm:$0xf0]  ;;  %v7528_v6 = vld [vmem:[#allocation13 + $0x20] sm:$0xf]  ;;  %v7557_v35 = vor.u32 %v9606_v36, %v7554_v62 }
 0x170   :  { %v11120_v5 = vpop.eup %10098  ;;  %v11123_v54 = vadd.f32 1.0, %v10097_v39  ;;  %10104 = vpow2.f32 %v7364_v37  ;;  %v7545_v39 = vor.u32 %v9607_v56, %v7544_v8  ;;  %v7549_v37 = vor.u32 %v9605_v30, %v7546_v23  ;;  %v9603_v48 = vld [vmem:[#allocation13 + $0x2c] sm:$0xf0]  ;;  %v7530_v8 = vld [vmem:[#allocation13 + $0x30] sm:$0xf0] }
 0x171   :  { %v11125_v26 = vpop.eup %10100  ;;  %v1231_v32 = vmul.f32 %v11120_v5, %v11107_v57  ;;  %v1261_v14 = vor.u32 1.1754944e-38, %v1260_v20  ;;  %vm1236_vm6 = vweird.f32 %v11120_v5  ;;  %v7553_v22 = vor.u32 %v9608_v28, %v7552_v29  ;;  %v7536_v56 = vld [vmem:[#allocation13 + $0x28] sm:$0xf]  ;;  %v9604_v30 = vld [vmem:[#allocation13 + $0x34] sm:$0xf0] }
 0x172   :  { %v1250_v24 = vmul.f32 %v11125_v26, %v11112_v18  ;;  %10106 = vrcp.f32 %v11123_v54  ;;  %v10103_v7 = vpop.eup %10102  ;;  %vm1255_vm7 = vweird.f32 %v11125_v26  ;;  %2161 = vmatpush.bf16.msrb.mxu0 %v7545_v39  ;;  %2174 = vmatpush.bf16.msrb.mxu1 %v7549_v37  ;;  %vm1237_vm8 = vmor %vm1235_vm3, %vm1236_vm6  ;;  %v7537_v36 = vor.u32 %v9604_v30, %v7536_v56  ;;  %v7520_v56 = vld [vmem:[#allocation13 + $0x8] sm:$0xf]  ;;  %v9600_v30 = vld [vmem:[#allocation13 + $0x14] sm:$0xf0] }
 0x173   :  { %v1232_v44 = vsub.f32 1.0, %v1231_v32  ;;  %10108 = vpow2.f32 %v7365_v17  ;;  %v11140_v46 = vpop.f32.mrf.mxu2  ;;  %v1508_v47 = vpop.f32.mrf.mxu0  ;;  %2187 = vmatpush.bf16.msrb.mxu2 %v7553_v22  ;;  %2200 = vmatpush.bf16.msrb.mxu3 %v7557_v35  ;;  %vm1256_vm9 = vmor %vm1254_vm4, %vm1255_vm7  ;;  %vm1259_vm10 = vcmp.eq.f32.partialorder %v1258_v42, 8.507059e+37  ;;  %v7514_v22 = vld [vmem:[#allocation13 + $0x10] sm:$0xf0]  ;;  %vm1274_vm12 = vweird.f32 %v11123_v54 }
 0x174   :  { %v1251_v38 = vsub.f32 1.0, %v1250_v24  ;;  %v1545_v49 = vpop.f32.mrf.mxu3  ;;  %v1521_v43 = vpop.f32.mrf.mxu1  ;;  %v7529_v47 = vor.u32 %v9603_v48, %v7528_v6 }
 0x175   :  { %v1233_v32 = vmul.f32 %v11120_v5, %v1232_v44  ;;  %v1552_v17 = vadd.f32 %v1545_v49, %v1304_v9  ;;  %v7533_v9 = vor.u32 %v9601_v63, %v7530_v8  ;;  %v9602_v43 = vld [vmem:[#allocation13 + $0x2c] sm:$0xf]  ;;  %v7538_v49 = vld [vmem:[#allocation13 + $0x38] sm:$0xf0]  ;;  %v1303_v8 = vunpack.c.l.bf16 %v11117_v21 }
 0x176   :  { %v1252_v24 = vmul.f32 %v11125_v26, %v1251_v38  ;;  %v10105_v20 = vpop.eup %10104  ;;  %v7541_v38 = vor.u32 %v9602_v43, %v7538_v49  ;;  %2162 = vmatpush.bf16.msrb.mxu0 %v7529_v47  ;;  %v7522_v47 = vld [vmem:[#allocation13 + $0x18] sm:$0xf0] }
 0x177   :  { %v1234_v23 = vadd.f32 %v11120_v5, %v1233_v32  ;;  %v7366_v44 = vmul.f32 -1.442695, %v1552_v17  ;;  %v11154_v28 = vadd.f32 1.0, %v10105_v20  ;;  %2175 = vmatpush.bf16.msrb.mxu1 %v7533_v9  ;;  %v9599_v32 = vld [vmem:[#allocation13 + $0xc] sm:$0xf0]  ;;  %2188 = vmatpush.bf16.msrb.mxu2 %v7537_v36  ;;  %v1551_v43 = vadd.f32 %v11140_v46, %v1303_v8 }
 0x178   :  { %v11147_v53 = vpop.eup %10106  ;;  %v1253_v29 = vadd.f32 %v11125_v26, %v1252_v24  ;;  %v9597_v24 = vld [vmem:[#allocation13 + $0x4] sm:$0xf]  ;;  %2201 = vmatpush.bf16.msrb.mxu3 %v7541_v38  ;;  %v7521_v36 = vor.u32 %v9600_v30, %v7520_v56 }
 0x179   :  { %v10109_v39 = vpop.eup %10108  ;;  %v1238_v63 = vsel %vm1237_vm8, %v11120_v5, %v1234_v23  ;;  %v1270_v57 = vmul.f32 %v11147_v53, %v11123_v54  ;;  %10110 = vpow2.f32 %v7366_v44  ;;  %v7512_v5 = vld [vmem:[#allocation13] sm:$0xf]  ;;  %v7517_v23 = vor.u32 %v9597_v24, %v7514_v22  ;;  %v9598_v44 = vld [vmem:[#allocation13 + $0xc] sm:$0xf]  ;;  %v11206_v22 = vpop.permute.xlu0 %1291 }
 0x17a   :  { %v1243_v37 = vsel %vm11136_vm5, %v1242_v12, %v1238_v63  ;;  %v1257_v62 = vsel %vm1256_vm9, %v11125_v26, %v1253_v29  ;;  %10112 = vrcp.f32 %v11154_v28  ;;  %v11167_v6 = vadd.f32 1.0, %v10109_v39  ;;  %12311 = vst [vmem:[#allocation40_spill] sm:$0xff] %v11206_v22 }
 0x17b   :  { %v1262_v18 = vsel %vm1259_vm10, %v1261_v14, %v1257_v62  ;;  %v1285_v17 = vmul.f32 %v10103_v7, %v1243_v37  ;;  %v1271_v42 = vsub.f32 1.0, %v1270_v57  ;;  %v1534_v48 = vpop.f32.mrf.mxu2  ;;  %v1280_v12 = vand.u32 2147483648, %v11123_v54  ;;  %2176 = vmatpush.bf16.msrb.mxu1 %v7517_v23  ;;  %2189 = vmatpush.bf16.msrb.mxu2 %v7521_v36 }
 0x17c   :  { %v1284_v35 = vmul.f32 0.0, %v1262_v18  ;;  %10114 = vrcp.f32 %v11167_v6  ;;  %v1547_v61 = vpop.f32.mrf.mxu3  ;;  %v1278_v7 = vand.u32 2147483647, %v11123_v54  ;;  %v7513_v20 = vor.u32 %v9599_v32, %v7512_v5 }
 0x17d   :  { %v1272_v26 = vmul.f32 %v11147_v53, %v1271_v42  ;;  %vm1275_vm11 = vweird.f32 %v11147_v53  ;;  %v7525_v39 = vor.u32 %v9598_v44, %v7522_v47  ;;  %v1281_v46 = vor.u32 1.1754944e-38, %v1280_v12  ;;  %v11203_v42 = vld [vmem:[%s12299_s2] sm:$0xff] }
 0x17e   :  { %v11173_v14 = vadd.f32 %v1285_v17, %v1284_v35  ;;  %2163 = vmatpush.bf16.msrb.mxu0 %v7513_v20  ;;  %vm11184_vm13 = vmor %vm1274_vm12, %vm1275_vm11  ;;  %vm11189_vm14 = vcmp.eq.f32.partialorder %v1278_v7, 8.507059e+37  ;;  %v1587_v32 = vand.u32 2147483648, %v11167_v6  ;;  %v1566_v18 = vand.u32 2147483647, %v11154_v28 }
 0x17f   :  { %v10111_v9 = vpop.eup %10110  ;;  %v1273_v49 = vadd.f32 %v11147_v53, %v1272_v26  ;;  %2202 = vmatpush.bf16.msrb.mxu3 %v7525_v39  ;;  %v1568_v17 = vand.u32 2147483648, %v11154_v28  ;;  %vm1626_vm15 = vcmp.gt.s32.totalorder %v11203_v42, 1  ;;  %vm1562_vm1 = vweird.f32 %v11154_v28 }
 0x180   :  { %v10113_v29 = vpop.eup %10112  ;;  %10116 = vtanh.f32 %v11173_v14  ;;  %v11180_v21 = vadd.f32 1.0, %v10111_v9  ;;  %v1585_v26 = vand.u32 2147483647, %v11167_v6  ;;  %vm1293_vm2 = vcmp.eq.s32.totalorder %v11206_v22, 1 }
 0x181   :  { %v1558_v38 = vmul.f32 %v10113_v29, %v11154_v28  ;;  %v1277_v54 = vsel %vm11184_vm13, %v11147_v53, %v1273_v49  ;;  %vm1563_vm0 = vweird.f32 %v10113_v29  ;;  %v12312_v53 = vmov 0   ;;  %vm11221_vm8 = vmpackc.low %vm1293_vm2, %vm1293_vm2 }
 0x182   :  { %v10115_v63 = vpop.eup %10114  ;;  %10118 = vrcp.f32 %v11180_v21  ;;  %v1946_v35 = vsel %vm1626_vm15, 1, %v12312_v53  ;;  %v1282_v12 = vsel %vm11189_vm14, %v1281_v46, %v1277_v54  ;;  %vm1581_vm4 = vweird.f32 %v11167_v6  ;;  %vm1564_vm5 = vmor %vm1562_vm1, %vm1563_vm0 }
 0x183   :  { %v1559_v62 = vsub.f32 1.0, %v1558_v38  ;;  %v1577_v5 = vmul.f32 %v10115_v63, %v11167_v6  ;;  %10120 = vtanh.f32 %v1551_v43  ;;  %1948 = vperm.xlu1 %10087, %v1946_v35   ;;  %vm1582_vm3 = vweird.f32 %v10115_v63  ;;  %v11250_v35 = vpop.permute.xlu0 %1618  ;;  %v9658_v43 = vld [vmem:[#allocation11 + $0xec] sm:$0xf] }
 0x184   :  { %v1588_v20 = vor.u32 1.1754944e-38, %v1587_v32  ;;  %v1569_v23 = vor.u32 1.1754944e-38, %v1568_v17  ;;  %vm1956_vm6 = vcmp.gt.s32.totalorder %v11203_v42, 6  ;;  %vm1567_vm7 = vcmp.eq.f32.partialorder %v1566_v18, 8.507059e+37  ;;  %vm1583_vm9 = vmor %vm1581_vm4, %vm1582_vm3 }
 0x185   :  { %v1578_v48 = vsub.f32 1.0, %v1577_v5  ;;  %v1560_v24 = vmul.f32 %v10113_v29, %v1559_v62  ;;  %vm1586_vm10 = vcmp.eq.f32.partialorder %v1585_v26, 8.507059e+37  ;;  %v2275_v57 = vsel %vm1956_vm6, 1, %v12312_v53 }
 0x186   :  { %v10117_v61 = vpop.eup %10116  ;;  %vm3277_vm12 = vcmp.gt.s32.totalorder %v11203_v42, 4  ;;  %v1607_v54 = vand.u32 2147483648, %v11180_v21  ;;  %vm1601_vm13 = vweird.f32 %v11180_v21  ;;  %v1605_v32 = vand.u32 2147483647, %v11180_v21 }
 0x187   :  { %v1579_v8 = vmul.f32 %v10115_v63, %v1578_v48  ;;  %v1561_v56 = vadd.f32 %v10113_v29, %v1560_v24  ;;  %v1288_v30 = vmul.f32 %v10117_v61, %v1282_v12  ;;  %v3597_v18 = vsel %vm3277_vm12, 1, %v12312_v53 }
 0x188   :  { %v10119_v7 = vpop.eup %10118  ;;  %v1608_v48 = vor.u32 1.1754944e-38, %v1607_v54  ;;  %vm1606_vm15 = vcmp.eq.f32.partialorder %v1605_v32, 8.507059e+37  ;;  %vm1620_vm0 = vcmp.eq.s32.totalorder %v11250_v35, 1  ;;  %v9654_v32 = vld [vmem:[#allocation11 + $0xcc] sm:$0xf] }
 0x189   :  { %v10121_v28 = vpop.eup %10120  ;;  %v1565_v44 = vsel %vm1564_vm5, %v10113_v29, %v1561_v56  ;;  %v1580_v47 = vadd.f32 %v10115_v63, %v1579_v8  ;;  %v1597_v9 = vmul.f32 %v10119_v7, %v11180_v21  ;;  %v11228_v49 = vsel %vm1293_vm2, %v1288_v30, 0.0  ;;  %vm7638_vm1 = vmpackc.low %vm1620_vm0, %vm1620_vm0  ;;  %v7767_v56 = vld [vmem:[#allocation11 + $0xe0] sm:$0xf] }
 0x18a   :  { %v1570_v6 = vsel %vm1567_vm7, %v1569_v23, %v1565_v44  ;;  %v7496_v29 = vpack.c.bf16 %v1288_v30, %v1288_v30  ;;  %1295 = vst [vmem:[#allocation23] sm:$0xff] %v11228_v49  ;;  %vm1602_vm11 = vweird.f32 %v10119_v7  ;;  %v9659_v30 = vld [vmem:[#allocation11 + $0xec] sm:$0xf0]  ;;  %v7769_v23 = vld [vmem:[#allocation11 + $0xf0] sm:$0xf0] }
 0x18b   :  { %v1584_v36 = vsel %vm1583_vm9, %v10115_v63, %v1580_v47  ;;  %v1612_v38 = vmul.f32 %v10121_v28, %v1570_v6  ;;  %v1598_v39 = vsub.f32 1.0, %v1597_v9  ;;  %2277 = vperm.xlu1 %10087, %v2275_v57   ;;  %vm1603_vm14 = vmor %vm1601_vm13, %vm1602_vm11  ;;  %v7775_v28 = vld [vmem:[#allocation11 + $0xe8] sm:$0xf]  ;;  %v9660_v44 = vld [vmem:[#allocation11 + $0xf4] sm:$0xf0] }
 0x18c   :  { %v1589_v46 = vsel %vm1586_vm10, %v1588_v20, %v1584_v36  ;;  %7497 = vmatmul.msk.bf16.vlgmr.msra.gmra.mxu0 %vm11221_vm8, %v7496_v29  ;;  %7500 = vmatmul.msk.bf16.vlgmr.msra.gmra.mxu1 %vm11221_vm8, %v7496_v29  ;;  %v7768_v20 = vor.u32 %v9659_v30, %v7767_v56  ;;  %v7776_v9 = vor.u32 %v9660_v44, %v7775_v28  ;;  %v7777_v6 = vld [vmem:[#allocation11 + $0xf8] sm:$0xf0]  ;;  %v7751_v36 = vld [vmem:[#allocation11 + $0xc0] sm:$0xf]  ;;  %v9652_v56 = vld [vmem:[#allocation11 + $0xb4] sm:$0xf0] }
 0x18d   :  { %v1611_v37 = vmul.f32 0.0, %v1589_v46  ;;  %v1599_v62 = vmul.f32 %v10119_v7, %v1598_v39  ;;  %7503 = vmatmul.msk.bf16.vlgmr.msra.gmra.mxu2 %vm11221_vm8, %v7496_v29  ;;  %7506 = vmatmul.msk.bf16.vlgmr.msra.gmra.mxu3 %vm11221_vm8, %v7496_v29  ;;  %v7780_v29 = vor.u32 %v9658_v43, %v7777_v6  ;;  %v9653_v39 = vld [vmem:[#allocation11 + $0xc4] sm:$0xf]  ;;  %v7753_v46 = vld [vmem:[#allocation11 + $0xd0] sm:$0xf0] }
 0x18e   :  { %2487 = vmatpush.bf16.msra.mxu0 %v7768_v20  ;;  %2513 = vmatpush.bf16.msra.mxu2 %v7776_v9  ;;  %v9650_v20 = vld [vmem:[#allocation11 + $0xac] sm:$0xf]  ;;  %v7719_v44 = vld [vmem:[#allocation11 + $0x80] sm:$0xf]  ;;  %v9645_v9 = vld [vmem:[#allocation11 + $0x84] sm:$0xf] }
 0x18f   :  { %v11242_v63 = vadd.f32 %v1612_v38, %v1611_v37  ;;  %v1600_v5 = vadd.f32 %v10119_v7, %v1599_v62  ;;  %2526 = vmatpush.bf16.msra.mxu3 %v7780_v29  ;;  %v9655_v38 = vld [vmem:[#allocation11 + $0xcc] sm:$0xf0]  ;;  %v7759_v37 = vld [vmem:[#allocation11 + $0xc8] sm:$0xf]  ;;  %v9656_v62 = vld [vmem:[#allocation11 + $0xd4] sm:$0xf0] }
 0x190   :  { %v7752_v57 = vor.u32 %v9655_v38, %v7751_v36  ;;  %v7760_v54 = vor.u32 %v9656_v62, %v7759_v37  ;;  %v7721_v6 = vld [vmem:[#allocation11 + $0x90] sm:$0xf0]  ;;  %v7727_v29 = vld [vmem:[#allocation11 + $0x88] sm:$0xf]  ;;  %v9648_v36 = vld [vmem:[#allocation11 + $0x94] sm:$0xf0] }
 0x191   :  { %10122 = vtanh.f32 %v11242_v63  ;;  %v1604_v17 = vsel %vm1603_vm14, %v10119_v7, %v1600_v5  ;;  %v9657_v7 = vld [vmem:[#allocation11 + $0xe4] sm:$0xf]  ;;  %v7756_v5 = vor.u32 %v9653_v39, %v7753_v46  ;;  %v7724_v38 = vor.u32 %v9645_v9, %v7721_v6  ;;  %v7729_v46 = vld [vmem:[#allocation11 + $0x98] sm:$0xf0]  ;;  %v7703_v62 = vld [vmem:[#allocation11 + $0x60] sm:$0xf] }
 0x192   :  { %v1609_v61 = vsel %vm1606_vm15, %v1608_v48, %v1604_v17  ;;  %v7772_v47 = vor.u32 %v9657_v7, %v7769_v23  ;;  %2488 = vmatpush.bf16.msra.mxu0 %v7752_v57  ;;  %2514 = vmatpush.bf16.msra.mxu2 %v7760_v54  ;;  %v7735_v48 = vld [vmem:[#allocation11 + $0xa0] sm:$0xf]  ;;  %v7745_v23 = vld [vmem:[#allocation11 + $0xb8] sm:$0xf0]  ;;  %v7728_v39 = vor.u32 %v9648_v36, %v7727_v29  ;;  %v9646_v57 = vld [vmem:[#allocation11 + $0x8c] sm:$0xf] }
 0x193   :  { %3599 = vperm.xlu1 %10087, %v3597_v18   ;;  %v7761_v18 = vld [vmem:[#allocation11 + $0xd8] sm:$0xf0]  ;;  %v7748_v28 = vor.u32 %v9650_v20, %v7745_v23  ;;  %v7732_v37 = vor.u32 %v9646_v57, %v7729_v46  ;;  %v9641_v54 = vld [vmem:[#allocation11 + $0x64] sm:$0xf]  ;;  %v7689_v23 = vld [vmem:[#allocation11 + $0x50] sm:$0xf0] }
 0x194   :  { %2500 = vmatpush.bf16.msra.mxu1 %v7772_v47  ;;  %v7764_v17 = vor.u32 %v9654_v32, %v7761_v18  ;;  %v9647_v47 = vld [vmem:[#allocation11 + $0x8c] sm:$0xf0]  ;;  %v7705_v18 = vld [vmem:[#allocation11 + $0x70] sm:$0xf0]  ;;  %v7697_v6 = vld [vmem:[#allocation11 + $0x58] sm:$0xf0] }
 0x195   :  { %v7720_v43 = vor.u32 %v9647_v47, %v7719_v44  ;;  %v9640_v44 = vld [vmem:[#allocation11 + $0x54] sm:$0xf0]  ;;  %v7671_v36 = vld [vmem:[#allocation11 + $0x20] sm:$0xf]  ;;  %v7673_v46 = vld [vmem:[#allocation11 + $0x30] sm:$0xf0] }
 0x196   :  { %2527 = vmatpush.bf16.msra.mxu3 %v7764_v17  ;;  %v7711_v17 = vld [vmem:[#allocation11 + $0x68] sm:$0xf] }
 0x197   :  { %v10123_v24 = vpop.eup %10122 }
 0x198   :  { %v1615_v26 = vmul.f32 %v10123_v24, %v1609_v61  ;;  %2501 = vmatpush.bf16.msra.mxu1 %v7756_v5  ;;  %v9651_v24 = vld [vmem:[#allocation11 + $0xac] sm:$0xf0]  ;;  %v9649_v61 = vld [vmem:[#allocation11 + $0xa4] sm:$0xf] }
 0x199   :  { %v9643_v5 = vld [vmem:[#allocation11 + $0x6c] sm:$0xf0] }
 0x19a   :  { %v11255_v12 = vsel %vm1620_vm0, %v1615_v26, 0.0  ;;  %v7639_v8 = vpack.c.bf16 %v1615_v26, %v1615_v26  ;;  %v7736_v26 = vor.u32 %v9651_v24, %v7735_v48  ;;  %2528 = vmatpush.bf16.msra.mxu3 %v7748_v28  ;;  %v7704_v32 = vor.u32 %v9643_v5, %v7703_v62  ;;  %v9644_v48 = vld [vmem:[#allocation11 + $0x74] sm:$0xf0]  ;;  %v7695_v28 = vld [vmem:[#allocation11 + $0x48] sm:$0xf] }
 0x19b   :  { %v1622_v21 = vpack.c.bf16 %v11255_v12, %v11255_v12  ;;  %v7708_v24 = vor.u32 %v9641_v54, %v7705_v18  ;;  %v7696_v9 = vor.u32 %v9640_v44, %v7695_v28  ;;  %v9636_v62 = vld [vmem:[#allocation11 + $0x34] sm:$0xf0]  ;;  %v7681_v18 = vld [vmem:[#allocation11 + $0x38] sm:$0xf0] }
 0x19c   :  { %7640 = vmatmul.msk.bf16.vlgmr.msrb.gmra.mxu0 %vm7638_vm1, %v7639_v8  ;;  %7643 = vmatmul.msk.bf16.vlgmr.msrb.gmra.mxu1 %vm7638_vm1, %v7639_v8 }
 0x19d   :  { %1624 = vst [vmem:[#allocation4 + $0x1c] sm:$0xf] %v1622_v21  ;;  %7646 = vmatmul.msk.bf16.vlgmr.msrb.gmra.mxu2 %vm7638_vm1, %v7639_v8  ;;  %7649 = vmatmul.msk.bf16.vlgmr.msrb.gmra.mxu3 %vm7638_vm1, %v7639_v8  ;;  %v7737_v8 = vld [vmem:[#allocation11 + $0xb0] sm:$0xf0]  ;;  %v7743_v21 = vld [vmem:[#allocation11 + $0xa8] sm:$0xf] }
 0x19e   :  { %v7740_v30 = vor.u32 %v9649_v61, %v7737_v8  ;;  %v7744_v7 = vor.u32 %v9652_v56, %v7743_v21  ;;  %2489 = vmatpush.bf16.msra.mxu0 %v7736_v26  ;;  %2529 = vmatpush.bf16.msra.mxu3 %v7732_v37  ;;  %v7712_v61 = vor.u32 %v9644_v48, %v7711_v17  ;;  %v9642_v26 = vld [vmem:[#allocation11 + $0x6c] sm:$0xf]  ;;  %v7713_v8 = vld [vmem:[#allocation11 + $0x78] sm:$0xf0]  ;;  %v7687_v56 = vld [vmem:[#allocation11 + $0x40] sm:$0xf]  ;;  %v1630_v48 = vunpack.c.l.bf16 %v10963_v33 }
 0x19f   :  { %v7716_v21 = vor.u32 %v9642_v26, %v7713_v8  ;;  %v7679_v37 = vld [vmem:[#allocation11 + $0x28] sm:$0xf]  ;;  %v9631_v26 = vld [vmem:[#allocation11 + $0xc] sm:$0xf0]  ;;  %v9629_v8 = vld [vmem:[#allocation11 + $0x4] sm:$0xf] }
 0x1a0   :  { %2502 = vmatpush.bf16.msra.mxu1 %v7740_v30  ;;  %2515 = vmatpush.bf16.msra.mxu2 %v7744_v7  ;;  %v9639_v30 = vld [vmem:[#allocation11 + $0x4c] sm:$0xf0]  ;;  %v9637_v7 = vld [vmem:[#allocation11 + $0x44] sm:$0xf]  ;;  %v7680_v54 = vor.u32 %v9636_v62, %v7679_v37  ;;  %vm2286_vm1 = vcmp.gt.s32.totalorder %v11203_v42, 2 }
 0x1a1   :  { %v7688_v20 = vor.u32 %v9639_v30, %v7687_v56  ;;  %v7692_v47 = vor.u32 %v9637_v7, %v7689_v23  ;;  %v7657_v7 = vld [vmem:[#allocation11 + $0x10] sm:$0xf0]  ;;  %v9632_v23 = vld [vmem:[#allocation11 + $0x14] sm:$0xf0] }
 0x1a2   :  { %2490 = vmatpush.bf16.msra.mxu0 %v7720_v43  ;;  %2530 = vmatpush.bf16.msra.mxu3 %v7716_v21  ;;  %v9638_v43 = vld [vmem:[#allocation11 + $0x4c] sm:$0xf] }
 0x1a3   :  { %v7700_v29 = vor.u32 %v9638_v43, %v7697_v6  ;;  %v9630_v43 = vld [vmem:[#allocation11 + $0xc] sm:$0xf]  ;;  %v7665_v6 = vld [vmem:[#allocation11 + $0x18] sm:$0xf0] }
 0x1a4   :  { %2503 = vmatpush.bf16.msra.mxu1 %v7724_v38  ;;  %2516 = vmatpush.bf16.msra.mxu2 %v7728_v39  ;;  %v9635_v38 = vld [vmem:[#allocation11 + $0x2c] sm:$0xf0]  ;;  %v9633_v39 = vld [vmem:[#allocation11 + $0x24] sm:$0xf] }
 0x1a5   :  { %v7672_v57 = vor.u32 %v9635_v38, %v7671_v36  ;;  %v7676_v5 = vor.u32 %v9633_v39, %v7673_v46  ;;  %v9691_v36 = vld [vmem:[#allocation13 + $0xec] sm:$0xf0]  ;;  %v9689_v38 = vld [vmem:[#allocation13 + $0xe4] sm:$0xf]  ;;  %v7900_v39 = vld [vmem:[#allocation13 + $0xf0] sm:$0xf0] }
 0x1a6   :  { %2491 = vmatpush.bf16.msra.mxu0 %v7704_v32  ;;  %2531 = vmatpush.bf16.msra.mxu3 %v7700_v29  ;;  %v9634_v32 = vld [vmem:[#allocation11 + $0x2c] sm:$0xf]  ;;  %v7898_v29 = vld [vmem:[#allocation13 + $0xe0] sm:$0xf]  ;;  %v7903_v62 = vor.u32 %v9689_v38, %v7900_v39  ;;  %v9683_v38 = vld [vmem:[#allocation13 + $0xac] sm:$0xf0] }
 0x1a7   :  { %v7684_v17 = vor.u32 %v9634_v32, %v7681_v18  ;;  %v7899_v37 = vor.u32 %v9691_v36, %v7898_v29  ;;  %v9690_v32 = vld [vmem:[#allocation13 + $0xec] sm:$0xf]  ;;  %v7908_v18 = vld [vmem:[#allocation13 + $0xf8] sm:$0xf0]  ;;  %v7866_v36 = vld [vmem:[#allocation13 + $0xa0] sm:$0xf] }
 0x1a8   :  { %2504 = vmatpush.bf16.msra.mxu1 %v7708_v24  ;;  %2517 = vmatpush.bf16.msra.mxu2 %v7712_v61  ;;  %v1631_v24 = vunpack.c.h.bf16 %v10963_v33  ;;  %v7655_v61 = vld [vmem:[#allocation11] sm:$0xf]  ;;  %v7668_v33 = vor.u32 %v9630_v43, %v7665_v6  ;;  %v9681_v39 = vld [vmem:[#allocation13 + $0xa4] sm:$0xf] }
 0x1a9   :  { %v7656_v30 = vor.u32 %v9631_v26, %v7655_v61  ;;  %v9687_v61 = vld [vmem:[#allocation13 + $0xcc] sm:$0xf0]  ;;  %v1633_v26 = vunpack.c.h.bf16 %v10970_v45 }
 0x1aa   :  { %2492 = vmatpush.bf16.msra.mxu0 %v7688_v20  ;;  %2532 = vmatpush.bf16.msra.mxu3 %v7684_v17  ;;  %v7663_v20 = vld [vmem:[#allocation11 + $0x8] sm:$0xf] }
 0x1ac   :  { %2505 = vmatpush.bf16.msra.mxu1 %v7692_v47  ;;  %2518 = vmatpush.bf16.msra.mxu2 %v7696_v9  ;;  %v7660_v47 = vor.u32 %v9629_v8, %v7657_v7  ;;  %v7664_v9 = vor.u32 %v9632_v23, %v7663_v20 }
 0x1ae   :  { %2493 = vmatpush.bf16.msra.mxu0 %v7672_v57  ;;  %2533 = vmatpush.bf16.msra.mxu3 %v7668_v33 }
 0x1b0   :  { %2506 = vmatpush.bf16.msra.mxu1 %v7676_v5  ;;  %2519 = vmatpush.bf16.msra.mxu2 %v7680_v54  ;;  %v7906_v5 = vld [vmem:[#allocation13 + $0xe8] sm:$0xf]  ;;  %v9692_v54 = vld [vmem:[#allocation13 + $0xf4] sm:$0xf0] }
 0x1b1   :  { %v7907_v17 = vor.u32 %v9692_v54, %v7906_v5 }
 0x1b2   :  { %2494 = vmatpush.bf16.msra.mxu0 %v7656_v30  ;;  %v7890_v30 = vld [vmem:[#allocation13 + $0xc8] sm:$0xf] }
 0x1b4   :  { %2507 = vmatpush.bf16.msra.mxu1 %v7660_v47  ;;  %2520 = vmatpush.bf16.msra.mxu2 %v7664_v9  ;;  %v7892_v47 = vld [vmem:[#allocation13 + $0xd8] sm:$0xf0] }
 0x1b6   :  { %2817 = vmatpush.bf16.msrb.mxu0 %v7899_v37  ;;  %v7874_v37 = vld [vmem:[#allocation13 + $0xa8] sm:$0xf] }
 0x1b8   :  { %2830 = vmatpush.bf16.msrb.mxu1 %v7903_v62  ;;  %2843 = vmatpush.bf16.msrb.mxu2 %v7907_v17  ;;  %v9684_v62 = vld [vmem:[#allocation13 + $0xb4] sm:$0xf0] }
 0x209   :  { %v1836_v21 = vpop.f32.mrf.mxu0  ;;  %v1849_v56 = vpop.f32.mrf.mxu1 }
 0x20a   :  { %v1879_v28 = vadd.f32 %v1836_v21, %v1630_v48  ;;  %v1880_v44 = vadd.f32 %v1849_v56, %v1631_v24  ;;  %v7911_v48 = vor.u32 %v9690_v32, %v7908_v18  ;;  %v7882_v24 = vld [vmem:[#allocation13 + $0xc0] sm:$0xf]  ;;  %v9685_v21 = vld [vmem:[#allocation13 + $0xc4] sm:$0xf]  ;;  %v7884_v56 = vld [vmem:[#allocation13 + $0xd0] sm:$0xf0] }
 0x20b   :  { %v7883_v8 = vor.u32 %v9687_v61, %v7882_v24  ;;  %v7887_v23 = vor.u32 %v9685_v21, %v7884_v56  ;;  %v9682_v32 = vld [vmem:[#allocation13 + $0xac] sm:$0xf]  ;;  %v7876_v18 = vld [vmem:[#allocation13 + $0xb8] sm:$0xf0]  ;;  %v7850_v21 = vld [vmem:[#allocation13 + $0x80] sm:$0xf] }
 0x20c   :  { %v7507_v57 = vmul.f32 -1.442695, %v1879_v28  ;;  %v7508_v46 = vmul.f32 -1.442695, %v1880_v44  ;;  %2856 = vmatpush.bf16.msrb.mxu3 %v7911_v48  ;;  %v9688_v28 = vld [vmem:[#allocation13 + $0xd4] sm:$0xf0]  ;;  %v7875_v48 = vor.u32 %v9684_v62, %v7874_v37  ;;  %v7879_v24 = vor.u32 %v9682_v32, %v7876_v18 }
 0x20d   :  { %v9686_v44 = vld [vmem:[#allocation13 + $0xcc] sm:$0xf]  ;;  %v7891_v29 = vor.u32 %v9688_v28, %v7890_v30  ;;  %2818 = vmatpush.bf16.msrb.mxu0 %v7883_v8  ;;  %2831 = vmatpush.bf16.msrb.mxu1 %v7887_v23  ;;  %v9679_v8 = vld [vmem:[#allocation13 + $0x8c] sm:$0xf0]  ;;  %v9677_v23 = vld [vmem:[#allocation13 + $0x84] sm:$0xf] }
 0x20e   :  { %10124 = vpow2.f32 %v7507_v57  ;;  %v7895_v33 = vor.u32 %v9686_v44, %v7892_v47  ;;  %v7867_v57 = vor.u32 %v9683_v38, %v7866_v36  ;;  %v7851_v30 = vor.u32 %v9679_v8, %v7850_v21  ;;  %v7834_v62 = vld [vmem:[#allocation13 + $0x60] sm:$0xf] }
 0x20f   :  { %10126 = vpow2.f32 %v7508_v46  ;;  %v7868_v46 = vld [vmem:[#allocation13 + $0xb0] sm:$0xf0]  ;;  %2844 = vmatpush.bf16.msrb.mxu2 %v7891_v29  ;;  %v1960_v47 = vunpack.c.l.bf16 %v11084_v60  ;;  %v9680_v29 = vld [vmem:[#allocation13 + $0x94] sm:$0xf0] }
 0x210   :  { %v1862_v7 = vpop.f32.mrf.mxu2  ;;  %v1875_v20 = vpop.f32.mrf.mxu3  ;;  %v7871_v54 = vor.u32 %v9681_v39, %v7868_v46  ;;  %2857 = vmatpush.bf16.msrb.mxu3 %v7895_v33  ;;  %v11277_v33 = vsel %vm1293_vm2, %v11173_v14, 0.0  ;;  %v9678_v39 = vld [vmem:[#allocation13 + $0x8c] sm:$0xf] }
 0x211   :  { %v1882_v9 = vadd.f32 %v1875_v20, %v1633_v26  ;;  %v1838_v43 = vpop.f32.mrf.mxu0  ;;  %v1851_v6 = vpop.f32.mrf.mxu1  ;;  %2819 = vmatpush.bf16.msrb.mxu0 %v7867_v57  ;;  %v1632_v20 = vunpack.c.l.bf16 %v10970_v45 }
 0x212   :  { %2832 = vmatpush.bf16.msrb.mxu1 %v7871_v54  ;;  %v7852_v43 = vld [vmem:[#allocation13 + $0x90] sm:$0xf0]  ;;  %v7858_v6 = vld [vmem:[#allocation13 + $0x88] sm:$0xf] }
 0x213   :  { %v7509_v5 = vmul.f32 -1.442695, %v1882_v9  ;;  %v1961_v9 = vunpack.c.h.bf16 %v11084_v60  ;;  %2845 = vmatpush.bf16.msrb.mxu2 %v7875_v48  ;;  %v1881_v45 = vadd.f32 %v1862_v7, %v1632_v20  ;;  %v7860_v60 = vld [vmem:[#allocation13 + $0x98] sm:$0xf0]  ;;  %v7855_v54 = vor.u32 %v9677_v23, %v7852_v43  ;;  %v9673_v48 = vld [vmem:[#allocation13 + $0x64] sm:$0xf] }
 0x214   :  { %v10125_v17 = vpop.eup %10124  ;;  %2858 = vmatpush.bf16.msrb.mxu3 %v7879_v24  ;;  %v7859_v32 = vor.u32 %v9680_v29, %v7858_v6  ;;  %v7863_v18 = vor.u32 %v9678_v39, %v7860_v60  ;;  %v7836_v24 = vld [vmem:[#allocation13 + $0x70] sm:$0xf0]  ;;  %v9674_v6 = vld [vmem:[#allocation13 + $0x6c] sm:$0xf]  ;;  %v7844_v29 = vld [vmem:[#allocation13 + $0x78] sm:$0xf0] }
 0x215   :  { %v10127_v61 = vpop.eup %10126  ;;  %v11265_v26 = vadd.f32 1.0, %v10125_v17  ;;  %10128 = vpow2.f32 %v7509_v5  ;;  %2820 = vmatpush.bf16.msrb.mxu0 %v7851_v30  ;;  %v9675_v17 = vld [vmem:[#allocation13 + $0x6c] sm:$0xf0]  ;;  %v7839_v23 = vor.u32 %v9673_v48, %v7836_v24  ;;  %v7818_v39 = vld [vmem:[#allocation13 + $0x40] sm:$0xf] }
 0x216   :  { %v11267_v56 = vadd.f32 1.0, %v10127_v61  ;;  %v7835_v21 = vor.u32 %v9675_v17, %v7834_v62  ;;  %2833 = vmatpush.bf16.msrb.mxu1 %v7855_v54  ;;  %v7826_v17 = vld [vmem:[#allocation13 + $0x48] sm:$0xf]  ;;  %v7812_v62 = vld [vmem:[#allocation13 + $0x38] sm:$0xf0] }
 0x217   :  { %10130 = vrcp.f32 %v11265_v26  ;;  %v1896_v57 = vand.u32 2147483647, %v11265_v26  ;;  %v1898_v30 = vand.u32 2147483648, %v11265_v26  ;;  %2846 = vmatpush.bf16.msrb.mxu2 %v7859_v32  ;;  %vm1892_vm3 = vweird.f32 %v11265_v26 }
 0x218   :  { %10132 = vrcp.f32 %v11267_v56  ;;  %v1864_v28 = vpop.f32.mrf.mxu2  ;;  %v1877_v44 = vpop.f32.mrf.mxu3  ;;  %v1917_v20 = vand.u32 2147483648, %v11267_v56  ;;  %v1915_v43 = vand.u32 2147483647, %v11267_v56  ;;  %2859 = vmatpush.bf16.msrb.mxu3 %v7863_v18  ;;  %v7820_v18 = vld [vmem:[#allocation13 + $0x50] sm:$0xf0]  ;;  %vm1911_vm5 = vweird.f32 %v11267_v56 }
 0x219   :  { %v2165_v36 = vpop.f32.mrf.mxu0  ;;  %v2178_v38 = vpop.f32.mrf.mxu1  ;;  %10134 = vtanh.f32 %v1881_v45  ;;  %v7842_v28 = vld [vmem:[#allocation13 + $0x68] sm:$0xf]  ;;  %v9676_v44 = vld [vmem:[#allocation13 + $0x74] sm:$0xf0]  ;;  %2821 = vmatpush.bf16.msrb.mxu0 %v7835_v21  ;;  %vm11298_vm4 = vcmp.eq.f32.partialorder %v1896_v57, 8.507059e+37  ;;  %v1899_v24 = vor.u32 1.1754944e-38, %v1898_v30 }
 0x21a   :  { %v2208_v46 = vadd.f32 %v2165_v36, %v1960_v47  ;;  %v2209_v37 = vadd.f32 %v2178_v38, %v1961_v9  ;;  %v1963_v36 = vunpack.c.h.bf16 %v11092_v51  ;;  %v11296_v38 = vpop.permute.xlu1 %1948  ;;  %v7843_v32 = vor.u32 %v9676_v44, %v7842_v28  ;;  %2834 = vmatpush.bf16.msrb.mxu1 %v7839_v23  ;;  %v9670_v57 = vld [vmem:[#allocation13 + $0x4c] sm:$0xf]  ;;  %v7828_v44 = vld [vmem:[#allocation13 + $0x58] sm:$0xf0] }
 0x21b   :  { %v10129_v5 = vpop.eup %10128  ;;  %vm1950_vm7 = vcmp.eq.s32.totalorder %v11296_v38, 1  ;;  %vm11318_vm10 = vcmp.eq.f32.partialorder %v1915_v43, 8.507059e+37 }
 0x21c   :  { %v11280_v14 = vadd.f32 1.0, %v10129_v5  ;;  %v7650_v7 = vmul.f32 -1.442695, %v2208_v46  ;;  %v7651_v61 = vmul.f32 -1.442695, %v2209_v37  ;;  %2847 = vmatpush.bf16.msrb.mxu2 %v7843_v32 }
 0x21d   :  { %v11282_v8 = vpop.eup %10130  ;;  %v9671_v46 = vld [vmem:[#allocation13 + $0x4c] sm:$0xf0]  ;;  %v9669_v37 = vld [vmem:[#allocation13 + $0x44] sm:$0xf] }
 0x21e   :  { %v11286_v47 = vpop.eup %10132  ;;  %v1888_v9 = vmul.f32 %v11282_v8, %v11265_v26  ;;  %10136 = vrcp.f32 %v11280_v14  ;;  %vm1893_vm6 = vweird.f32 %v11282_v8  ;;  %v7819_v28 = vor.u32 %v9671_v46, %v7818_v39  ;;  %v7804_v39 = vld [vmem:[#allocation13 + $0x30] sm:$0xf0] }
 0x21f   :  { %v1907_v45 = vmul.f32 %v11286_v47, %v11267_v56  ;;  %10138 = vpow2.f32 %v7650_v7  ;;  %v10135_v41 = vpop.eup %10134  ;;  %vm1912_vm8 = vweird.f32 %v11286_v47  ;;  %v7823_v23 = vor.u32 %v9669_v37, %v7820_v18  ;;  %vm1894_vm9 = vmor %vm1892_vm3, %vm1893_vm6 }
 0x220   :  { %v1889_v60 = vsub.f32 1.0, %v1888_v9  ;;  %10140 = vpow2.f32 %v7651_v61  ;;  %v11302_v5 = vpop.f32.mrf.mxu2  ;;  %v2204_v54 = vpop.f32.mrf.mxu3  ;;  %v9672_v9 = vld [vmem:[#allocation13 + $0x54] sm:$0xf0]  ;;  %v7847_v61 = vor.u32 %v9674_v6, %v7844_v29  ;;  %2822 = vmatpush.bf16.msrb.mxu0 %v7819_v28  ;;  %v7831_v29 = vor.u32 %v9670_v57, %v7828_v44  ;;  %vm1913_vm11 = vmor %vm1911_vm5, %vm1912_vm8 }
 0x221   :  { %v1908_v48 = vsub.f32 1.0, %v1907_v45  ;;  %v2211_v7 = vadd.f32 %v2204_v54, %v1963_v36  ;;  %v2167_v21 = vpop.f32.mrf.mxu0  ;;  %v2180_v22 = vpop.f32.mrf.mxu1  ;;  %v7802_v45 = vld [vmem:[#allocation13 + $0x20] sm:$0xf]  ;;  %v9667_v36 = vld [vmem:[#allocation13 + $0x2c] sm:$0xf0]  ;;  %v7827_v6 = vor.u32 %v9672_v9, %v7826_v17  ;;  %2835 = vmatpush.bf16.msrb.mxu1 %v7823_v23  ;;  %vm1931_vm13 = vweird.f32 %v11280_v14 }
 0x222   :  { %v1890_v52 = vmul.f32 %v11282_v8, %v1889_v60  ;;  %v9665_v54 = vld [vmem:[#allocation13 + $0x24] sm:$0xf]  ;;  %v1918_v60 = vor.u32 1.1754944e-38, %v1917_v20  ;;  %2860 = vmatpush.bf16.msrb.mxu3 %v7847_v61  ;;  %v7803_v43 = vor.u32 %v9667_v36, %v7802_v45  ;;  %v7810_v61 = vld [vmem:[#allocation13 + $0x28] sm:$0xf] }
 0x223   :  { %v1909_v30 = vmul.f32 %v11286_v47, %v1908_v48  ;;  %v7652_v22 = vmul.f32 -1.442695, %v2211_v7  ;;  %2848 = vmatpush.bf16.msrb.mxu2 %v7827_v6  ;;  %v7807_v17 = vor.u32 %v9665_v54, %v7804_v39  ;;  %v9668_v44 = vld [vmem:[#allocation13 + $0x34] sm:$0xf0]  ;;  %v9666_v45 = vld [vmem:[#allocation13 + $0x2c] sm:$0xf] }
 0x224   :  { %v11310_v21 = vpop.eup %10136  ;;  %v1891_v15 = vadd.f32 %v11282_v8, %v1890_v52  ;;  %2823 = vmatpush.bf16.msrb.mxu0 %v7803_v43  ;;  %v9661_v23 = vld [vmem:[#allocation13 + $0x4] sm:$0xf]  ;;  %v7815_v6 = vor.u32 %v9666_v45, %v7812_v62  ;;  %v7794_v39 = vld [vmem:[#allocation13 + $0x8] sm:$0xf] }
 0x225   :  { %v10139_v46 = vpop.eup %10138  ;;  %v1910_v37 = vadd.f32 %v11286_v47, %v1909_v30  ;;  %v1927_v52 = vmul.f32 %v11310_v21, %v11280_v14  ;;  %10142 = vpow2.f32 %v7652_v22  ;;  %v1937_v30 = vand.u32 2147483648, %v11280_v14  ;;  %2836 = vmatpush.bf16.msrb.mxu1 %v7807_v17  ;;  %v7786_v22 = vld [vmem:[#allocation13] sm:$0xf] }
 0x226   :  { %v10141_v20 = vpop.eup %10140  ;;  %v1895_v26 = vsel %vm1894_vm9, %v11282_v8, %v1891_v15  ;;  %v11329_v18 = vadd.f32 1.0, %v10139_v46  ;;  %2861 = vmatpush.bf16.msrb.mxu3 %v7831_v29  ;;  %v7788_v29 = vld [vmem:[#allocation13 + $0x10] sm:$0xf0]  ;;  %v9664_v46 = vld [vmem:[#allocation13 + $0x14] sm:$0xf0]  ;;  %vm1932_vm12 = vweird.f32 %v11310_v21  ;;  %vm2616_vm9 = vcmp.gt.s32.totalorder %v11203_v42, 5 }
 0x227   :  { %v1900_v48 = vsel %vm11298_vm4, %v1899_v24, %v1895_v26  ;;  %v1914_v7 = vsel %vm1913_vm11, %v11286_v47, %v1910_v37  ;;  %v1928_v9 = vsub.f32 1.0, %v1927_v52  ;;  %v11334_v57 = vadd.f32 1.0, %v10141_v20  ;;  %vm11358_vm14 = vmor %vm1931_vm13, %vm1932_vm12 }
 0x228   :  { %v1919_v56 = vsel %vm11318_vm10, %v1918_v60, %v1914_v7  ;;  %v1942_v28 = vmul.f32 %v10135_v41, %v1900_v48  ;;  %10144 = vrcp.f32 %v11329_v18  ;;  %v2193_v15 = vpop.f32.mrf.mxu2  ;;  %v2206_v8 = vpop.f32.mrf.mxu3  ;;  %v9663_v41 = vld [vmem:[#allocation13 + $0xc] sm:$0xf0]  ;;  %v7811_v60 = vor.u32 %v9668_v44, %v7810_v61  ;;  %v7796_v61 = vld [vmem:[#allocation13 + $0x18] sm:$0xf0] }
 0x229   :  { %v1941_v24 = vmul.f32 %v1919_v56, %v11277_v33  ;;  %v1929_v47 = vmul.f32 %v11310_v21, %v1928_v9  ;;  %10146 = vrcp.f32 %v11334_v57  ;;  %v1962_v37 = vunpack.c.l.bf16 %v11092_v51  ;;  %v9662_v9 = vld [vmem:[#allocation13 + $0xc] sm:$0xf] }
 0x22a   :  { %v1935_v52 = vand.u32 2147483647, %v11280_v14  ;;  %2849 = vmatpush.bf16.msrb.mxu2 %v7811_v60  ;;  %2862 = vmatpush.bf16.msrb.mxu3 %v7815_v6  ;;  %v7787_v51 = vor.u32 %v9663_v41, %v7786_v22  ;;  %v7791_v48 = vor.u32 %v9661_v23, %v7788_v29  ;;  %v7795_v7 = vor.u32 %v9664_v46, %v7794_v39 }
 0x22b   :  { %v10143_v36 = vpop.eup %10142  ;;  %v1943_v54 = vadd.f32 %v1942_v28, %v1941_v24  ;;  %v1930_v32 = vadd.f32 %v11310_v21, %v1929_v47  ;;  %v2210_v17 = vadd.f32 %v11302_v5, %v1962_v37  ;;  %v1938_v28 = vor.u32 1.1754944e-38, %v1937_v30 }
 0x22c   :  { %v11348_v20 = vadd.f32 1.0, %v10143_v36  ;;  %v2246_v5 = vand.u32 2147483648, %v11334_v57  ;;  %vm11369_vm15 = vcmp.eq.f32.partialorder %v1935_v52, 8.507059e+37  ;;  %2824 = vmatpush.bf16.msrb.mxu0 %v7787_v51  ;;  %2837 = vmatpush.bf16.msrb.mxu1 %v7791_v48  ;;  %v2227_v62 = vand.u32 2147483648, %v11329_v18 }
 0x22d   :  { %10148 = vtanh.f32 %v1943_v54  ;;  %v11353_v26 = vsel %vm1950_vm7, %v1943_v54, %v11277_v33  ;;  %v1934_v8 = vsel %vm11358_vm14, %v11310_v21, %v1930_v32  ;;  %v7799_v24 = vor.u32 %v9662_v9, %v7796_v61 }
 0x22e   :  { %v10145_v43 = vpop.eup %10144  ;;  %10150 = vrcp.f32 %v11348_v20  ;;  %2850 = vmatpush.bf16.msrb.mxu2 %v7795_v7  ;;  %v2225_v30 = vand.u32 2147483647, %v11329_v18  ;;  %v2606_v22 = vsel %vm2286_vm1, 1, %v12312_v53  ;;  %v2244_v23 = vand.u32 2147483647, %v11334_v57 }
 0x22f   :  { %v10147_v56 = vpop.eup %10146  ;;  %v2217_v33 = vmul.f32 %v10145_v43, %v11329_v18  ;;  %10152 = vtanh.f32 %v2210_v17  ;;  %vm2222_vm3 = vweird.f32 %v10145_v43  ;;  %v1939_v36 = vsel %vm11369_vm15, %v1938_v28, %v1934_v8  ;;  %2863 = vmatpush.bf16.msrb.mxu3 %v7799_v24  ;;  %2608 = vperm.xlu2 %10088, %v2606_v22  }
 0x230   :  { %v2236_v15 = vmul.f32 %v10147_v56, %v11334_v57  ;;  %vm2241_vm4 = vweird.f32 %v10147_v56  ;;  %vm2221_vm5 = vweird.f32 %v11329_v18  ;;  %vm2240_vm6 = vweird.f32 %v11334_v57 }
 0x231   :  { %v2218_v45 = vsub.f32 1.0, %v2217_v33  ;;  %v2247_v29 = vor.u32 1.1754944e-38, %v2246_v5  ;;  %v2228_v46 = vor.u32 1.1754944e-38, %v2227_v62  ;;  %vm2223_vm8 = vmor %vm2221_vm5, %vm2222_vm3  ;;  %vm2226_vm11 = vcmp.eq.f32.partialorder %v2225_v30, 8.507059e+37 }
 0x232   :  { %v2237_v47 = vsub.f32 1.0, %v2236_v15  ;;  %vm2242_vm10 = vmor %vm2240_vm6, %vm2241_vm4  ;;  %vm2245_vm12 = vcmp.eq.f32.partialorder %v2244_v23, 8.507059e+37  ;;  %v1625_v42 = vsel %vm1620_vm0, %v11242_v63, 0.0  ;;  %v2936_v14 = vsel %vm2616_vm9, 1, %v12312_v53  ;;  %v9721_v23 = vld [vmem:[#allocation11 + $0xe4] sm:$0xf] }
 0x233   :  { %v10149_v21 = vpop.eup %10148  ;;  %v2219_v41 = vmul.f32 %v10145_v43, %v2218_v45  ;;  %v2266_v63 = vand.u32 2147483648, %v11348_v20  ;;  %vm2260_vm15 = vweird.f32 %v11348_v20  ;;  %v2264_v5 = vand.u32 2147483647, %v11348_v20 }
 0x234   :  { %v2238_v54 = vmul.f32 %v10147_v56, %v2237_v47  ;;  %v1945_v60 = vmul.f32 %v10149_v21, %v1939_v36  ;;  %v10151_v6 = vpop.eup %10150 }
 0x235   :  { %v2220_v39 = vadd.f32 %v10145_v43, %v2219_v41  ;;  %v2256_v32 = vmul.f32 %v10151_v6, %v11348_v20  ;;  %v10153_v57 = vpop.eup %10152  ;;  %vm2261_vm13 = vweird.f32 %v10151_v6  ;;  %v2267_v44 = vor.u32 1.1754944e-38, %v2266_v63  ;;  %v8029_v20 = vld [vmem:[#allocation11 + $0xe0] sm:$0xf]  ;;  %v9723_v41 = vld [vmem:[#allocation11 + $0xec] sm:$0xf0] }
 0x236   :  { %v2239_v37 = vadd.f32 %v10147_v56, %v2238_v54  ;;  %v1951_v52 = vsel %vm1950_vm7, %v1945_v60, 0.0  ;;  %v11389_v18 = vsel %vm1950_vm7, %v1945_v60, %v11228_v49  ;;  %vm2262_vm1 = vmor %vm2260_vm15, %vm2261_vm13  ;;  %vm2265_vm3 = vcmp.eq.f32.partialorder %v2264_v5, 8.507059e+37  ;;  %v8031_v54 = vld [vmem:[#allocation11 + $0xf0] sm:$0xf0]  ;;  %v8037_v60 = vld [vmem:[#allocation11 + $0xe8] sm:$0xf] }
 0x237   :  { %v2224_v17 = vsel %vm2223_vm8, %v10145_v43, %v2220_v39  ;;  %1953 = vst [vmem:[#allocation23 + $0x8] sm:$0xff] %v1951_v52  ;;  %v2257_v7 = vsub.f32 1.0, %v2256_v32  ;;  %v2294_v9 = vpack.c.bf16 %v11389_v18, %v11389_v18  ;;  %2938 = vperm.xlu2 %10088, %v2936_v14   ;;  %v8030_v36 = vor.u32 %v9723_v41, %v8029_v20  ;;  %v8013_v32 = vld [vmem:[#allocation11 + $0xc0] sm:$0xf]  ;;  %v9719_v52 = vld [vmem:[#allocation11 + $0xcc] sm:$0xf0] }
 0x238   :  { %v2229_v51 = vsel %vm2226_vm11, %v2228_v46, %v2224_v17  ;;  %v2243_v48 = vsel %vm2242_vm10, %v10147_v56, %v2239_v37  ;;  %v11397_v56 = vpop.permute.xlu1 %2277  ;;  %v8039_v46 = vld [vmem:[#allocation11 + $0xf8] sm:$0xf0]  ;;  %v9717_v17 = vld [vmem:[#allocation11 + $0xc4] sm:$0xf]  ;;  %v7999_v63 = vld [vmem:[#allocation11 + $0xb0] sm:$0xf0] }
 0x239   :  { %v2248_v43 = vsel %vm2245_vm12, %v2247_v29, %v2243_v48  ;;  %v2271_v61 = vmul.f32 %v10153_v57, %v2229_v51  ;;  %v2258_v33 = vmul.f32 %v10151_v6, %v2257_v7  ;;  %2495 = vmatmul.bf16.vlgmr.msra.gmra.mxu0 %v2294_v9  ;;  %2508 = vmatmul.bf16.vlgmr.msra.gmra.mxu1 %v2294_v9  ;;  %vm2279_vm14 = vcmp.eq.s32.totalorder %v11397_v56, 1  ;;  %v8015_v51 = vld [vmem:[#allocation11 + $0xd0] sm:$0xf0]  ;;  %v8021_v48 = vld [vmem:[#allocation11 + $0xc8] sm:$0xf] }
 0x23a   :  { %v2270_v28 = vmul.f32 %v2248_v43, %v1625_v42  ;;  %2521 = vmatmul.bf16.vlgmr.msra.gmra.mxu2 %v2294_v9  ;;  %2534 = vmatmul.bf16.vlgmr.msra.gmra.mxu3 %v2294_v9  ;;  %v8034_v29 = vor.u32 %v9721_v23, %v8031_v54  ;;  %v8014_v57 = vor.u32 %v9719_v52, %v8013_v32  ;;  %v9720_v7 = vld [vmem:[#allocation11 + $0xd4] sm:$0xf0]  ;;  %v9718_v43 = vld [vmem:[#allocation11 + $0xcc] sm:$0xf]  ;;  %v8005_v5 = vld [vmem:[#allocation11 + $0xa8] sm:$0xf] }
 0x23b   :  { %v2259_v15 = vadd.f32 %v10151_v6, %v2258_v33  ;;  %3148 = vmatpush.bf16.msra.mxu0 %v8030_v36  ;;  %v8018_v9 = vor.u32 %v9717_v17, %v8015_v51  ;;  %v9715_v33 = vld [vmem:[#allocation11 + $0xac] sm:$0xf0]  ;;  %v9709_v20 = vld [vmem:[#allocation11 + $0x84] sm:$0xf]  ;;  %v7983_v23 = vld [vmem:[#allocation11 + $0x90] sm:$0xf0] }
 0x23c   :  { %v2272_v49 = vadd.f32 %v2271_v61, %v2270_v28  ;;  %3161 = vmatpush.bf16.msra.mxu1 %v8034_v29  ;;  %v8023_v61 = vld [vmem:[#allocation11 + $0xd8] sm:$0xf0]  ;;  %v7997_v28 = vld [vmem:[#allocation11 + $0xa0] sm:$0xf]  ;;  %v7989_v36 = vld [vmem:[#allocation11 + $0x88] sm:$0xf] }
 0x23d   :  { %v2263_v8 = vsel %vm2262_vm1, %v10151_v6, %v2259_v15  ;;  %v9724_v6 = vld [vmem:[#allocation11 + $0xf4] sm:$0xf0]  ;;  %v8026_v14 = vor.u32 %v9718_v43, %v8023_v61  ;;  %v7998_v15 = vor.u32 %v9715_v33, %v7997_v28  ;;  %v9710_v29 = vld [vmem:[#allocation11 + $0x8c] sm:$0xf]  ;;  %v9705_v32 = vld [vmem:[#allocation11 + $0x64] sm:$0xf] }
 0x23e   :  { %10154 = vtanh.f32 %v2272_v49  ;;  %v11403_v53 = vsel %vm2279_vm14, %v2272_v49, %v1625_v42  ;;  %v2268_v62 = vsel %vm2265_vm3, %v2267_v44, %v2263_v8  ;;  %v8038_v39 = vor.u32 %v9724_v6, %v8037_v60  ;;  %v9713_v49 = vld [vmem:[#allocation11 + $0xa4] sm:$0xf]  ;;  %v9716_v8 = vld [vmem:[#allocation11 + $0xb4] sm:$0xf0]  ;;  %v7967_v17 = vld [vmem:[#allocation11 + $0x70] sm:$0xf0] }
 0x23f   :  { %v8022_v42 = vor.u32 %v9720_v7, %v8021_v48  ;;  %3149 = vmatpush.bf16.msra.mxu0 %v8014_v57  ;;  %v8002_v44 = vor.u32 %v9713_v49, %v7999_v63  ;;  %v9712_v54 = vld [vmem:[#allocation11 + $0x94] sm:$0xf0]  ;;  %v7986_v60 = vor.u32 %v9709_v20, %v7983_v23  ;;  %v7973_v57 = vld [vmem:[#allocation11 + $0x68] sm:$0xf]  ;;  %v7970_v48 = vor.u32 %v9705_v32, %v7967_v17  ;;  %v7949_v61 = vld [vmem:[#allocation11 + $0x40] sm:$0xf] }
 0x240   :  { %3174 = vmatpush.bf16.msra.mxu2 %v8038_v39  ;;  %3162 = vmatpush.bf16.msra.mxu1 %v8018_v9  ;;  %v7990_v6 = vor.u32 %v9712_v54, %v7989_v36  ;;  %v7991_v39 = vld [vmem:[#allocation11 + $0x98] sm:$0xf0]  ;;  %v9708_v51 = vld [vmem:[#allocation11 + $0x74] sm:$0xf0]  ;;  %v9706_v9 = vld [vmem:[#allocation11 + $0x6c] sm:$0xf] }
 0x241   :  { %v7974_v7 = vor.u32 %v9708_v51, %v7973_v57  ;;  %v9701_v28 = vld [vmem:[#allocation11 + $0x44] sm:$0xf]  ;;  %v7951_v49 = vld [vmem:[#allocation11 + $0x50] sm:$0xf0]  ;;  %v9704_v63 = vld [vmem:[#allocation11 + $0x54] sm:$0xf0] }
 0x242   :  { %v7935_v20 = vld [vmem:[#allocation11 + $0x30] sm:$0xf0]  ;;  %v9700_v23 = vld [vmem:[#allocation11 + $0x34] sm:$0xf0]  ;;  %v9693_v32 = vld [vmem:[#allocation11 + $0x4] sm:$0xf] }
 0x243   :  { %3150 = vmatpush.bf16.msra.mxu0 %v7998_v15  ;;  %v7957_v15 = vld [vmem:[#allocation11 + $0x48] sm:$0xf]  ;;  %v7919_v51 = vld [vmem:[#allocation11 + $0x10] sm:$0xf0] }
 0x244   :  { %v10155_v45 = vpop.eup %10154  ;;  %3175 = vmatpush.bf16.msra.mxu2 %v8022_v42  ;;  %3163 = vmatpush.bf16.msra.mxu1 %v8002_v44  ;;  %v7975_v42 = vld [vmem:[#allocation11 + $0x78] sm:$0xf0]  ;;  %v9702_v44 = vld [vmem:[#allocation11 + $0x4c] sm:$0xf] }
 0x245   :  { %v2274_v24 = vmul.f32 %v10155_v45, %v2268_v62  ;;  %v8006_v45 = vor.u32 %v9716_v8, %v8005_v5  ;;  %v9714_v62 = vld [vmem:[#allocation11 + $0xac] sm:$0xf]  ;;  %v7978_v43 = vor.u32 %v9706_v9, %v7975_v42  ;;  %v7954_v5 = vor.u32 %v9701_v28, %v7951_v49  ;;  %v7927_v28 = vld [vmem:[#allocation11 + $0x18] sm:$0xf0]  ;;  %v9755_v49 = vld [vmem:[#allocation13 + $0xec] sm:$0xf0] }
 0x246   :  { %v7958_v8 = vor.u32 %v9704_v63, %v7957_v15  ;;  %v9753_v15 = vld [vmem:[#allocation13 + $0xe4] sm:$0xf]  ;;  %v8162_v63 = vld [vmem:[#allocation13 + $0xf0] sm:$0xf0] }
 0x247   :  { %v2280_v47 = vsel %vm2279_vm14, %v2274_v24, 0.0  ;;  %v11412_v30 = vsel %vm2279_vm14, %v2274_v24, %v11255_v12  ;;  %v9722_v12 = vld [vmem:[#allocation11 + $0xec] sm:$0xf]  ;;  %v8007_v24 = vld [vmem:[#allocation11 + $0xb8] sm:$0xf0] }
 0x248   :  { %v2281_v22 = vpack.c.bf16 %v2280_v47, %v2280_v47  ;;  %v2624_v21 = vpack.c.bf16 %v11412_v30, %v11412_v30  ;;  %v8042_v37 = vor.u32 %v9722_v12, %v8039_v46  ;;  %v8010_v47 = vor.u32 %v9714_v62, %v8007_v24  ;;  %3176 = vmatpush.bf16.msra.mxu2 %v8006_v45  ;;  %v7965_v46 = vld [vmem:[#allocation11 + $0x60] sm:$0xf]  ;;  %v7959_v45 = vld [vmem:[#allocation11 + $0x58] sm:$0xf0] }
 0x249   :  { %v7994_v12 = vor.u32 %v9710_v29, %v7991_v39  ;;  %3164 = vmatpush.bf16.msra.mxu1 %v7986_v60  ;;  %v7962_v62 = vor.u32 %v9702_v44, %v7959_v45  ;;  %v7933_v24 = vld [vmem:[#allocation11 + $0x20] sm:$0xf]  ;;  %v9698_v60 = vld [vmem:[#allocation11 + $0x2c] sm:$0xf]  ;;  %v2290_v39 = vunpack.c.l.bf16 %v10973_v3  ;;  %v8165_v45 = vor.u32 %v9753_v15, %v8162_v63  ;;  %v8138_v63 = vld [vmem:[#allocation13 + $0xb8] sm:$0xf0] }
 0x24a   :  { %2283 = vst [vmem:[#allocation4 + $0x18] sm:$0xf] %v2281_v22  ;;  %2825 = vmatmul.bf16.vlgmr.msrb.gmra.mxu0 %v2624_v21  ;;  %2838 = vmatmul.bf16.vlgmr.msrb.gmra.mxu1 %v2624_v21  ;;  %v7981_v22 = vld [vmem:[#allocation11 + $0x80] sm:$0xf]  ;;  %v9746_v15 = vld [vmem:[#allocation13 + $0xac] sm:$0xf] }
 0x24b   :  { %2851 = vmatmul.bf16.vlgmr.msrb.gmra.mxu2 %v2624_v21  ;;  %2864 = vmatmul.bf16.vlgmr.msrb.gmra.mxu3 %v2624_v21  ;;  %v9711_v21 = vld [vmem:[#allocation11 + $0x8c] sm:$0xf0] }
 0x24c   :  { %3187 = vmatpush.bf16.msra.mxu3 %v8042_v37  ;;  %v7982_v41 = vor.u32 %v9711_v21, %v7981_v22  ;;  %3177 = vmatpush.bf16.msra.mxu2 %v7990_v6  ;;  %v9707_v37 = vld [vmem:[#allocation11 + $0x6c] sm:$0xf0]  ;;  %v9697_v22 = vld [vmem:[#allocation11 + $0x24] sm:$0xf]  ;;  %v7943_v6 = vld [vmem:[#allocation11 + $0x38] sm:$0xf0] }
 0x24d   :  { %v7966_v52 = vor.u32 %v9707_v37, %v7965_v46  ;;  %3165 = vmatpush.bf16.msra.mxu1 %v7970_v48  ;;  %v7938_v36 = vor.u32 %v9697_v22, %v7935_v20  ;;  %v7946_v29 = vor.u32 %v9698_v60, %v7943_v6  ;;  %v7917_v46 = vld [vmem:[#allocation11] sm:$0xf]  ;;  %v9695_v37 = vld [vmem:[#allocation11 + $0xc] sm:$0xf0]  ;;  %v7925_v48 = vld [vmem:[#allocation11 + $0x8] sm:$0xf] }
 0x24e   :  { %3151 = vmatpush.bf16.msra.mxu0 %v7982_v41  ;;  %v7941_v41 = vld [vmem:[#allocation11 + $0x28] sm:$0xf]  ;;  %v7918_v57 = vor.u32 %v9695_v37, %v7917_v46  ;;  %v8170_v22 = vld [vmem:[#allocation13 + $0xf8] sm:$0xf0]  ;;  %v9749_v60 = vld [vmem:[#allocation13 + $0xc4] sm:$0xf] }
 0x24f   :  { %v7942_v54 = vor.u32 %v9700_v23, %v7941_v41  ;;  %v8144_v41 = vld [vmem:[#allocation13 + $0xc0] sm:$0xf]  ;;  %v9751_v23 = vld [vmem:[#allocation13 + $0xcc] sm:$0xf0]  ;;  %v8146_v6 = vld [vmem:[#allocation13 + $0xd0] sm:$0xf0] }
 0x250   :  { %3188 = vmatpush.bf16.msra.mxu3 %v8026_v14  ;;  %3178 = vmatpush.bf16.msra.mxu2 %v7974_v7  ;;  %v9703_v14 = vld [vmem:[#allocation11 + $0x4c] sm:$0xf0]  ;;  %v9696_v7 = vld [vmem:[#allocation11 + $0x14] sm:$0xf0]  ;;  %v8149_v46 = vor.u32 %v9749_v60, %v8146_v6  ;;  %v2620_v60 = vunpack.c.l.bf16 %v11076_v58  ;;  %v2621_v6 = vunpack.c.h.bf16 %v11076_v58 }
 0x251   :  { %v7950_v33 = vor.u32 %v9703_v14, %v7949_v61  ;;  %3166 = vmatpush.bf16.msra.mxu1 %v7954_v5  ;;  %v7926_v61 = vor.u32 %v9696_v7, %v7925_v48  ;;  %v9694_v14 = vld [vmem:[#allocation11 + $0xc] sm:$0xf]  ;;  %v9752_v37 = vld [vmem:[#allocation13 + $0xd4] sm:$0xf0] }
 0x252   :  { %3152 = vmatpush.bf16.msra.mxu0 %v7966_v52 }
 0x254   :  { %3189 = vmatpush.bf16.msra.mxu3 %v8010_v47  ;;  %3179 = vmatpush.bf16.msra.mxu2 %v7958_v8  ;;  %v9699_v47 = vld [vmem:[#allocation11 + $0x2c] sm:$0xf0] }
 0x255   :  { %v7934_v21 = vor.u32 %v9699_v47, %v7933_v24  ;;  %3167 = vmatpush.bf16.msra.mxu1 %v7938_v36  ;;  %v9756_v24 = vld [vmem:[#allocation13 + $0xf4] sm:$0xf0]  ;;  %v9754_v47 = vld [vmem:[#allocation13 + $0xec] sm:$0xf]  ;;  %v2293_v36 = vunpack.c.h.bf16 %v10983_v19 }
 0x256   :  { %3153 = vmatpush.bf16.msra.mxu0 %v7950_v33  ;;  %v8160_v33 = vld [vmem:[#allocation13 + $0xe0] sm:$0xf]  ;;  %v8173_v20 = vor.u32 %v9754_v47, %v8170_v22  ;;  %v9743_v47 = vld [vmem:[#allocation13 + $0x8c] sm:$0xf0] }
 0x257   :  { %v8161_v44 = vor.u32 %v9755_v49, %v8160_v33  ;;  %v9748_v33 = vld [vmem:[#allocation13 + $0xb4] sm:$0xf0] }
 0x258   :  { %3190 = vmatpush.bf16.msra.mxu3 %v7994_v12  ;;  %v2291_v12 = vunpack.c.h.bf16 %v10973_v3  ;;  %3180 = vmatpush.bf16.msra.mxu2 %v7942_v54  ;;  %v7930_v3 = vor.u32 %v9694_v14, %v7927_v28  ;;  %v8145_v54 = vor.u32 %v9751_v23, %v8144_v41  ;;  %v8130_v14 = vld [vmem:[#allocation13 + $0xb0] sm:$0xf0]  ;;  %v8136_v28 = vld [vmem:[#allocation13 + $0xa8] sm:$0xf]  ;;  %v2292_v23 = vunpack.c.l.bf16 %v10983_v19 }
 0x259   :  { %v8114_v41 = vld [vmem:[#allocation13 + $0x90] sm:$0xf0] }
 0x25a   :  { %3154 = vmatpush.bf16.msra.mxu0 %v7934_v21 }
 0x25c   :  { %3191 = vmatpush.bf16.msra.mxu3 %v7978_v43  ;;  %v7922_v43 = vor.u32 %v9693_v32, %v7919_v51  ;;  %3181 = vmatpush.bf16.msra.mxu2 %v7926_v61  ;;  %v9750_v32 = vld [vmem:[#allocation13 + $0xcc] sm:$0xf] }
 0x25e   :  { %3155 = vmatpush.bf16.msra.mxu0 %v7918_v57  ;;  %3168 = vmatpush.bf16.msra.mxu1 %v7922_v43  ;;  %v9745_v43 = vld [vmem:[#allocation13 + $0xa4] sm:$0xf] }
 0x25f   :  { %v8133_v49 = vor.u32 %v9745_v43, %v8130_v14  ;;  %v9739_v43 = vld [vmem:[#allocation13 + $0x6c] sm:$0xf0]  ;;  %v8098_v14 = vld [vmem:[#allocation13 + $0x70] sm:$0xf0] }
 0x260   :  { %3192 = vmatpush.bf16.msra.mxu3 %v7962_v62  ;;  %v8168_v62 = vld [vmem:[#allocation13 + $0xe8] sm:$0xf] }
 0x261   :  { %v8169_v21 = vor.u32 %v9756_v24, %v8168_v62  ;;  %v8112_v24 = vld [vmem:[#allocation13 + $0x80] sm:$0xf] }
 0x262   :  { %3478 = vmatpush.bf16.msrb.mxu0 %v8161_v44  ;;  %3491 = vmatpush.bf16.msrb.mxu1 %v8165_v45  ;;  %v8141_v44 = vor.u32 %v9746_v15, %v8138_v63 }
 0x263   :  { %3504 = vmatpush.bf16.msrb.mxu2 %v8169_v21  ;;  %v8113_v21 = vor.u32 %v9743_v47, %v8112_v24 }
 0x264   :  { %3193 = vmatpush.bf16.msra.mxu3 %v7946_v29  ;;  %v8152_v29 = vld [vmem:[#allocation13 + $0xc8] sm:$0xf] }
 0x265   :  { %v8153_v48 = vor.u32 %v9752_v37, %v8152_v29  ;;  %v8120_v29 = vld [vmem:[#allocation13 + $0x88] sm:$0xf] }
 0x266   :  { %3479 = vmatpush.bf16.msrb.mxu0 %v8145_v54  ;;  %3492 = vmatpush.bf16.msrb.mxu1 %v8149_v46 }
 0x267   :  { %3505 = vmatpush.bf16.msrb.mxu2 %v8153_v48  ;;  %v8122_v48 = vld [vmem:[#allocation13 + $0x98] sm:$0xf0] }
 0x268   :  { %3194 = vmatpush.bf16.msra.mxu3 %v7930_v3 }
 0x26a   :  { %3493 = vmatpush.bf16.msrb.mxu1 %v8133_v49 }
 0x26c   :  { %3517 = vmatpush.bf16.msrb.mxu3 %v8173_v20  ;;  %v9741_v20 = vld [vmem:[#allocation13 + $0x84] sm:$0xf] }
 0x2b6   :  { %v2496_v52 = vpop.f32.mrf.mxu0  ;;  %v2509_v17 = vpop.f32.mrf.mxu1 }
 0x2b7   :  { %v2539_v9 = vadd.f32 %v2496_v52, %v2290_v39  ;;  %v2540_v42 = vadd.f32 %v2509_v17, %v2291_v12  ;;  %v8154_v52 = vld [vmem:[#allocation13 + $0xd8] sm:$0xf0] }
 0x2b8   :  { %v8157_v7 = vor.u32 %v9750_v32, %v8154_v52  ;;  %v8117_v52 = vor.u32 %v9741_v20, %v8114_v41  ;;  %v8106_v20 = vld [vmem:[#allocation13 + $0x78] sm:$0xf0] }
 0x2b9   :  { %v7781_v5 = vmul.f32 -1.442695, %v2539_v9  ;;  %v7782_v8 = vmul.f32 -1.442695, %v2540_v42  ;;  %v8128_v9 = vld [vmem:[#allocation13 + $0xa0] sm:$0xf] }
 0x2ba   :  { %v9747_v42 = vld [vmem:[#allocation13 + $0xac] sm:$0xf0]  ;;  %3518 = vmatpush.bf16.msrb.mxu3 %v8157_v7  ;;  %v8096_v7 = vld [vmem:[#allocation13 + $0x60] sm:$0xf]  ;;  %3494 = vmatpush.bf16.msrb.mxu1 %v8117_v52  ;;  %v8088_v52 = vld [vmem:[#allocation13 + $0x48] sm:$0xf] }
 0x2bb   :  { %10156 = vpow2.f32 %v7781_v5  ;;  %v8129_v61 = vor.u32 %v9747_v42, %v8128_v9 }
 0x2bc   :  { %10158 = vpow2.f32 %v7782_v8  ;;  %v8137_v8 = vor.u32 %v9748_v33, %v8136_v28 }
 0x2bd   :  { %v2522_v39 = vpop.f32.mrf.mxu2  ;;  %v2535_v12 = vpop.f32.mrf.mxu3  ;;  %3480 = vmatpush.bf16.msrb.mxu0 %v8129_v61  ;;  %v9737_v61 = vld [vmem:[#allocation13 + $0x64] sm:$0xf] }
 0x2be   :  { %v2542_v17 = vadd.f32 %v2535_v12, %v2293_v36  ;;  %v2498_v57 = vpop.f32.mrf.mxu0  ;;  %v2511_v51 = vpop.f32.mrf.mxu1  ;;  %3506 = vmatpush.bf16.msrb.mxu2 %v8137_v8  ;;  %3519 = vmatpush.bf16.msrb.mxu3 %v8141_v44  ;;  %v9744_v12 = vld [vmem:[#allocation13 + $0x94] sm:$0xf0]  ;;  %v2541_v46 = vadd.f32 %v2522_v39, %v2292_v23  ;;  %v8104_v8 = vld [vmem:[#allocation13 + $0x68] sm:$0xf]  ;;  %v2623_v23 = vunpack.c.h.bf16 %v11082_v50 }
 0x2bf   :  { %v8121_v42 = vor.u32 %v9744_v12, %v8120_v29  ;;  %v9740_v44 = vld [vmem:[#allocation13 + $0x74] sm:$0xf0]  ;;  %v8074_v29 = vld [vmem:[#allocation13 + $0x38] sm:$0xf0] }
 0x2c0   :  { %v7783_v3 = vmul.f32 -1.442695, %v2542_v17  ;;  %v9742_v17 = vld [vmem:[#allocation13 + $0x8c] sm:$0xf] }
 0x2c1   :  { %v10157_v5 = vpop.eup %10156  ;;  %3481 = vmatpush.bf16.msrb.mxu0 %v8113_v21  ;;  %v8125_v58 = vor.u32 %v9742_v17, %v8122_v48  ;;  %v9738_v21 = vld [vmem:[#allocation13 + $0x6c] sm:$0xf] }
 0x2c2   :  { %v10159_v45 = vpop.eup %10158  ;;  %v11419_v62 = vadd.f32 1.0, %v10157_v5  ;;  %10160 = vpow2.f32 %v7783_v3  ;;  %v8097_v3 = vor.u32 %v9739_v43, %v8096_v7  ;;  %3507 = vmatpush.bf16.msrb.mxu2 %v8121_v42  ;;  %v8101_v5 = vor.u32 %v9737_v61, %v8098_v14  ;;  %v9734_v42 = vld [vmem:[#allocation13 + $0x4c] sm:$0xf]  ;;  %v8090_v61 = vld [vmem:[#allocation13 + $0x58] sm:$0xf0] }
 0x2c3   :  { %v11421_v22 = vadd.f32 1.0, %v10159_v45  ;;  %3520 = vmatpush.bf16.msrb.mxu3 %v8125_v58  ;;  %v8109_v58 = vor.u32 %v9738_v21, %v8106_v20  ;;  %v8064_v14 = vld [vmem:[#allocation13 + $0x20] sm:$0xf]  ;;  %v8093_v20 = vor.u32 %v9734_v42, %v8090_v61  ;;  %v9727_v61 = vld [vmem:[#allocation13 + $0xc] sm:$0xf0] }
 0x2c4   :  { %10162 = vrcp.f32 %v11419_v62  ;;  %v2556_v57 = vand.u32 2147483647, %v11419_v62  ;;  %v2558_v63 = vand.u32 2147483648, %v11419_v62  ;;  %vm2552_vm4 = vweird.f32 %v11419_v62  ;;  %3495 = vmatpush.bf16.msrb.mxu1 %v8101_v5  ;;  %v9731_v5 = vld [vmem:[#allocation13 + $0x2c] sm:$0xf0] }
 0x2c5   :  { %10164 = vrcp.f32 %v11421_v22  ;;  %v2524_v36 = vpop.f32.mrf.mxu2  ;;  %v2537_v54 = vpop.f32.mrf.mxu3  ;;  %v2577_v15 = vand.u32 2147483648, %v11421_v22  ;;  %v2575_v47 = vand.u32 2147483647, %v11421_v22  ;;  %3482 = vmatpush.bf16.msrb.mxu0 %v8097_v3  ;;  %vm2571_vm6 = vweird.f32 %v11421_v22 }
 0x2c6   :  { %10166 = vtanh.f32 %v2541_v46  ;;  %v8080_v36 = vld [vmem:[#allocation13 + $0x40] sm:$0xf]  ;;  %v9735_v54 = vld [vmem:[#allocation13 + $0x4c] sm:$0xf0]  ;;  %vm11445_vm5 = vcmp.eq.f32.partialorder %v2556_v57, 8.507059e+37 }
 0x2c7   :  { %v2826_v37 = vpop.f32.mrf.mxu0  ;;  %v2839_v32 = vpop.f32.mrf.mxu1  ;;  %v8081_v43 = vor.u32 %v9735_v54, %v8080_v36  ;;  %3521 = vmatpush.bf16.msrb.mxu3 %v8109_v58  ;;  %vm11464_vm11 = vcmp.eq.f32.partialorder %v2575_v47, 8.507059e+37  ;;  %v8065_v47 = vor.u32 %v9731_v5, %v8064_v14  ;;  %v9730_v58 = vld [vmem:[#allocation13 + $0x2c] sm:$0xf]  ;;  %v9725_v14 = vld [vmem:[#allocation13 + $0x4] sm:$0xf] }
 0x2c8   :  { %v2869_v19 = vadd.f32 %v2826_v37, %v2620_v60  ;;  %v2870_v51 = vadd.f32 %v2839_v32, %v2621_v6  ;;  %v10161_v9 = vpop.eup %10160  ;;  %v9733_v60 = vld [vmem:[#allocation13 + $0x44] sm:$0xf]  ;;  %v8105_v37 = vor.u32 %v9740_v44, %v8104_v8  ;;  %v8082_v32 = vld [vmem:[#allocation13 + $0x50] sm:$0xf0]  ;;  %v8077_v5 = vor.u32 %v9730_v58, %v8074_v29 }
 0x2c9   :  { %v11429_v28 = vadd.f32 1.0, %v10161_v9  ;;  %v9736_v9 = vld [vmem:[#allocation13 + $0x54] sm:$0xf0]  ;;  %v9729_v8 = vld [vmem:[#allocation13 + $0x24] sm:$0xf]  ;;  %3483 = vmatpush.bf16.msrb.mxu0 %v8081_v43 }
 0x2ca   :  { %v7912_v39 = vmul.f32 -1.442695, %v2869_v19  ;;  %v7913_v33 = vmul.f32 -1.442695, %v2870_v51  ;;  %v11431_v49 = vpop.eup %10162  ;;  %v2559_v19 = vor.u32 1.1754944e-38, %v2558_v63  ;;  %3508 = vmatpush.bf16.msrb.mxu2 %v8105_v37  ;;  %v8085_v63 = vor.u32 %v9733_v60, %v8082_v32  ;;  %v11477_v37 = vpop.permute.xlu2 %2608 }
 0x2cb   :  { %v11435_v45 = vpop.eup %10164  ;;  %v2548_v24 = vmul.f32 %v11431_v49, %v11419_v62  ;;  %10168 = vrcp.f32 %v11429_v28  ;;  %vm2553_vm8 = vweird.f32 %v11431_v49  ;;  %v8089_v21 = vor.u32 %v9736_v9, %v8088_v52  ;;  %3522 = vmatpush.bf16.msrb.mxu3 %v8093_v20  ;;  %v8048_v43 = vld [vmem:[#allocation13] sm:$0xf] }
 0x2cc   :  { %v2567_v41 = vmul.f32 %v11435_v45, %v11421_v22  ;;  %10170 = vpow2.f32 %v7912_v39  ;;  %v10167_v39 = vpop.eup %10166  ;;  %vm2572_vm9 = vweird.f32 %v11435_v45  ;;  %vm2554_vm10 = vmor %vm2552_vm4, %vm2553_vm8  ;;  %3496 = vmatpush.bf16.msrb.mxu1 %v8085_v63  ;;  %vm2610_vm13 = vcmp.eq.s32.totalorder %v11477_v37, 1  ;;  %v9978_v37 = vld [vmem:[#allocation11 + $0xec] sm:$0xf] }
 0x2cd   :  { %v2549_v6 = vsub.f32 1.0, %v2548_v24  ;;  %10172 = vpow2.f32 %v7913_v33  ;;  %v2578_v24 = vor.u32 1.1754944e-38, %v2577_v15  ;;  %vm2573_vm12 = vmor %vm2571_vm6, %vm2572_vm9  ;;  %3484 = vmatpush.bf16.msrb.mxu0 %v8065_v47  ;;  %vm2591_vm15 = vweird.f32 %v11429_v28  ;;  %v9726_v47 = vld [vmem:[#allocation13 + $0xc] sm:$0xf] }
 0x2ce   :  { %v11449_v12 = vpop.f32.mrf.mxu2  ;;  %v2865_v46 = vpop.f32.mrf.mxu3  ;;  %v2568_v17 = vsub.f32 1.0, %v2567_v41  ;;  %3509 = vmatpush.bf16.msrb.mxu2 %v8089_v21  ;;  %v2597_v21 = vand.u32 2147483648, %v11429_v28 }
 0x2cf   :  { %v2872_v51 = vadd.f32 %v2865_v46, %v2623_v23  ;;  %v2828_v48 = vpop.f32.mrf.mxu0  ;;  %v2841_v7 = vpop.f32.mrf.mxu1  ;;  %v2550_v57 = vmul.f32 %v11431_v49, %v2549_v6  ;;  %v8066_v23 = vld [vmem:[#allocation13 + $0x30] sm:$0xf0]  ;;  %3523 = vmatpush.bf16.msrb.mxu3 %v8077_v5 }
 0x2d0   :  { %v2569_v33 = vmul.f32 %v11435_v45, %v2568_v17  ;;  %v8069_v32 = vor.u32 %v9729_v8, %v8066_v23  ;;  %v8072_v7 = vld [vmem:[#allocation13 + $0x28] sm:$0xf]  ;;  %v8050_v8 = vld [vmem:[#allocation13 + $0x10] sm:$0xf0] }
 0x2d1   :  { %v7914_v3 = vmul.f32 -1.442695, %v2872_v51  ;;  %v11456_v44 = vpop.eup %10168  ;;  %v2551_v41 = vadd.f32 %v11431_v49, %v2550_v57  ;;  %v9732_v57 = vld [vmem:[#allocation13 + $0x34] sm:$0xf0] }
 0x2d2   :  { %v10171_v36 = vpop.eup %10170  ;;  %v2570_v54 = vadd.f32 %v11435_v45, %v2569_v33  ;;  %v2587_v15 = vmul.f32 %v11456_v44, %v11429_v28  ;;  %3497 = vmatpush.bf16.msrb.mxu1 %v8069_v32  ;;  %v8073_v63 = vor.u32 %v9732_v57, %v8072_v7  ;;  %vm2592_vm1 = vweird.f32 %v11456_v44  ;;  %v8058_v32 = vld [vmem:[#allocation13 + $0x18] sm:$0xf0] }
 0x2d3   :  { %10174 = vpow2.f32 %v7914_v3  ;;  %v10173_v6 = vpop.eup %10172  ;;  %v2555_v62 = vsel %vm2554_vm10, %v11431_v49, %v2551_v41  ;;  %v11475_v46 = vadd.f32 1.0, %v10171_v36  ;;  %v2622_v3 = vunpack.c.l.bf16 %v11082_v50  ;;  %v9728_v41 = vld [vmem:[#allocation13 + $0x14] sm:$0xf0]  ;;  %vm11509_vm3 = vmor %vm2591_vm15, %vm2592_vm1 }
 0x2d4   :  { %v2560_v52 = vsel %vm11445_vm5, %v2559_v19, %v2555_v62  ;;  %v2574_v17 = vsel %vm2573_vm12, %v11435_v45, %v2570_v54  ;;  %v2588_v51 = vsub.f32 1.0, %v2587_v15  ;;  %v11482_v48 = vadd.f32 1.0, %v10173_v6  ;;  %3510 = vmatpush.bf16.msrb.mxu2 %v8073_v63 }
 0x2d5   :  { %v2579_v22 = vsel %vm11464_vm11, %v2578_v24, %v2574_v17  ;;  %v2602_v49 = vmul.f32 %v10167_v39, %v2560_v52  ;;  %10176 = vrcp.f32 %v11475_v46  ;;  %v8056_v24 = vld [vmem:[#allocation13 + $0x8] sm:$0xf]  ;;  %v2595_v36 = vand.u32 2147483647, %v11429_v28 }
 0x2d6   :  { %v2854_v9 = vpop.f32.mrf.mxu2  ;;  %v2867_v42 = vpop.f32.mrf.mxu3  ;;  %v2601_v19 = vmul.f32 %v2579_v22, %v11353_v26  ;;  %v2589_v45 = vmul.f32 %v11456_v44, %v2588_v51  ;;  %10178 = vrcp.f32 %v11482_v48  ;;  %v2871_v60 = vadd.f32 %v11449_v12, %v2622_v3 }
 0x2d7   :  { %v8049_v15 = vor.u32 %v9727_v61, %v8048_v43  ;;  %v8053_v6 = vor.u32 %v9725_v14, %v8050_v8  ;;  %v8057_v62 = vor.u32 %v9728_v41, %v8056_v24  ;;  %v2598_v7 = vor.u32 1.1754944e-38, %v2597_v21 }
 0x2d8   :  { %v2603_v33 = vadd.f32 %v2602_v49, %v2601_v19  ;;  %v2590_v20 = vadd.f32 %v11456_v44, %v2589_v45  ;;  %v2888_v28 = vand.u32 2147483648, %v11475_v46  ;;  %v8061_v49 = vor.u32 %v9726_v47, %v8058_v32 }
 0x2d9   :  { %v10175_v39 = vpop.eup %10174  ;;  %3485 = vmatpush.bf16.msrb.mxu0 %v8049_v15  ;;  %3498 = vmatpush.bf16.msrb.mxu1 %v8053_v6  ;;  %v2907_v42 = vand.u32 2147483648, %v11482_v48  ;;  %vm2596_vm4 = vcmp.eq.f32.partialorder %v2595_v36, 8.507059e+37  ;;  %v2886_v29 = vand.u32 2147483647, %v11475_v46  ;;  %v2905_v45 = vand.u32 2147483647, %v11482_v48  ;;  %v11536_v6 = vpop.permute.xlu2 %2938 }
 0x2da   :  { %10180 = vtanh.f32 %v2603_v33  ;;  %v11496_v23 = vadd.f32 1.0, %v10175_v39  ;;  %v11502_v50 = vsel %vm2610_vm13, %v2603_v33, %v11353_v26  ;;  %v2594_v51 = vsel %vm11509_vm3, %v11456_v44, %v2590_v20  ;;  %3511 = vmatpush.bf16.msrb.mxu2 %v8057_v62  ;;  %3524 = vmatpush.bf16.msrb.mxu3 %v8061_v49 }
 0x2db   :  { %v10177_v54 = vpop.eup %10176  ;;  %v2599_v19 = vsel %vm2596_vm4, %v2598_v7, %v2594_v51  ;;  %vm2901_vm8 = vweird.f32 %v11482_v48  ;;  %vm2882_vm9 = vweird.f32 %v11475_v46  ;;  %v2889_v39 = vor.u32 1.1754944e-38, %v2888_v28 }
 0x2dc   :  { %v10179_v52 = vpop.eup %10178  ;;  %v2878_v26 = vmul.f32 %v10177_v54, %v11475_v46  ;;  %10182 = vrcp.f32 %v11496_v23  ;;  %vm2883_vm5 = vweird.f32 %v10177_v54  ;;  %v2908_v8 = vor.u32 1.1754944e-38, %v2907_v42  ;;  %v9785_v42 = vld [vmem:[#allocation11 + $0xe4] sm:$0xf] }
 0x2dd   :  { %v2897_v12 = vmul.f32 %v10179_v52, %v11482_v48  ;;  %10184 = vtanh.f32 %v2871_v60  ;;  %vm2902_vm6 = vweird.f32 %v10179_v52  ;;  %vm2884_vm10 = vmor %vm2882_vm9, %vm2883_vm5  ;;  %vm2887_vm12 = vcmp.eq.f32.partialorder %v2886_v29, 8.507059e+37  ;;  %v8299_v29 = vld [vmem:[#allocation11 + $0xe8] sm:$0xf] }
 0x2de   :  { %v2879_v22 = vsub.f32 1.0, %v2878_v26  ;;  %vm2903_vm11 = vmor %vm2901_vm8, %vm2902_vm6  ;;  %vm2906_vm15 = vcmp.eq.f32.partialorder %v2905_v45, 8.507059e+37  ;;  %vm2940_vm3 = vcmp.eq.s32.totalorder %v11536_v6, 1  ;;  %v2927_v47 = vand.u32 2147483648, %v11496_v23 }
 0x2df   :  { %v2898_v9 = vsub.f32 1.0, %v2897_v12  ;;  %vm2921_vm4 = vweird.f32 %v11496_v23 }
 0x2e0   :  { %v10181_v57 = vpop.eup %10180  ;;  %v2880_v58 = vmul.f32 %v10177_v54, %v2879_v22  ;;  %v2928_v26 = vor.u32 1.1754944e-38, %v2927_v47  ;;  %v9780_v47 = vld [vmem:[#allocation11 + $0xb4] sm:$0xf0] }
 0x2e1   :  { %v2899_v44 = vmul.f32 %v10179_v52, %v2898_v9  ;;  %v2605_v43 = vmul.f32 %v10181_v57, %v2599_v19  ;;  %v9787_v9 = vld [vmem:[#allocation11 + $0xec] sm:$0xf0]  ;;  %v9788_v19 = vld [vmem:[#allocation11 + $0xf4] sm:$0xf0] }
 0x2e2   :  { %v10183_v61 = vpop.eup %10182  ;;  %v2881_v14 = vadd.f32 %v10177_v54, %v2880_v58  ;;  %v8293_v58 = vld [vmem:[#allocation11 + $0xf0] sm:$0xf0]  ;;  %v8300_v45 = vor.u32 %v9788_v19, %v8299_v29  ;;  %v9774_v29 = vld [vmem:[#allocation11 + $0x8c] sm:$0xf]  ;;  %v8253_v19 = vld [vmem:[#allocation11 + $0x98] sm:$0xf0] }
 0x2e3   :  { %v2900_v33 = vadd.f32 %v10179_v52, %v2899_v44  ;;  %v2917_v3 = vmul.f32 %v10183_v61, %v11496_v23  ;;  %v2611_v63 = vsel %vm2610_vm13, %v2605_v43, 0.0  ;;  %v11531_v5 = vsel %vm2610_vm13, %v2605_v43, %v11389_v18  ;;  %v10185_v48 = vpop.eup %10184  ;;  %v8301_v43 = vld [vmem:[#allocation11 + $0xf8] sm:$0xf0] }
 0x2e4   :  { %v2885_v24 = vsel %vm2884_vm10, %v10177_v54, %v2881_v14  ;;  %2613 = vst [vmem:[#allocation23 + $0x10] sm:$0xff] %v2611_v63  ;;  %v2955_v46 = vpack.c.bf16 %v11531_v5, %v11531_v5  ;;  %vm2922_vm1 = vweird.f32 %v10183_v61  ;;  %v8296_v44 = vor.u32 %v9785_v42, %v8293_v58  ;;  %v8275_v14 = vld [vmem:[#allocation11 + $0xc0] sm:$0xf]  ;;  %v8277_v63 = vld [vmem:[#allocation11 + $0xd0] sm:$0xf0] }
 0x2e5   :  { %v2890_v41 = vsel %vm2887_vm12, %v2889_v39, %v2885_v24  ;;  %v2904_v21 = vsel %vm2903_vm11, %v10179_v52, %v2900_v33  ;;  %v2918_v20 = vsub.f32 1.0, %v2917_v3  ;;  %v2925_v52 = vand.u32 2147483647, %v11496_v23  ;;  %vm2923_vm5 = vmor %vm2921_vm4, %vm2922_vm1  ;;  %v8291_v23 = vld [vmem:[#allocation11 + $0xe0] sm:$0xf] }
 0x2e6   :  { %v2909_v36 = vsel %vm2906_vm15, %v2908_v8, %v2904_v21  ;;  %v2932_v60 = vmul.f32 %v10185_v48, %v2890_v41  ;;  %3156 = vmatmul.bf16.vlgmr.msra.gmra.mxu0 %v2955_v46  ;;  %3169 = vmatmul.bf16.vlgmr.msra.gmra.mxu1 %v2955_v46  ;;  %v8292_v57 = vor.u32 %v9787_v9, %v8291_v23  ;;  %v9783_v39 = vld [vmem:[#allocation11 + $0xcc] sm:$0xf0]  ;;  %v9781_v33 = vld [vmem:[#allocation11 + $0xc4] sm:$0xf]  ;;  %v8283_v8 = vld [vmem:[#allocation11 + $0xc8] sm:$0xf] }
 0x2e7   :  { %v2931_v18 = vmul.f32 %v2909_v36, %v11403_v53  ;;  %v2919_v15 = vmul.f32 %v10183_v61, %v2918_v20  ;;  %3182 = vmatmul.bf16.vlgmr.msra.gmra.mxu2 %v2955_v46  ;;  %3195 = vmatmul.bf16.vlgmr.msra.gmra.mxu3 %v2955_v46  ;;  %vm2926_vm6 = vcmp.eq.f32.partialorder %v2925_v52, 8.507059e+37  ;;  %v8276_v3 = vor.u32 %v9783_v39, %v8275_v14  ;;  %v9784_v24 = vld [vmem:[#allocation11 + $0xd4] sm:$0xf0]  ;;  %v9782_v41 = vld [vmem:[#allocation11 + $0xcc] sm:$0xf] }
 0x2e8   :  { %3808 = vmatpush.bf16.msra.mxu0 %v8292_v57  ;;  %3821 = vmatpush.bf16.msra.mxu1 %v8296_v44  ;;  %v8280_v46 = vor.u32 %v9781_v33, %v8277_v63  ;;  %v8284_v48 = vor.u32 %v9784_v24, %v8283_v8  ;;  %v8285_v21 = vld [vmem:[#allocation11 + $0xd8] sm:$0xf0]  ;;  %v8259_v36 = vld [vmem:[#allocation11 + $0xa0] sm:$0xf]  ;;  %v8245_v23 = vld [vmem:[#allocation11 + $0x90] sm:$0xf0]  ;;  %v8256_v44 = vor.u32 %v9774_v29, %v8253_v19 }
 0x2e9   :  { %v2933_v54 = vadd.f32 %v2932_v60, %v2931_v18  ;;  %v2920_v62 = vadd.f32 %v10183_v61, %v2919_v15  ;;  %3834 = vmatpush.bf16.msra.mxu2 %v8300_v45  ;;  %v8288_v20 = vor.u32 %v9782_v41, %v8285_v21  ;;  %v9779_v60 = vld [vmem:[#allocation11 + $0xac] sm:$0xf0]  ;;  %v9777_v18 = vld [vmem:[#allocation11 + $0xa4] sm:$0xf]  ;;  %v8251_v9 = vld [vmem:[#allocation11 + $0x88] sm:$0xf] }
 0x2ea   :  { %v8260_v15 = vor.u32 %v9779_v60, %v8259_v36  ;;  %v9776_v42 = vld [vmem:[#allocation11 + $0x94] sm:$0xf0]  ;;  %v8227_v45 = vld [vmem:[#allocation11 + $0x60] sm:$0xf]  ;;  %v8229_v14 = vld [vmem:[#allocation11 + $0x70] sm:$0xf0] }
 0x2eb   :  { %10186 = vtanh.f32 %v2933_v54  ;;  %v11543_v32 = vsel %vm2940_vm3, %v2933_v54, %v11403_v53  ;;  %v2924_v17 = vsel %vm2923_vm5, %v10183_v61, %v2920_v62  ;;  %v8261_v54 = vld [vmem:[#allocation11 + $0xb0] sm:$0xf0]  ;;  %v8267_v62 = vld [vmem:[#allocation11 + $0xa8] sm:$0xf]  ;;  %v8252_v58 = vor.u32 %v9776_v42, %v8251_v9  ;;  %v9772_v33 = vld [vmem:[#allocation11 + $0x74] sm:$0xf0] }
 0x2ec   :  { %v2929_v51 = vsel %vm2926_vm6, %v2928_v26, %v2924_v17  ;;  %3809 = vmatpush.bf16.msra.mxu0 %v8276_v3  ;;  %3822 = vmatpush.bf16.msra.mxu1 %v8280_v46  ;;  %v8264_v52 = vor.u32 %v9777_v18, %v8261_v54  ;;  %v8268_v17 = vor.u32 %v9780_v47, %v8267_v62  ;;  %v9778_v26 = vld [vmem:[#allocation11 + $0xac] sm:$0xf]  ;;  %v8235_v39 = vld [vmem:[#allocation11 + $0x68] sm:$0xf]  ;;  %v8237_v24 = vld [vmem:[#allocation11 + $0x78] sm:$0xf0] }
 0x2ed   :  { %3835 = vmatpush.bf16.msra.mxu2 %v8284_v48  ;;  %v8236_v63 = vor.u32 %v9772_v33, %v8235_v39  ;;  %v9770_v8 = vld [vmem:[#allocation11 + $0x6c] sm:$0xf]  ;;  %v8211_v48 = vld [vmem:[#allocation11 + $0x40] sm:$0xf]  ;;  %v9767_v41 = vld [vmem:[#allocation11 + $0x4c] sm:$0xf0] }
 0x2ee   :  { %v8240_v46 = vor.u32 %v9770_v8, %v8237_v24  ;;  %v9765_v21 = vld [vmem:[#allocation11 + $0x44] sm:$0xf]  ;;  %v8213_v36 = vld [vmem:[#allocation11 + $0x50] sm:$0xf0]  ;;  %v8219_v60 = vld [vmem:[#allocation11 + $0x48] sm:$0xf] }
 0x2ef   :  { %v9768_v18 = vld [vmem:[#allocation11 + $0x54] sm:$0xf0]  ;;  %v9766_v62 = vld [vmem:[#allocation11 + $0x4c] sm:$0xf]  ;;  %v8221_v47 = vld [vmem:[#allocation11 + $0x58] sm:$0xf0] }
 0x2f0   :  { %3810 = vmatpush.bf16.msra.mxu0 %v8260_v15  ;;  %3823 = vmatpush.bf16.msra.mxu1 %v8264_v52  ;;  %v8216_v15 = vor.u32 %v9765_v21, %v8213_v36  ;;  %v8220_v54 = vor.u32 %v9768_v18, %v8219_v60  ;;  %v8224_v52 = vor.u32 %v9766_v62, %v8221_v47  ;;  %v9762_v9 = vld [vmem:[#allocation11 + $0x2c] sm:$0xf]  ;;  %v8205_v42 = vld [vmem:[#allocation11 + $0x38] sm:$0xf0]  ;;  %v8181_v33 = vld [vmem:[#allocation11 + $0x10] sm:$0xf0] }
 0x2f1   :  { %v10187_v12 = vpop.eup %10186  ;;  %3836 = vmatpush.bf16.msra.mxu2 %v8268_v17  ;;  %v8195_v17 = vld [vmem:[#allocation11 + $0x20] sm:$0xf]  ;;  %v8208_v29 = vor.u32 %v9762_v9, %v8205_v42  ;;  %v9819_v36 = vld [vmem:[#allocation13 + $0xec] sm:$0xf0]  ;;  %v9817_v18 = vld [vmem:[#allocation13 + $0xe4] sm:$0xf] }
 0x2f2   :  { %v2935_v7 = vmul.f32 %v10187_v12, %v2929_v51  ;;  %v8269_v12 = vld [vmem:[#allocation11 + $0xb8] sm:$0xf0]  ;;  %v9820_v47 = vld [vmem:[#allocation13 + $0xf4] sm:$0xf0]  ;;  %v8408_v42 = vld [vmem:[#allocation13 + $0xd0] sm:$0xf0] }
 0x2f3   :  { %v8272_v51 = vor.u32 %v9778_v26, %v8269_v12  ;;  %v9763_v26 = vld [vmem:[#allocation11 + $0x2c] sm:$0xf0]  ;;  %v9761_v12 = vld [vmem:[#allocation11 + $0x24] sm:$0xf] }
 0x2f4   :  { %v2941_v22 = vsel %vm2940_vm3, %v2935_v7, 0.0  ;;  %v11552_v28 = vsel %vm2940_vm3, %v2935_v7, %v11412_v30  ;;  %v9786_v30 = vld [vmem:[#allocation11 + $0xec] sm:$0xf]  ;;  %v8243_v7 = vld [vmem:[#allocation11 + $0x80] sm:$0xf] }
 0x2f5   :  { %v2942_v53 = vpack.c.bf16 %v2941_v22, %v2941_v22  ;;  %v3285_v49 = vpack.c.bf16 %v11552_v28, %v11552_v28  ;;  %v8304_v61 = vor.u32 %v9786_v30, %v8301_v43  ;;  %v9775_v22 = vld [vmem:[#allocation11 + $0x8c] sm:$0xf0]  ;;  %3837 = vmatpush.bf16.msra.mxu2 %v8252_v58  ;;  %v9769_v43 = vld [vmem:[#allocation11 + $0x64] sm:$0xf]  ;;  %v2952_v58 = vunpack.c.h.bf16 %v10985_v55 }
 0x2f6   :  { %v9771_v30 = vld [vmem:[#allocation11 + $0x6c] sm:$0xf0]  ;;  %v8232_v3 = vor.u32 %v9769_v43, %v8229_v14  ;;  %v9757_v43 = vld [vmem:[#allocation11 + $0x4] sm:$0xf] }
 0x2f7   :  { %2944 = vst [vmem:[#allocation4 + $0x14] sm:$0xf] %v2942_v53  ;;  %3486 = vmatmul.bf16.vlgmr.msrb.gmra.mxu0 %v3285_v49  ;;  %3499 = vmatmul.bf16.vlgmr.msrb.gmra.mxu1 %v3285_v49  ;;  %v9773_v53 = vld [vmem:[#allocation11 + $0x84] sm:$0xf]  ;;  %v8184_v8 = vor.u32 %v9757_v43, %v8181_v33  ;;  %v8416_v43 = vld [vmem:[#allocation13 + $0xd8] sm:$0xf0] }
 0x2f8   :  { %3512 = vmatmul.bf16.vlgmr.msrb.gmra.mxu2 %v3285_v49  ;;  %3525 = vmatmul.bf16.vlgmr.msrb.gmra.mxu3 %v3285_v49  ;;  %v8244_v49 = vor.u32 %v9775_v22, %v8243_v7  ;;  %v8248_v57 = vor.u32 %v9773_v53, %v8245_v23  ;;  %v8197_v7 = vld [vmem:[#allocation11 + $0x30] sm:$0xf0]  ;;  %v8203_v22 = vld [vmem:[#allocation11 + $0x28] sm:$0xf]  ;;  %v9764_v53 = vld [vmem:[#allocation11 + $0x34] sm:$0xf0] }
 0x2f9   :  { %3847 = vmatpush.bf16.msra.mxu3 %v8304_v61  ;;  %v8228_v61 = vor.u32 %v9771_v30, %v8227_v45  ;;  %3838 = vmatpush.bf16.msra.mxu2 %v8236_v63  ;;  %v8204_v23 = vor.u32 %v9764_v53, %v8203_v22  ;;  %v8179_v45 = vld [vmem:[#allocation11] sm:$0xf]  ;;  %v9759_v30 = vld [vmem:[#allocation11 + $0xc] sm:$0xf0]  ;;  %v9760_v63 = vld [vmem:[#allocation11 + $0x14] sm:$0xf0] }
 0x2fa   :  { %3811 = vmatpush.bf16.msra.mxu0 %v8244_v49  ;;  %3824 = vmatpush.bf16.msra.mxu1 %v8248_v57  ;;  %v8200_v49 = vor.u32 %v9761_v12, %v8197_v7  ;;  %v2951_v57 = vunpack.c.l.bf16 %v10985_v55  ;;  %v8180_v39 = vor.u32 %v9759_v30, %v8179_v45  ;;  %v8189_v55 = vld [vmem:[#allocation11 + $0x18] sm:$0xf0]  ;;  %v8406_v7 = vld [vmem:[#allocation13 + $0xc0] sm:$0xf]  ;;  %v9815_v22 = vld [vmem:[#allocation13 + $0xcc] sm:$0xf0] }
 0x2fb   :  { %v9813_v53 = vld [vmem:[#allocation13 + $0xc4] sm:$0xf]  ;;  %v8407_v9 = vor.u32 %v9815_v22, %v8406_v7  ;;  %v9814_v30 = vld [vmem:[#allocation13 + $0xcc] sm:$0xf]  ;;  %v9811_v33 = vld [vmem:[#allocation13 + $0xac] sm:$0xf0]  ;;  %v3281_v7 = vunpack.c.l.bf16 %v11068_v4  ;;  %v3282_v22 = vunpack.c.h.bf16 %v11068_v4 }
 0x2fc   :  { %v8411_v45 = vor.u32 %v9813_v53, %v8408_v42  ;;  %v8376_v53 = vld [vmem:[#allocation13 + $0x90] sm:$0xf0] }
 0x2fd   :  { %3848 = vmatpush.bf16.msra.mxu3 %v8288_v20  ;;  %v8212_v20 = vor.u32 %v9767_v41, %v8211_v48  ;;  %3839 = vmatpush.bf16.msra.mxu2 %v8220_v54  ;;  %v8422_v48 = vld [vmem:[#allocation13 + $0xe0] sm:$0xf]  ;;  %v8430_v54 = vld [vmem:[#allocation13 + $0xe8] sm:$0xf] }
 0x2fe   :  { %3812 = vmatpush.bf16.msra.mxu0 %v8228_v61  ;;  %3825 = vmatpush.bf16.msra.mxu1 %v8232_v3  ;;  %v8187_v3 = vld [vmem:[#allocation11 + $0x8] sm:$0xf]  ;;  %v8423_v60 = vor.u32 %v9819_v36, %v8422_v48  ;;  %v8431_v12 = vor.u32 %v9820_v47, %v8430_v54  ;;  %v9807_v47 = vld [vmem:[#allocation13 + $0x8c] sm:$0xf0] }
 0x2ff   :  { %v8188_v24 = vor.u32 %v9760_v63, %v8187_v3  ;;  %v9809_v3 = vld [vmem:[#allocation13 + $0xa4] sm:$0xf] }
 0x301   :  { %3849 = vmatpush.bf16.msra.mxu3 %v8272_v51  ;;  %v8196_v51 = vor.u32 %v9763_v26, %v8195_v17  ;;  %3840 = vmatpush.bf16.msra.mxu2 %v8204_v23  ;;  %v8432_v17 = vld [vmem:[#allocation13 + $0xf8] sm:$0xf0]  ;;  %v2954_v26 = vunpack.c.h.bf16 %v10991_v0 }
 0x302   :  { %3813 = vmatpush.bf16.msra.mxu0 %v8212_v20  ;;  %3826 = vmatpush.bf16.msra.mxu1 %v8216_v15  ;;  %v8424_v15 = vld [vmem:[#allocation13 + $0xf0] sm:$0xf0] }
 0x303   :  { %v8427_v62 = vor.u32 %v9817_v18, %v8424_v15 }
 0x305   :  { %3850 = vmatpush.bf16.msra.mxu3 %v8256_v44  ;;  %3841 = vmatpush.bf16.msra.mxu2 %v8188_v24  ;;  %v8392_v24 = vld [vmem:[#allocation13 + $0xb0] sm:$0xf0] }
 0x306   :  { %3814 = vmatpush.bf16.msra.mxu0 %v8196_v51  ;;  %3827 = vmatpush.bf16.msra.mxu1 %v8200_v49  ;;  %v8395_v48 = vor.u32 %v9809_v3, %v8392_v24  ;;  %v8358_v3 = vld [vmem:[#allocation13 + $0x60] sm:$0xf] }
 0x309   :  { %3851 = vmatpush.bf16.msra.mxu3 %v8240_v46  ;;  %v9758_v46 = vld [vmem:[#allocation11 + $0xc] sm:$0xf]  ;;  %4158 = vmatpush.bf16.msrb.mxu2 %v8431_v12 }
 0x30a   :  { %3815 = vmatpush.bf16.msra.mxu0 %v8180_v39  ;;  %v8192_v20 = vor.u32 %v9758_v46, %v8189_v55  ;;  %3828 = vmatpush.bf16.msra.mxu1 %v8184_v8  ;;  %v8390_v39 = vld [vmem:[#allocation13 + $0xa0] sm:$0xf]  ;;  %v8398_v46 = vld [vmem:[#allocation13 + $0xa8] sm:$0xf] }
 0x30b   :  { %v8391_v8 = vor.u32 %v9811_v33, %v8390_v39 }
 0x30d   :  { %3852 = vmatpush.bf16.msra.mxu3 %v8224_v52  ;;  %v9818_v52 = vld [vmem:[#allocation13 + $0xec] sm:$0xf] }
 0x30e   :  { %4132 = vmatpush.bf16.msrb.mxu0 %v8423_v60  ;;  %v8435_v51 = vor.u32 %v9818_v52, %v8432_v17  ;;  %4145 = vmatpush.bf16.msrb.mxu1 %v8427_v62  ;;  %v8374_v62 = vld [vmem:[#allocation13 + $0x80] sm:$0xf]  ;;  %v2953_v52 = vunpack.c.l.bf16 %v10991_v0  ;;  %v9805_v17 = vld [vmem:[#allocation13 + $0x84] sm:$0xf] }
 0x30f   :  { %v8375_v0 = vor.u32 %v9807_v47, %v8374_v62  ;;  %v8379_v42 = vor.u32 %v9805_v17, %v8376_v53  ;;  %v3284_v47 = vunpack.c.h.bf16 %v11074_v13  ;;  %v8368_v17 = vld [vmem:[#allocation13 + $0x78] sm:$0xf0] }
 0x311   :  { %3853 = vmatpush.bf16.msra.mxu3 %v8208_v29 }
 0x312   :  { %4133 = vmatpush.bf16.msrb.mxu0 %v8407_v9  ;;  %4146 = vmatpush.bf16.msrb.mxu1 %v8411_v45 }
 0x315   :  { %3854 = vmatpush.bf16.msra.mxu3 %v8192_v20  ;;  %v8400_v20 = vld [vmem:[#allocation13 + $0xb8] sm:$0xf0] }
 0x316   :  { %4134 = vmatpush.bf16.msrb.mxu0 %v8391_v8  ;;  %4147 = vmatpush.bf16.msrb.mxu1 %v8395_v48  ;;  %v9801_v8 = vld [vmem:[#allocation13 + $0x64] sm:$0xf]  ;;  %v8366_v48 = vld [vmem:[#allocation13 + $0x68] sm:$0xf] }
 0x319   :  { %4171 = vmatpush.bf16.msrb.mxu3 %v8435_v51 }
 0x31a   :  { %4135 = vmatpush.bf16.msrb.mxu0 %v8375_v0  ;;  %4148 = vmatpush.bf16.msrb.mxu1 %v8379_v42 }
 0x363   :  { %v3157_v19 = vpop.f32.mrf.mxu0  ;;  %v3170_v44 = vpop.f32.mrf.mxu1 }
 0x364   :  { %v3200_v61 = vadd.f32 %v3157_v19, %v2951_v57  ;;  %v3201_v14 = vadd.f32 %v3170_v44, %v2952_v58  ;;  %v8414_v57 = vld [vmem:[#allocation13 + $0xc8] sm:$0xf]  ;;  %v9816_v58 = vld [vmem:[#allocation13 + $0xd4] sm:$0xf0] }
 0x366   :  { %v8043_v41 = vmul.f32 -1.442695, %v3200_v61  ;;  %v8044_v21 = vmul.f32 -1.442695, %v3201_v14  ;;  %v8415_v61 = vor.u32 %v9816_v58, %v8414_v57  ;;  %v8419_v14 = vor.u32 %v9814_v30, %v8416_v43  ;;  %v8382_v57 = vld [vmem:[#allocation13 + $0x88] sm:$0xf] }
 0x367   :  { %v9808_v58 = vld [vmem:[#allocation13 + $0x94] sm:$0xf0]  ;;  %v9806_v30 = vld [vmem:[#allocation13 + $0x8c] sm:$0xf]  ;;  %v8384_v43 = vld [vmem:[#allocation13 + $0x98] sm:$0xf0] }
 0x368   :  { %10188 = vpow2.f32 %v8043_v41  ;;  %v9812_v41 = vld [vmem:[#allocation13 + $0xb4] sm:$0xf0]  ;;  %4159 = vmatpush.bf16.msrb.mxu2 %v8415_v61  ;;  %4172 = vmatpush.bf16.msrb.mxu3 %v8419_v14  ;;  %v8383_v45 = vor.u32 %v9808_v58, %v8382_v57  ;;  %v8387_v33 = vor.u32 %v9806_v30, %v8384_v43  ;;  %v9797_v57 = vld [vmem:[#allocation13 + $0x44] sm:$0xf]  ;;  %v8344_v58 = vld [vmem:[#allocation13 + $0x50] sm:$0xf0] }
 0x369   :  { %10190 = vpow2.f32 %v8044_v21  ;;  %v9810_v21 = vld [vmem:[#allocation13 + $0xac] sm:$0xf]  ;;  %v8399_v18 = vor.u32 %v9812_v41, %v8398_v46 }
 0x36a   :  { %v11559_v49 = vpop.f32.mrf.mxu2  ;;  %v3196_v23 = vpop.f32.mrf.mxu3  ;;  %v8403_v15 = vor.u32 %v9810_v21, %v8400_v20 }
 0x36b   :  { %v3203_v29 = vadd.f32 %v3196_v23, %v2954_v26  ;;  %v3159_v19 = vpop.f32.mrf.mxu0  ;;  %v3172_v44 = vpop.f32.mrf.mxu1  ;;  %v3202_v61 = vadd.f32 %v11559_v49, %v2953_v52  ;;  %v9802_v52 = vld [vmem:[#allocation13 + $0x6c] sm:$0xf] }
 0x36c   :  { %4160 = vmatpush.bf16.msrb.mxu2 %v8399_v18  ;;  %4173 = vmatpush.bf16.msrb.mxu3 %v8403_v15  ;;  %v8371_v42 = vor.u32 %v9802_v52, %v8368_v17  ;;  %v8334_v52 = vld [vmem:[#allocation13 + $0x28] sm:$0xf] }
 0x36d   :  { %v8045_v63 = vmul.f32 -1.442695, %v3203_v29 }
 0x36e   :  { %v10189_v55 = vpop.eup %10188 }
 0x36f   :  { %v10191_v36 = vpop.eup %10190  ;;  %v11561_v60 = vadd.f32 1.0, %v10189_v55  ;;  %10192 = vpow2.f32 %v8045_v63  ;;  %v9803_v63 = vld [vmem:[#allocation13 + $0x6c] sm:$0xf0]  ;;  %v8360_v55 = vld [vmem:[#allocation13 + $0x70] sm:$0xf0] }
 0x370   :  { %v11563_v54 = vadd.f32 1.0, %v10191_v36  ;;  %v8359_v46 = vor.u32 %v9803_v63, %v8358_v3  ;;  %4161 = vmatpush.bf16.msrb.mxu2 %v8383_v45  ;;  %4174 = vmatpush.bf16.msrb.mxu3 %v8387_v33  ;;  %v8363_v49 = vor.u32 %v9801_v8, %v8360_v55  ;;  %v9804_v36 = vld [vmem:[#allocation13 + $0x74] sm:$0xf0]  ;;  %v8350_v45 = vld [vmem:[#allocation13 + $0x48] sm:$0xf]  ;;  %v8347_v63 = vor.u32 %v9797_v57, %v8344_v58 }
 0x371   :  { %10194 = vrcp.f32 %v11561_v60  ;;  %v3217_v26 = vand.u32 2147483647, %v11561_v60  ;;  %v3219_v9 = vand.u32 2147483648, %v11561_v60  ;;  %v8367_v0 = vor.u32 %v9804_v36, %v8366_v48  ;;  %v9795_v55 = vld [vmem:[#allocation13 + $0x2c] sm:$0xf0] }
 0x372   :  { %10196 = vrcp.f32 %v11563_v54  ;;  %v3185_v12 = vpop.f32.mrf.mxu2  ;;  %v3198_v51 = vpop.f32.mrf.mxu3  ;;  %v3238_v23 = vand.u32 2147483648, %v11563_v54  ;;  %v3236_v29 = vand.u32 2147483647, %v11563_v54  ;;  %4136 = vmatpush.bf16.msrb.mxu0 %v8359_v46  ;;  %4149 = vmatpush.bf16.msrb.mxu1 %v8363_v49  ;;  %vm3213_vm12 = vweird.f32 %v11561_v60  ;;  %v8326_v46 = vld [vmem:[#allocation13 + $0x20] sm:$0xf] }
 0x373   :  { %vm11583_vm8 = vcmp.eq.f32.partialorder %v3217_v26, 8.507059e+37  ;;  %v9799_v26 = vld [vmem:[#allocation13 + $0x4c] sm:$0xf0]  ;;  %v9793_v48 = vld [vmem:[#allocation13 + $0x24] sm:$0xf]  ;;  %vm3232_vm1 = vweird.f32 %v11563_v54 }
 0x374   :  { %v3487_v19 = vpop.f32.mrf.mxu0  ;;  %v3500_v44 = vpop.f32.mrf.mxu1  ;;  %v11591_v51 = vor.u32 1.1754944e-38, %v3238_v23  ;;  %vm11596_vm10 = vcmp.eq.f32.partialorder %v3236_v29, 8.507059e+37  ;;  %4162 = vmatpush.bf16.msrb.mxu2 %v8367_v0  ;;  %4175 = vmatpush.bf16.msrb.mxu3 %v8371_v42  ;;  %v9800_v29 = vld [vmem:[#allocation13 + $0x54] sm:$0xf0]  ;;  %v8336_v0 = vld [vmem:[#allocation13 + $0x38] sm:$0xf0] }
 0x375   :  { %v10193_v4 = vpop.eup %10192  ;;  %v3530_v14 = vadd.f32 %v3487_v19, %v3281_v7  ;;  %v3531_v39 = vadd.f32 %v3500_v44, %v3282_v22  ;;  %v11593_v7 = vor.u32 1.1754944e-38, %v3219_v9  ;;  %v8342_v22 = vld [vmem:[#allocation13 + $0x40] sm:$0xf]  ;;  %v8351_v8 = vor.u32 %v9800_v29, %v8350_v45 }
 0x376   :  { %v11575_v24 = vadd.f32 1.0, %v10193_v4  ;;  %v8343_v3 = vor.u32 %v9799_v26, %v8342_v22  ;;  %4150 = vmatpush.bf16.msrb.mxu1 %v8347_v63  ;;  %v8327_v26 = vor.u32 %v9795_v55, %v8326_v46  ;;  %v9789_v63 = vld [vmem:[#allocation13 + $0x4] sm:$0xf]  ;;  %v3283_v46 = vunpack.c.l.bf16 %v11074_v13  ;;  %v9792_v55 = vld [vmem:[#allocation13 + $0x14] sm:$0xf0] }
 0x377   :  { %v11577_v41 = vpop.eup %10194  ;;  %v8174_v21 = vmul.f32 -1.442695, %v3530_v14  ;;  %v8175_v20 = vmul.f32 -1.442695, %v3531_v39  ;;  %v9798_v14 = vld [vmem:[#allocation13 + $0x4c] sm:$0xf] }
 0x378   :  { %v11579_v18 = vpop.eup %10196  ;;  %v3209_v15 = vmul.f32 %v11577_v41, %v11561_v60  ;;  %10198 = vrcp.f32 %v11575_v24  ;;  %vm3214_vm9 = vweird.f32 %v11577_v41  ;;  %v8352_v39 = vld [vmem:[#allocation13 + $0x58] sm:$0xf0]  ;;  %4137 = vmatpush.bf16.msrb.mxu0 %v8343_v3  ;;  %v9796_v60 = vld [vmem:[#allocation13 + $0x34] sm:$0xf0]  ;;  %4163 = vmatpush.bf16.msrb.mxu2 %v8351_v8  ;;  %v8312_v8 = vld [vmem:[#allocation13 + $0x10] sm:$0xf0] }
 0x379   :  { %v3228_v12 = vmul.f32 %v11579_v18, %v11563_v54  ;;  %10200 = vtanh.f32 %v3202_v61  ;;  %vm3233_vm11 = vweird.f32 %v11579_v18  ;;  %vm11613_vm15 = vmor %vm3213_vm12, %vm3214_vm9  ;;  %v8335_v58 = vor.u32 %v9796_v60, %v8334_v52 }
 0x37a   :  { %v3210_v53 = vsub.f32 1.0, %v3209_v15  ;;  %10202 = vpow2.f32 %v8174_v21  ;;  %v8355_v15 = vor.u32 %v9798_v14, %v8352_v39  ;;  %vm3234_vm4 = vmor %vm3232_vm1, %vm3233_vm11  ;;  %v8310_v39 = vld [vmem:[#allocation13] sm:$0xf]  ;;  %v3256_v52 = vand.u32 2147483647, %v11575_v24 }
 0x37b   :  { %v3229_v19 = vsub.f32 1.0, %v3228_v12  ;;  %10204 = vpow2.f32 %v8175_v20  ;;  %v11600_v23 = vpop.f32.mrf.mxu2  ;;  %v3526_v9 = vpop.f32.mrf.mxu3 }
 0x37c   :  { %v3211_v30 = vmul.f32 %v11577_v41, %v3210_v53  ;;  %v3533_v43 = vadd.f32 %v3526_v9, %v3284_v47  ;;  %v3489_v4 = vpop.f32.mrf.mxu0  ;;  %v3502_v61 = vpop.f32.mrf.mxu1  ;;  %v8328_v47 = vld [vmem:[#allocation13 + $0x30] sm:$0xf0]  ;;  %v9794_v53 = vld [vmem:[#allocation13 + $0x2c] sm:$0xf]  ;;  %4176 = vmatpush.bf16.msrb.mxu3 %v8355_v15  ;;  %4138 = vmatpush.bf16.msrb.mxu0 %v8327_v26 }
 0x37d   :  { %v3230_v33 = vmul.f32 %v11579_v18, %v3229_v19  ;;  %v8331_v54 = vor.u32 %v9793_v48, %v8328_v47  ;;  %v11626_v9 = vpop.permute.xlu0 %3269  ;;  %v8339_v14 = vor.u32 %v9794_v53, %v8336_v0  ;;  %4164 = vmatpush.bf16.msrb.mxu2 %v8335_v58  ;;  %v9790_v48 = vld [vmem:[#allocation13 + $0xc] sm:$0xf]  ;;  %v8315_v47 = vor.u32 %v9789_v63, %v8312_v8 }
 0x37e   :  { %v11606_v21 = vpop.eup %10198  ;;  %v3212_v20 = vadd.f32 %v11577_v41, %v3211_v30  ;;  %v8176_v36 = vmul.f32 -1.442695, %v3533_v43  ;;  %vm3271_vm5 = vcmp.eq.s32.totalorder %v11626_v9, 1 }
 0x37f   :  { %v10201_v17 = vpop.eup %10200  ;;  %v3231_v12 = vadd.f32 %v11579_v18, %v3230_v33  ;;  %v3248_v22 = vmul.f32 %v11606_v21, %v11575_v24  ;;  %4151 = vmatpush.bf16.msrb.mxu1 %v8331_v54  ;;  %vm3253_vm6 = vweird.f32 %v11606_v21 }
 0x380   :  { %v10203_v42 = vpop.eup %10202  ;;  %v3216_v57 = vsel %vm11613_vm15, %v11577_v41, %v3212_v20  ;;  %10206 = vpow2.f32 %v8176_v36  ;;  %4177 = vmatpush.bf16.msrb.mxu3 %v8339_v14  ;;  %v8320_v20 = vld [vmem:[#allocation13 + $0x18] sm:$0xf0] }
 0x381   :  { %v10205_v19 = vpop.eup %10204  ;;  %v3221_v45 = vsel %vm11583_vm8, %v11593_v7, %v3216_v57  ;;  %v3235_v30 = vsel %vm3234_vm4, %v11579_v18, %v3231_v12  ;;  %v3249_v43 = vsub.f32 1.0, %v3248_v22  ;;  %v11632_v4 = vadd.f32 1.0, %v10203_v42  ;;  %v9791_v7 = vld [vmem:[#allocation13 + $0xc] sm:$0xf0] }
 0x382   :  { %v3240_v41 = vsel %vm11596_vm10, %v11591_v51, %v3235_v30  ;;  %v3263_v61 = vmul.f32 %v10201_v17, %v3221_v45  ;;  %v11637_v29 = vadd.f32 1.0, %v10205_v19  ;;  %v8318_v51 = vld [vmem:[#allocation13 + $0x8] sm:$0xf]  ;;  %v8311_v15 = vor.u32 %v9791_v7, %v8310_v39 }
 0x383   :  { %v3262_v33 = vmul.f32 %v3240_v41, %v11502_v50  ;;  %v3250_v3 = vmul.f32 %v11606_v21, %v3249_v43  ;;  %10208 = vrcp.f32 %v11632_v4  ;;  %v3515_v62 = vpop.f32.mrf.mxu2  ;;  %v3528_v18 = vpop.f32.mrf.mxu3  ;;  %vm3252_vm8 = vweird.f32 %v11575_v24  ;;  %4152 = vmatpush.bf16.msrb.mxu1 %v8315_v47 }
 0x384   :  { %10210 = vrcp.f32 %v11637_v29  ;;  %v3258_v17 = vand.u32 2147483648, %v11575_v24  ;;  %v3532_v12 = vadd.f32 %v11600_v23, %v3283_v46  ;;  %4139 = vmatpush.bf16.msrb.mxu0 %v8311_v15  ;;  %v8319_v22 = vor.u32 %v9792_v55, %v8318_v51  ;;  %vm11653_vm9 = vmor %vm3252_vm8, %vm3253_vm6 }
 0x385   :  { %v3264_v44 = vadd.f32 %v3263_v61, %v3262_v33  ;;  %v3251_v36 = vadd.f32 %v11606_v21, %v3250_v3  ;;  %v8323_v26 = vor.u32 %v9790_v48, %v8320_v20  ;;  %vm3257_vm10 = vcmp.eq.f32.partialorder %v3256_v52, 8.507059e+37 }
 0x386   :  { %v10207_v49 = vpop.eup %10206  ;;  %4165 = vmatpush.bf16.msrb.mxu2 %v8319_v22  ;;  %v3259_v57 = vor.u32 1.1754944e-38, %v3258_v17  ;;  %v3568_v45 = vand.u32 2147483648, %v11637_v29  ;;  %v3549_v30 = vand.u32 2147483648, %v11632_v4  ;;  %v3547_v41 = vand.u32 2147483647, %v11632_v4 }
 0x387   :  { %10212 = vtanh.f32 %v3264_v44  ;;  %v11651_v13 = vadd.f32 1.0, %v10207_v49  ;;  %v11660_v0 = vsel %vm3271_vm5, %v3264_v44, %v11502_v50  ;;  %v3255_v24 = vsel %vm11653_vm9, %v11606_v21, %v3251_v36  ;;  %4178 = vmatpush.bf16.msrb.mxu3 %v8323_v26  ;;  %v11685_v49 = vpop.permute.xlu1 %3599 }
 0x388   :  { %v3260_v43 = vsel %vm3257_vm10, %v3259_v57, %v3255_v24  ;;  %vm3543_vm15 = vweird.f32 %v11632_v4  ;;  %v3566_v39 = vand.u32 2147483647, %v11637_v29  ;;  %vm3562_vm1 = vweird.f32 %v11637_v29 }
 0x389   :  { %v10209_v60 = vpop.eup %10208  ;;  %10214 = vrcp.f32 %v11651_v13  ;;  %v3550_v7 = vor.u32 1.1754944e-38, %v3549_v30  ;;  %vm3548_vm8 = vcmp.eq.f32.partialorder %v3547_v41, 8.507059e+37  ;;  %vm3601_vm10 = vcmp.eq.s32.totalorder %v11685_v49, 1  ;;  %v8561_v30 = vld [vmem:[#allocation11 + $0xe8] sm:$0xf] }
 0x38a   :  { %v10211_v42 = vpop.eup %10210  ;;  %v3539_v23 = vmul.f32 %v10209_v60, %v11632_v4  ;;  %10216 = vtanh.f32 %v3532_v12  ;;  %vm3544_vm11 = vweird.f32 %v10209_v60  ;;  %vm3567_vm9 = vcmp.eq.f32.partialorder %v3566_v39, 8.507059e+37  ;;  %v8537_v39 = vld [vmem:[#allocation11 + $0xc0] sm:$0xf] }
 0x38b   :  { %v3558_v54 = vmul.f32 %v10211_v42, %v11637_v29  ;;  %vm3563_vm12 = vweird.f32 %v10211_v42  ;;  %vm3545_vm4 = vmor %vm3543_vm15, %vm3544_vm11  ;;  %v3569_v29 = vor.u32 1.1754944e-38, %v3568_v45  ;;  %v3588_v17 = vand.u32 2147483648, %v11651_v13  ;;  %v8555_v45 = vld [vmem:[#allocation11 + $0xf0] sm:$0xf0] }
 0x38c   :  { %v3540_v58 = vsub.f32 1.0, %v3539_v23  ;;  %vm3564_vm6 = vmor %vm3562_vm1, %vm3563_vm12  ;;  %vm3582_vm12 = vweird.f32 %v11651_v13  ;;  %v3586_v22 = vand.u32 2147483647, %v11651_v13 }
 0x38d   :  { %v10213_v19 = vpop.eup %10212  ;;  %v3559_v50 = vsub.f32 1.0, %v3558_v54 }
 0x38e   :  { %v3541_v21 = vmul.f32 %v10209_v60, %v3540_v58  ;;  %v3266_v61 = vmul.f32 %v10213_v19, %v3260_v43  ;;  %vm3587_vm1 = vcmp.eq.f32.partialorder %v3586_v22, 8.507059e+37  ;;  %v9851_v58 = vld [vmem:[#allocation11 + $0xec] sm:$0xf0]  ;;  %v9849_v19 = vld [vmem:[#allocation11 + $0xe4] sm:$0xf] }
 0x38f   :  { %v3560_v14 = vmul.f32 %v10211_v42, %v3559_v50  ;;  %v10215_v33 = vpop.eup %10214  ;;  %v9852_v43 = vld [vmem:[#allocation11 + $0xf4] sm:$0xf0]  ;;  %v9842_v22 = vld [vmem:[#allocation11 + $0xac] sm:$0xf] }
 0x390   :  { %v3542_v3 = vadd.f32 %v10209_v60, %v3541_v21  ;;  %v3272_v62 = vsel %vm3271_vm5, %v3266_v61, 0.0  ;;  %v11679_v18 = vsel %vm3271_vm5, %v3266_v61, %v11531_v5  ;;  %v3578_v8 = vmul.f32 %v10215_v33, %v11651_v13  ;;  %v10217_v51 = vpop.eup %10216  ;;  %v8553_v13 = vld [vmem:[#allocation11 + $0xe0] sm:$0xf]  ;;  %v8563_v61 = vld [vmem:[#allocation11 + $0xf8] sm:$0xf0] }
 0x391   :  { %v3561_v63 = vadd.f32 %v10211_v42, %v3560_v14  ;;  %3274 = vst [vmem:[#allocation23 + $0x18] sm:$0xff] %v3272_v62  ;;  %v3615_v4 = vpack.c.bf16 %v11679_v18, %v11679_v18  ;;  %vm3583_vm11 = vweird.f32 %v10215_v33  ;;  %v8554_v50 = vor.u32 %v9851_v58, %v8553_v13  ;;  %v9840_v13 = vld [vmem:[#allocation11 + $0x94] sm:$0xf0] }
 0x392   :  { %v3546_v44 = vsel %vm3545_vm4, %v10209_v60, %v3542_v3  ;;  %v3579_v5 = vsub.f32 1.0, %v3578_v8  ;;  %vm3584_vm15 = vmor %vm3582_vm12, %vm3583_vm11  ;;  %v3589_v60 = vor.u32 1.1754944e-38, %v3588_v17  ;;  %v8558_v21 = vor.u32 %v9849_v19, %v8555_v45  ;;  %v9845_v3 = vld [vmem:[#allocation11 + $0xc4] sm:$0xf]  ;;  %v9848_v8 = vld [vmem:[#allocation11 + $0xd4] sm:$0xf0] }
 0x393   :  { %v3551_v46 = vsel %vm3548_vm8, %v3550_v7, %v3546_v44  ;;  %v3565_v55 = vsel %vm3564_vm6, %v10211_v42, %v3561_v63  ;;  %3816 = vmatmul.bf16.vlgmr.msra.gmra.mxu0 %v3615_v4  ;;  %3829 = vmatmul.bf16.vlgmr.msra.gmra.mxu1 %v3615_v4  ;;  %v8562_v41 = vor.u32 %v9852_v43, %v8561_v30  ;;  %v8539_v7 = vld [vmem:[#allocation11 + $0xd0] sm:$0xf0]  ;;  %v8545_v63 = vld [vmem:[#allocation11 + $0xc8] sm:$0xf]  ;;  %v8547_v44 = vld [vmem:[#allocation11 + $0xd8] sm:$0xf0] }
 0x394   :  { %v3570_v48 = vsel %vm3567_vm9, %v3569_v29, %v3565_v55  ;;  %v3593_v20 = vmul.f32 %v10217_v51, %v3551_v46  ;;  %3842 = vmatmul.bf16.vlgmr.msra.gmra.mxu2 %v3615_v4  ;;  %3855 = vmatmul.bf16.vlgmr.msra.gmra.mxu3 %v3615_v4  ;;  %v3580_v15 = vmul.f32 %v10215_v33, %v3579_v5  ;;  %v9846_v29 = vld [vmem:[#allocation11 + $0xcc] sm:$0xf]  ;;  %v8521_v55 = vld [vmem:[#allocation11 + $0xa0] sm:$0xf]  ;;  %v9843_v5 = vld [vmem:[#allocation11 + $0xac] sm:$0xf0] }
 0x395   :  { %v3592_v36 = vmul.f32 %v3570_v48, %v11543_v32  ;;  %4457 = vmatpush.bf16.msra.mxu0 %v8554_v50  ;;  %4470 = vmatpush.bf16.msra.mxu1 %v8558_v21  ;;  %v8542_v4 = vor.u32 %v9845_v3, %v8539_v7  ;;  %v8546_v51 = vor.u32 %v9848_v8, %v8545_v63  ;;  %v9841_v48 = vld [vmem:[#allocation11 + $0xa4] sm:$0xf]  ;;  %v9838_v50 = vld [vmem:[#allocation11 + $0x8c] sm:$0xf]  ;;  %v8515_v45 = vld [vmem:[#allocation11 + $0x98] sm:$0xf0] }
 0x396   :  { %v3581_v52 = vadd.f32 %v10215_v33, %v3580_v15  ;;  %4483 = vmatpush.bf16.msra.mxu2 %v8562_v41  ;;  %v8550_v46 = vor.u32 %v9846_v29, %v8547_v44  ;;  %v8529_v15 = vld [vmem:[#allocation11 + $0xa8] sm:$0xf]  ;;  %v8518_v30 = vor.u32 %v9838_v50, %v8515_v45  ;;  %v8489_v43 = vld [vmem:[#allocation11 + $0x60] sm:$0xf]  ;;  %v9835_v21 = vld [vmem:[#allocation11 + $0x6c] sm:$0xf0] }
 0x397   :  { %v3594_v47 = vadd.f32 %v3593_v20, %v3592_v36  ;;  %v8522_v20 = vor.u32 %v9843_v5, %v8521_v55  ;;  %v8523_v36 = vld [vmem:[#allocation11 + $0xb0] sm:$0xf0]  ;;  %v9833_v41 = vld [vmem:[#allocation11 + $0x64] sm:$0xf]  ;;  %v8499_v7 = vld [vmem:[#allocation11 + $0x78] sm:$0xf0] }
 0x398   :  { %v3585_v26 = vsel %vm3584_vm15, %v10215_v33, %v3581_v52  ;;  %v9847_v33 = vld [vmem:[#allocation11 + $0xcc] sm:$0xf0]  ;;  %v8526_v52 = vor.u32 %v9841_v48, %v8523_v36  ;;  %v8473_v8 = vld [vmem:[#allocation11 + $0x40] sm:$0xf]  ;;  %v8475_v44 = vld [vmem:[#allocation11 + $0x50] sm:$0xf0] }
 0x399   :  { %10218 = vtanh.f32 %v3594_v47  ;;  %v11693_v12 = vsel %vm3601_vm10, %v3594_v47, %v11543_v32  ;;  %v3590_v42 = vsel %vm3587_vm1, %v3589_v60, %v3585_v26  ;;  %v8538_v62 = vor.u32 %v9847_v33, %v8537_v39  ;;  %4471 = vmatpush.bf16.msra.mxu1 %v8542_v4  ;;  %v9844_v47 = vld [vmem:[#allocation11 + $0xb4] sm:$0xf0]  ;;  %v8531_v26 = vld [vmem:[#allocation11 + $0xb8] sm:$0xf0]  ;;  %v9831_v4 = vld [vmem:[#allocation11 + $0x4c] sm:$0xf0] }
 0x39a   :  { %4484 = vmatpush.bf16.msra.mxu2 %v8546_v51  ;;  %v8530_v17 = vor.u32 %v9844_v47, %v8529_v15  ;;  %v8534_v60 = vor.u32 %v9842_v22, %v8531_v26  ;;  %v9836_v39 = vld [vmem:[#allocation11 + $0x74] sm:$0xf0]  ;;  %v9829_v51 = vld [vmem:[#allocation11 + $0x44] sm:$0xf]  ;;  %v8474_v29 = vor.u32 %v9831_v4, %v8473_v8  ;;  %v8483_v36 = vld [vmem:[#allocation11 + $0x58] sm:$0xf0]  ;;  %v3611_v22 = vunpack.c.l.bf16 %v10993_v1 }
 0x39b   :  { %4458 = vmatpush.bf16.msra.mxu0 %v8538_v62  ;;  %v9834_v62 = vld [vmem:[#allocation11 + $0x6c] sm:$0xf]  ;;  %v9832_v55 = vld [vmem:[#allocation11 + $0x54] sm:$0xf0]  ;;  %v8478_v5 = vor.u32 %v9829_v51, %v8475_v44  ;;  %v8457_v47 = vld [vmem:[#allocation11 + $0x20] sm:$0xf]  ;;  %v3612_v26 = vunpack.c.h.bf16 %v10993_v1  ;;  %v3614_v51 = vunpack.c.h.bf16 %v10999_v10 }
 0x39c   :  { %v8502_v63 = vor.u32 %v9834_v62, %v8499_v7  ;;  %v9821_v1 = vld [vmem:[#allocation11 + $0x4] sm:$0xf]  ;;  %v9822_v62 = vld [vmem:[#allocation11 + $0xc] sm:$0xf]  ;;  %v8684_v8 = vld [vmem:[#allocation13 + $0xe0] sm:$0xf] }
 0x39d   :  { %4472 = vmatpush.bf16.msra.mxu1 %v8526_v52  ;;  %v9827_v52 = vld [vmem:[#allocation11 + $0x2c] sm:$0xf0] }
 0x39e   :  { %4485 = vmatpush.bf16.msra.mxu2 %v8530_v17  ;;  %v9825_v17 = vld [vmem:[#allocation11 + $0x24] sm:$0xf]  ;;  %v9883_v4 = vld [vmem:[#allocation13 + $0xec] sm:$0xf0] }
 0x39f   :  { %v10219_v53 = vpop.eup %10218  ;;  %4459 = vmatpush.bf16.msra.mxu0 %v8522_v20  ;;  %v9830_v20 = vld [vmem:[#allocation11 + $0x4c] sm:$0xf]  ;;  %v8685_v44 = vor.u32 %v9883_v4, %v8684_v8  ;;  %v9876_v8 = vld [vmem:[#allocation13 + $0xb4] sm:$0xf0] }
 0x3a0   :  { %v3596_v24 = vmul.f32 %v10219_v53, %v3590_v42  ;;  %v8505_v53 = vld [vmem:[#allocation11 + $0x80] sm:$0xf]  ;;  %v9839_v42 = vld [vmem:[#allocation11 + $0x8c] sm:$0xf0]  ;;  %v8486_v15 = vor.u32 %v9830_v20, %v8483_v36  ;;  %v9874_v4 = vld [vmem:[#allocation13 + $0xac] sm:$0xf] }
 0x3a2   :  { %v3602_v23 = vsel %vm3601_vm10, %v3596_v24, 0.0  ;;  %v11702_v57 = vsel %vm3601_vm10, %v3596_v24, %v11552_v28  ;;  %v9850_v28 = vld [vmem:[#allocation11 + $0xec] sm:$0xf]  ;;  %v9837_v24 = vld [vmem:[#allocation11 + $0x84] sm:$0xf] }
 0x3a3   :  { %v3603_v32 = vpack.c.bf16 %v3602_v23, %v3602_v23  ;;  %v3939_v54 = vpack.c.bf16 %v11702_v57, %v11702_v57  ;;  %v8566_v14 = vor.u32 %v9850_v28, %v8563_v61  ;;  %v8506_v23 = vor.u32 %v9839_v42, %v8505_v53  ;;  %v8491_v61 = vld [vmem:[#allocation11 + $0x70] sm:$0xf0]  ;;  %v8465_v42 = vld [vmem:[#allocation11 + $0x28] sm:$0xf] }
 0x3a4   :  { %v8490_v28 = vor.u32 %v9835_v21, %v8489_v43  ;;  %v8494_v33 = vor.u32 %v9833_v41, %v8491_v61  ;;  %v8459_v53 = vld [vmem:[#allocation11 + $0x30] sm:$0xf0]  ;;  %v8441_v43 = vld [vmem:[#allocation11] sm:$0xf]  ;;  %v9823_v21 = vld [vmem:[#allocation11 + $0xc] sm:$0xf0] }
 0x3a5   :  { %3605 = vst [vmem:[#allocation4 + $0x10] sm:$0xf] %v3603_v32  ;;  %4140 = vmatmul.bf16.vlgmr.msrb.gmra.mxu0 %v3939_v54  ;;  %4153 = vmatmul.bf16.vlgmr.msrb.gmra.mxu1 %v3939_v54  ;;  %v8507_v32 = vld [vmem:[#allocation11 + $0x90] sm:$0xf0]  ;;  %v8442_v61 = vor.u32 %v9823_v21, %v8441_v43  ;;  %v8678_v43 = vld [vmem:[#allocation13 + $0xd8] sm:$0xf0] }
 0x3a6   :  { %4166 = vmatmul.bf16.vlgmr.msrb.gmra.mxu2 %v3939_v54  ;;  %4179 = vmatmul.bf16.vlgmr.msrb.gmra.mxu3 %v3939_v54  ;;  %v8513_v54 = vld [vmem:[#allocation11 + $0x88] sm:$0xf]  ;;  %v8510_v58 = vor.u32 %v9837_v24, %v8507_v32  ;;  %v9828_v24 = vld [vmem:[#allocation11 + $0x34] sm:$0xf0] }
 0x3a7   :  { %4496 = vmatpush.bf16.msra.mxu3 %v8566_v14  ;;  %v8514_v19 = vor.u32 %v9840_v13, %v8513_v54  ;;  %4460 = vmatpush.bf16.msra.mxu0 %v8506_v23  ;;  %v8497_v14 = vld [vmem:[#allocation11 + $0x68] sm:$0xf]  ;;  %v8462_v54 = vor.u32 %v9825_v17, %v8459_v53  ;;  %v8466_v13 = vor.u32 %v9828_v24, %v8465_v42  ;;  %v8668_v53 = vld [vmem:[#allocation13 + $0xc0] sm:$0xf]  ;;  %v9879_v42 = vld [vmem:[#allocation13 + $0xcc] sm:$0xf0] }
 0x3a8   :  { %4473 = vmatpush.bf16.msra.mxu1 %v8510_v58  ;;  %v8498_v3 = vor.u32 %v9836_v39, %v8497_v14  ;;  %v9826_v58 = vld [vmem:[#allocation11 + $0x2c] sm:$0xf]  ;;  %v8443_v14 = vld [vmem:[#allocation11 + $0x10] sm:$0xf0]  ;;  %v9877_v24 = vld [vmem:[#allocation13 + $0xc4] sm:$0xf] }
 0x3a9   :  { %4486 = vmatpush.bf16.msra.mxu2 %v8514_v19  ;;  %v8467_v19 = vld [vmem:[#allocation11 + $0x38] sm:$0xf0]  ;;  %v8446_v39 = vor.u32 %v9821_v1, %v8443_v14 }
 0x3ab   :  { %4497 = vmatpush.bf16.msra.mxu3 %v8550_v46  ;;  %4461 = vmatpush.bf16.msra.mxu0 %v8490_v28  ;;  %v8481_v46 = vld [vmem:[#allocation11 + $0x48] sm:$0xf] }
 0x3ac   :  { %4474 = vmatpush.bf16.msra.mxu1 %v8494_v33  ;;  %v8482_v48 = vor.u32 %v9832_v55, %v8481_v46  ;;  %v8449_v33 = vld [vmem:[#allocation11 + $0x8] sm:$0xf]  ;;  %v9881_v46 = vld [vmem:[#allocation13 + $0xe4] sm:$0xf]  ;;  %v8686_v55 = vld [vmem:[#allocation13 + $0xf0] sm:$0xf0] }
 0x3ad   :  { %4487 = vmatpush.bf16.msra.mxu2 %v8498_v3  ;;  %v9824_v3 = vld [vmem:[#allocation11 + $0x14] sm:$0xf0]  ;;  %v8689_v36 = vor.u32 %v9881_v46, %v8686_v55  ;;  %v3935_v55 = vunpack.c.l.bf16 %v11060_v34 }
 0x3ae   :  { %v8450_v7 = vor.u32 %v9824_v3, %v8449_v33  ;;  %v8654_v3 = vld [vmem:[#allocation13 + $0xb0] sm:$0xf0] }
 0x3af   :  { %4498 = vmatpush.bf16.msra.mxu3 %v8534_v60  ;;  %4462 = vmatpush.bf16.msra.mxu0 %v8474_v29  ;;  %v8458_v60 = vor.u32 %v9827_v52, %v8457_v47  ;;  %v9882_v47 = vld [vmem:[#allocation13 + $0xec] sm:$0xf]  ;;  %v8694_v52 = vld [vmem:[#allocation13 + $0xf8] sm:$0xf0] }
 0x3b0   :  { %4475 = vmatpush.bf16.msra.mxu1 %v8478_v5  ;;  %v8692_v5 = vld [vmem:[#allocation13 + $0xe8] sm:$0xf] }
 0x3b1   :  { %4488 = vmatpush.bf16.msra.mxu2 %v8482_v48 }
 0x3b3   :  { %4499 = vmatpush.bf16.msra.mxu3 %v8518_v30  ;;  %4463 = vmatpush.bf16.msra.mxu0 %v8458_v60  ;;  %v8470_v30 = vor.u32 %v9826_v58, %v8467_v19  ;;  %v9880_v58 = vld [vmem:[#allocation13 + $0xd4] sm:$0xf0] }
 0x3b4   :  { %4476 = vmatpush.bf16.msra.mxu1 %v8462_v54  ;;  %v8670_v54 = vld [vmem:[#allocation13 + $0xd0] sm:$0xf0] }
 0x3b5   :  { %4489 = vmatpush.bf16.msra.mxu2 %v8466_v13  ;;  %v8676_v13 = vld [vmem:[#allocation13 + $0xc8] sm:$0xf] }
 0x3b7   :  { %4500 = vmatpush.bf16.msra.mxu3 %v8502_v63  ;;  %4464 = vmatpush.bf16.msra.mxu0 %v8442_v61  ;;  %v8451_v63 = vld [vmem:[#allocation11 + $0x18] sm:$0xf0]  ;;  %v9873_v61 = vld [vmem:[#allocation13 + $0xa4] sm:$0xf] }
 0x3b8   :  { %4477 = vmatpush.bf16.msra.mxu1 %v8446_v39  ;;  %v8454_v29 = vor.u32 %v9822_v62, %v8451_v63  ;;  %v8660_v62 = vld [vmem:[#allocation13 + $0xa8] sm:$0xf]  ;;  %v8657_v63 = vor.u32 %v9873_v61, %v8654_v3  ;;  %v9865_v61 = vld [vmem:[#allocation13 + $0x64] sm:$0xf] }
 0x3b9   :  { %4490 = vmatpush.bf16.msra.mxu2 %v8450_v7 }
 0x3bb   :  { %4501 = vmatpush.bf16.msra.mxu3 %v8486_v15  ;;  %v9884_v15 = vld [vmem:[#allocation13 + $0xf4] sm:$0xf0]  ;;  %4781 = vmatpush.bf16.msrb.mxu0 %v8685_v44 }
 0x3bc   :  { %v8693_v60 = vor.u32 %v9884_v15, %v8692_v5  ;;  %4794 = vmatpush.bf16.msrb.mxu1 %v8689_v36  ;;  %v8636_v5 = vld [vmem:[#allocation13 + $0x80] sm:$0xf]  ;;  %v8661_v15 = vor.u32 %v9876_v8, %v8660_v62  ;;  %v3938_v62 = vunpack.c.h.bf16 %v11066_v59  ;;  %v9868_v8 = vld [vmem:[#allocation13 + $0x74] sm:$0xf0] }
 0x3be   :  { %4807 = vmatpush.bf16.msrb.mxu2 %v8693_v60 }
 0x3bf   :  { %4502 = vmatpush.bf16.msra.mxu3 %v8470_v30  ;;  %v9878_v30 = vld [vmem:[#allocation13 + $0xcc] sm:$0xf] }
 0x3c0   :  { %v8681_v1 = vor.u32 %v9878_v30, %v8678_v43  ;;  %v8620_v43 = vld [vmem:[#allocation13 + $0x60] sm:$0xf] }
 0x3c3   :  { %4503 = vmatpush.bf16.msra.mxu3 %v8454_v29  ;;  %v8662_v29 = vld [vmem:[#allocation13 + $0xb8] sm:$0xf0] }
 0x410   :  { %v3817_v23 = vpop.f32.mrf.mxu0  ;;  %v3830_v32 = vpop.f32.mrf.mxu1 }
 0x411   :  { %v3860_v50 = vadd.f32 %v3817_v23, %v3611_v22  ;;  %v3861_v45 = vadd.f32 %v3830_v32, %v3612_v26  ;;  %v8697_v23 = vor.u32 %v9882_v47, %v8694_v52  ;;  %v8669_v32 = vor.u32 %v9879_v42, %v8668_v53  ;;  %v9871_v52 = vld [vmem:[#allocation13 + $0x8c] sm:$0xf0]  ;;  %v8638_v53 = vld [vmem:[#allocation13 + $0x90] sm:$0xf0]  ;;  %v8644_v42 = vld [vmem:[#allocation13 + $0x88] sm:$0xf] }
 0x412   :  { %v8665_v47 = vor.u32 %v9874_v4, %v8662_v29  ;;  %v8637_v60 = vor.u32 %v9871_v52, %v8636_v5 }
 0x413   :  { %v8305_v41 = vmul.f32 -1.442695, %v3860_v50  ;;  %v8306_v28 = vmul.f32 -1.442695, %v3861_v45  ;;  %v8673_v50 = vor.u32 %v9877_v24, %v8670_v54  ;;  %v8677_v45 = vor.u32 %v9880_v58, %v8676_v13  ;;  %4820 = vmatpush.bf16.msrb.mxu3 %v8697_v23  ;;  %4782 = vmatpush.bf16.msrb.mxu0 %v8669_v32  ;;  %v9872_v54 = vld [vmem:[#allocation13 + $0x94] sm:$0xf0] }
 0x414   :  { %v9870_v13 = vld [vmem:[#allocation13 + $0x8c] sm:$0xf]  ;;  %v8646_v58 = vld [vmem:[#allocation13 + $0x98] sm:$0xf0]  ;;  %v8645_v30 = vor.u32 %v9872_v54, %v8644_v42  ;;  %v9863_v42 = vld [vmem:[#allocation13 + $0x4c] sm:$0xf0] }
 0x415   :  { %10220 = vpow2.f32 %v8305_v41  ;;  %v8652_v41 = vld [vmem:[#allocation13 + $0xa0] sm:$0xf]  ;;  %4795 = vmatpush.bf16.msrb.mxu1 %v8673_v50  ;;  %4808 = vmatpush.bf16.msrb.mxu2 %v8677_v45 }
 0x416   :  { %10222 = vpow2.f32 %v8306_v28  ;;  %v9875_v28 = vld [vmem:[#allocation13 + $0xac] sm:$0xf0] }
 0x417   :  { %v3843_v48 = vpop.f32.mrf.mxu2  ;;  %v3856_v20 = vpop.f32.mrf.mxu3  ;;  %v8653_v33 = vor.u32 %v9875_v28, %v8652_v41  ;;  %4821 = vmatpush.bf16.msrb.mxu3 %v8681_v1  ;;  %v8649_v41 = vor.u32 %v9870_v13, %v8646_v58 }
 0x418   :  { %v3863_v17 = vadd.f32 %v3856_v20, %v3614_v51  ;;  %v3819_v22 = vpop.f32.mrf.mxu0  ;;  %v3832_v26 = vpop.f32.mrf.mxu1  ;;  %v3613_v51 = vunpack.c.l.bf16 %v10999_v10 }
 0x419   :  { %4783 = vmatpush.bf16.msrb.mxu0 %v8653_v33  ;;  %v3936_v26 = vunpack.c.h.bf16 %v11060_v34  ;;  %4796 = vmatpush.bf16.msrb.mxu1 %v8657_v63  ;;  %v9867_v34 = vld [vmem:[#allocation13 + $0x6c] sm:$0xf0]  ;;  %v8628_v63 = vld [vmem:[#allocation13 + $0x68] sm:$0xf] }
 0x41a   :  { %v8307_v19 = vmul.f32 -1.442695, %v3863_v17  ;;  %v3862_v20 = vadd.f32 %v3843_v48, %v3613_v51  ;;  %v9869_v17 = vld [vmem:[#allocation13 + $0x84] sm:$0xf]  ;;  %4809 = vmatpush.bf16.msrb.mxu2 %v8661_v15  ;;  %v8621_v28 = vor.u32 %v9867_v34, %v8620_v43 }
 0x41b   :  { %v10221_v21 = vpop.eup %10220  ;;  %v8641_v32 = vor.u32 %v9869_v17, %v8638_v53  ;;  %4822 = vmatpush.bf16.msrb.mxu3 %v8665_v47  ;;  %v8572_v17 = vld [vmem:[#allocation13] sm:$0xf]  ;;  %v9853_v51 = vld [vmem:[#allocation13 + $0x4] sm:$0xf] }
 0x41c   :  { %v10223_v14 = vpop.eup %10222  ;;  %v11709_v39 = vadd.f32 1.0, %v10221_v21  ;;  %10224 = vpow2.f32 %v8307_v19 }
 0x41d   :  { %v11711_v7 = vadd.f32 1.0, %v10223_v14  ;;  %4784 = vmatpush.bf16.msrb.mxu0 %v8637_v60  ;;  %v8622_v14 = vld [vmem:[#allocation13 + $0x70] sm:$0xf0]  ;;  %4797 = vmatpush.bf16.msrb.mxu1 %v8641_v32 }
 0x41e   :  { %10226 = vrcp.f32 %v11709_v39  ;;  %v3877_v36 = vand.u32 2147483647, %v11709_v39  ;;  %v3879_v22 = vand.u32 2147483648, %v11709_v39  ;;  %vm3873_vm6 = vweird.f32 %v11709_v39  ;;  %4810 = vmatpush.bf16.msrb.mxu2 %v8645_v30  ;;  %v9862_v30 = vld [vmem:[#allocation13 + $0x4c] sm:$0xf] }
 0x41f   :  { %10228 = vrcp.f32 %v11711_v7  ;;  %v3845_v44 = vpop.f32.mrf.mxu2  ;;  %v3858_v46 = vpop.f32.mrf.mxu3  ;;  %v3898_v10 = vand.u32 2147483648, %v11711_v7  ;;  %v3896_v1 = vand.u32 2147483647, %v11711_v7  ;;  %4823 = vmatpush.bf16.msrb.mxu3 %v8649_v41  ;;  %v8625_v15 = vor.u32 %v9865_v61, %v8622_v14  ;;  %v8614_v61 = vld [vmem:[#allocation13 + $0x58] sm:$0xf0] }
 0x420   :  { %10230 = vtanh.f32 %v3862_v20  ;;  %vm11736_vm8 = vcmp.eq.f32.partialorder %v3877_v36, 8.507059e+37  ;;  %v3880_v29 = vor.u32 1.1754944e-38, %v3879_v22  ;;  %v9866_v44 = vld [vmem:[#allocation13 + $0x6c] sm:$0xf]  ;;  %v8630_v46 = vld [vmem:[#allocation13 + $0x78] sm:$0xf0]  ;;  %v8629_v36 = vor.u32 %v9868_v8, %v8628_v63 }
 0x421   :  { %v3899_v52 = vor.u32 1.1754944e-38, %v3898_v10  ;;  %vm11746_vm11 = vcmp.eq.f32.partialorder %v3896_v1, 8.507059e+37  ;;  %4785 = vmatpush.bf16.msrb.mxu0 %v8621_v28  ;;  %v8604_v22 = vld [vmem:[#allocation13 + $0x40] sm:$0xf]  ;;  %4798 = vmatpush.bf16.msrb.mxu1 %v8625_v15  ;;  %v8633_v10 = vor.u32 %v9866_v44, %v8630_v46  ;;  %vm3892_vm15 = vweird.f32 %v11711_v7  ;;  %v9857_v8 = vld [vmem:[#allocation13 + $0x24] sm:$0xf] }
 0x422   :  { %v10225_v24 = vpop.eup %10224  ;;  %v4141_v23 = vpop.f32.mrf.mxu0  ;;  %4811 = vmatpush.bf16.msrb.mxu2 %v8629_v36  ;;  %v8605_v1 = vor.u32 %v9863_v42, %v8604_v22  ;;  %v8588_v14 = vld [vmem:[#allocation13 + $0x20] sm:$0xf]  ;;  %v8596_v44 = vld [vmem:[#allocation13 + $0x28] sm:$0xf]  ;;  %v9860_v15 = vld [vmem:[#allocation13 + $0x34] sm:$0xf0] }
 0x423   :  { %v4154_v48 = vpop.f32.mrf.mxu1  ;;  %v11721_v19 = vadd.f32 1.0, %v10225_v24  ;;  %v4184_v50 = vadd.f32 %v4141_v23, %v3935_v55  ;;  %v9861_v24 = vld [vmem:[#allocation13 + $0x44] sm:$0xf]  ;;  %v8606_v23 = vld [vmem:[#allocation13 + $0x50] sm:$0xf0]  ;;  %4824 = vmatpush.bf16.msrb.mxu3 %v8633_v10 }
 0x424   :  { %v4185_v45 = vadd.f32 %v4154_v48, %v3936_v26  ;;  %v11723_v21 = vpop.eup %10226  ;;  %v8609_v41 = vor.u32 %v9861_v24, %v8606_v23  ;;  %v8598_v10 = vld [vmem:[#allocation13 + $0x38] sm:$0xf0]  ;;  %v8597_v23 = vor.u32 %v9860_v15, %v8596_v44 }
 0x425   :  { %v11726_v33 = vpop.eup %10228  ;;  %v3869_v3 = vmul.f32 %v11723_v21, %v11709_v39  ;;  %vm3874_vm4 = vweird.f32 %v11723_v21  ;;  %10232 = vrcp.f32 %v11721_v19  ;;  %v8436_v5 = vmul.f32 -1.442695, %v4184_v50  ;;  %v8612_v50 = vld [vmem:[#allocation13 + $0x48] sm:$0xf]  ;;  %4786 = vmatpush.bf16.msrb.mxu0 %v8605_v1 }
 0x426   :  { %v3888_v4 = vmul.f32 %v11726_v33, %v11711_v7  ;;  %v8437_v20 = vmul.f32 -1.442695, %v4185_v45  ;;  %vm11742_vm9 = vmor %vm3873_vm6, %vm3874_vm4  ;;  %v10231_v48 = vpop.eup %10230  ;;  %vm3893_vm12 = vweird.f32 %v11726_v33  ;;  %v9864_v45 = vld [vmem:[#allocation13 + $0x54] sm:$0xf0]  ;;  %4799 = vmatpush.bf16.msrb.mxu1 %v8609_v41  ;;  %v8617_v7 = vor.u32 %v9862_v30, %v8614_v61  ;;  %v9854_v61 = vld [vmem:[#allocation13 + $0xc] sm:$0xf] }
 0x427   :  { %v3870_v55 = vsub.f32 1.0, %v3869_v3  ;;  %10234 = vpow2.f32 %v8436_v5  ;;  %v8613_v28 = vor.u32 %v9864_v45, %v8612_v50  ;;  %v9859_v3 = vld [vmem:[#allocation13 + $0x2c] sm:$0xf0]  ;;  %vm11764_vm1 = vmor %vm3892_vm15, %vm3893_vm12  ;;  %v8580_v45 = vld [vmem:[#allocation13 + $0x8] sm:$0xf]  ;;  %vm3912_vm6 = vweird.f32 %v11721_v19 }
 0x428   :  { %v3889_v47 = vsub.f32 1.0, %v3888_v4  ;;  %10236 = vpow2.f32 %v8437_v20  ;;  %v8590_v4 = vld [vmem:[#allocation13 + $0x30] sm:$0xf0]  ;;  %v8589_v20 = vor.u32 %v9859_v3, %v8588_v14  ;;  %4825 = vmatpush.bf16.msrb.mxu3 %v8617_v7  ;;  %v9856_v30 = vld [vmem:[#allocation13 + $0x14] sm:$0xf0] }
 0x429   :  { %v3871_v26 = vmul.f32 %v11723_v21, %v3870_v55  ;;  %v11751_v60 = vpop.f32.mrf.mxu2  ;;  %v4180_v53 = vpop.f32.mrf.mxu3  ;;  %4812 = vmatpush.bf16.msrb.mxu2 %v8613_v28  ;;  %v8581_v28 = vor.u32 %v9856_v30, %v8580_v45  ;;  %v8582_v14 = vld [vmem:[#allocation13 + $0x18] sm:$0xf0] }
 0x42a   :  { %v3890_v32 = vmul.f32 %v11726_v33, %v3889_v47  ;;  %v4187_v54 = vadd.f32 %v4180_v53, %v3938_v62  ;;  %v4143_v13 = vpop.f32.mrf.mxu0  ;;  %v9858_v47 = vld [vmem:[#allocation13 + $0x2c] sm:$0xf]  ;;  %v8593_v53 = vor.u32 %v9857_v8, %v8590_v4  ;;  %4787 = vmatpush.bf16.msrb.mxu0 %v8589_v20  ;;  %v3916_v8 = vand.u32 2147483647, %v11721_v19 }
 0x42b   :  { %v4156_v58 = vpop.f32.mrf.mxu1  ;;  %v11755_v43 = vpop.eup %10232  ;;  %v3872_v34 = vadd.f32 %v11723_v21, %v3871_v26  ;;  %v8601_v50 = vor.u32 %v9858_v47, %v8598_v10  ;;  %v3937_v4 = vunpack.c.l.bf16 %v11066_v59  ;;  %v8585_v44 = vor.u32 %v9854_v61, %v8582_v14 }
 0x42c   :  { %v3891_v62 = vadd.f32 %v11726_v33, %v3890_v32  ;;  %v3908_v63 = vmul.f32 %v11755_v43, %v11721_v19  ;;  %v8438_v5 = vmul.f32 -1.442695, %v4187_v54  ;;  %v9855_v32 = vld [vmem:[#allocation13 + $0xc] sm:$0xf0]  ;;  %4800 = vmatpush.bf16.msrb.mxu1 %v8593_v53  ;;  %vm3913_vm4 = vweird.f32 %v11755_v43 }
 0x42d   :  { %v3876_v55 = vsel %vm11742_vm9, %v11723_v21, %v3872_v34  ;;  %v10235_v21 = vpop.eup %10234  ;;  %4813 = vmatpush.bf16.msrb.mxu2 %v8597_v23  ;;  %4826 = vmatpush.bf16.msrb.mxu3 %v8601_v50  ;;  %v4186_v59 = vadd.f32 %v11751_v60, %v3937_v4  ;;  %vm3917_vm9 = vcmp.eq.f32.partialorder %v3916_v8, 8.507059e+37 }
 0x42e   :  { %v3881_v36 = vsel %vm11736_vm8, %v3880_v29, %v3876_v55  ;;  %v3895_v22 = vsel %vm11764_vm1, %v11726_v33, %v3891_v62  ;;  %v3909_v26 = vsub.f32 1.0, %v3908_v63  ;;  %10238 = vpow2.f32 %v8438_v5  ;;  %v8574_v29 = vld [vmem:[#allocation13 + $0x10] sm:$0xf0]  ;;  %v10237_v54 = vpop.eup %10236  ;;  %vm11792_vm8 = vmor %vm3912_vm6, %vm3913_vm4 }
 0x42f   :  { %v3900_v42 = vsel %vm11746_vm11, %v3899_v52, %v3895_v22  ;;  %v3923_v24 = vmul.f32 %v10231_v48, %v3881_v36  ;;  %v11780_v58 = vadd.f32 1.0, %v10235_v21  ;;  %v11782_v34 = vadd.f32 1.0, %v10237_v54 }
 0x430   :  { %v3922_v13 = vmul.f32 %v3900_v42, %v11660_v0  ;;  %v3910_v33 = vmul.f32 %v11755_v43, %v3909_v26  ;;  %v8573_v48 = vor.u32 %v9855_v32, %v8572_v17  ;;  %v8577_v1 = vor.u32 %v9853_v51, %v8574_v29 }
 0x431   :  { %v4169_v52 = vpop.f32.mrf.mxu2  ;;  %v4182_v39 = vpop.f32.mrf.mxu3  ;;  %10240 = vrcp.f32 %v11780_v58  ;;  %v3918_v62 = vand.u32 2147483648, %v11721_v19  ;;  %4814 = vmatpush.bf16.msrb.mxu2 %v8581_v28  ;;  %4827 = vmatpush.bf16.msrb.mxu3 %v8585_v44  ;;  %v4201_v60 = vand.u32 2147483647, %v11780_v58  ;;  %v4203_v17 = vand.u32 2147483648, %v11780_v58 }
 0x432   :  { %v3924_v41 = vadd.f32 %v3923_v24, %v3922_v13  ;;  %v3911_v3 = vadd.f32 %v11755_v43, %v3910_v33  ;;  %10242 = vrcp.f32 %v11782_v34  ;;  %4788 = vmatpush.bf16.msrb.mxu0 %v8573_v48  ;;  %4801 = vmatpush.bf16.msrb.mxu1 %v8577_v1  ;;  %v4220_v51 = vand.u32 2147483647, %v11782_v34 }
 0x433   :  { %v3919_v20 = vor.u32 1.1754944e-38, %v3918_v62  ;;  %vm4197_vm15 = vweird.f32 %v11780_v58  ;;  %vm4216_vm1 = vweird.f32 %v11782_v34  ;;  %v4204_v49 = vor.u32 1.1754944e-38, %v4203_v17 }
 0x434   :  { %10244 = vtanh.f32 %v3924_v41  ;;  %v10239_v63 = vpop.eup %10238  ;;  %v11801_v5 = vsel %vm3601_vm10, %v3924_v41, %v11660_v0  ;;  %v3915_v19 = vsel %vm11792_vm8, %v11755_v43, %v3911_v3  ;;  %v4222_v43 = vand.u32 2147483648, %v11782_v34 }
 0x435   :  { %v11796_v55 = vadd.f32 1.0, %v10239_v63  ;;  %v3920_v0 = vsel %vm3917_vm9, %v3919_v20, %v3915_v19  ;;  %vm4202_vm6 = vcmp.eq.f32.partialorder %v4201_v60, 8.507059e+37  ;;  %vm4221_vm8 = vcmp.eq.f32.partialorder %v4220_v51, 8.507059e+37  ;;  %v9913_v20 = vld [vmem:[#allocation11 + $0xe4] sm:$0xf] }
 0x436   :  { %v4223_v50 = vor.u32 1.1754944e-38, %v4222_v43  ;;  %v9911_v43 = vld [vmem:[#allocation11 + $0xcc] sm:$0xf0]  ;;  %v9909_v60 = vld [vmem:[#allocation11 + $0xc4] sm:$0xf] }
 0x437   :  { %v10241_v7 = vpop.eup %10240  ;;  %10246 = vrcp.f32 %v11796_v55  ;;  %v4242_v61 = vand.u32 2147483648, %v11796_v55  ;;  %v4240_v3 = vand.u32 2147483647, %v11796_v55 }
 0x438   :  { %v10243_v15 = vpop.eup %10242  ;;  %v4193_v47 = vmul.f32 %v10241_v7, %v11780_v58  ;;  %10248 = vtanh.f32 %v4186_v59  ;;  %vm4198_vm11 = vweird.f32 %v10241_v7 }
 0x439   :  { %v4212_v22 = vmul.f32 %v10243_v15, %v11782_v34  ;;  %vm4217_vm12 = vweird.f32 %v10243_v15  ;;  %vm4199_vm4 = vmor %vm4197_vm15, %vm4198_vm11  ;;  %vm4236_vm11 = vweird.f32 %v11796_v55  ;;  %v4243_v63 = vor.u32 1.1754944e-38, %v4242_v61  ;;  %v9901_v61 = vld [vmem:[#allocation11 + $0x84] sm:$0xf] }
 0x43a   :  { %v10245_v36 = vpop.eup %10244  ;;  %v4194_v26 = vsub.f32 1.0, %v4193_v47  ;;  %vm4241_vm15 = vcmp.eq.f32.partialorder %v4240_v3, 8.507059e+37  ;;  %v8817_v47 = vld [vmem:[#allocation11 + $0xf0] sm:$0xf0] }
 0x43b   :  { %v3926_v53 = vmul.f32 %v10245_v36, %v3920_v0  ;;  %v4213_v10 = vsub.f32 1.0, %v4212_v22  ;;  %v8823_v36 = vld [vmem:[#allocation11 + $0xe8] sm:$0xf]  ;;  %v9916_v22 = vld [vmem:[#allocation11 + $0xf4] sm:$0xf0]  ;;  %v8820_v0 = vor.u32 %v9913_v20, %v8817_v47 }
 0x43c   :  { %v4195_v21 = vmul.f32 %v10241_v7, %v4194_v26  ;;  %v8824_v9 = vor.u32 %v9916_v22, %v8823_v36  ;;  %v8825_v26 = vld [vmem:[#allocation11 + $0xf8] sm:$0xf0]  ;;  %v9897_v20 = vld [vmem:[#allocation11 + $0x64] sm:$0xf]  ;;  %v8753_v47 = vld [vmem:[#allocation11 + $0x70] sm:$0xf0] }
 0x43d   :  { %v3927_v42 = vsel %vm3601_vm10, %v3926_v53, 0.0  ;;  %v11818_v24 = vsel %vm3601_vm10, %v3926_v53, %v11679_v18  ;;  %v10247_v23 = vpop.eup %10246  ;;  %v4214_v32 = vmul.f32 %v10243_v15, %v4213_v10  ;;  %vm4218_vm10 = vmor %vm4216_vm1, %vm4217_vm12  ;;  %v8799_v10 = vld [vmem:[#allocation11 + $0xc0] sm:$0xf]  ;;  %v8759_v36 = vld [vmem:[#allocation11 + $0x68] sm:$0xf] }
 0x43e   :  { %3929 = vst [vmem:[#allocation23 + $0x20] sm:$0xff] %v3927_v42  ;;  %v4264_v29 = vpack.c.bf16 %v11818_v24, %v11818_v24  ;;  %v4196_v54 = vadd.f32 %v10241_v7, %v4195_v21  ;;  %v4232_v13 = vmul.f32 %v10247_v23, %v11796_v55  ;;  %v10249_v33 = vpop.eup %10248  ;;  %vm4237_vm9 = vweird.f32 %v10247_v23  ;;  %v8815_v55 = vld [vmem:[#allocation11 + $0xe0] sm:$0xf]  ;;  %v8801_v21 = vld [vmem:[#allocation11 + $0xd0] sm:$0xf0] }
 0x43f   :  { %v4215_v18 = vadd.f32 %v10243_v15, %v4214_v32  ;;  %vm4238_vm12 = vmor %vm4236_vm11, %vm4237_vm9  ;;  %v8800_v17 = vor.u32 %v9911_v43, %v8799_v10  ;;  %v8807_v42 = vld [vmem:[#allocation11 + $0xc8] sm:$0xf]  ;;  %v8804_v32 = vor.u32 %v9909_v60, %v8801_v21  ;;  %v9900_v22 = vld [vmem:[#allocation11 + $0x74] sm:$0xf0] }
 0x440   :  { %4465 = vmatmul.bf16.vlgmr.msra.gmra.mxu0 %v4264_v29  ;;  %4478 = vmatmul.bf16.vlgmr.msra.gmra.mxu1 %v4264_v29  ;;  %v4200_v45 = vsel %vm4199_vm4, %v10241_v7, %v4196_v54  ;;  %v4233_v30 = vsub.f32 1.0, %v4232_v13  ;;  %v9915_v7 = vld [vmem:[#allocation11 + $0xec] sm:$0xf0]  ;;  %v8809_v54 = vld [vmem:[#allocation11 + $0xd8] sm:$0xf0] }
 0x441   :  { %4491 = vmatmul.bf16.vlgmr.msra.gmra.mxu2 %v4264_v29  ;;  %4504 = vmatmul.bf16.vlgmr.msra.gmra.mxu3 %v4264_v29  ;;  %v4205_v52 = vsel %vm4202_vm6, %v4204_v49, %v4200_v45  ;;  %v4219_v39 = vsel %vm4218_vm10, %v10243_v15, %v4215_v18  ;;  %v8816_v15 = vor.u32 %v9915_v7, %v8815_v55  ;;  %v9910_v29 = vld [vmem:[#allocation11 + $0xcc] sm:$0xf]  ;;  %v8783_v49 = vld [vmem:[#allocation11 + $0xa0] sm:$0xf]  ;;  %v9907_v18 = vld [vmem:[#allocation11 + $0xac] sm:$0xf0] }
 0x442   :  { %v4224_v58 = vsel %vm4221_vm8, %v4223_v50, %v4219_v39  ;;  %v4247_v48 = vmul.f32 %v10249_v33, %v4205_v52  ;;  %v4234_v1 = vmul.f32 %v10247_v23, %v4233_v30  ;;  %5119 = vmatpush.bf16.msra.mxu1 %v8820_v0  ;;  %5132 = vmatpush.bf16.msra.mxu2 %v8824_v9  ;;  %v9905_v33 = vld [vmem:[#allocation11 + $0xa4] sm:$0xf]  ;;  %v8785_v45 = vld [vmem:[#allocation11 + $0xb0] sm:$0xf0]  ;;  %v8791_v30 = vld [vmem:[#allocation11 + $0xa8] sm:$0xf] }
 0x443   :  { %v4246_v34 = vmul.f32 %v4224_v58, %v11693_v12  ;;  %5106 = vmatpush.bf16.msra.mxu0 %v8816_v15  ;;  %v8812_v13 = vor.u32 %v9910_v29, %v8809_v54  ;;  %v8784_v50 = vor.u32 %v9907_v18, %v8783_v49  ;;  %v9908_v52 = vld [vmem:[#allocation11 + $0xb4] sm:$0xf0]  ;;  %v8788_v39 = vor.u32 %v9905_v33, %v8785_v45  ;;  %v8751_v55 = vld [vmem:[#allocation11 + $0x60] sm:$0xf]  ;;  %v9899_v7 = vld [vmem:[#allocation11 + $0x6c] sm:$0xf0] }
 0x444   :  { %v4235_v28 = vadd.f32 %v10247_v23, %v4234_v1  ;;  %v8792_v58 = vor.u32 %v9908_v52, %v8791_v30  ;;  %v8793_v1 = vld [vmem:[#allocation11 + $0xb8] sm:$0xf0]  ;;  %v8752_v15 = vor.u32 %v9899_v7, %v8751_v55  ;;  %v8756_v0 = vor.u32 %v9897_v20, %v8753_v47  ;;  %v8735_v10 = vld [vmem:[#allocation11 + $0x40] sm:$0xf]  ;;  %v9895_v43 = vld [vmem:[#allocation11 + $0x4c] sm:$0xf0] }
 0x445   :  { %v4248_v41 = vadd.f32 %v4247_v48, %v4246_v34  ;;  %v9906_v48 = vld [vmem:[#allocation11 + $0xac] sm:$0xf]  ;;  %v8760_v9 = vor.u32 %v9900_v22, %v8759_v36  ;;  %v9893_v60 = vld [vmem:[#allocation11 + $0x44] sm:$0xf]  ;;  %v8737_v21 = vld [vmem:[#allocation11 + $0x50] sm:$0xf0]  ;;  %v4261_v49 = vunpack.c.h.bf16 %v11001_v11  ;;  %v4263_v20 = vunpack.c.h.bf16 %v11007_v25 }
 0x446   :  { %v4239_v62 = vsel %vm4238_vm12, %v10247_v23, %v4235_v28  ;;  %v9912_v23 = vld [vmem:[#allocation11 + $0xd4] sm:$0xf0]  ;;  %5120 = vmatpush.bf16.msra.mxu1 %v8804_v32  ;;  %v8796_v34 = vor.u32 %v9906_v48, %v8793_v1  ;;  %v9903_v28 = vld [vmem:[#allocation11 + $0x8c] sm:$0xf0]  ;;  %v8740_v32 = vor.u32 %v9893_v60, %v8737_v21  ;;  %v9894_v29 = vld [vmem:[#allocation11 + $0x4c] sm:$0xf] }
 0x447   :  { %10250 = vtanh.f32 %v4248_v41  ;;  %v11831_v14 = vsel %vm3271_vm5, %v4248_v41, %v11693_v12  ;;  %v4244_v4 = vsel %vm4241_vm15, %v4243_v63, %v4239_v62  ;;  %v8808_v51 = vor.u32 %v9912_v23, %v8807_v42  ;;  %5107 = vmatpush.bf16.msra.mxu0 %v8800_v17  ;;  %v8767_v41 = vld [vmem:[#allocation11 + $0x80] sm:$0xf]  ;;  %v8769_v62 = vld [vmem:[#allocation11 + $0x90] sm:$0xf0]  ;;  %v8775_v63 = vld [vmem:[#allocation11 + $0x88] sm:$0xf] }
 0x448   :  { %v8768_v3 = vor.u32 %v9903_v28, %v8767_v41  ;;  %v8736_v17 = vor.u32 %v9895_v43, %v8735_v10  ;;  %v8743_v42 = vld [vmem:[#allocation11 + $0x48] sm:$0xf]  ;;  %v9896_v23 = vld [vmem:[#allocation11 + $0x54] sm:$0xf0]  ;;  %v8745_v54 = vld [vmem:[#allocation11 + $0x58] sm:$0xf0] }
 0x449   :  { %5133 = vmatpush.bf16.msra.mxu2 %v8808_v51  ;;  %v8744_v51 = vor.u32 %v9896_v23, %v8743_v42  ;;  %v8748_v18 = vor.u32 %v9894_v29, %v8745_v54  ;;  %v8719_v45 = vld [vmem:[#allocation11 + $0x20] sm:$0xf]  ;;  %v9891_v30 = vld [vmem:[#allocation11 + $0x2c] sm:$0xf0]  ;;  %v9889_v52 = vld [vmem:[#allocation11 + $0x24] sm:$0xf] }
 0x44a   :  { %5121 = vmatpush.bf16.msra.mxu1 %v8788_v39  ;;  %v8720_v48 = vor.u32 %v9891_v30, %v8719_v45  ;;  %v8721_v1 = vld [vmem:[#allocation11 + $0x30] sm:$0xf0]  ;;  %v9892_v41 = vld [vmem:[#allocation11 + $0x34] sm:$0xf0]  ;;  %v8711_v55 = vld [vmem:[#allocation11 + $0x8] sm:$0xf] }
 0x44b   :  { %5108 = vmatpush.bf16.msra.mxu0 %v8784_v50  ;;  %v8724_v28 = vor.u32 %v9889_v52, %v8721_v1  ;;  %v9888_v7 = vld [vmem:[#allocation11 + $0x14] sm:$0xf0]  ;;  %v9886_v36 = vld [vmem:[#allocation11 + $0xc] sm:$0xf]  ;;  %v8713_v22 = vld [vmem:[#allocation11 + $0x18] sm:$0xf0] }
 0x44c   :  { %v8712_v47 = vor.u32 %v9888_v7, %v8711_v55  ;;  %v9945_v10 = vld [vmem:[#allocation13 + $0xe4] sm:$0xf]  ;;  %v8948_v43 = vld [vmem:[#allocation13 + $0xf0] sm:$0xf0]  ;;  %v8954_v23 = vld [vmem:[#allocation13 + $0xe8] sm:$0xf] }
 0x44d   :  { %v10251_v8 = vpop.eup %10250  ;;  %5134 = vmatpush.bf16.msra.mxu2 %v8792_v58  ;;  %v8951_v29 = vor.u32 %v9945_v10, %v8948_v43  ;;  %v9941_v30 = vld [vmem:[#allocation13 + $0xc4] sm:$0xf]  ;;  %v8932_v52 = vld [vmem:[#allocation13 + $0xd0] sm:$0xf0]  ;;  %v9944_v1 = vld [vmem:[#allocation13 + $0xd4] sm:$0xf0] }
 0x44e   :  { %v4250_v44 = vmul.f32 %v10251_v8, %v4244_v4  ;;  %v9904_v8 = vld [vmem:[#allocation11 + $0x94] sm:$0xf0]  ;;  %v8772_v4 = vor.u32 %v9901_v61, %v8769_v62  ;;  %v8898_v43 = vld [vmem:[#allocation13 + $0x80] sm:$0xf] }
 0x44f   :  { %5109 = vmatpush.bf16.msra.mxu0 %v8768_v3  ;;  %v9890_v3 = vld [vmem:[#allocation11 + $0x2c] sm:$0xf] }
 0x450   :  { %v4251_v46 = vsel %vm3271_vm5, %v4250_v44, 0.0  ;;  %v11840_v19 = vsel %vm3271_vm5, %v4250_v44, %v11702_v57  ;;  %v9914_v57 = vld [vmem:[#allocation11 + $0xec] sm:$0xf]  ;;  %v8776_v44 = vor.u32 %v9904_v8, %v8775_v63  ;;  %5122 = vmatpush.bf16.msra.mxu1 %v8772_v4  ;;  %v8703_v4 = vld [vmem:[#allocation11] sm:$0xf] }
 0x451   :  { %v4252_v12 = vpack.c.bf16 %v4251_v46, %v4251_v46  ;;  %v4588_v59 = vpack.c.bf16 %v11840_v19, %v11840_v19  ;;  %v8828_v53 = vor.u32 %v9914_v57, %v8825_v26  ;;  %v9902_v46 = vld [vmem:[#allocation11 + $0x8c] sm:$0xf]  ;;  %v8761_v26 = vld [vmem:[#allocation11 + $0x78] sm:$0xf0] }
 0x452   :  { %5135 = vmatpush.bf16.msra.mxu2 %v8776_v44  ;;  %v9898_v57 = vld [vmem:[#allocation11 + $0x6c] sm:$0xf]  ;;  %v9887_v44 = vld [vmem:[#allocation11 + $0xc] sm:$0xf0] }
 0x453   :  { %4254 = vst [vmem:[#allocation4 + $0xc] sm:$0xf] %v4252_v12  ;;  %4789 = vmatmul.bf16.vlgmr.msrb.gmra.mxu0 %v4588_v59  ;;  %4802 = vmatmul.bf16.vlgmr.msrb.gmra.mxu1 %v4588_v59  ;;  %v8777_v12 = vld [vmem:[#allocation11 + $0x98] sm:$0xf0] }
 0x454   :  { %4815 = vmatmul.bf16.vlgmr.msrb.gmra.mxu2 %v4588_v59  ;;  %4828 = vmatmul.bf16.vlgmr.msrb.gmra.mxu3 %v4588_v59  ;;  %v8780_v59 = vor.u32 %v9902_v46, %v8777_v12  ;;  %v9885_v46 = vld [vmem:[#allocation11 + $0x4] sm:$0xf]  ;;  %v8704_v12 = vor.u32 %v9887_v44, %v8703_v4 }
 0x455   :  { %5145 = vmatpush.bf16.msra.mxu3 %v8828_v53  ;;  %5110 = vmatpush.bf16.msra.mxu0 %v8752_v15  ;;  %v8764_v53 = vor.u32 %v9898_v57, %v8761_v26  ;;  %v8716_v26 = vor.u32 %v9886_v36, %v8713_v22  ;;  %v9937_v4 = vld [vmem:[#allocation13 + $0xa4] sm:$0xf] }
 0x456   :  { %5123 = vmatpush.bf16.msra.mxu1 %v8756_v0  ;;  %5136 = vmatpush.bf16.msra.mxu2 %v8760_v9  ;;  %v8946_v0 = vld [vmem:[#allocation13 + $0xe0] sm:$0xf] }
 0x459   :  { %5146 = vmatpush.bf16.msra.mxu3 %v8812_v13  ;;  %v4260_v13 = vunpack.c.l.bf16 %v11001_v11  ;;  %5111 = vmatpush.bf16.msra.mxu0 %v8736_v17  ;;  %v8729_v11 = vld [vmem:[#allocation11 + $0x38] sm:$0xf0] }
 0x45a   :  { %5124 = vmatpush.bf16.msra.mxu1 %v8740_v32  ;;  %5137 = vmatpush.bf16.msra.mxu2 %v8744_v51  ;;  %v8732_v8 = vor.u32 %v9890_v3, %v8729_v11  ;;  %v9948_v32 = vld [vmem:[#allocation13 + $0xf4] sm:$0xf0]  ;;  %v9946_v51 = vld [vmem:[#allocation13 + $0xec] sm:$0xf]  ;;  %v8940_v3 = vld [vmem:[#allocation13 + $0xd8] sm:$0xf0] }
 0x45b   :  { %v8955_v54 = vor.u32 %v9948_v32, %v8954_v23  ;;  %v8900_v23 = vld [vmem:[#allocation13 + $0x90] sm:$0xf0] }
 0x45d   :  { %5147 = vmatpush.bf16.msra.mxu3 %v8796_v34  ;;  %v8727_v34 = vld [vmem:[#allocation11 + $0x28] sm:$0xf]  ;;  %5112 = vmatpush.bf16.msra.mxu0 %v8720_v48 }
 0x45e   :  { %v8728_v61 = vor.u32 %v9892_v41, %v8727_v34  ;;  %5125 = vmatpush.bf16.msra.mxu1 %v8724_v28  ;;  %v8938_v48 = vld [vmem:[#allocation13 + $0xc8] sm:$0xf]  ;;  %v9942_v34 = vld [vmem:[#allocation13 + $0xcc] sm:$0xf] }
 0x460   :  { %5138 = vmatpush.bf16.msra.mxu2 %v8728_v61  ;;  %v8939_v61 = vor.u32 %v9944_v1, %v8938_v48  ;;  %v8908_v48 = vld [vmem:[#allocation13 + $0x98] sm:$0xf0]  ;;  %v8882_v1 = vld [vmem:[#allocation13 + $0x60] sm:$0xf] }
 0x461   :  { %5148 = vmatpush.bf16.msra.mxu3 %v8780_v59  ;;  %v8705_v59 = vld [vmem:[#allocation11 + $0x10] sm:$0xf0]  ;;  %5113 = vmatpush.bf16.msra.mxu0 %v8704_v12 }
 0x462   :  { %v8708_v15 = vor.u32 %v9885_v46, %v8705_v59  ;;  %v8916_v12 = vld [vmem:[#allocation13 + $0xb0] sm:$0xf0]  ;;  %v4262_v59 = vunpack.c.l.bf16 %v11007_v25  ;;  %v9933_v25 = vld [vmem:[#allocation13 + $0x84] sm:$0xf] }
 0x464   :  { %5126 = vmatpush.bf16.msra.mxu1 %v8708_v15  ;;  %5139 = vmatpush.bf16.msra.mxu2 %v8712_v47  ;;  %v8922_v15 = vld [vmem:[#allocation13 + $0xa8] sm:$0xf]  ;;  %v9940_v47 = vld [vmem:[#allocation13 + $0xb4] sm:$0xf0] }
 0x465   :  { %5149 = vmatpush.bf16.msra.mxu3 %v8764_v53  ;;  %v9947_v53 = vld [vmem:[#allocation13 + $0xec] sm:$0xf0]  ;;  %v8923_v22 = vor.u32 %v9940_v47, %v8922_v15 }
 0x466   :  { %v8947_v42 = vor.u32 %v9947_v53, %v8946_v0  ;;  %v9938_v0 = vld [vmem:[#allocation13 + $0xac] sm:$0xf] }
 0x468   :  { %5430 = vmatpush.bf16.msrb.mxu0 %v8947_v42  ;;  %5443 = vmatpush.bf16.msrb.mxu1 %v8951_v29 }
 0x469   :  { %5150 = vmatpush.bf16.msra.mxu3 %v8748_v18  ;;  %v9943_v18 = vld [vmem:[#allocation13 + $0xcc] sm:$0xf0]  ;;  %5456 = vmatpush.bf16.msrb.mxu2 %v8955_v54 }
 0x46d   :  { %5151 = vmatpush.bf16.msra.mxu3 %v8732_v8  ;;  %v9939_v8 = vld [vmem:[#allocation13 + $0xac] sm:$0xf0]  ;;  %5457 = vmatpush.bf16.msrb.mxu2 %v8939_v61  ;;  %v9929_v61 = vld [vmem:[#allocation13 + $0x64] sm:$0xf] }
 0x471   :  { %5152 = vmatpush.bf16.msra.mxu3 %v8716_v26  ;;  %5458 = vmatpush.bf16.msrb.mxu2 %v8923_v22  ;;  %v8892_v22 = vld [vmem:[#allocation13 + $0x78] sm:$0xf0] }
 0x4bd   :  { %v4466_v33 = vpop.f32.mrf.mxu0  ;;  %v4479_v50 = vpop.f32.mrf.mxu1 }
 0x4be   :  { %v4509_v39 = vadd.f32 %v4466_v33, %v4260_v13  ;;  %v4510_v58 = vadd.f32 %v4479_v50, %v4261_v49  ;;  %v8956_v13 = vld [vmem:[#allocation13 + $0xf8] sm:$0xf0]  ;;  %v8930_v49 = vld [vmem:[#allocation13 + $0xc0] sm:$0xf] }
 0x4bf   :  { %v8959_v50 = vor.u32 %v9946_v51, %v8956_v13  ;;  %v8931_v45 = vor.u32 %v9943_v18, %v8930_v49  ;;  %v8903_v49 = vor.u32 %v9933_v25, %v8900_v23  ;;  %v8906_v18 = vld [vmem:[#allocation13 + $0x88] sm:$0xf] }
 0x4c0   :  { %v8567_v62 = vmul.f32 -1.442695, %v4509_v39  ;;  %v8568_v63 = vmul.f32 -1.442695, %v4510_v58  ;;  %v8935_v58 = vor.u32 %v9941_v30, %v8932_v52  ;;  %v4585_v52 = vunpack.c.h.bf16 %v11052_v16 }
 0x4c1   :  { %5469 = vmatpush.bf16.msrb.mxu3 %v8959_v50  ;;  %5431 = vmatpush.bf16.msrb.mxu0 %v8931_v45 }
 0x4c2   :  { %10252 = vpow2.f32 %v8567_v62  ;;  %v8943_v62 = vor.u32 %v9942_v34, %v8940_v3  ;;  %5444 = vmatpush.bf16.msrb.mxu1 %v8935_v58  ;;  %v9934_v58 = vld [vmem:[#allocation13 + $0x8c] sm:$0xf]  ;;  %v8884_v3 = vld [vmem:[#allocation13 + $0x70] sm:$0xf0] }
 0x4c3   :  { %10254 = vpow2.f32 %v8568_v63  ;;  %v8914_v63 = vld [vmem:[#allocation13 + $0xa0] sm:$0xf] }
 0x4c4   :  { %v11847_v9 = vpop.f32.mrf.mxu2  ;;  %v4505_v57 = vpop.f32.mrf.mxu3  ;;  %v8915_v7 = vor.u32 %v9939_v8, %v8914_v63 }
 0x4c5   :  { %v4512_v60 = vadd.f32 %v4505_v57, %v4263_v20  ;;  %v4468_v17 = vpop.f32.mrf.mxu0  ;;  %v4481_v21 = vpop.f32.mrf.mxu1  ;;  %5470 = vmatpush.bf16.msrb.mxu3 %v8943_v62  ;;  %v8919_v20 = vor.u32 %v9937_v4, %v8916_v12  ;;  %v8924_v57 = vld [vmem:[#allocation13 + $0xb8] sm:$0xf0]  ;;  %v4511_v53 = vadd.f32 %v11847_v9, %v4262_v59  ;;  %v4584_v9 = vunpack.c.l.bf16 %v11052_v16  ;;  %v8890_v4 = vld [vmem:[#allocation13 + $0x68] sm:$0xf] }
 0x4c6   :  { %5432 = vmatpush.bf16.msrb.mxu0 %v8915_v7  ;;  %v8927_v10 = vor.u32 %v9938_v0, %v8924_v57  ;;  %v8911_v59 = vor.u32 %v9934_v58, %v8908_v48  ;;  %v8887_v57 = vor.u32 %v9929_v61, %v8884_v3  ;;  %v8850_v61 = vld [vmem:[#allocation13 + $0x20] sm:$0xf]  ;;  %v9923_v3 = vld [vmem:[#allocation13 + $0x2c] sm:$0xf0] }
 0x4c7   :  { %v8569_v33 = vmul.f32 -1.442695, %v4512_v60  ;;  %v9935_v60 = vld [vmem:[#allocation13 + $0x8c] sm:$0xf0]  ;;  %5445 = vmatpush.bf16.msrb.mxu1 %v8919_v20 }
 0x4c8   :  { %v10253_v39 = vpop.eup %10252  ;;  %v8899_v42 = vor.u32 %v9935_v60, %v8898_v43  ;;  %v9927_v43 = vld [vmem:[#allocation13 + $0x4c] sm:$0xf0]  ;;  %v9925_v60 = vld [vmem:[#allocation13 + $0x44] sm:$0xf] }
 0x4c9   :  { %v10255_v41 = vpop.eup %10254  ;;  %v11849_v28 = vadd.f32 1.0, %v10253_v39  ;;  %10256 = vpow2.f32 %v8569_v33  ;;  %5471 = vmatpush.bf16.msrb.mxu3 %v8927_v10  ;;  %v9936_v33 = vld [vmem:[#allocation13 + $0x94] sm:$0xf0]  ;;  %v4587_v39 = vunpack.c.h.bf16 %v11058_v31  ;;  %v8866_v10 = vld [vmem:[#allocation13 + $0x40] sm:$0xf] }
 0x4ca   :  { %v11851_v11 = vadd.f32 1.0, %v10255_v41  ;;  %5433 = vmatpush.bf16.msrb.mxu0 %v8899_v42  ;;  %v9931_v41 = vld [vmem:[#allocation13 + $0x6c] sm:$0xf0]  ;;  %v8907_v8 = vor.u32 %v9936_v33, %v8906_v18 }
 0x4cb   :  { %10258 = vrcp.f32 %v11849_v28  ;;  %v4528_v55 = vand.u32 2147483648, %v11849_v28  ;;  %v4526_v36 = vand.u32 2147483647, %v11849_v28  ;;  %vm4522_vm1 = vweird.f32 %v11849_v28  ;;  %5446 = vmatpush.bf16.msrb.mxu1 %v8903_v49 }
 0x4cc   :  { %10260 = vrcp.f32 %v11851_v11  ;;  %v4494_v44 = vpop.f32.mrf.mxu2  ;;  %v4507_v46 = vpop.f32.mrf.mxu3  ;;  %v4545_v17 = vand.u32 2147483647, %v11851_v11  ;;  %v4547_v51 = vand.u32 2147483648, %v11851_v11  ;;  %5459 = vmatpush.bf16.msrb.mxu2 %v8907_v8  ;;  %vm4541_vm8 = vweird.f32 %v11851_v11 }
 0x4cd   :  { %v11865_v29 = vor.u32 1.1754944e-38, %v4528_v55  ;;  %vm11872_vm5 = vcmp.eq.f32.partialorder %v4526_v36, 8.507059e+37  ;;  %v9932_v44 = vld [vmem:[#allocation13 + $0x74] sm:$0xf0]  ;;  %v9930_v55 = vld [vmem:[#allocation13 + $0x6c] sm:$0xf]  ;;  %v8883_v36 = vor.u32 %v9931_v41, %v8882_v1  ;;  %5472 = vmatpush.bf16.msrb.mxu3 %v8911_v59 }
 0x4ce   :  { %v4548_v12 = vor.u32 1.1754944e-38, %v4547_v51  ;;  %v8867_v51 = vor.u32 %v9927_v43, %v8866_v10  ;;  %vm11909_vm11 = vcmp.eq.f32.partialorder %v4545_v17, 8.507059e+37  ;;  %v9926_v1 = vld [vmem:[#allocation13 + $0x4c] sm:$0xf] }
 0x4cf   :  { %v10257_v26 = vpop.eup %10256  ;;  %5434 = vmatpush.bf16.msrb.mxu0 %v8883_v36  ;;  %5447 = vmatpush.bf16.msrb.mxu1 %v8887_v57  ;;  %v9919_v36 = vld [vmem:[#allocation13 + $0xc] sm:$0xf0]  ;;  %v9917_v57 = vld [vmem:[#allocation13 + $0x4] sm:$0xf] }
 0x4d0   :  { %v11860_v21 = vadd.f32 1.0, %v10257_v26  ;;  %v4790_v54 = vpop.f32.mrf.mxu0  ;;  %v4803_v13 = vpop.f32.mrf.mxu1  ;;  %v8891_v26 = vor.u32 %v9932_v44, %v8890_v4  ;;  %v8858_v44 = vld [vmem:[#allocation13 + $0x28] sm:$0xf] }
 0x4d1   :  { %v11862_v32 = vpop.eup %10258  ;;  %v4833_v63 = vadd.f32 %v4790_v54, %v4584_v9  ;;  %v4834_v16 = vadd.f32 %v4803_v13, %v4585_v52  ;;  %v8868_v9 = vld [vmem:[#allocation13 + $0x50] sm:$0xf0]  ;;  %v8874_v54 = vld [vmem:[#allocation13 + $0x48] sm:$0xf]  ;;  %v9928_v13 = vld [vmem:[#allocation13 + $0x54] sm:$0xf0] }
 0x4d2   :  { %v11868_v50 = vpop.eup %10260  ;;  %v4518_v45 = vmul.f32 %v11862_v32, %v11849_v28  ;;  %10262 = vrcp.f32 %v11860_v21  ;;  %vm4523_vm4 = vweird.f32 %v11862_v32  ;;  %5460 = vmatpush.bf16.msrb.mxu2 %v8891_v26  ;;  %v8871_v17 = vor.u32 %v9925_v60, %v8868_v9  ;;  %v8836_v26 = vld [vmem:[#allocation13 + $0x10] sm:$0xf0] }
 0x4d3   :  { %v4537_v34 = vmul.f32 %v11868_v50, %v11851_v11  ;;  %10264 = vtanh.f32 %v4511_v53  ;;  %vm4542_vm10 = vweird.f32 %v11868_v50  ;;  %vm11889_vm6 = vmor %vm4522_vm1, %vm4523_vm4  ;;  %v8698_v15 = vmul.f32 -1.442695, %v4833_v63  ;;  %5435 = vmatpush.bf16.msrb.mxu0 %v8867_v51 }
 0x4d4   :  { %v4519_v62 = vsub.f32 1.0, %v4518_v45  ;;  %v8699_v47 = vmul.f32 -1.442695, %v4834_v16  ;;  %v8895_v53 = vor.u32 %v9930_v55, %v8892_v22  ;;  %vm11902_vm9 = vmor %vm4541_vm8, %vm4542_vm10  ;;  %v8875_v4 = vor.u32 %v9928_v13, %v8874_v54  ;;  %v9924_v55 = vld [vmem:[#allocation13 + $0x34] sm:$0xf0]  ;;  %5448 = vmatpush.bf16.msrb.mxu1 %v8871_v17 }
 0x4d5   :  { %v4538_v46 = vsub.f32 1.0, %v4537_v34  ;;  %10266 = vpow2.f32 %v8698_v15  ;;  %v8876_v34 = vld [vmem:[#allocation13 + $0x58] sm:$0xf0]  ;;  %v4567_v18 = vand.u32 2147483648, %v11860_v21  ;;  %v9918_v45 = vld [vmem:[#allocation13 + $0xc] sm:$0xf]  ;;  %vm4561_vm15 = vweird.f32 %v11860_v21 }
 0x4d6   :  { %v4520_v7 = vmul.f32 %v11862_v32, %v4519_v62  ;;  %10268 = vpow2.f32 %v8699_v47  ;;  %v9921_v62 = vld [vmem:[#allocation13 + $0x24] sm:$0xf]  ;;  %5473 = vmatpush.bf16.msrb.mxu3 %v8895_v53  ;;  %v8879_v20 = vor.u32 %v9926_v1, %v8876_v34  ;;  %v8860_v15 = vld [vmem:[#allocation13 + $0x38] sm:$0xf0]  ;;  %v8834_v47 = vld [vmem:[#allocation13] sm:$0xf]  ;;  %5461 = vmatpush.bf16.msrb.mxu2 %v8875_v4 }
 0x4d7   :  { %v4539_v0 = vmul.f32 %v11868_v50, %v4538_v46  ;;  %v11898_v42 = vpop.f32.mrf.mxu2  ;;  %v4829_v23 = vpop.f32.mrf.mxu3  ;;  %v4568_v17 = vor.u32 1.1754944e-38, %v4567_v18  ;;  %v9977_v4 = vld [vmem:[#allocation11 + $0xe4] sm:$0xf] }
 0x4d8   :  { %v11894_v25 = vpop.eup %10262  ;;  %v4521_v28 = vadd.f32 %v11862_v32, %v4520_v7  ;;  %v4792_v58 = vpop.f32.mrf.mxu0  ;;  %v4836_v11 = vadd.f32 %v4829_v23, %v4587_v39  ;;  %v9922_v7 = vld [vmem:[#allocation13 + $0x2c] sm:$0xf]  ;;  %v9920_v23 = vld [vmem:[#allocation13 + $0x14] sm:$0xf0] }
 0x4d9   :  { %v10265_v49 = vpop.eup %10264  ;;  %v4540_v33 = vadd.f32 %v11868_v50, %v4539_v0  ;;  %v4557_v52 = vmul.f32 %v11894_v25, %v11860_v21  ;;  %v4805_v48 = vpop.f32.mrf.mxu1  ;;  %v8863_v60 = vor.u32 %v9922_v7, %v8860_v15  ;;  %vm4562_vm12 = vweird.f32 %v11894_v25 }
 0x4da   :  { %v4525_v41 = vsel %vm11889_vm6, %v11862_v32, %v4521_v28  ;;  %v8852_v32 = vld [vmem:[#allocation13 + $0x30] sm:$0xf0]  ;;  %v8700_v59 = vmul.f32 -1.442695, %v4836_v11  ;;  %5474 = vmatpush.bf16.msrb.mxu3 %v8879_v20  ;;  %v8842_v28 = vld [vmem:[#allocation13 + $0x8] sm:$0xf] }
 0x4db   :  { %v4530_v63 = vsel %vm11872_vm5, %v11865_v29, %v4525_v41  ;;  %v4544_v16 = vsel %vm11902_vm9, %v11868_v50, %v4540_v33  ;;  %v4558_v8 = vsub.f32 1.0, %v4557_v52  ;;  %v8851_v50 = vor.u32 %v9923_v3, %v8850_v61  ;;  %v10267_v22 = vpop.eup %10266  ;;  %v8844_v52 = vld [vmem:[#allocation13 + $0x18] sm:$0xf0]  ;;  %vm11942_vm5 = vmor %vm4561_vm15, %vm4562_vm12  ;;  %v9063_v20 = vld [vmem:[#allocation11 + $0xd0] sm:$0xf0] }
 0x4dc   :  { %v4549_v39 = vsel %vm11909_vm11, %v4548_v12, %v4544_v16  ;;  %v4572_v46 = vmul.f32 %v10265_v49, %v4530_v63  ;;  %10270 = vpow2.f32 %v8700_v59  ;;  %v8855_v0 = vor.u32 %v9921_v62, %v8852_v32  ;;  %v10269_v53 = vpop.eup %10268 }
 0x4dd   :  { %v4571_v30 = vmul.f32 %v4549_v39, %v11801_v5  ;;  %v4559_v29 = vmul.f32 %v11894_v25, %v4558_v8  ;;  %v8859_v12 = vor.u32 %v9924_v55, %v8858_v44  ;;  %v11930_v43 = vadd.f32 1.0, %v10267_v22  ;;  %5436 = vmatpush.bf16.msrb.mxu0 %v8851_v50 }
 0x4de   :  { %v11934_v9 = vadd.f32 1.0, %v10269_v53  ;;  %v8835_v49 = vor.u32 %v9919_v36, %v8834_v47  ;;  %5449 = vmatpush.bf16.msrb.mxu1 %v8855_v0  ;;  %v8839_v33 = vor.u32 %v9917_v57, %v8836_v26  ;;  %v4565_v58 = vand.u32 2147483647, %v11860_v21  ;;  %5475 = vmatpush.bf16.msrb.mxu3 %v8863_v60  ;;  %v9047_v60 = vld [vmem:[#allocation11 + $0xb0] sm:$0xf0] }
 0x4df   :  { %v4573_v10 = vadd.f32 %v4572_v46, %v4571_v30  ;;  %v4560_v51 = vadd.f32 %v11894_v25, %v4559_v29  ;;  %v4818_v54 = vpop.f32.mrf.mxu2  ;;  %v4831_v13 = vpop.f32.mrf.mxu3  ;;  %5462 = vmatpush.bf16.msrb.mxu2 %v8859_v12  ;;  %v8843_v48 = vor.u32 %v9920_v23, %v8842_v28  ;;  %v8847_v21 = vor.u32 %v9918_v45, %v8844_v52  ;;  %v9973_v29 = vld [vmem:[#allocation11 + $0xc4] sm:$0xf] }
 0x4e0   :  { %vm4566_vm1 = vcmp.eq.f32.partialorder %v4565_v58, 8.507059e+37  ;;  %v4586_v3 = vunpack.c.l.bf16 %v11058_v31  ;;  %v4852_v30 = vand.u32 2147483648, %v11930_v43  ;;  %v4871_v15 = vand.u32 2147483648, %v11934_v9 }
 0x4e1   :  { %10272 = vtanh.f32 %v4573_v10  ;;  %v4564_v41 = vsel %vm11942_vm5, %v11894_v25, %v4560_v51  ;;  %5437 = vmatpush.bf16.msrb.mxu0 %v8835_v49  ;;  %v11953_v11 = vsel %vm2940_vm3, %v4573_v10, %v11801_v5  ;;  %v9079_v5 = vld [vmem:[#allocation11 + $0xf0] sm:$0xf0]  ;;  %v4850_v6 = vand.u32 2147483647, %v11930_v43  ;;  %v9969_v10 = vld [vmem:[#allocation11 + $0xa4] sm:$0xf] }
 0x4e2   :  { %10274 = vrcp.f32 %v11930_v43  ;;  %v10271_v34 = vpop.eup %10270  ;;  %5450 = vmatpush.bf16.msrb.mxu1 %v8839_v33  ;;  %v4569_v63 = vsel %vm4566_vm1, %v4568_v17, %v4564_v41  ;;  %5476 = vmatpush.bf16.msrb.mxu3 %v8847_v21  ;;  %v4835_v16 = vadd.f32 %v11898_v42, %v4586_v3  ;;  %v9082_v55 = vor.u32 %v9977_v4, %v9079_v5  ;;  %v9077_v4 = vld [vmem:[#allocation11 + $0xe0] sm:$0xf]  ;;  %v9979_v5 = vld [vmem:[#allocation11 + $0xec] sm:$0xf0] }
 0x4e3   :  { %10276 = vrcp.f32 %v11934_v9  ;;  %v11955_v61 = vadd.f32 1.0, %v10271_v34  ;;  %5463 = vmatpush.bf16.msrb.mxu2 %v8843_v48  ;;  %v4869_v36 = vand.u32 2147483647, %v11934_v9  ;;  %vm4846_vm10 = vweird.f32 %v11930_v43 }
 0x4e4   :  { %v9066_v12 = vor.u32 %v9973_v29, %v9063_v20  ;;  %vm4865_vm6 = vweird.f32 %v11934_v9  ;;  %v4853_v57 = vor.u32 1.1754944e-38, %v4852_v30  ;;  %v4872_v28 = vor.u32 1.1754944e-38, %v4871_v15  ;;  %v9061_v30 = vld [vmem:[#allocation11 + $0xc0] sm:$0xf]  ;;  %v9975_v29 = vld [vmem:[#allocation11 + $0xcc] sm:$0xf0] }
 0x4e5   :  { %10278 = vrcp.f32 %v11955_v61  ;;  %vm4851_vm11 = vcmp.eq.f32.partialorder %v4850_v6, 8.507059e+37  ;;  %vm4870_vm12 = vcmp.eq.f32.partialorder %v4869_v36, 8.507059e+37  ;;  %v4891_v58 = vand.u32 2147483648, %v11955_v61  ;;  %v9069_v20 = vld [vmem:[#allocation11 + $0xc8] sm:$0xf] }
 0x4e6   :  { %10280 = vtanh.f32 %v4835_v16  ;;  %vm4885_vm5 = vweird.f32 %v11955_v61  ;;  %v4889_v1 = vand.u32 2147483647, %v11955_v61  ;;  %v9031_v16 = vld [vmem:[#allocation11 + $0x90] sm:$0xf0]  ;;  %v9976_v15 = vld [vmem:[#allocation11 + $0xd4] sm:$0xf0] }
 0x4e7   :  { %v10273_v62 = vpop.eup %10272  ;;  %v4892_v41 = vor.u32 1.1754944e-38, %v4891_v58  ;;  %v9071_v6 = vld [vmem:[#allocation11 + $0xd8] sm:$0xf0]  ;;  %v9966_v58 = vld [vmem:[#allocation11 + $0x8c] sm:$0xf] }
 0x4e8   :  { %v10275_v25 = vpop.eup %10274  ;;  %v4575_v8 = vmul.f32 %v10273_v62, %v4569_v63 }
 0x4e9   :  { %v10277_v32 = vpop.eup %10276  ;;  %v4842_v44 = vmul.f32 %v10275_v25, %v11930_v43  ;;  %vm4847_vm4 = vweird.f32 %v10275_v25 }
 0x4ea   :  { %v4861_v39 = vmul.f32 %v10277_v32, %v11934_v9  ;;  %v4576_v31 = vsel %vm2940_vm3, %v4575_v8, 0.0  ;;  %v11967_v46 = vsel %vm2940_vm3, %v4575_v8, %v11818_v24  ;;  %vm4866_vm3 = vweird.f32 %v10277_v32  ;;  %vm4848_vm8 = vmor %vm4846_vm10, %vm4847_vm4 }
 0x4eb   :  { %v4843_v59 = vsub.f32 1.0, %v4842_v44  ;;  %4578 = vst [vmem:[#allocation23 + $0x28] sm:$0xff] %v4576_v31  ;;  %v4913_v42 = vpack.c.bf16 %v11967_v46, %v11967_v46  ;;  %v10279_v50 = vpop.eup %10278  ;;  %vm4867_vm9 = vmor %vm4865_vm6, %vm4866_vm3  ;;  %v9050_v9 = vor.u32 %v9969_v10, %v9047_v60  ;;  %vm4890_vm4 = vcmp.eq.f32.partialorder %v4889_v1, 8.507059e+37  ;;  %v9972_v60 = vld [vmem:[#allocation11 + $0xb4] sm:$0xf0] }
 0x4ec   :  { %v4862_v7 = vsub.f32 1.0, %v4861_v39  ;;  %v4881_v22 = vmul.f32 %v10279_v50, %v11955_v61  ;;  %v10281_v51 = vpop.eup %10280  ;;  %vm4886_vm15 = vweird.f32 %v10279_v50  ;;  %v9965_v61 = vld [vmem:[#allocation11 + $0x84] sm:$0xf]  ;;  %v9078_v44 = vor.u32 %v9979_v5, %v9077_v4  ;;  %v9980_v39 = vld [vmem:[#allocation11 + $0xf4] sm:$0xf0] }
 0x4ed   :  { %v4844_v47 = vmul.f32 %v10275_v25, %v4843_v59  ;;  %5114 = vmatmul.bf16.vlgmr.msra.gmra.mxu0 %v4913_v42  ;;  %5127 = vmatmul.bf16.vlgmr.msra.gmra.mxu1 %v4913_v42  ;;  %vm4887_vm1 = vmor %vm4885_vm5, %vm4886_vm15  ;;  %v9034_v8 = vor.u32 %v9965_v61, %v9031_v16  ;;  %v9039_v1 = vld [vmem:[#allocation11 + $0x98] sm:$0xf0]  ;;  %v9964_v16 = vld [vmem:[#allocation11 + $0x74] sm:$0xf0] }
 0x4ee   :  { %v4863_v24 = vmul.f32 %v10277_v32, %v4862_v7  ;;  %5140 = vmatmul.bf16.vlgmr.msra.gmra.mxu2 %v4913_v42  ;;  %5153 = vmatmul.bf16.vlgmr.msra.gmra.mxu3 %v4913_v42  ;;  %v4882_v53 = vsub.f32 1.0, %v4881_v22  ;;  %v9961_v42 = vld [vmem:[#allocation11 + $0x64] sm:$0xf]  ;;  %v9023_v4 = vld [vmem:[#allocation11 + $0x78] sm:$0xf0] }
 0x4ef   :  { %v4845_v0 = vadd.f32 %v10275_v25, %v4844_v47  ;;  %5768 = vmatpush.bf16.msra.mxu1 %v9082_v55  ;;  %5755 = vmatpush.bf16.msra.mxu0 %v9078_v44  ;;  %v9015_v55 = vld [vmem:[#allocation11 + $0x70] sm:$0xf0]  ;;  %v9974_v47 = vld [vmem:[#allocation11 + $0xcc] sm:$0xf]  ;;  %v9957_v22 = vld [vmem:[#allocation11 + $0x44] sm:$0xf] }
 0x4f0   :  { %v4864_v26 = vadd.f32 %v10277_v32, %v4863_v24  ;;  %v4883_v18 = vmul.f32 %v10279_v50, %v4882_v53  ;;  %v9018_v7 = vor.u32 %v9961_v42, %v9015_v55  ;;  %v9070_v24 = vor.u32 %v9976_v15, %v9069_v20  ;;  %v9053_v53 = vld [vmem:[#allocation11 + $0xa8] sm:$0xf]  ;;  %v10009_v44 = vld [vmem:[#allocation13 + $0xe4] sm:$0xf]  ;;  %v9960_v55 = vld [vmem:[#allocation11 + $0x54] sm:$0xf0] }
 0x4f1   :  { %v4849_v23 = vsel %vm4848_vm8, %v10275_v25, %v4845_v0  ;;  %v9074_v36 = vor.u32 %v9974_v47, %v9071_v6  ;;  %v8999_v0 = vld [vmem:[#allocation11 + $0x50] sm:$0xf0]  ;;  %v4910_v20 = vunpack.c.h.bf16 %v11009_v27  ;;  %v10005_v47 = vld [vmem:[#allocation13 + $0xc4] sm:$0xf] }
 0x4f2   :  { %v4854_v54 = vsel %vm4851_vm11, %v4853_v57, %v4849_v23  ;;  %v4868_v13 = vsel %vm4867_vm9, %v10277_v32, %v4864_v26  ;;  %v4884_v52 = vadd.f32 %v10279_v50, %v4883_v18  ;;  %v9085_v32 = vld [vmem:[#allocation11 + $0xe8] sm:$0xf]  ;;  %v9045_v57 = vld [vmem:[#allocation11 + $0xa0] sm:$0xf]  ;;  %v9971_v26 = vld [vmem:[#allocation11 + $0xac] sm:$0xf0] }
 0x4f3   :  { %v4873_v43 = vsel %vm4870_vm12, %v4872_v28, %v4868_v13  ;;  %v4896_v49 = vmul.f32 %v10281_v51, %v4854_v54  ;;  %5769 = vmatpush.bf16.msra.mxu1 %v9066_v12  ;;  %v9086_v31 = vor.u32 %v9980_v39, %v9085_v32  ;;  %v9002_v12 = vor.u32 %v9957_v22, %v8999_v0  ;;  %v9970_v28 = vld [vmem:[#allocation11 + $0xac] sm:$0xf]  ;;  %v9055_v23 = vld [vmem:[#allocation11 + $0xb8] sm:$0xf0]  ;;  %v9953_v13 = vld [vmem:[#allocation11 + $0x24] sm:$0xf] }
 0x4f4   :  { %v4895_v33 = vmul.f32 %v4873_v43, %v11831_v14  ;;  %v4888_v34 = vsel %vm4887_vm1, %v10279_v50, %v4884_v52  ;;  %v9062_v50 = vor.u32 %v9975_v29, %v9061_v30  ;;  %v9046_v10 = vor.u32 %v9971_v26, %v9045_v57  ;;  %v8983_v43 = vld [vmem:[#allocation11 + $0x30] sm:$0xf0]  ;;  %v9029_v18 = vld [vmem:[#allocation11 + $0x80] sm:$0xf]  ;;  %v9968_v52 = vld [vmem:[#allocation11 + $0x94] sm:$0xf0] }
 0x4f5   :  { %v4893_v17 = vsel %vm4890_vm4, %v4892_v41, %v4888_v34  ;;  %5781 = vmatpush.bf16.msra.mxu2 %v9086_v31  ;;  %v9054_v51 = vor.u32 %v9972_v60, %v9053_v53  ;;  %v9058_v54 = vor.u32 %v9970_v28, %v9055_v23  ;;  %v9042_v41 = vor.u32 %v9966_v58, %v9039_v1  ;;  %v9210_v39 = vld [vmem:[#allocation13 + $0xf0] sm:$0xf0]  ;;  %v9959_v31 = vld [vmem:[#allocation11 + $0x4c] sm:$0xf0]  ;;  %v9007_v30 = vld [vmem:[#allocation11 + $0x58] sm:$0xf0] }
 0x4f6   :  { %v4897_v45 = vadd.f32 %v4896_v49, %v4895_v33  ;;  %5756 = vmatpush.bf16.msra.mxu0 %v9062_v50  ;;  %v8986_v49 = vor.u32 %v9953_v13, %v8983_v43  ;;  %v9037_v33 = vld [vmem:[#allocation11 + $0x88] sm:$0xf]  ;;  %v4909_v29 = vunpack.c.l.bf16 %v11009_v27  ;;  %v9194_v6 = vld [vmem:[#allocation13 + $0xd0] sm:$0xf0]  ;;  %v8981_v57 = vld [vmem:[#allocation11 + $0x20] sm:$0xf] }
 0x4f7   :  { %5770 = vmatpush.bf16.msra.mxu1 %v9050_v9  ;;  %v9967_v9 = vld [vmem:[#allocation11 + $0x8c] sm:$0xf0]  ;;  %v9038_v34 = vor.u32 %v9968_v52, %v9037_v33  ;;  %v9197_v22 = vor.u32 %v10005_v47, %v9194_v6  ;;  %v8989_v53 = vld [vmem:[#allocation11 + $0x28] sm:$0xf]  ;;  %v9956_v60 = vld [vmem:[#allocation11 + $0x34] sm:$0xf0]  ;;  %v4912_v52 = vunpack.c.h.bf16 %v11018_v40 }
 0x4f8   :  { %10282 = vtanh.f32 %v4897_v45  ;;  %v11985_v48 = vsel %vm2610_vm13, %v4897_v45, %v11831_v14  ;;  %v9030_v45 = vor.u32 %v9967_v9, %v9029_v18  ;;  %v9955_v26 = vld [vmem:[#allocation11 + $0x2c] sm:$0xf0]  ;;  %v9954_v28 = vld [vmem:[#allocation11 + $0x2c] sm:$0xf]  ;;  %v8991_v27 = vld [vmem:[#allocation11 + $0x38] sm:$0xf0] }
 0x4f9   :  { %5782 = vmatpush.bf16.msra.mxu2 %v9070_v24  ;;  %v8994_v13 = vor.u32 %v9954_v28, %v8991_v27  ;;  %v10001_v43 = vld [vmem:[#allocation13 + $0xa4] sm:$0xf]  ;;  %v8965_v9 = vld [vmem:[#allocation11] sm:$0xf]  ;;  %v9951_v33 = vld [vmem:[#allocation11 + $0xc] sm:$0xf0]  ;;  %v4911_v28 = vunpack.c.l.bf16 %v11018_v40 }
 0x4fa   :  { %5757 = vmatpush.bf16.msra.mxu0 %v9046_v10  ;;  %v8982_v10 = vor.u32 %v9955_v26, %v8981_v57  ;;  %v8966_v58 = vor.u32 %v9951_v33, %v8965_v9  ;;  %v9952_v1 = vld [vmem:[#allocation11 + $0x14] sm:$0xf0]  ;;  %v9200_v47 = vld [vmem:[#allocation13 + $0xc8] sm:$0xf]  ;;  %v9202_v57 = vld [vmem:[#allocation13 + $0xd8] sm:$0xf0] }
 0x4fb   :  { %5771 = vmatpush.bf16.msra.mxu1 %v9034_v8  ;;  %v9962_v8 = vld [vmem:[#allocation11 + $0x6c] sm:$0xf]  ;;  %v10008_v6 = vld [vmem:[#allocation13 + $0xd4] sm:$0xf0]  ;;  %v9176_v27 = vld [vmem:[#allocation13 + $0xa0] sm:$0xf] }
 0x4fc   :  { %v9026_v32 = vor.u32 %v9962_v8, %v9023_v4  ;;  %v10004_v9 = vld [vmem:[#allocation13 + $0xb4] sm:$0xf0]  ;;  %v9186_v40 = vld [vmem:[#allocation13 + $0xb8] sm:$0xf0] }
 0x4fd   :  { %5783 = vmatpush.bf16.msra.mxu2 %v9054_v51 }
 0x4fe   :  { %v10283_v21 = vpop.eup %10282  ;;  %5758 = vmatpush.bf16.msra.mxu0 %v9030_v45  ;;  %v8973_v45 = vld [vmem:[#allocation11 + $0x8] sm:$0xf] }
 0x4ff   :  { %v4899_v3 = vmul.f32 %v10283_v21, %v4893_v17  ;;  %5772 = vmatpush.bf16.msra.mxu1 %v9018_v7  ;;  %v9949_v21 = vld [vmem:[#allocation11 + $0x4] sm:$0xf]  ;;  %v8967_v17 = vld [vmem:[#allocation11 + $0x10] sm:$0xf0]  ;;  %v9958_v7 = vld [vmem:[#allocation11 + $0x4c] sm:$0xf] }
 0x500   :  { %v9010_v15 = vor.u32 %v9958_v7, %v9007_v30  ;;  %v9146_v30 = vld [vmem:[#allocation13 + $0x70] sm:$0xf0] }
 0x501   :  { %v4900_v62 = vsel %vm2610_vm13, %v4899_v3, 0.0  ;;  %v11994_v63 = vsel %vm2610_vm13, %v4899_v3, %v11840_v19  ;;  %v9087_v19 = vld [vmem:[#allocation11 + $0xf8] sm:$0xf0]  ;;  %5784 = vmatpush.bf16.msra.mxu2 %v9038_v34  ;;  %v8970_v3 = vor.u32 %v9949_v21, %v8967_v17  ;;  %v9950_v34 = vld [vmem:[#allocation11 + $0xc] sm:$0xf] }
 0x502   :  { %v4901_v14 = vpack.c.bf16 %v4900_v62, %v4900_v62  ;;  %v5237_v25 = vpack.c.bf16 %v11994_v63, %v11994_v63  ;;  %v9090_v59 = vor.u32 %v9978_v37, %v9087_v19  ;;  %v9013_v62 = vld [vmem:[#allocation11 + $0x60] sm:$0xf]  ;;  %v9213_v37 = vor.u32 %v10009_v44, %v9210_v39  ;;  %v9216_v44 = vld [vmem:[#allocation13 + $0xe8] sm:$0xf]  ;;  %v10012_v39 = vld [vmem:[#allocation13 + $0xf4] sm:$0xf0] }
 0x503   :  { %5773 = vmatpush.bf16.msra.mxu1 %v9002_v12  ;;  %v8997_v19 = vld [vmem:[#allocation11 + $0x40] sm:$0xf] }
 0x504   :  { %4903 = vst [vmem:[#allocation4 + $0x8] sm:$0xf] %v4901_v14  ;;  %5438 = vmatmul.bf16.vlgmr.msrb.gmra.mxu0 %v5237_v25  ;;  %5451 = vmatmul.bf16.vlgmr.msrb.gmra.mxu1 %v5237_v25  ;;  %v9963_v14 = vld [vmem:[#allocation11 + $0x6c] sm:$0xf0]  ;;  %v8998_v42 = vor.u32 %v9959_v31, %v8997_v19  ;;  %v9217_v19 = vor.u32 %v10012_v39, %v9216_v44  ;;  %v10010_v31 = vld [vmem:[#allocation13 + $0xec] sm:$0xf] }
 0x505   :  { %5464 = vmatmul.bf16.vlgmr.msrb.gmra.mxu2 %v5237_v25  ;;  %5477 = vmatmul.bf16.vlgmr.msrb.gmra.mxu3 %v5237_v25  ;;  %v9021_v25 = vld [vmem:[#allocation11 + $0x68] sm:$0xf]  ;;  %v9014_v61 = vor.u32 %v9963_v14, %v9013_v62  ;;  %v9997_v14 = vld [vmem:[#allocation13 + $0x84] sm:$0xf]  ;;  %v9170_v44 = vld [vmem:[#allocation13 + $0x98] sm:$0xf0] }
 0x506   :  { %5794 = vmatpush.bf16.msra.mxu3 %v9090_v59  ;;  %v9022_v5 = vor.u32 %v9964_v16, %v9021_v25  ;;  %v9005_v59 = vld [vmem:[#allocation11 + $0x48] sm:$0xf]  ;;  %v9162_v25 = vld [vmem:[#allocation13 + $0x90] sm:$0xf0] }
 0x507   :  { %5774 = vmatpush.bf16.msra.mxu1 %v8986_v49  ;;  %5759 = vmatpush.bf16.msra.mxu0 %v9014_v61  ;;  %v9006_v50 = vor.u32 %v9960_v55, %v9005_v59  ;;  %v9178_v49 = vld [vmem:[#allocation13 + $0xb0] sm:$0xf0]  ;;  %v9208_v61 = vld [vmem:[#allocation13 + $0xe0] sm:$0xf]  ;;  %v9218_v59 = vld [vmem:[#allocation13 + $0xf8] sm:$0xf0] }
 0x508   :  { %5785 = vmatpush.bf16.msra.mxu2 %v9022_v5  ;;  %v9181_v18 = vor.u32 %v10001_v43, %v9178_v49  ;;  %v9165_v5 = vor.u32 %v9997_v14, %v9162_v25  ;;  %v9221_v7 = vor.u32 %v10010_v31, %v9218_v59  ;;  %v9999_v14 = vld [vmem:[#allocation13 + $0x8c] sm:$0xf0]  ;;  %v9168_v25 = vld [vmem:[#allocation13 + $0x88] sm:$0xf]  ;;  %v9981_v59 = vld [vmem:[#allocation13 + $0x4] sm:$0xf] }
 0x50a   :  { %5795 = vmatpush.bf16.msra.mxu3 %v9074_v36 }
 0x50b   :  { %5775 = vmatpush.bf16.msra.mxu1 %v8970_v3  ;;  %5760 = vmatpush.bf16.msra.mxu0 %v8998_v42  ;;  %v8974_v3 = vor.u32 %v9952_v1, %v8973_v45  ;;  %v9993_v42 = vld [vmem:[#allocation13 + $0x64] sm:$0xf] }
 0x50c   :  { %5786 = vmatpush.bf16.msra.mxu2 %v9006_v50  ;;  %v9149_v50 = vor.u32 %v9993_v42, %v9146_v30  ;;  %v9098_v42 = vld [vmem:[#allocation13 + $0x10] sm:$0xf0] }
 0x50e   :  { %5796 = vmatpush.bf16.msra.mxu3 %v9058_v54  ;;  %v8990_v54 = vor.u32 %v9956_v60, %v8989_v53  ;;  %v9130_v60 = vld [vmem:[#allocation13 + $0x50] sm:$0xf0] }
 0x50f   :  { %6091 = vmatpush.bf16.msrb.mxu1 %v9213_v37  ;;  %5761 = vmatpush.bf16.msra.mxu0 %v8982_v10  ;;  %v9989_v10 = vld [vmem:[#allocation13 + $0x44] sm:$0xf] }
 0x510   :  { %5787 = vmatpush.bf16.msra.mxu2 %v8990_v54  ;;  %v10003_v54 = vld [vmem:[#allocation13 + $0xac] sm:$0xf0]  ;;  %v9133_v43 = vor.u32 %v9989_v10, %v9130_v60  ;;  %v9996_v10 = vld [vmem:[#allocation13 + $0x74] sm:$0xf0] }
 0x511   :  { %v9177_v49 = vor.u32 %v10003_v54, %v9176_v27 }
 0x512   :  { %5797 = vmatpush.bf16.msra.mxu3 %v9042_v41  ;;  %v8975_v41 = vld [vmem:[#allocation11 + $0x18] sm:$0xf0] }
 0x513   :  { %6092 = vmatpush.bf16.msrb.mxu1 %v9197_v22  ;;  %v8978_v62 = vor.u32 %v9950_v34, %v8975_v41  ;;  %5762 = vmatpush.bf16.msra.mxu0 %v8966_v58  ;;  %v9985_v34 = vld [vmem:[#allocation13 + $0x24] sm:$0xf]  ;;  %v9114_v41 = vld [vmem:[#allocation13 + $0x30] sm:$0xf0] }
 0x514   :  { %5788 = vmatpush.bf16.msra.mxu2 %v8974_v3 }
 0x516   :  { %5798 = vmatpush.bf16.msra.mxu3 %v9026_v32  ;;  %v10011_v32 = vld [vmem:[#allocation13 + $0xec] sm:$0xf0] }
 0x517   :  { %6093 = vmatpush.bf16.msrb.mxu1 %v9181_v18  ;;  %v9209_v37 = vor.u32 %v10011_v32, %v9208_v61  ;;  %v9184_v18 = vld [vmem:[#allocation13 + $0xa8] sm:$0xf]  ;;  %v9998_v32 = vld [vmem:[#allocation13 + $0x8c] sm:$0xf] }
 0x518   :  { %6104 = vmatpush.bf16.msrb.mxu2 %v9217_v19  ;;  %v9185_v45 = vor.u32 %v10004_v9, %v9184_v18  ;;  %v12357_v19 = vld [vmem:[#allocation39_spill] sm:$0xff]  ;;  %v9128_v9 = vld [vmem:[#allocation13 + $0x40] sm:$0xf] }
 0x519   :  { %6078 = vmatpush.bf16.msrb.mxu0 %v9209_v37  ;;  %v5236_v31 = vunpack.c.h.bf16 %v12357_v19 }
 0x51a   :  { %5799 = vmatpush.bf16.msra.mxu3 %v9010_v15  ;;  %v10007_v15 = vld [vmem:[#allocation13 + $0xcc] sm:$0xf0] }
 0x51b   :  { %6094 = vmatpush.bf16.msrb.mxu1 %v9165_v5  ;;  %v10000_v5 = vld [vmem:[#allocation13 + $0x94] sm:$0xf0] }
 0x51e   :  { %5800 = vmatpush.bf16.msra.mxu3 %v8994_v13 }
 0x51f   :  { %6095 = vmatpush.bf16.msrb.mxu1 %v9149_v50 }
 0x522   :  { %5801 = vmatpush.bf16.msra.mxu3 %v8978_v62 }
 0x523   :  { %6096 = vmatpush.bf16.msrb.mxu1 %v9133_v43 }
 0x526   :  { %6117 = vmatpush.bf16.msrb.mxu3 %v9221_v7 }
 0x56a   :  { %v5115_v24 = vpop.f32.mrf.mxu0  ;;  %v5128_v36 = vpop.f32.mrf.mxu1 }
 0x56b   :  { %v5158_v0 = vadd.f32 %v5115_v24, %v4909_v29  ;;  %v5159_v12 = vadd.f32 %v5128_v36, %v4910_v20  ;;  %v9192_v29 = vld [vmem:[#allocation13 + $0xc0] sm:$0xf] }
 0x56c   :  { %v9193_v22 = vor.u32 %v10007_v15, %v9192_v29  ;;  %v9144_v29 = vld [vmem:[#allocation13 + $0x60] sm:$0xf] }
 0x56d   :  { %v8829_v23 = vmul.f32 -1.442695, %v5158_v0  ;;  %v8830_v51 = vmul.f32 -1.442695, %v5159_v12  ;;  %v9201_v0 = vor.u32 %v10008_v6, %v9200_v47  ;;  %v10006_v12 = vld [vmem:[#allocation13 + $0xcc] sm:$0xf]  ;;  %v9169_v47 = vor.u32 %v10000_v5, %v9168_v25 }
 0x56e   :  { %v9205_v53 = vor.u32 %v10006_v12, %v9202_v57  ;;  %6079 = vmatpush.bf16.msrb.mxu0 %v9193_v22  ;;  %v9173_v6 = vor.u32 %v9998_v32, %v9170_v44  ;;  %v9995_v22 = vld [vmem:[#allocation13 + $0x6c] sm:$0xf0]  ;;  %v9138_v25 = vld [vmem:[#allocation13 + $0x58] sm:$0xf0]  ;;  %v9112_v5 = vld [vmem:[#allocation13 + $0x20] sm:$0xf] }
 0x56f   :  { %10284 = vpow2.f32 %v8829_v23  ;;  %6105 = vmatpush.bf16.msrb.mxu2 %v9201_v0  ;;  %v9152_v0 = vld [vmem:[#allocation13 + $0x68] sm:$0xf]  ;;  %v9145_v27 = vor.u32 %v9995_v22, %v9144_v29  ;;  %v9987_v32 = vld [vmem:[#allocation13 + $0x2c] sm:$0xf0] }
 0x570   :  { %10286 = vpow2.f32 %v8830_v51  ;;  %6118 = vmatpush.bf16.msrb.mxu3 %v9205_v53  ;;  %v9113_v7 = vor.u32 %v9987_v32, %v9112_v5  ;;  %v9983_v22 = vld [vmem:[#allocation13 + $0xc] sm:$0xf0] }
 0x571   :  { %v5141_v21 = vpop.f32.mrf.mxu2  ;;  %v5154_v17 = vpop.f32.mrf.mxu3 }
 0x572   :  { %v5161_v16 = vadd.f32 %v5154_v17, %v4912_v52  ;;  %v5117_v8 = vpop.f32.mrf.mxu0  ;;  %v5130_v4 = vpop.f32.mrf.mxu1  ;;  %v5160_v13 = vadd.f32 %v5141_v21, %v4911_v28  ;;  %v10002_v52 = vld [vmem:[#allocation13 + $0xac] sm:$0xf]  ;;  %v9160_v17 = vld [vmem:[#allocation13 + $0x80] sm:$0xf]  ;;  %6080 = vmatpush.bf16.msrb.mxu0 %v9177_v49  ;;  %v9117_v21 = vor.u32 %v9985_v34, %v9114_v41  ;;  %v9153_v49 = vor.u32 %v9996_v10, %v9152_v0  ;;  %v9992_v34 = vld [vmem:[#allocation13 + $0x54] sm:$0xf0] }
 0x573   :  { %v9189_v1 = vor.u32 %v10002_v52, %v9186_v40  ;;  %v5234_v8 = vunpack.c.h.bf16 %v11044_v2  ;;  %6106 = vmatpush.bf16.msrb.mxu2 %v9185_v45  ;;  %v9161_v4 = vor.u32 %v9999_v14, %v9160_v17  ;;  %v9990_v14 = vld [vmem:[#allocation13 + $0x4c] sm:$0xf] }
 0x574   :  { %v8831_v55 = vmul.f32 -1.442695, %v5161_v16  ;;  %v5233_v16 = vunpack.c.l.bf16 %v11044_v2  ;;  %6097 = vmatpush.bf16.msrb.mxu1 %v9117_v21 }
 0x575   :  { %v10285_v20 = vpop.eup %10284  ;;  %6119 = vmatpush.bf16.msrb.mxu3 %v9189_v1  ;;  %v9136_v1 = vld [vmem:[#allocation13 + $0x48] sm:$0xf] }
 0x576   :  { %v10287_v24 = vpop.eup %10286  ;;  %v12001_v36 = vadd.f32 1.0, %v10285_v20  ;;  %10288 = vpow2.f32 %v8831_v55  ;;  %6081 = vmatpush.bf16.msrb.mxu0 %v9161_v4  ;;  %v9141_v4 = vor.u32 %v9990_v14, %v9138_v25 }
 0x577   :  { %v12003_v26 = vadd.f32 1.0, %v10287_v24  ;;  %v9101_v24 = vor.u32 %v9981_v59, %v9098_v42  ;;  %6107 = vmatpush.bf16.msrb.mxu2 %v9169_v47  ;;  %v9986_v47 = vld [vmem:[#allocation13 + $0x2c] sm:$0xf] }
 0x578   :  { %10290 = vrcp.f32 %v12001_v36  ;;  %v5175_v33 = vand.u32 2147483647, %v12001_v36  ;;  %v5177_v3 = vand.u32 2147483648, %v12001_v36  ;;  %vm5171_vm13 = vweird.f32 %v12001_v36 }
 0x579   :  { %10292 = vrcp.f32 %v12003_v26  ;;  %v5143_v23 = vpop.f32.mrf.mxu2  ;;  %v5156_v51 = vpop.f32.mrf.mxu3  ;;  %v5196_v55 = vand.u32 2147483648, %v12003_v26  ;;  %v5194_v30 = vand.u32 2147483647, %v12003_v26  ;;  %6120 = vmatpush.bf16.msrb.mxu3 %v9173_v6  ;;  %vm5190_vm8 = vweird.f32 %v12003_v26  ;;  %6098 = vmatpush.bf16.msrb.mxu1 %v9101_v24  ;;  %v9122_v6 = vld [vmem:[#allocation13 + $0x38] sm:$0xf0] }
 0x57a   :  { %10294 = vtanh.f32 %v5160_v13  ;;  %vm12026_vm3 = vcmp.eq.f32.partialorder %v5175_v33, 8.507059e+37  ;;  %v5178_v57 = vor.u32 1.1754944e-38, %v5177_v3  ;;  %v9994_v23 = vld [vmem:[#allocation13 + $0x6c] sm:$0xf]  ;;  %v9154_v51 = vld [vmem:[#allocation13 + $0x78] sm:$0xf0]  ;;  %6082 = vmatpush.bf16.msrb.mxu0 %v9145_v27 }
 0x57b   :  { %v9157_v18 = vor.u32 %v9994_v23, %v9154_v51  ;;  %v9991_v33 = vld [vmem:[#allocation13 + $0x4c] sm:$0xf0]  ;;  %v5197_v41 = vor.u32 1.1754944e-38, %v5196_v55  ;;  %6108 = vmatpush.bf16.msrb.mxu2 %v9153_v49  ;;  %vm5195_vm12 = vcmp.eq.f32.partialorder %v5194_v30, 8.507059e+37  ;;  %v9096_v30 = vld [vmem:[#allocation13] sm:$0xf] }
 0x57c   :  { %v10289_v58 = vpop.eup %10288  ;;  %v9106_v27 = vld [vmem:[#allocation13 + $0x18] sm:$0xf0] }
 0x57d   :  { %v12010_v62 = vadd.f32 1.0, %v10289_v58  ;;  %v9129_v58 = vor.u32 %v9991_v33, %v9128_v9  ;;  %6121 = vmatpush.bf16.msrb.mxu3 %v9157_v18 }
 0x57e   :  { %v12012_v61 = vpop.eup %10290 }
 0x57f   :  { %v12016_v39 = vpop.eup %10292  ;;  %v5167_v37 = vmul.f32 %v12012_v61, %v12001_v36  ;;  %10296 = vrcp.f32 %v12010_v62  ;;  %vm5172_vm10 = vweird.f32 %v12012_v61  ;;  %6083 = vmatpush.bf16.msrb.mxu0 %v9129_v58  ;;  %vm5210_vm15 = vweird.f32 %v12010_v62 }
 0x580   :  { %v5186_v2 = vmul.f32 %v12016_v39, %v12003_v26  ;;  %vm5191_vm6 = vweird.f32 %v12016_v39  ;;  %v10295_v54 = vpop.eup %10294  ;;  %vm12043_vm9 = vmor %vm5171_vm13, %vm5172_vm10  ;;  %v5214_v9 = vand.u32 2147483647, %v12010_v62 }
 0x581   :  { %v5168_v20 = vsub.f32 1.0, %v5167_v37  ;;  %v5439_v50 = vpop.f32.mrf.mxu0  ;;  %v5452_v15 = vpop.f32.mrf.mxu1  ;;  %vm12054_vm11 = vmor %vm5190_vm8, %vm5191_vm6  ;;  %6122 = vmatpush.bf16.msrb.mxu3 %v9141_v4 }
 0x582   :  { %v5187_v12 = vsub.f32 1.0, %v5186_v2  ;;  %v5482_v53 = vadd.f32 %v5439_v50, %v5233_v16  ;;  %v5483_v28 = vadd.f32 %v5452_v15, %v5234_v8  ;;  %v9137_v8 = vor.u32 %v9992_v34, %v9136_v1  ;;  %v9120_v2 = vld [vmem:[#allocation13 + $0x28] sm:$0xf] }
 0x583   :  { %v5169_v60 = vmul.f32 %v12012_v61, %v5168_v20  ;;  %6084 = vmatpush.bf16.msrb.mxu0 %v9113_v7  ;;  %vm5215_vm4 = vcmp.eq.f32.partialorder %v5214_v9, 8.507059e+37 }
 0x584   :  { %v5188_v13 = vmul.f32 %v12016_v39, %v5187_v12  ;;  %v8960_v43 = vmul.f32 -1.442695, %v5482_v53  ;;  %v8961_v40 = vmul.f32 -1.442695, %v5483_v28  ;;  %6109 = vmatpush.bf16.msrb.mxu2 %v9137_v8  ;;  %v9104_v53 = vld [vmem:[#allocation13 + $0x8] sm:$0xf] }
 0x585   :  { %v12035_v45 = vpop.eup %10296  ;;  %v5170_v52 = vadd.f32 %v12012_v61, %v5169_v60  ;;  %v9984_v60 = vld [vmem:[#allocation13 + $0x14] sm:$0xf0]  ;;  %v9982_v28 = vld [vmem:[#allocation13 + $0xc] sm:$0xf] }
 0x586   :  { %v5189_v3 = vadd.f32 %v12016_v39, %v5188_v13  ;;  %v5206_v21 = vmul.f32 %v12035_v45, %v12010_v62  ;;  %10298 = vpow2.f32 %v8960_v43  ;;  %vm5211_vm5 = vweird.f32 %v12035_v45 }
 0x587   :  { %v5174_v36 = vsel %vm12043_vm9, %v12012_v61, %v5170_v52  ;;  %10300 = vpow2.f32 %v8961_v40  ;;  %v9988_v61 = vld [vmem:[#allocation13 + $0x34] sm:$0xf0]  ;;  %v9097_v13 = vor.u32 %v9983_v22, %v9096_v30  ;;  %v5216_v43 = vand.u32 2147483648, %v12010_v62  ;;  %vm5212_vm1 = vmor %vm5210_vm15, %vm5211_vm5 }
 0x588   :  { %v5179_v44 = vsel %vm12026_vm3, %v5178_v57, %v5174_v36  ;;  %v5193_v26 = vsel %vm12054_vm11, %v12016_v39, %v5189_v3  ;;  %v5207_v37 = vsub.f32 1.0, %v5206_v21  ;;  %v5465_v59 = vpop.f32.mrf.mxu2  ;;  %v5478_v42 = vpop.f32.mrf.mxu3  ;;  %v9121_v12 = vor.u32 %v9988_v61, %v9120_v2 }
 0x589   :  { %v5198_v55 = vsel %vm5195_vm12, %v5197_v41, %v5193_v26  ;;  %v5221_v29 = vmul.f32 %v10295_v54, %v5179_v44  ;;  %v5485_v20 = vadd.f32 %v5478_v42, %v5236_v31  ;;  %v5441_v50 = vpop.f32.mrf.mxu0  ;;  %v5454_v15 = vpop.f32.mrf.mxu1  ;;  %v9125_v57 = vor.u32 %v9986_v47, %v9122_v6  ;;  %6085 = vmatpush.bf16.msrb.mxu0 %v9097_v13  ;;  %v10024_v44 = vld [vmem:[#allocation14 + $0x38] sm:$0xff] }
 0x58a   :  { %v5220_v24 = vmul.f32 %v5198_v55, %v11953_v11  ;;  %v5208_v39 = vmul.f32 %v12035_v45, %v5207_v37  ;;  %6110 = vmatpush.bf16.msrb.mxu2 %v9121_v12  ;;  %v9105_v33 = vor.u32 %v9984_v60, %v9104_v53  ;;  %v9109_v52 = vor.u32 %v9982_v28, %v9106_v27  ;;  %v10023_v50 = vld [vmem:[#allocation14 + $0x30] sm:$0xff]  ;;  %v10021_v60 = vld [vmem:[#allocation14 + $0x20] sm:$0xff] }
 0x58b   :  { %v8962_v0 = vmul.f32 -1.442695, %v5485_v20  ;;  %6123 = vmatpush.bf16.msrb.mxu3 %v9125_v57  ;;  %v5217_v1 = vor.u32 1.1754944e-38, %v5216_v43  ;;  %v5235_v41 = vunpack.c.l.bf16 %v12357_v19  ;;  %v10022_v57 = vld [vmem:[#allocation14 + $0x28] sm:$0xff] }
 0x58c   :  { %v10299_v10 = vpop.eup %10298  ;;  %v5222_v31 = vadd.f32 %v5221_v29, %v5220_v24  ;;  %v5209_v51 = vadd.f32 %v12035_v45, %v5208_v39 }
 0x58d   :  { %v10301_v23 = vpop.eup %10300  ;;  %v12073_v54 = vadd.f32 1.0, %v10299_v10  ;;  %10302 = vpow2.f32 %v8962_v0  ;;  %v5484_v14 = vadd.f32 %v5465_v59, %v5235_v41  ;;  %v6206_v41 = vld [vmem:[#allocation23 + $0x10] sm:$0xff] }
 0x58e   :  { %10304 = vtanh.f32 %v5222_v31  ;;  %v12076_v49 = vadd.f32 1.0, %v10301_v23  ;;  %v12081_v18 = vsel %vm2279_vm14, %v5222_v31, %v11953_v11  ;;  %v5213_v11 = vsel %vm5212_vm1, %v12035_v45, %v5209_v51  ;;  %6111 = vmatpush.bf16.msrb.mxu2 %v9105_v33 }
 0x58f   :  { %10306 = vrcp.f32 %v12073_v54  ;;  %6124 = vmatpush.bf16.msrb.mxu3 %v9109_v52  ;;  %v5218_v21 = vsel %vm5215_vm4, %v5217_v1, %v5213_v11  ;;  %v5501_v5 = vand.u32 2147483648, %v12073_v54  ;;  %v5499_v59 = vand.u32 2147483647, %v12073_v54  ;;  %v10017_v11 = vld [vmem:[#allocation14] sm:$0xff]  ;;  %v6205_v1 = vld [vmem:[#allocation23 + $0x8] sm:$0xff] }
 0x590   :  { %10308 = vrcp.f32 %v12076_v49  ;;  %v5467_v40 = vpop.f32.mrf.mxu2  ;;  %v5480_v58 = vpop.f32.mrf.mxu3  ;;  %v5520_v26 = vand.u32 2147483648, %v12076_v49  ;;  %v5518_v2 = vand.u32 2147483647, %v12076_v49  ;;  %vm5495_vm10 = vweird.f32 %v12073_v54 }
 0x591   :  { %vm5514_vm6 = vweird.f32 %v12076_v49  ;;  %v5502_v55 = vor.u32 1.1754944e-38, %v5501_v5  ;;  %vm5500_vm11 = vcmp.eq.f32.partialorder %v5499_v59, 8.507059e+37  ;;  %v10019_v40 = vld [vmem:[#allocation14 + $0x10] sm:$0xff]  ;;  %v10018_v58 = vld [vmem:[#allocation14 + $0x8] sm:$0xff] }
 0x592   :  { %v5521_v15 = vor.u32 1.1754944e-38, %v5520_v26  ;;  %vm5519_vm12 = vcmp.eq.f32.partialorder %v5518_v2, 8.507059e+37  ;;  %v10047_v5 = vld [vmem:[#allocation19 + $0x30] sm:$0xff] }
 0x593   :  { %v10303_v34 = vpop.eup %10302 }
 0x594   :  { %v10305_v17 = vpop.eup %10304  ;;  %v12092_v3 = vadd.f32 1.0, %v10303_v34  ;;  %v6204_v34 = vld [vmem:[#allocation23] sm:$0xff] }
 0x595   :  { %v10307_v62 = vpop.eup %10306  ;;  %v12094_v25 = vmul.f32 %v10305_v17, %v5218_v21  ;;  %v6212_v38 = vpack.c.bf16 %v6205_v1, %v6204_v34  ;;  %v6208_v21 = vld [vmem:[#allocation23 + $0x20] sm:$0xff]  ;;  %v10031_v1 = vld [vmem:[#allocation16 + $0x30] sm:$0xff] }
 0x596   :  { %v10309_v16 = vpop.eup %10308  ;;  %v5491_v36 = vmul.f32 %v10307_v62, %v12073_v54  ;;  %10310 = vrcp.f32 %v12092_v3  ;;  %vm5496_vm13 = vweird.f32 %v10307_v62  ;;  %v5540_v31 = vand.u32 2147483648, %v12092_v3  ;;  %v10020_v54 = vld [vmem:[#allocation14 + $0x18] sm:$0xff] }
 0x597   :  { %v5510_v45 = vmul.f32 %v10309_v16, %v12076_v49  ;;  %v12103_v19 = vsel %vm2279_vm14, %v12094_v25, %v11967_v46  ;;  %10312 = vtanh.f32 %v5484_v14  ;;  %vm5515_vm3 = vweird.f32 %v10309_v16  ;;  %vm5497_vm8 = vmor %vm5495_vm10, %vm5496_vm13  ;;  %v10040_v14 = vld [vmem:[#allocation17 + $0x38] sm:$0xff] }
 0x598   :  { %v5492_v8 = vsub.f32 1.0, %v5491_v36  ;;  %v5562_v32 = vpack.c.bf16 %v12103_v19, %v12103_v19  ;;  %vm5516_vm9 = vmor %vm5514_vm6, %vm5515_vm3  ;;  %vm5534_vm5 = vweird.f32 %v12092_v3  ;;  %v5538_v27 = vand.u32 2147483647, %v12092_v3  ;;  %v10038_v36 = vld [vmem:[#allocation17 + $0x28] sm:$0xff] }
 0x599   :  { %v5511_v4 = vsub.f32 1.0, %v5510_v45  ;;  %v5541_v51 = vor.u32 1.1754944e-38, %v5540_v31  ;;  %v10037_v45 = vld [vmem:[#allocation17 + $0x20] sm:$0xff] }
 0x59a   :  { %v5493_v37 = vmul.f32 %v10307_v62, %v5492_v8  ;;  %5763 = vmatmul.bf16.vlgmr.msra.gmra.mxu0 %v5562_v32  ;;  %5776 = vmatmul.bf16.vlgmr.msra.gmra.mxu1 %v5562_v32  ;;  %vm5539_vm4 = vcmp.eq.f32.partialorder %v5538_v27, 8.507059e+37  ;;  %v10048_v8 = vld [vmem:[#allocation19 + $0x38] sm:$0xff] }
 0x59b   :  { %v5512_v42 = vmul.f32 %v10309_v16, %v5511_v4  ;;  %5789 = vmatmul.bf16.vlgmr.msra.gmra.mxu2 %v5562_v32  ;;  %5802 = vmatmul.bf16.vlgmr.msra.gmra.mxu3 %v5562_v32  ;;  %v10036_v4 = vld [vmem:[#allocation17 + $0x18] sm:$0xff]  ;;  %v10035_v32 = vld [vmem:[#allocation17 + $0x10] sm:$0xff] }
 0x59c   :  { %v10311_v46 = vpop.eup %10310  ;;  %v5494_v61 = vadd.f32 %v10307_v62, %v5493_v37  ;;  %6405 = vmatpush.bf16.msra.mxu1 %v10024_v44  ;;  %6597 = vmatpush.bf16.msra.mxu3 %v10040_v14  ;;  %v12364_v44 = vld [vmem:[#allocation35_spill] sm:$0xff]  ;;  %v10041_v14 = vld [vmem:[#allocation19] sm:$0xff] }
 0x59d   :  { %v5513_v29 = vadd.f32 %v10309_v16, %v5512_v42  ;;  %v5530_v20 = vmul.f32 %v10311_v46, %v12092_v3  ;;  %v10313_v47 = vpop.eup %10312  ;;  %vm5535_vm15 = vweird.f32 %v10311_v46  ;;  %v6209_v3 = vld [vmem:[#allocation23 + $0x28] sm:$0xff]  ;;  %6536 = vmatpush.bf16.msra.mxu2 %v10048_v8  ;;  %v5558_v26 = vunpack.c.l.bf16 %v12364_v44  ;;  %v10064_v8 = vld [vmem:[#allocation22 + $0x38] sm:$0xff] }
 0x59e   :  { %v5498_v7 = vsel %vm5497_vm8, %v10307_v62, %v5494_v61  ;;  %vm5536_vm1 = vmor %vm5534_vm5, %vm5535_vm15  ;;  %v6214_v62 = vpack.c.bf16 %v6209_v3, %v6208_v21  ;;  %v5559_v37 = vunpack.c.h.bf16 %v12364_v44  ;;  %v10046_v61 = vld [vmem:[#allocation19 + $0x28] sm:$0xff] }
 0x59f   :  { %v5503_v6 = vsel %vm5500_vm11, %v5502_v55, %v5498_v7  ;;  %v5517_v24 = vsel %vm5516_vm9, %v10309_v16, %v5513_v29  ;;  %v5531_v39 = vsub.f32 1.0, %v5530_v20  ;;  %v10039_v16 = vld [vmem:[#allocation17 + $0x30] sm:$0xff]  ;;  %v10034_v55 = vld [vmem:[#allocation17 + $0x8] sm:$0xff]  ;;  %v10045_v7 = vld [vmem:[#allocation19 + $0x20] sm:$0xff] }
 0x5a0   :  { %v5522_v30 = vsel %vm5519_vm12, %v5521_v15, %v5517_v24  ;;  %v5545_v22 = vmul.f32 %v10313_v47, %v5503_v6  ;;  %6406 = vmatpush.bf16.msra.mxu1 %v10023_v50  ;;  %6598 = vmatpush.bf16.msra.mxu3 %v10039_v16  ;;  %v12365_v50 = vld [vmem:[#allocation36_spill] sm:$0xff]  ;;  %v10033_v47 = vld [vmem:[#allocation17] sm:$0xff] }
 0x5a1   :  { %v5544_v0 = vmul.f32 %v5522_v30, %v11985_v48  ;;  %v5532_v12 = vmul.f32 %v10311_v46, %v5531_v39  ;;  %6537 = vmatpush.bf16.msra.mxu2 %v10047_v5  ;;  %v5561_v15 = vunpack.c.h.bf16 %v12365_v50  ;;  %v10056_v39 = vld [vmem:[#allocation20 + $0x38] sm:$0xff] }
 0x5a3   :  { %v5546_v53 = vadd.f32 %v5545_v22, %v5544_v0  ;;  %v5533_v10 = vadd.f32 %v10311_v46, %v5532_v12 }
 0x5a4   :  { %6407 = vmatpush.bf16.msra.mxu1 %v10022_v57  ;;  %6599 = vmatpush.bf16.msra.mxu3 %v10038_v36  ;;  %v10044_v57 = vld [vmem:[#allocation19 + $0x18] sm:$0xff] }
 0x5a5   :  { %10314 = vtanh.f32 %v5546_v53  ;;  %v12120_v28 = vsel %vm1950_vm7, %v5546_v53, %v11985_v48  ;;  %v5537_v23 = vsel %vm5536_vm1, %v10311_v46, %v5533_v10  ;;  %6538 = vmatpush.bf16.msra.mxu2 %v10046_v61  ;;  %v10055_v10 = vld [vmem:[#allocation20 + $0x30] sm:$0xff] }
 0x5a6   :  { %v5542_v43 = vsel %vm5539_vm4, %v5541_v51, %v5537_v23  ;;  %v10043_v23 = vld [vmem:[#allocation19 + $0x10] sm:$0xff] }
 0x5a8   :  { %6408 = vmatpush.bf16.msra.mxu1 %v10021_v60  ;;  %6600 = vmatpush.bf16.msra.mxu3 %v10037_v45 }
 0x5a9   :  { %6539 = vmatpush.bf16.msra.mxu2 %v10045_v7 }
 0x5ab   :  { %v10315_v13 = vpop.eup %10314 }
 0x5ac   :  { %v5548_v49 = vmul.f32 %v10315_v13, %v5542_v43  ;;  %6409 = vmatpush.bf16.msra.mxu1 %v10020_v54  ;;  %6601 = vmatpush.bf16.msra.mxu3 %v10036_v4  ;;  %v10054_v13 = vld [vmem:[#allocation20 + $0x28] sm:$0xff]  ;;  %v10032_v43 = vld [vmem:[#allocation16 + $0x38] sm:$0xff] }
 0x5ad   :  { %6540 = vmatpush.bf16.msra.mxu2 %v10044_v57  ;;  %6328 = vmatpush.bf16.msra.mxu0 %v10032_v43  ;;  %v10052_v4 = vld [vmem:[#allocation20 + $0x18] sm:$0xff]  ;;  %v12371_v57 = vld [vmem:[#allocation38_spill] sm:$0xff] }
 0x5ae   :  { %v5549_v9 = vsel %vm1950_vm7, %v5548_v49, 0.0  ;;  %v12129_v48 = vsel %vm1950_vm7, %v5548_v49, %v11994_v63  ;;  %v6207_v63 = vld [vmem:[#allocation23 + $0x18] sm:$0xff]  ;;  %v5560_v49 = vunpack.c.l.bf16 %v12365_v50  ;;  %v10051_v50 = vld [vmem:[#allocation20 + $0x10] sm:$0xff] }
 0x5af   :  { %v5550_v33 = vpack.c.bf16 %v5549_v9, %v5549_v9  ;;  %v5885_v52 = vpack.c.bf16 %v12129_v48, %v12129_v48  ;;  %v6213_v17 = vpack.c.bf16 %v6207_v63, %v6206_v41  ;;  %v12366_v63 = vld [vmem:[#allocation37_spill] sm:$0xff]  ;;  %v10028_v43 = vld [vmem:[#allocation16 + $0x18] sm:$0xff] }
 0x5b0   :  { %6410 = vmatpush.bf16.msra.mxu1 %v10019_v40  ;;  %6602 = vmatpush.bf16.msra.mxu3 %v10035_v32  ;;  %v5881_v41 = vunpack.c.l.bf16 %v12366_v63 }
 0x5b1   :  { %5552 = vst [vmem:[#allocation4 + $0x4] sm:$0xf] %v5550_v33  ;;  %6086 = vmatmul.bf16.vlgmr.msrb.gmra.mxu0 %v5885_v52  ;;  %6099 = vmatmul.bf16.vlgmr.msrb.gmra.mxu1 %v5885_v52  ;;  %v10042_v33 = vld [vmem:[#allocation19 + $0x8] sm:$0xff] }
 0x5b2   :  { %6112 = vmatmul.bf16.vlgmr.msrb.gmra.mxu2 %v5885_v52  ;;  %6125 = vmatmul.bf16.vlgmr.msrb.gmra.mxu3 %v5885_v52 }
 0x5b3   :  { %6541 = vmatpush.bf16.msra.mxu2 %v10043_v23  ;;  %6329 = vmatpush.bf16.msra.mxu0 %v10031_v1 }
 0x5b4   :  { %6411 = vmatpush.bf16.msra.mxu1 %v10018_v58  ;;  %6603 = vmatpush.bf16.msra.mxu3 %v10034_v55  ;;  %v10053_v58 = vld [vmem:[#allocation20 + $0x20] sm:$0xff] }
 0x5b7   :  { %6542 = vmatpush.bf16.msra.mxu2 %v10042_v33 }
 0x5b8   :  { %6412 = vmatpush.bf16.msra.mxu1 %v10017_v11  ;;  %6604 = vmatpush.bf16.msra.mxu3 %v10033_v47 }
 0x5bb   :  { %6543 = vmatpush.bf16.msra.mxu2 %v10041_v14 }
 0x5bc   :  { %6759 = vmatpush.bf16.msrb.mxu3 %v10056_v39 }
 0x5bf   :  { %6698 = vmatpush.bf16.msrb.mxu2 %v10064_v8 }
 0x5c0   :  { %6760 = vmatpush.bf16.msrb.mxu3 %v10055_v10 }
 0x5c1   :  { %6413 = vmatmul.bf16.vlgmr.msra.gmra.mxu1 %v6212_v38 }
 0x5c4   :  { %6761 = vmatpush.bf16.msrb.mxu3 %v10054_v13  ;;  %v10050_v13 = vld [vmem:[#allocation20 + $0x8] sm:$0xff] }
 0x5c8   :  { %6762 = vmatpush.bf16.msrb.mxu3 %v10053_v58 }
 0x5cc   :  { %6763 = vmatpush.bf16.msrb.mxu3 %v10052_v4 }
 0x5d0   :  { %6764 = vmatpush.bf16.msrb.mxu3 %v10051_v50 }
 0x5d1   :  { %6418 = vmatmul.bf16.gmra.mxu1 %v6213_v17  ;;  %v5882_v17 = vunpack.c.h.bf16 %v12366_v63 }
 0x5d4   :  { %6765 = vmatpush.bf16.msrb.mxu3 %v10050_v13 }
 0x5e1   :  { %6423 = vmatmul.bf16.gmra.mxu1 %v6214_v62 }
 0x617   :  { %v5764_v59 = vpop.f32.mrf.mxu0  ;;  %v5777_v42 = vpop.f32.mrf.mxu1 }
 0x618   :  { %v5807_v2 = vadd.f32 %v5764_v59, %v5558_v26  ;;  %v5808_v46 = vadd.f32 %v5777_v42, %v5559_v37  ;;  %v10030_v37 = vld [vmem:[#allocation16 + $0x28] sm:$0xff] }
 0x619   :  { %6330 = vmatpush.bf16.msra.mxu0 %v10030_v37 }
 0x61a   :  { %v9091_v29 = vmul.f32 -1.442695, %v5807_v2  ;;  %v9092_v20 = vmul.f32 -1.442695, %v5808_v46 }
 0x61c   :  { %10316 = vpow2.f32 %v9091_v29 }
 0x61d   :  { %10318 = vpow2.f32 %v9092_v20  ;;  %v10063_v20 = vld [vmem:[#allocation22 + $0x30] sm:$0xff] }
 0x61e   :  { %v5790_v6 = vpop.f32.mrf.mxu2  ;;  %v5803_v24 = vpop.f32.mrf.mxu3  ;;  %6699 = vmatpush.bf16.msrb.mxu2 %v10063_v20 }
 0x61f   :  { %v5810_v30 = vadd.f32 %v5803_v24, %v5561_v15  ;;  %v5766_v22 = vpop.f32.mrf.mxu0  ;;  %v5779_v0 = vpop.f32.mrf.mxu1  ;;  %v5809_v52 = vadd.f32 %v5790_v6, %v5560_v49  ;;  %v10029_v15 = vld [vmem:[#allocation16 + $0x20] sm:$0xff] }
 0x620   :  { %6331 = vmatpush.bf16.msra.mxu0 %v10029_v15 }
 0x621   :  { %v9093_v12 = vmul.f32 -1.442695, %v5810_v30 }
 0x622   :  { %v10317_v53 = vpop.eup %10316 }
 0x623   :  { %v10319_v31 = vpop.eup %10318  ;;  %v12136_v60 = vadd.f32 1.0, %v10317_v53  ;;  %10320 = vpow2.f32 %v9093_v12  ;;  %v5884_v53 = vunpack.c.h.bf16 %v12371_v57 }
 0x624   :  { %v12138_v27 = vadd.f32 1.0, %v10319_v31  ;;  %6332 = vmatpush.bf16.msra.mxu0 %v10028_v43 }
 0x625   :  { %10322 = vrcp.f32 %v12136_v60  ;;  %v5824_v44 = vand.u32 2147483647, %v12136_v60  ;;  %v5826_v26 = vand.u32 2147483648, %v12136_v60  ;;  %vm5820_vm10 = vweird.f32 %v12136_v60 }
 0x626   :  { %10324 = vrcp.f32 %v12138_v27  ;;  %v5792_v51 = vpop.f32.mrf.mxu2  ;;  %v5805_v54 = vpop.f32.mrf.mxu3  ;;  %v5845_v32 = vand.u32 2147483648, %v12138_v27  ;;  %v5843_v61 = vand.u32 2147483647, %v12138_v27  ;;  %vm5839_vm3 = vweird.f32 %v12138_v27 }
 0x627   :  { %v5827_v47 = vor.u32 1.1754944e-38, %v5826_v26  ;;  %vm5825_vm9 = vcmp.eq.f32.partialorder %v5824_v44, 8.507059e+37  ;;  %v10062_v54 = vld [vmem:[#allocation22 + $0x28] sm:$0xff]  ;;  %v5883_v26 = vunpack.c.l.bf16 %v12371_v57 }
 0x628   :  { %v5846_v22 = vor.u32 1.1754944e-38, %v5845_v32  ;;  %vm5844_vm11 = vcmp.eq.f32.partialorder %v5843_v61, 8.507059e+37  ;;  %6700 = vmatpush.bf16.msrb.mxu2 %v10062_v54  ;;  %v10026_v32 = vld [vmem:[#allocation16 + $0x8] sm:$0xff] }
 0x629   :  { %v10321_v9 = vpop.eup %10320 }
 0x62a   :  { %v12143_v40 = vadd.f32 1.0, %v10321_v9 }
 0x62b   :  { %v10323_v11 = vpop.eup %10322 }
 0x62c   :  { %v12145_v34 = vpop.eup %10324  ;;  %v5816_v38 = vmul.f32 %v10323_v11, %v12136_v60  ;;  %10326 = vrcp.f32 %v12143_v40  ;;  %vm5821_vm7 = vweird.f32 %v10323_v11  ;;  %v5865_v14 = vand.u32 2147483648, %v12143_v40 }
 0x62d   :  { %v5835_v3 = vmul.f32 %v12145_v34, %v12138_v27  ;;  %10328 = vtanh.f32 %v5809_v52  ;;  %vm5840_vm13 = vweird.f32 %v12145_v34  ;;  %vm12164_vm6 = vmor %vm5820_vm10, %vm5821_vm7  ;;  %vm5859_vm15 = vweird.f32 %v12143_v40 }
 0x62e   :  { %v6087_v21 = vpop.f32.mrf.mxu0  ;;  %v6100_v62 = vpop.f32.mrf.mxu1  ;;  %v5817_v16 = vsub.f32 1.0, %v5816_v38  ;;  %vm12173_vm8 = vmor %vm5839_vm3, %vm5840_vm13  ;;  %v10049_v38 = vld [vmem:[#allocation20] sm:$0xff]  ;;  %v5866_v44 = vor.u32 1.1754944e-38, %v5865_v14 }
 0x62f   :  { %v6130_v36 = vadd.f32 %v6087_v21, %v5881_v41  ;;  %v6131_v45 = vadd.f32 %v6100_v62, %v5882_v17  ;;  %v5836_v5 = vsub.f32 1.0, %v5835_v3  ;;  %v10027_v3 = vld [vmem:[#allocation16 + $0x10] sm:$0xff]  ;;  %6766 = vmatpush.bf16.msrb.mxu3 %v10049_v38  ;;  %vm10349_vm3 = vmpackc.low %vm1620_vm0, %vm2279_vm14 }
 0x630   :  { %v5818_v59 = vmul.f32 %v10323_v11, %v5817_v16  ;;  %v5863_v16 = vand.u32 2147483647, %v12143_v40  ;;  %6333 = vmatpush.bf16.msra.mxu0 %v10027_v3 }
 0x631   :  { %v9222_v42 = vmul.f32 -1.442695, %v6130_v36  ;;  %v9223_v2 = vmul.f32 -1.442695, %v6131_v45  ;;  %v5837_v46 = vmul.f32 %v12145_v34, %v5836_v5  ;;  %v10060_v5 = vld [vmem:[#allocation22 + $0x18] sm:$0xff] }
 0x632   :  { %v12159_v55 = vpop.eup %10326  ;;  %v5819_v29 = vadd.f32 %v10323_v11, %v5818_v59  ;;  %vm5864_vm1 = vcmp.eq.f32.partialorder %v5863_v16, 8.507059e+37  ;;  %v10059_v59 = vld [vmem:[#allocation22 + $0x10] sm:$0xff] }
 0x633   :  { %10330 = vpow2.f32 %v9222_v42  ;;  %v5838_v6 = vadd.f32 %v12145_v34, %v5837_v46  ;;  %v5855_v24 = vmul.f32 %v12159_v55, %v12143_v40  ;;  %v10329_v39 = vpop.eup %10328  ;;  %vm5860_vm12 = vweird.f32 %v12159_v55 }
 0x634   :  { %10332 = vpow2.f32 %v9223_v2  ;;  %v5823_v0 = vsel %vm12164_vm6, %v10323_v11, %v5819_v29  ;;  %vm12195_vm5 = vmor %vm5859_vm15, %vm5860_vm12  ;;  %6334 = vmatpush.bf16.msra.mxu0 %v10026_v32  ;;  %v10016_v32 = vld [vmem:[#allocation4 + $0x18] sm:$0xff] }
 0x635   :  { %v6113_v12 = vpop.f32.mrf.mxu2  ;;  %v6126_v10 = vpop.f32.mrf.mxu3  ;;  %v5828_v31 = vsel %vm5825_vm9, %v5827_v47, %v5823_v0  ;;  %v5842_v60 = vsel %vm12173_vm8, %v12145_v34, %v5838_v6  ;;  %v5856_v27 = vsub.f32 1.0, %v5855_v24  ;;  %v10061_v34 = vld [vmem:[#allocation22 + $0x20] sm:$0xff]  ;;  %v10058_v6 = vld [vmem:[#allocation22 + $0x8] sm:$0xff] }
 0x636   :  { %v6089_v23 = vpop.f32.mrf.mxu0  ;;  %v6102_v51 = vpop.f32.mrf.mxu1  ;;  %v5847_v49 = vsel %vm5844_vm11, %v5846_v22, %v5842_v60  ;;  %v5870_v9 = vmul.f32 %v10329_v39, %v5828_v31  ;;  %v6133_v33 = vadd.f32 %v6126_v10, %v5884_v53  ;;  %6701 = vmatpush.bf16.msrb.mxu2 %v10061_v34  ;;  %v6132_v2 = vadd.f32 %v6113_v12, %v5883_v26  ;;  %v10057_v10 = vld [vmem:[#allocation22] sm:$0xff] }
 0x637   :  { %v5869_v52 = vmul.f32 %v5847_v49, %v12081_v18  ;;  %v5857_v58 = vmul.f32 %v12159_v55, %v5856_v27 }
 0x638   :  { %v9224_v1 = vmul.f32 -1.442695, %v6133_v33 }
 0x639   :  { %v10331_v11 = vpop.eup %10330  ;;  %v5871_v41 = vadd.f32 %v5870_v9, %v5869_v52  ;;  %v5858_v21 = vadd.f32 %v12159_v55, %v5857_v58 }
 0x63a   :  { %v10333_v63 = vpop.eup %10332  ;;  %v12185_v17 = vadd.f32 1.0, %v10331_v11  ;;  %10334 = vpow2.f32 %v9224_v1  ;;  %6702 = vmatpush.bf16.msrb.mxu2 %v10060_v5  ;;  %v10015_v5 = vld [vmem:[#allocation4 + $0x10] sm:$0xff] }
 0x63b   :  { %v12189_v62 = vadd.f32 1.0, %v10333_v63  ;;  %10336 = vtanh.f32 %v5871_v41  ;;  %v5862_v4 = vsel %vm12195_vm5, %v12159_v55, %v5858_v21  ;;  %v12206_v40 = vsel %vm1620_vm0, %v5871_v41, %v12081_v18  ;;  %v10025_v55 = vld [vmem:[#allocation16] sm:$0xff] }
 0x63c   :  { %10338 = vrcp.f32 %v12185_v17  ;;  %v5867_v61 = vsel %vm5864_vm1, %v5866_v44, %v5862_v4  ;;  %6335 = vmatpush.bf16.msra.mxu0 %v10025_v55  ;;  %v6147_v39 = vand.u32 2147483647, %v12185_v17  ;;  %v6149_v30 = vand.u32 2147483648, %v12185_v17 }
 0x63d   :  { %v6115_v36 = vpop.f32.mrf.mxu2  ;;  %v6128_v45 = vpop.f32.mrf.mxu3  ;;  %10340 = vrcp.f32 %v12189_v62  ;;  %v6168_v0 = vand.u32 2147483648, %v12189_v62  ;;  %v6166_v53 = vand.u32 2147483647, %v12189_v62  ;;  %vm6143_vm13 = vweird.f32 %v12185_v17 }
 0x63e   :  { %6703 = vmatpush.bf16.msrb.mxu2 %v10059_v59  ;;  %vm6162_vm10 = vweird.f32 %v12189_v62  ;;  %v6150_v27 = vor.u32 1.1754944e-38, %v6149_v30  ;;  %vm6148_vm9 = vcmp.eq.f32.partialorder %v6147_v39, 8.507059e+37  ;;  %v6616_v3 = vpack.c.bf16 %v12206_v40, %v12206_v40  ;;  %v10014_v40 = vld [vmem:[#allocation4 + $0x8] sm:$0xff]  ;;  %v10091_v39 = vld [vmem:[%s12278_s16] ss:$0 sm:$0xff]  ;;  %s10722_s16 = smov [#allocation23]  }
 0x63f   :  { %v6169_v13 = vor.u32 1.1754944e-38, %v6168_v0  ;;  %vm6167_vm11 = vcmp.eq.f32.partialorder %v6166_v53, 8.507059e+37  ;;  %s6782_s19 = sshll.u32 %s10722_s16, 4  ;;  %s6783_s19 = int_to_ptr.vmem [resolvable:$true] %s6782_s19 }
 0x640   :  { %v10335_v37 = vpop.eup %10334 }
 0x641   :  { %v10337_v42 = vpop.eup %10336  ;;  %v12209_v46 = vadd.f32 1.0, %v10335_v37  ;;  %v6414_v37 = vpop.f32.mrf.mxu1 }
 0x642   :  { %v10339_v29 = vpop.eup %10338  ;;  %v5873_v20 = vmul.f32 %v10337_v42, %v5867_v61  ;;  %6704 = vmatpush.bf16.msrb.mxu2 %v10058_v6  ;;  %v10090_v61 = vld [vmem:[%s12272_s10] ss:$0 sm:$0xff]  ;;  %s10721_s10 = smov [#allocation26]  }
 0x643   :  { %v10341_v18 = vpop.eup %10340  ;;  %v6139_v50 = vmul.f32 %v10339_v29, %v12185_v17  ;;  %10342 = vrcp.f32 %v12209_v46  ;;  %vm6144_vm4 = vweird.f32 %v10339_v29  ;;  %v6188_v1 = vand.u32 2147483648, %v12209_v46  ;;  %s6807_s27 = sshll.u32 %s10721_s10, 4  ;;  %s6808_s27 = int_to_ptr.vmem [resolvable:$true] %s6807_s27 }
 0x644   :  { %v6158_v15 = vmul.f32 %v10341_v18, %v12189_v62  ;;  %10344 = vtanh.f32 %v6132_v2  ;;  %v5877_v47 = vsel %vm1620_vm0, %v5873_v20, %v12103_v19  ;;  %vm6163_vm7 = vweird.f32 %v10341_v18  ;;  %vm6145_vm6 = vmor %vm6143_vm13, %vm6144_vm4 }
 0x645   :  { %v6140_v7 = vsub.f32 1.0, %v6139_v50  ;;  %v6454_v22 = vpack.c.bf16 %v5877_v47, %v5877_v47  ;;  %v10350_v60 = vpack.c.bf16 %v5873_v20, %v12094_v25  ;;  %vm6164_vm8 = vmor %vm6162_vm10, %vm6163_vm7  ;;  %vm6182_vm14 = vweird.f32 %v12209_v46 }
 0x646   :  { %v6159_v24 = vsub.f32 1.0, %v6158_v15  ;;  %6705 = vmatpush.bf16.msrb.mxu2 %v10057_v10  ;;  %v6186_v63 = vand.u32 2147483647, %v12209_v46  ;;  %v6189_v17 = vor.u32 1.1754944e-38, %v6188_v1 }
 0x647   :  { %v6141_v12 = vmul.f32 %v10339_v29, %v6140_v7  ;;  %6605 = vmatmul.bf16.vlgmr.msra.gmra.mxu3 %v6454_v22  ;;  %10351 = vmatmul.msk.bf16.gmra.mxu1 %vm10349_vm3, %v10350_v60 }
 0x648   :  { %v6160_v57 = vmul.f32 %v10341_v18, %v6159_v24  ;;  %vm6187_vm15 = vcmp.eq.f32.partialorder %v6186_v63, 8.507059e+37 }
 0x649   :  { %v10343_v19 = vpop.eup %10342  ;;  %v6142_v31 = vadd.f32 %v10339_v29, %v6141_v12  ;;  %v6416_v2 = vpop.f32.mrf.mxu1 }
 0x64a   :  { %v6161_v23 = vadd.f32 %v10341_v18, %v6160_v57  ;;  %v6178_v51 = vmul.f32 %v10343_v19, %v12209_v46  ;;  %v10345_v54 = vpop.eup %10344  ;;  %vm6183_vm0 = vweird.f32 %v10343_v19 }
 0x64b   :  { %v6146_v43 = vsel %vm6145_vm6, %v10339_v29, %v6142_v31  ;;  %vm6184_vm12 = vmor %vm6182_vm14, %vm6183_vm0 }
 0x64c   :  { %v6151_v56 = vsel %vm6148_vm9, %v6150_v27, %v6146_v43  ;;  %v6165_v49 = vsel %vm6164_vm8, %v10341_v18, %v6161_v23  ;;  %v6179_v35 = vsub.f32 1.0, %v6178_v51 }
 0x64d   :  { %v6170_v25 = vsel %vm6167_vm11, %v6169_v13, %v6165_v49  ;;  %v6193_v9 = vmul.f32 %v10345_v54, %v6151_v56 }
 0x64e   :  { %v6192_v33 = vmul.f32 %v6170_v25, %v12120_v28  ;;  %v6180_v52 = vmul.f32 %v10343_v19, %v6179_v35 }
 0x650   :  { %v6194_v58 = vadd.f32 %v6193_v9, %v6192_v33  ;;  %v6181_v11 = vadd.f32 %v10343_v19, %v6180_v52 }
 0x651   :  { %v6419_v7 = vpop.f32.mrf.mxu1 }
 0x652   :  { %10346 = vtanh.f32 %v6194_v58  ;;  %v6201_v38 = vsel %vm1293_vm2, %v6194_v58, %v12120_v28  ;;  %v6185_v41 = vsel %vm6184_vm12, %v10343_v19, %v6181_v11 }
 0x653   :  { %v6190_v62 = vsel %vm6187_vm15, %v6189_v17, %v6185_v41  ;;  %v6633_v4 = vpack.c.bf16 %v6201_v38, %v6201_v38 }
 0x657   :  { %6767 = vmatmul.bf16.vlgmr.msrb.gmra.mxu3 %v6616_v3 }
 0x658   :  { %v10347_v21 = vpop.eup %10346 }
 0x659   :  { %v6196_v14 = vmul.f32 %v10347_v21, %v6190_v62  ;;  %v6421_v53 = vpop.f32.mrf.mxu1 }
 0x65b   :  { %v6197_v16 = vsel %vm1293_vm2, %v6196_v14, 0.0  ;;  %v6200_v28 = vsel %vm1293_vm2, %v6196_v14, %v12129_v48  ;;  %v10089_v48 = vld [vmem:[%s12275_s13] ss:$0 sm:$0xff] }
 0x65c   :  { %v6198_v36 = vpack.c.bf16 %v6197_v16, %v6197_v16  ;;  %v6471_v45 = vpack.c.bf16 %v6200_v28, %v6200_v28 }
 0x65e   :  { %6199 = vst [vmem:[#allocation4] sm:$0xf] %v6198_v36  ;;  %6544 = vmatmul.bf16.vlgmr.msra.gmra.mxu2 %v6471_v45 }
 0x661   :  { %v6424_v23 = vpop.f32.mrf.mxu1 }
 0x665   :  { %v10013_v8 = vld [vmem:[#allocation4] sm:$0xff] }
 0x666   :  { %6336 = vmatmul.bf16.vlgmr.msra.gmra.mxu0 %v10013_v8 }
 0x669   :  { %v6426_v43 = vpop.f32.mrf.mxu1 }
 0x66e   :  { %6706 = vmatmul.bf16.vlgmr.msrb.gmra.mxu2 %v6633_v4 }
 0x676   :  { %6341 = vmatmul.bf16.gmra.mxu0 %v10014_v40 }
 0x686   :  { %6346 = vmatmul.bf16.gmra.mxu0 %v10015_v5 }
 0x696   :  { %6351 = vmatmul.bf16.gmra.mxu0 %v10016_v32 }
 0x6c4   :  { %v6429_v25 = vpop.f32.mrf.mxu1 }
 0x6ca   :  { %v6606_v44 = vpop.f32.mrf.mxu3 }
 0x6cc   :  { %v6431_v58 = vpop.f32.mrf.mxu1 }
 0x6d2   :  { %v6608_v26 = vpop.f32.mrf.mxu3 }
 0x6da   :  { %v6768_v59 = vpop.f32.mrf.mxu3 }
 0x6e1   :  { %v6545_v42 = vpop.f32.mrf.mxu2 }
 0x6e2   :  { %v6607_v46 = vadd.f32 %v6606_v44, %v6545_v42  ;;  %v6770_v55 = vpop.f32.mrf.mxu3 }
 0x6e3   :  { %v6337_v20 = vpop.f32.mrf.mxu0 }
 0x6e4   :  { %v6614_v29 = vadd.f32 %v10089_v48, %v6607_v46  ;;  %v6415_v18 = vadd.f32 %v6414_v37, %v6337_v20 }
 0x6e6   :  { %6615 = vst [vmem:[#allocation24] sm:$0xff] %v6614_v29  ;;  %v6438_v50 = vadd.f32 %v10090_v61, %v6415_v18 }
 0x6e7   :  { %6801 = dma.vmem_to_hbm [thread:$0]  %s6797_s30, 128, %s6799_s14, [#allocation25]  }
 0x6e8   :  { %6446 = vst [vmem:[#allocation23] sm:$0xff] %v6438_v50 }
 0x6e9   :  { %v6547_v15 = vpop.f32.mrf.mxu2 }
 0x6eb   :  { %v6339_v47 = vpop.f32.mrf.mxu0 }
 0x6ec   :  { %v6417_v6 = vadd.f32 %v6416_v2, %v6339_v47 }
 0x6ee   :  { %v6439_v24 = vadd.f32 %v10090_v61, %v6417_v6 }
 0x6f0   :  { %6447 = vst [vmem:[#allocation23 + $0x8] sm:$0xff] %v6439_v24 }
 0x6f1   :  { %v6707_v30 = vpop.f32.mrf.mxu2 }
 0x6f2   :  { %v6769_v22 = vadd.f32 %v6768_v59, %v6707_v30 }
 0x6f3   :  { %v6342_v12 = vpop.f32.mrf.mxu0 }
 0x6f4   :  { %v6776_v0 = vadd.f32 %v10091_v39, %v6769_v22  ;;  %v6420_v57 = vadd.f32 %v6419_v7, %v6342_v12 }
 0x6f6   :  { %6777 = vst [vmem:[#allocation26] sm:$0xff] %v6776_v0  ;;  %v6440_v10 = vadd.f32 %v10090_v61, %v6420_v57 }
 0x6f7   :  { %6812 = dma.vmem_to_hbm [thread:$0]  %s6808_s27, 128, %s6810_s24, [#allocation25]  }
 0x6f8   :  { %6448 = vst [vmem:[#allocation23 + $0x10] sm:$0xff] %v6440_v10 }
 0x6f9   :  { %v6709_v19 = vpop.f32.mrf.mxu2 }
 0x6fb   :  { %v6344_v31 = vpop.f32.mrf.mxu0 }
 0x6fc   :  { %v6422_v60 = vadd.f32 %v6421_v53, %v6344_v31 }
 0x6fe   :  { %v6441_v27 = vadd.f32 %v10090_v61, %v6422_v60 }
 0x700   :  { %6449 = vst [vmem:[#allocation23 + $0x18] sm:$0xff] %v6441_v27 }
 0x703   :  { %v6347_v51 = vpop.f32.mrf.mxu0 }
 0x704   :  { %v6425_v54 = vadd.f32 %v6424_v23, %v6347_v51 }
 0x706   :  { %v6442_v13 = vadd.f32 %v10090_v61, %v6425_v54 }
 0x708   :  { %6450 = vst [vmem:[#allocation23 + $0x20] sm:$0xff] %v6442_v13 }
 0x70b   :  { %v6349_v56 = vpop.f32.mrf.mxu0 }
 0x70c   :  { %v6427_v49 = vadd.f32 %v6426_v43, %v6349_v56 }
 0x70e   :  { %v6443_v35 = vadd.f32 %v10090_v61, %v6427_v49 }
 0x710   :  { %6451 = vst [vmem:[#allocation23 + $0x28] sm:$0xff] %v6443_v35 }
 0x713   :  { %v6352_v9 = vpop.f32.mrf.mxu0 }
 0x714   :  { %v6430_v33 = vadd.f32 %v6429_v25, %v6352_v9 }
 0x716   :  { %v6444_v52 = vadd.f32 %v10090_v61, %v6430_v33 }
 0x718   :  { %6452 = vst [vmem:[#allocation23 + $0x30] sm:$0xff] %v6444_v52 }
 0x71b   :  { %v6354_v11 = vpop.f32.mrf.mxu0 }
 0x71c   :  { %v6432_v1 = vadd.f32 %v6431_v58, %v6354_v11 }
 0x71e   :  { %v6445_v34 = vadd.f32 %v10090_v61, %v6432_v1 }
 0x720   :  { %6453 = vst [vmem:[#allocation23 + $0x38] sm:$0xff] %v6445_v34 }
 0x721   :  { %6790 = dma.vmem_to_hbm [thread:$0]  %s6783_s19, 1024, %s6785_s25, [#allocation7], %s10723_s15, %s10723_s15, %s10724_s3  }
 0x722   :  { %10700 = dma.done.wait [#allocation7], 1024  }
 0x723   :  { %10701 = vsyncadd [#allocation7], 4294966272 }
 0x724   :  { %10702 = dma.done.wait [#allocation25], 256  }
 0x725   :  { %10703 = vsyncadd [#allocation25], 4294967040 }
 0x726   :  { %6825 = vsyncpa [#allocation6], 1 }
 0x727   :  { %6826 = vsyncpa [#allocation9], 1 }
 0x728   :  { %6827 = vsyncpa [#allocation12], 1 }
 0x729   :  { %6828 = vsyncpa [#allocation15], 1 }
 0x72a   :  { %6829 = vsyncpa [#allocation18], 1 }
 0x72b   :  { %6830 = vsyncpa [#allocation21], 1 }
 0x72c   :  { %6831 = vsyncpa [#allocation7], 1 }
 0x72d   :  { %6832 = vsyncpa [#allocation25], 1 }

</bundles_post_ra>
